<compile_context>
chip_gen: v7x
topology: tpu7x:2x2x1
jax: 0.10.0
libtpu: 0.0.40
codegen_flags: <defaults>
</compile_context>

<pallas_src>
import functools

import jax
import jax.numpy as jnp
import numpy as np
from jax.experimental import pallas as pl
from jax.experimental.pallas import tpu as pltpu

CMID = 64        # hidden channels of ContextNet
COUT_PAD = 128   # final Cout=1 padded to a full lane width for dense stores
KSIZE = 5


def _round_up(x, m):
    return (x + m - 1) // m * m


def _context_net_kernel(x_ref, w1_ref, w2_ref, w3_ref,
                        s1_ref, c1_ref, s2_ref, c2_ref, b3_ref,
                        o_ref, slab_ref, *, W, Wp, Mp, off0):
    # x_ref:  (1, Mp, 128)        layer-1 im2col (over-computed rows i = y*Wp + x), bf16
    # w1_ref: (128, 64)           layer-1 im2col weights (zero rows in the K pad), bf16
    # w2_ref: (15, 128, 64)       layer-2 pair-grouped tap weights, bf16
    # w3_ref: (15, 128, 128)      layer-3 pair-grouped tap weights (Cout padded), bf16
    # s*/c*:  (1, 64) f32         folded BN scale / (conv-bias + BN shift)
    # b3_ref: (1, 128) f32        layer-3 conv bias (padding lanes zero)
    # o_ref:  (1, Mp, 128) f32    lane-dense output (lane 0 / valid rows are the result)
    # slab_ref: (R, 128) bf16     shifted-slab activation scratch (see header comment)
    row = jax.lax.broadcasted_iota(jnp.int32, (Mp, 1), 0)
    valid = (row % Wp) < W                      # real output rows (x < W)

    # Halo / never-written rows of the slab must be zero.  A full zero-fill of the bf16
    # slab is only ~26 vreg stores, and keeps the kernel correct under any grid->core
    # assignment, so do it every step.
    slab_ref[...] = jnp.zeros_like(slab_ref)

    st_a = off0 + 2 * Wp + 2                    # even (multiple of 8) store offset
    st_b = st_a - 2                             # even store offset for the shifted copy

    def store_act(y_f32):
        # lanes [0:64): act[p - off0];  lanes [64:128): act[p - off0 + 1]
        y_m = jnp.where(valid, y_f32, 0.0)
        slab_ref[st_a:st_a + Mp, 0:CMID] = y_m.astype(jnp.bfloat16)
        zero_row = jnp.zeros((1, CMID), y_m.dtype)
        y_prev = jnp.concatenate([zero_row, y_m[:Mp - 1, :]], axis=0)
        slab_ref[st_b:st_b + Mp, CMID:2 * CMID] = y_prev.astype(jnp.bfloat16)

    # ---------------- layer 1: single K=128 im2col matmul + BN + ReLU ----------------
    y = jnp.dot(x_ref[0], w1_ref[...], preferred_element_type=jnp.float32)
    y = jnp.maximum(y * s1_ref[...] + c1_ref[...], 0.0)
    store_act(y)

    # -------- layer 2: 15 pair-grouped K=128 matmuls, register-carried accumulator ---
    acc = jnp.zeros((Mp, CMID), jnp.float32)
    for kh in range(KSIZE):
        for g in range(3):
            q = off0 + kh * Wp + 2 * g
            acc = acc + jnp.dot(slab_ref[q:q + Mp, :], w2_ref[kh * 3 + g],
                                preferred_element_type=jnp.float32)
    y = jnp.maximum(acc * s2_ref[...] + c2_ref[...], 0.0)
    store_act(y)

    # -------- layer 3: same structure; bias folded into the accumulator init ---------
    # Split M in two halves so the 128-lane f32 accumulator stays ~20 vregs.
    h0 = _round_up(Mp // 2, 8)
    for start, size in ((0, h0), (h0, Mp - h0)):
        acc = jnp.zeros((size, COUT_PAD), jnp.float32) + b3_ref[...]
        for kh in range(KSIZE):
            for g in range(3):
                q = off0 + kh * Wp + 2 * g + start
                acc = acc + jnp.dot(slab_ref[q:q + size, :], w3_ref[kh * 3 + g],
                                    preferred_element_type=jnp.float32)
        o_ref[0, start:start + size, :] = acc


def context_net_forward(params, x_nchw):
    """Forward pass of ContextNet. Input/output in NCHW to mirror PyTorch (eval-mode BN)."""
    eps = 1e-5
    N, Cin, H, W = x_nchw.shape
    Hp, Wp = H + 4, W + 4
    Mp = _round_up((H - 1) * Wp + W, 8)          # over-computed rows (i = y*Wp + x)
    off0 = (-(2 * Wp + 2)) % 8                   # makes the slab store offset 8-aligned
    R = _round_up(off0 + 4 * Wp + 5 + Mp, 16)    # slab rows (bf16 sublane-tile multiple)
    k1 = 25 * Cin
    k1_pad = _round_up(k1, 128)

    x = jnp.transpose(x_nchw, (0, 2, 3, 1)).astype(jnp.float32)   # NCHW -> NHWC

    # ---- layer-1 im2col in the wrapper (tiny at this size), in the over-computed
    #      i = y*Wp + x row indexing so it shares the kernel's epilogue/mask/store path.
    # TODO(synk): move this im2col into the kernel (DMA only the ~7 KiB padded image).
    xp = jnp.pad(x, ((0, 0), (2, 2), (2, 2), (0, 0))).reshape(N, Hp * Wp, Cin)
    need = 4 * Wp + 4 + Mp
    xp = jnp.pad(xp, ((0, 0), (0, need - Hp * Wp), (0, 0)))
    cols = [xp[:, kh * Wp + kw: kh * Wp + kw + Mp, :]
            for kh in range(KSIZE) for kw in range(KSIZE)]
    xcol = jnp.concatenate(cols, axis=-1)                              # (N, Mp, 25*Cin)
    xcol = jnp.pad(xcol, ((0, 0), (0, 0), (0, k1_pad - k1))).astype(jnp.bfloat16)

    # ---- fold eval-mode BN into per-channel scale/bias; pack weights (bf16) ----
    p1, p2, p3 = params
    s1 = p1["gamma"] / jnp.sqrt(p1["var"] + eps)
    c1 = (p1["b"] - p1["mean"]) * s1 + p1["beta"]
    s2 = p2["gamma"] / jnp.sqrt(p2["var"] + eps)
    c2 = (p2["b"] - p2["mean"]) * s2 + p2["beta"]

    w1 = jnp.pad(p1["w"].reshape(k1, CMID),
                 ((0, k1_pad - k1), (0, 0))).astype(jnp.bfloat16)      # (k1_pad, 64)

    def pack_pairs(w_hwio, cout_pad):
        # (5,5,64,Cout) -> (15, 128, cout_pad): per kh, kw pairs (0,1),(2,3),(4,zero)
        cout = w_hwio.shape[-1]
        w = jnp.pad(w_hwio, ((0, 0), (0, 1), (0, 0), (0, cout_pad - cout)))
        w = w.reshape(KSIZE, 3, 2, CMID, cout_pad)      # (kh, pair, which, Cin, Cout)
        w = w.reshape(KSIZE, 3, 2 * CMID, cout_pad)     # concat the pair along K
        return w.reshape(KSIZE * 3, 2 * CMID, cout_pad).astype(jnp.bfloat16)

    w2p = pack_pairs(p2["w"], CMID)                                     # (15, 128, 64)
    w3p = pack_pairs(p3["w"], COUT_PAD)                                 # (15, 128, 128)
    b3 = jnp.pad(p3["b"], (0, COUT_PAD - 1)).reshape(1, COUT_PAD)

    kernel = functools.partial(_context_net_kernel, W=W, Wp=Wp, Mp=Mp, off0=off0)

    out = pl.pallas_call(
        kernel,
        out_shape=jax.ShapeDtypeStruct((N, Mp, COUT_PAD), jnp.float32),
        grid=(N,),
        in_specs=[
            pl.BlockSpec((1, Mp, k1_pad), lambda n: (n, 0, 0)),
            pl.BlockSpec((k1_pad, CMID), lambda n: (0, 0)),
            pl.BlockSpec((KSIZE * 3, 2 * CMID, CMID), lambda n: (0, 0, 0)),
            pl.BlockSpec((KSIZE * 3, 2 * CMID, COUT_PAD), lambda n: (0, 0, 0)),
            pl.BlockSpec((1, CMID), lambda n: (0, 0)),
            pl.BlockSpec((1, CMID), lambda n: (0, 0)),
            pl.BlockSpec((1, CMID), lambda n: (0, 0)),
            pl.BlockSpec((1, CMID), lambda n: (0, 0)),
            pl.BlockSpec((1, COUT_PAD), lambda n: (0, 0)),
        ],
        out_specs=pl.BlockSpec((1, Mp, COUT_PAD), lambda n: (n, 0, 0)),
        scratch_shapes=[
            pltpu.VMEM((R, 2 * CMID), jnp.bfloat16),    # shifted-slab activation scratch
        ],
        compiler_params=pltpu.CompilerParams(
            dimension_semantics=("parallel",)),
    )(xcol, w1, w2p, w3p,
      s1.reshape(1, CMID), c1.reshape(1, CMID),
      s2.reshape(1, CMID), c2.reshape(1, CMID), b3)

    # lane 0 of the valid rows is the real result; drop the over-computed wrap columns.
    o = out[:, :, 0]
    total = H * Wp
    if Mp < total:
        o = jnp.pad(o, ((0, 0), (0, total - Mp)))
    else:
        o = o[:, :total]
    o = o.reshape(N, H, Wp)[:, :, :W]
    return o[:, None, :, :]


def init_context_net_params(key, c_in):
    """Deterministic parameters matching ContextNet(__init__) shapes (eval-mode BN)."""
    chans = [(c_in, 64), (64, 64), (64, 1)]
    params = []
    for li, (ci, co) in enumerate(chans):
        key, kw, kb, kg, kbt, km, kv = jax.random.split(key, 7)
        fan_in = ci * 5 * 5
        bound = 1.0 / np.sqrt(fan_in)
        w = jax.random.uniform(kw, (5, 5, ci, co), jnp.float32, -bound, bound)  # HWIO
        b = jax.random.uniform(kb, (co,), jnp.float32, -bound, bound)
        layer = {"w": w, "b": b}
        if li < 2:  # first two convs are followed by BatchNorm2d(64)
            layer["gamma"] = 1.0 + 0.1 * jax.random.normal(kg, (co,), jnp.float32)
            layer["beta"] = 0.1 * jax.random.normal(kbt, (co,), jnp.float32)
            layer["mean"] = 0.1 * jax.random.normal(km, (co,), jnp.float32)
            layer["var"] = 1.0 + 0.1 * jax.random.uniform(kv, (co,), jnp.float32)
        params.append(layer)
    return params


def _reference_forward(params, x_nchw):
    """Plain-JAX f32 reference (lax.conv) for a numerical sanity check."""
    eps = 1e-5
    x = jnp.transpose(x_nchw, (0, 2, 3, 1)).astype(jnp.float32)
    for p in params:
        y = jax.lax.conv_general_dilated(
            x, p["w"], window_strides=(1, 1), padding="SAME",
            dimension_numbers=("NHWC", "HWIO", "NHWC"),
            precision=jax.lax.Precision.HIGHEST) + p["b"]
        if "gamma" in p:
            y = (y - p["mean"]) / jnp.sqrt(p["var"] + eps) * p["gamma"] + p["beta"]
            y = jnp.maximum(y, 0.0)
        x = y
    return jnp.transpose(x, (0, 3, 1, 2))


if __name__ == "__main__":
    key = jax.random.PRNGKey(0)
    k_params, k_x = jax.random.split(key)

    # input_shape = (C, H, W) = (4, 16, 16); batch = 2  ->  x: (2, 4, 16, 16) NCHW
    C_IN, H, W, N = 4, 16, 16, 2
    params = init_context_net_params(k_params, C_IN)
    x = jax.random.normal(k_x, (N, C_IN, H, W), jnp.float32)

    fwd = jax.jit(context_net_forward)
    out = jax.block_until_ready(fwd(params, x))
    assert out.shape == (N, 1, H, W), out.shape

    ref = jax.block_until_ready(_reference_forward(params, x))
    # bf16 matmul operands with f32 accumulation -> compare against the f32 reference
    # with a bf16-appropriate tolerance.
    np.testing.assert_allclose(np.asarray(out), np.asarray(ref), rtol=2e-2, atol=2e-2)

    print("KERNEL_OK")
</pallas_src>

<mosaic_0001>
module attributes {stable_mosaic.version = 11 : i64} {
  func.func @_context_net_kernel(%arg0: i32, %arg1: memref<1x320x128xbf16, #tpu.memory_space<vmem>>, %arg2: memref<128x64xbf16, #tpu.memory_space<vmem>>, %arg3: memref<15x128x64xbf16, #tpu.memory_space<vmem>>, %arg4: memref<15x128x128xbf16, #tpu.memory_space<vmem>>, %arg5: memref<1x64xf32, #tpu.memory_space<vmem>>, %arg6: memref<1x64xf32, #tpu.memory_space<vmem>>, %arg7: memref<1x64xf32, #tpu.memory_space<vmem>>, %arg8: memref<1x64xf32, #tpu.memory_space<vmem>>, %arg9: memref<1x128xf32, #tpu.memory_space<vmem>>, %arg10: memref<1x320x128xf32, #tpu.memory_space<vmem>>, %arg11: memref<416x128xbf16, #tpu.memory_space<vmem>>) attributes {dimension_semantics = [#tpu.dimension_semantics<parallel>], iteration_bounds = array<i64: 2>, scalar_prefetch = 0 : i64, scratch_operands = 1 : i64, tpu.core_type = #tpu.core_type<tc>, window_params = [{transform_indices = @transform_0, window_bounds = array<i64: 1, 320, 128>}, {pipeline_mode = #tpu.pipeline_mode<synchronous>, transform_indices = @transform_1, window_bounds = array<i64: 128, 64>}, {pipeline_mode = #tpu.pipeline_mode<synchronous>, transform_indices = @transform_2, window_bounds = array<i64: 15, 128, 64>}, {pipeline_mode = #tpu.pipeline_mode<synchronous>, transform_indices = @transform_3, window_bounds = array<i64: 15, 128, 128>}, {pipeline_mode = #tpu.pipeline_mode<synchronous>, transform_indices = @transform_4, window_bounds = array<i64: 1, 64>}, {pipeline_mode = #tpu.pipeline_mode<synchronous>, transform_indices = @transform_5, window_bounds = array<i64: 1, 64>}, {pipeline_mode = #tpu.pipeline_mode<synchronous>, transform_indices = @transform_6, window_bounds = array<i64: 1, 64>}, {pipeline_mode = #tpu.pipeline_mode<synchronous>, transform_indices = @transform_7, window_bounds = array<i64: 1, 64>}, {pipeline_mode = #tpu.pipeline_mode<synchronous>, transform_indices = @transform_8, window_bounds = array<i64: 1, 128>}, {transform_indices = @transform_9, window_bounds = array<i64: 1, 320, 128>}]} {
    %0 = tpu.iota {dimensions = array<i32: 0>} : vector<320x1xi32>
    %c20_i32 = arith.constant 20 : i32
    %c0_i32 = arith.constant 0 : i32
    %1 = arith.cmpi eq, %c20_i32, %c0_i32 : i32
    %c1_i32 = arith.constant 1 : i32
    %2 = arith.select %1, %c1_i32, %c20_i32 : i32
    %3 = vector.broadcast %2 : i32 to vector<320x1xi32>
    %4 = arith.remsi %0, %3 : vector<320x1xi32>
    %c0_i32_0 = arith.constant 0 : i32
    %5 = vector.broadcast %c0_i32_0 : i32 to vector<320x1xi32>
    %6 = arith.cmpi ne, %4, %5 : vector<320x1xi32>
    %c0_i32_1 = arith.constant 0 : i32
    %7 = vector.broadcast %c0_i32_1 : i32 to vector<320x1xi32>
    %8 = arith.cmpi slt, %4, %7 : vector<320x1xi32>
    %c0_i32_2 = arith.constant 0 : i32
    %9 = arith.cmpi slt, %2, %c0_i32_2 : i32
    %10 = vector.broadcast %9 : i1 to vector<320x1xi1>
    %11 = vector.broadcast %10 : vector<320x1xi1> to vector<320x1xi1>
    %12 = arith.xori %8, %11 : vector<320x1xi1>
    %13 = arith.andi %12, %6 : vector<320x1xi1>
    %14 = vector.broadcast %2 : i32 to vector<320x1xi32>
    %15 = arith.addi %4, %14 : vector<320x1xi32>
    %16 = arith.select %13, %15, %4 : vector<320x1xi1>, vector<320x1xi32>
    %c16_i32 = arith.constant 16 : i32
    %17 = vector.broadcast %c16_i32 : i32 to vector<320x1xi32>
    %18 = arith.cmpi slt, %16, %17 : vector<320x1xi32>
    %cst = arith.constant 0.000000e+00 : bf16
    %19 = vector.broadcast %cst : bf16 to vector<416x128xbf16>
    %c0 = arith.constant 0 : index
    %c0_3 = arith.constant 0 : index
    %20 = vector.load %arg11[%c0, %c0_3] : memref<416x128xbf16, #tpu.memory_space<vmem>>, vector<416x128xbf16>
    tpu.vector_store %arg11[%c0, %c0_3], %19 {strides = array<i32>} : memref<416x128xbf16, #tpu.memory_space<vmem>>, vector<416x128xbf16>,
    %c0_4 = arith.constant 0 : index
    %c0_5 = arith.constant 0 : index
    %c0_6 = arith.constant 0 : index
    %21 = vector.load %arg1[%c0_4, %c0_5, %c0_6] : memref<1x320x128xbf16, #tpu.memory_space<vmem>>, vector<1x320x128xbf16>
    %22 = vector.shape_cast %21 : vector<1x320x128xbf16> to vector<320x128xbf16>
    %c0_7 = arith.constant 0 : index
    %c0_8 = arith.constant 0 : index
    %23 = vector.load %arg2[%c0_7, %c0_8] : memref<128x64xbf16, #tpu.memory_space<vmem>>, vector<128x64xbf16>
    %cst_9 = arith.constant dense<0.000000e+00> : vector<320x64xf32>
    %24 = tpu.matmul %22, %23, %cst_9 {dimension_numbers = #tpu.dot_dimension_numbers<[1], [0], [0], [1], [0, 0, 1, 1], [], []>} : vector<320x128xbf16>, vector<128x64xbf16>, vector<320x64xf32> -> vector<320x64xf32>
    %c0_10 = arith.constant 0 : index
    %c0_11 = arith.constant 0 : index
    %25 = vector.load %arg5[%c0_10, %c0_11] : memref<1x64xf32, #tpu.memory_space<vmem>>, vector<1x64xf32>
    %26 = vector.broadcast %25 : vector<1x64xf32> to vector<320x64xf32>
    %27 = arith.mulf %24, %26 : vector<320x64xf32>
    %c0_12 = arith.constant 0 : index
    %c0_13 = arith.constant 0 : index
    %28 = vector.load %arg6[%c0_12, %c0_13] : memref<1x64xf32, #tpu.memory_space<vmem>>, vector<1x64xf32>
    %29 = vector.broadcast %28 : vector<1x64xf32> to vector<320x64xf32>
    %30 = arith.addf %27, %29 : vector<320x64xf32>
    %cst_14 = arith.constant 0.000000e+00 : f32
    %31 = vector.broadcast %cst_14 : f32 to vector<320x64xf32>
    %32 = arith.maximumf %30, %31 : vector<320x64xf32>
    %cst_15 = arith.constant 0.000000e+00 : f32
    %33 = vector.shape_cast %18 : vector<320x1xi1> to vector<320x1xi1>
    %34 = vector.broadcast %33 : vector<320x1xi1> to vector<320x64xi1>
    %35 = vector.broadcast %cst_15 : f32 to vector<320x64xf32>
    %36 = arith.select %34, %32, %35 : vector<320x64xi1>, vector<320x64xf32>
    %37 = arith.truncf %36 : vector<320x64xf32> to vector<320x64xbf16>
    %c48 = arith.constant 48 : index
    %c0_16 = arith.constant 0 : index
    %38 = vector.load %arg11[%c48, %c0_16] : memref<416x128xbf16, #tpu.memory_space<vmem>>, vector<320x64xbf16>
    tpu.vector_store %arg11[%c48, %c0_16], %37 {strides = array<i32>} : memref<416x128xbf16, #tpu.memory_space<vmem>>, vector<320x64xbf16>,
    %cst_17 = arith.constant 0.000000e+00 : f32
    %39 = vector.broadcast %cst_17 : f32 to vector<1x64xf32>
    %40 = vector.extract_strided_slice %36 {offsets = [0, 0], sizes = [319, 64], strides = [1, 1]} : vector<320x64xf32> to vector<319x64xf32>
    %41 = tpu.concatenate %39, %40 in 0 : vector<1x64xf32>, vector<319x64xf32> -> vector<320x64xf32>
    %42 = arith.truncf %41 : vector<320x64xf32> to vector<320x64xbf16>
    %c46 = arith.constant 46 : index
    %c64 = arith.constant 64 : index
    %43 = vector.load %arg11[%c46, %c64] : memref<416x128xbf16, #tpu.memory_space<vmem>>, vector<320x64xbf16>
    tpu.vector_store %arg11[%c46, %c64], %42 {strides = array<i32>} : memref<416x128xbf16, #tpu.memory_space<vmem>>, vector<320x64xbf16>,
    %cst_18 = arith.constant 0.000000e+00 : f32
    %44 = vector.broadcast %cst_18 : f32 to vector<320x64xf32>
    %c6 = arith.constant 6 : index
    %c0_19 = arith.constant 0 : index
    %45 = vector.load %arg11[%c6, %c0_19] : memref<416x128xbf16, #tpu.memory_space<vmem>>, vector<320x128xbf16>
    %c0_20 = arith.constant 0 : index
    %c0_21 = arith.constant 0 : index
    %c0_22 = arith.constant 0 : index
    %46 = vector.load %arg3[%c0_20, %c0_21, %c0_22] : memref<15x128x64xbf16, #tpu.memory_space<vmem>>, vector<1x128x64xbf16>
    %47 = vector.shape_cast %46 : vector<1x128x64xbf16> to vector<128x64xbf16>
    %cst_23 = arith.constant dense<0.000000e+00> : vector<320x64xf32>
    %48 = tpu.matmul %45, %47, %cst_23 {dimension_numbers = #tpu.dot_dimension_numbers<[1], [0], [0], [1], [0, 0, 1, 1], [], []>} : vector<320x128xbf16>, vector<128x64xbf16>, vector<320x64xf32> -> vector<320x64xf32>
    %49 = arith.addf %44, %48 : vector<320x64xf32>
    %c8 = arith.constant 8 : index
    %c0_24 = arith.constant 0 : index
    %50 = vector.load %arg11[%c8, %c0_24] : memref<416x128xbf16, #tpu.memory_space<vmem>>, vector<320x128xbf16>
    %c1 = arith.constant 1 : index
    %c0_25 = arith.constant 0 : index
    %c0_26 = arith.constant 0 : index
    %51 = vector.load %arg3[%c1, %c0_25, %c0_26] : memref<15x128x64xbf16, #tpu.memory_space<vmem>>, vector<1x128x64xbf16>
    %52 = vector.shape_cast %51 : vector<1x128x64xbf16> to vector<128x64xbf16>
    %cst_27 = arith.constant dense<0.000000e+00> : vector<320x64xf32>
    %53 = tpu.matmul %50, %52, %cst_27 {dimension_numbers = #tpu.dot_dimension_numbers<[1], [0], [0], [1], [0, 0, 1, 1], [], []>} : vector<320x128xbf16>, vector<128x64xbf16>, vector<320x64xf32> -> vector<320x64xf32>
    %54 = arith.addf %49, %53 : vector<320x64xf32>
    %c10 = arith.constant 10 : index
    %c0_28 = arith.constant 0 : index
    %55 = vector.load %arg11[%c10, %c0_28] : memref<416x128xbf16, #tpu.memory_space<vmem>>, vector<320x128xbf16>
    %c2 = arith.constant 2 : index
    %c0_29 = arith.constant 0 : index
    %c0_30 = arith.constant 0 : index
    %56 = vector.load %arg3[%c2, %c0_29, %c0_30] : memref<15x128x64xbf16, #tpu.memory_space<vmem>>, vector<1x128x64xbf16>
    %57 = vector.shape_cast %56 : vector<1x128x64xbf16> to vector<128x64xbf16>
    %cst_31 = arith.constant dense<0.000000e+00> : vector<320x64xf32>
    %58 = tpu.matmul %55, %57, %cst_31 {dimension_numbers = #tpu.dot_dimension_numbers<[1], [0], [0], [1], [0, 0, 1, 1], [], []>} : vector<320x128xbf16>, vector<128x64xbf16>, vector<320x64xf32> -> vector<320x64xf32>
    %59 = arith.addf %54, %58 : vector<320x64xf32>
    %c26 = arith.constant 26 : index
    %c0_32 = arith.constant 0 : index
    %60 = vector.load %arg11[%c26, %c0_32] : memref<416x128xbf16, #tpu.memory_space<vmem>>, vector<320x128xbf16>
    %c3 = arith.constant 3 : index
    %c0_33 = arith.constant 0 : index
    %c0_34 = arith.constant 0 : index
    %61 = vector.load %arg3[%c3, %c0_33, %c0_34] : memref<15x128x64xbf16, #tpu.memory_space<vmem>>, vector<1x128x64xbf16>
    %62 = vector.shape_cast %61 : vector<1x128x64xbf16> to vector<128x64xbf16>
    %cst_35 = arith.constant dense<0.000000e+00> : vector<320x64xf32>
    %63 = tpu.matmul %60, %62, %cst_35 {dimension_numbers = #tpu.dot_dimension_numbers<[1], [0], [0], [1], [0, 0, 1, 1], [], []>} : vector<320x128xbf16>, vector<128x64xbf16>, vector<320x64xf32> -> vector<320x64xf32>
    %64 = arith.addf %59, %63 : vector<320x64xf32>
    %c28 = arith.constant 28 : index
    %c0_36 = arith.constant 0 : index
    %65 = vector.load %arg11[%c28, %c0_36] : memref<416x128xbf16, #tpu.memory_space<vmem>>, vector<320x128xbf16>
    %c4 = arith.constant 4 : index
    %c0_37 = arith.constant 0 : index
    %c0_38 = arith.constant 0 : index
    %66 = vector.load %arg3[%c4, %c0_37, %c0_38] : memref<15x128x64xbf16, #tpu.memory_space<vmem>>, vector<1x128x64xbf16>
    %67 = vector.shape_cast %66 : vector<1x128x64xbf16> to vector<128x64xbf16>
    %cst_39 = arith.constant dense<0.000000e+00> : vector<320x64xf32>
    %68 = tpu.matmul %65, %67, %cst_39 {dimension_numbers = #tpu.dot_dimension_numbers<[1], [0], [0], [1], [0, 0, 1, 1], [], []>} : vector<320x128xbf16>, vector<128x64xbf16>, vector<320x64xf32> -> vector<320x64xf32>
    %69 = arith.addf %64, %68 : vector<320x64xf32>
    %c30 = arith.constant 30 : index
    %c0_40 = arith.constant 0 : index
    %70 = vector.load %arg11[%c30, %c0_40] : memref<416x128xbf16, #tpu.memory_space<vmem>>, vector<320x128xbf16>
    %c5 = arith.constant 5 : index
    %c0_41 = arith.constant 0 : index
    %c0_42 = arith.constant 0 : index
    %71 = vector.load %arg3[%c5, %c0_41, %c0_42] : memref<15x128x64xbf16, #tpu.memory_space<vmem>>, vector<1x128x64xbf16>
    %72 = vector.shape_cast %71 : vector<1x128x64xbf16> to vector<128x64xbf16>
    %cst_43 = arith.constant dense<0.000000e+00> : vector<320x64xf32>
    %73 = tpu.matmul %70, %72, %cst_43 {dimension_numbers = #tpu.dot_dimension_numbers<[1], [0], [0], [1], [0, 0, 1, 1], [], []>} : vector<320x128xbf16>, vector<128x64xbf16>, vector<320x64xf32> -> vector<320x64xf32>
    %74 = arith.addf %69, %73 : vector<320x64xf32>
    %c46_44 = arith.constant 46 : index
    %c0_45 = arith.constant 0 : index
    %75 = vector.load %arg11[%c46_44, %c0_45] : memref<416x128xbf16, #tpu.memory_space<vmem>>, vector<320x128xbf16>
    %c6_46 = arith.constant 6 : index
    %c0_47 = arith.constant 0 : index
    %c0_48 = arith.constant 0 : index
    %76 = vector.load %arg3[%c6_46, %c0_47, %c0_48] : memref<15x128x64xbf16, #tpu.memory_space<vmem>>, vector<1x128x64xbf16>
    %77 = vector.shape_cast %76 : vector<1x128x64xbf16> to vector<128x64xbf16>
    %cst_49 = arith.constant dense<0.000000e+00> : vector<320x64xf32>
    %78 = tpu.matmul %75, %77, %cst_49 {dimension_numbers = #tpu.dot_dimension_numbers<[1], [0], [0], [1], [0, 0, 1, 1], [], []>} : vector<320x128xbf16>, vector<128x64xbf16>, vector<320x64xf32> -> vector<320x64xf32>
    %79 = arith.addf %74, %78 : vector<320x64xf32>
    %c48_50 = arith.constant 48 : index
    %c0_51 = arith.constant 0 : index
    %80 = vector.load %arg11[%c48_50, %c0_51] : memref<416x128xbf16, #tpu.memory_space<vmem>>, vector<320x128xbf16>
    %c7 = arith.constant 7 : index
    %c0_52 = arith.constant 0 : index
    %c0_53 = arith.constant 0 : index
    %81 = vector.load %arg3[%c7, %c0_52, %c0_53] : memref<15x128x64xbf16, #tpu.memory_space<vmem>>, vector<1x128x64xbf16>
    %82 = vector.shape_cast %81 : vector<1x128x64xbf16> to vector<128x64xbf16>
    %cst_54 = arith.constant dense<0.000000e+00> : vector<320x64xf32>
    %83 = tpu.matmul %80, %82, %cst_54 {dimension_numbers = #tpu.dot_dimension_numbers<[1], [0], [0], [1], [0, 0, 1, 1], [], []>} : vector<320x128xbf16>, vector<128x64xbf16>, vector<320x64xf32> -> vector<320x64xf32>
    %84 = arith.addf %79, %83 : vector<320x64xf32>
    %c50 = arith.constant 50 : index
    %c0_55 = arith.constant 0 : index
    %85 = vector.load %arg11[%c50, %c0_55] : memref<416x128xbf16, #tpu.memory_space<vmem>>, vector<320x128xbf16>
    %c8_56 = arith.constant 8 : index
    %c0_57 = arith.constant 0 : index
    %c0_58 = arith.constant 0 : index
    %86 = vector.load %arg3[%c8_56, %c0_57, %c0_58] : memref<15x128x64xbf16, #tpu.memory_space<vmem>>, vector<1x128x64xbf16>
    %87 = vector.shape_cast %86 : vector<1x128x64xbf16> to vector<128x64xbf16>
    %cst_59 = arith.constant dense<0.000000e+00> : vector<320x64xf32>
    %88 = tpu.matmul %85, %87, %cst_59 {dimension_numbers = #tpu.dot_dimension_numbers<[1], [0], [0], [1], [0, 0, 1, 1], [], []>} : vector<320x128xbf16>, vector<128x64xbf16>, vector<320x64xf32> -> vector<320x64xf32>
    %89 = arith.addf %84, %88 : vector<320x64xf32>
    %c66 = arith.constant 66 : index
    %c0_60 = arith.constant 0 : index
    %90 = vector.load %arg11[%c66, %c0_60] : memref<416x128xbf16, #tpu.memory_space<vmem>>, vector<320x128xbf16>
    %c9 = arith.constant 9 : index
    %c0_61 = arith.constant 0 : index
    %c0_62 = arith.constant 0 : index
    %91 = vector.load %arg3[%c9, %c0_61, %c0_62] : memref<15x128x64xbf16, #tpu.memory_space<vmem>>, vector<1x128x64xbf16>
    %92 = vector.shape_cast %91 : vector<1x128x64xbf16> to vector<128x64xbf16>
    %cst_63 = arith.constant dense<0.000000e+00> : vector<320x64xf32>
    %93 = tpu.matmul %90, %92, %cst_63 {dimension_numbers = #tpu.dot_dimension_numbers<[1], [0], [0], [1], [0, 0, 1, 1], [], []>} : vector<320x128xbf16>, vector<128x64xbf16>, vector<320x64xf32> -> vector<320x64xf32>
    %94 = arith.addf %89, %93 : vector<320x64xf32>
    %c68 = arith.constant 68 : index
    %c0_64 = arith.constant 0 : index
    %95 = vector.load %arg11[%c68, %c0_64] : memref<416x128xbf16, #tpu.memory_space<vmem>>, vector<320x128xbf16>
    %c10_65 = arith.constant 10 : index
    %c0_66 = arith.constant 0 : index
    %c0_67 = arith.constant 0 : index
    %96 = vector.load %arg3[%c10_65, %c0_66, %c0_67] : memref<15x128x64xbf16, #tpu.memory_space<vmem>>, vector<1x128x64xbf16>
    %97 = vector.shape_cast %96 : vector<1x128x64xbf16> to vector<128x64xbf16>
    %cst_68 = arith.constant dense<0.000000e+00> : vector<320x64xf32>
    %98 = tpu.matmul %95, %97, %cst_68 {dimension_numbers = #tpu.dot_dimension_numbers<[1], [0], [0], [1], [0, 0, 1, 1], [], []>} : vector<320x128xbf16>, vector<128x64xbf16>, vector<320x64xf32> -> vector<320x64xf32>
    %99 = arith.addf %94, %98 : vector<320x64xf32>
    %c70 = arith.constant 70 : index
    %c0_69 = arith.constant 0 : index
    %100 = vector.load %arg11[%c70, %c0_69] : memref<416x128xbf16, #tpu.memory_space<vmem>>, vector<320x128xbf16>
    %c11 = arith.constant 11 : index
    %c0_70 = arith.constant 0 : index
    %c0_71 = arith.constant 0 : index
    %101 = vector.load %arg3[%c11, %c0_70, %c0_71] : memref<15x128x64xbf16, #tpu.memory_space<vmem>>, vector<1x128x64xbf16>
    %102 = vector.shape_cast %101 : vector<1x128x64xbf16> to vector<128x64xbf16>
    %cst_72 = arith.constant dense<0.000000e+00> : vector<320x64xf32>
    %103 = tpu.matmul %100, %102, %cst_72 {dimension_numbers = #tpu.dot_dimension_numbers<[1], [0], [0], [1], [0, 0, 1, 1], [], []>} : vector<320x128xbf16>, vector<128x64xbf16>, vector<320x64xf32> -> vector<320x64xf32>
    %104 = arith.addf %99, %103 : vector<320x64xf32>
    %c86 = arith.constant 86 : index
    %c0_73 = arith.constant 0 : index
    %105 = vector.load %arg11[%c86, %c0_73] : memref<416x128xbf16, #tpu.memory_space<vmem>>, vector<320x128xbf16>
    %c12 = arith.constant 12 : index
    %c0_74 = arith.constant 0 : index
    %c0_75 = arith.constant 0 : index
    %106 = vector.load %arg3[%c12, %c0_74, %c0_75] : memref<15x128x64xbf16, #tpu.memory_space<vmem>>, vector<1x128x64xbf16>
    %107 = vector.shape_cast %106 : vector<1x128x64xbf16> to vector<128x64xbf16>
    %cst_76 = arith.constant dense<0.000000e+00> : vector<320x64xf32>
    %108 = tpu.matmul %105, %107, %cst_76 {dimension_numbers = #tpu.dot_dimension_numbers<[1], [0], [0], [1], [0, 0, 1, 1], [], []>} : vector<320x128xbf16>, vector<128x64xbf16>, vector<320x64xf32> -> vector<320x64xf32>
    %109 = arith.addf %104, %108 : vector<320x64xf32>
    %c88 = arith.constant 88 : index
    %c0_77 = arith.constant 0 : index
    %110 = vector.load %arg11[%c88, %c0_77] : memref<416x128xbf16, #tpu.memory_space<vmem>>, vector<320x128xbf16>
    %c13 = arith.constant 13 : index
    %c0_78 = arith.constant 0 : index
    %c0_79 = arith.constant 0 : index
    %111 = vector.load %arg3[%c13, %c0_78, %c0_79] : memref<15x128x64xbf16, #tpu.memory_space<vmem>>, vector<1x128x64xbf16>
    %112 = vector.shape_cast %111 : vector<1x128x64xbf16> to vector<128x64xbf16>
    %cst_80 = arith.constant dense<0.000000e+00> : vector<320x64xf32>
    %113 = tpu.matmul %110, %112, %cst_80 {dimension_numbers = #tpu.dot_dimension_numbers<[1], [0], [0], [1], [0, 0, 1, 1], [], []>} : vector<320x128xbf16>, vector<128x64xbf16>, vector<320x64xf32> -> vector<320x64xf32>
    %114 = arith.addf %109, %113 : vector<320x64xf32>
    %c90 = arith.constant 90 : index
    %c0_81 = arith.constant 0 : index
    %115 = vector.load %arg11[%c90, %c0_81] : memref<416x128xbf16, #tpu.memory_space<vmem>>, vector<320x128xbf16>
    %c14 = arith.constant 14 : index
    %c0_82 = arith.constant 0 : index
    %c0_83 = arith.constant 0 : index
    %116 = vector.load %arg3[%c14, %c0_82, %c0_83] : memref<15x128x64xbf16, #tpu.memory_space<vmem>>, vector<1x128x64xbf16>
    %117 = vector.shape_cast %116 : vector<1x128x64xbf16> to vector<128x64xbf16>
    %cst_84 = arith.constant dense<0.000000e+00> : vector<320x64xf32>
    %118 = tpu.matmul %115, %117, %cst_84 {dimension_numbers = #tpu.dot_dimension_numbers<[1], [0], [0], [1], [0, 0, 1, 1], [], []>} : vector<320x128xbf16>, vector<128x64xbf16>, vector<320x64xf32> -> vector<320x64xf32>
    %119 = arith.addf %114, %118 : vector<320x64xf32>
    %c0_85 = arith.constant 0 : index
    %c0_86 = arith.constant 0 : index
    %120 = vector.load %arg7[%c0_85, %c0_86] : memref<1x64xf32, #tpu.memory_space<vmem>>, vector<1x64xf32>
    %121 = vector.broadcast %120 : vector<1x64xf32> to vector<320x64xf32>
    %122 = arith.mulf %119, %121 : vector<320x64xf32>
    %c0_87 = arith.constant 0 : index
    %c0_88 = arith.constant 0 : index
    %123 = vector.load %arg8[%c0_87, %c0_88] : memref<1x64xf32, #tpu.memory_space<vmem>>, vector<1x64xf32>
    %124 = vector.broadcast %123 : vector<1x64xf32> to vector<320x64xf32>
    %125 = arith.addf %122, %124 : vector<320x64xf32>
    %cst_89 = arith.constant 0.000000e+00 : f32
    %126 = vector.broadcast %cst_89 : f32 to vector<320x64xf32>
    %127 = arith.maximumf %125, %126 : vector<320x64xf32>
    %cst_90 = arith.constant 0.000000e+00 : f32
    %128 = vector.shape_cast %18 : vector<320x1xi1> to vector<320x1xi1>
    %129 = vector.broadcast %128 : vector<320x1xi1> to vector<320x64xi1>
    %130 = vector.broadcast %cst_90 : f32 to vector<320x64xf32>
    %131 = arith.select %129, %127, %130 : vector<320x64xi1>, vector<320x64xf32>
    %132 = arith.truncf %131 : vector<320x64xf32> to vector<320x64xbf16>
    %c48_91 = arith.constant 48 : index
    %c0_92 = arith.constant 0 : index
    %133 = vector.load %arg11[%c48_91, %c0_92] : memref<416x128xbf16, #tpu.memory_space<vmem>>, vector<320x64xbf16>
    tpu.vector_store %arg11[%c48_91, %c0_92], %132 {strides = array<i32>} : memref<416x128xbf16, #tpu.memory_space<vmem>>, vector<320x64xbf16>,
    %cst_93 = arith.constant 0.000000e+00 : f32
    %134 = vector.broadcast %cst_93 : f32 to vector<1x64xf32>
    %135 = vector.extract_strided_slice %131 {offsets = [0, 0], sizes = [319, 64], strides = [1, 1]} : vector<320x64xf32> to vector<319x64xf32>
    %136 = tpu.concatenate %134, %135 in 0 : vector<1x64xf32>, vector<319x64xf32> -> vector<320x64xf32>
    %137 = arith.truncf %136 : vector<320x64xf32> to vector<320x64xbf16>
    %c46_94 = arith.constant 46 : index
    %c64_95 = arith.constant 64 : index
    %138 = vector.load %arg11[%c46_94, %c64_95] : memref<416x128xbf16, #tpu.memory_space<vmem>>, vector<320x64xbf16>
    tpu.vector_store %arg11[%c46_94, %c64_95], %137 {strides = array<i32>} : memref<416x128xbf16, #tpu.memory_space<vmem>>, vector<320x64xbf16>,
    %cst_96 = arith.constant 0.000000e+00 : f32
    %139 = vector.broadcast %cst_96 : f32 to vector<160x128xf32>
    %c0_97 = arith.constant 0 : index
    %c0_98 = arith.constant 0 : index
    %140 = vector.load %arg9[%c0_97, %c0_98] : memref<1x128xf32, #tpu.memory_space<vmem>>, vector<1x128xf32>
    %141 = vector.broadcast %140 : vector<1x128xf32> to vector<160x128xf32>
    %142 = arith.addf %139, %141 : vector<160x128xf32>
    %c6_99 = arith.constant 6 : index
    %c0_100 = arith.constant 0 : index
    %143 = vector.load %arg11[%c6_99, %c0_100] : memref<416x128xbf16, #tpu.memory_space<vmem>>, vector<160x128xbf16>
    %c0_101 = arith.constant 0 : index
    %c0_102 = arith.constant 0 : index
    %c0_103 = arith.constant 0 : index
    %144 = vector.load %arg4[%c0_101, %c0_102, %c0_103] : memref<15x128x128xbf16, #tpu.memory_space<vmem>>, vector<1x128x128xbf16>
    %145 = vector.shape_cast %144 : vector<1x128x128xbf16> to vector<128x128xbf16>
    %cst_104 = arith.constant dense<0.000000e+00> : vector<160x128xf32>
    %146 = tpu.matmul %143, %145, %cst_104 {dimension_numbers = #tpu.dot_dimension_numbers<[1], [0], [0], [1], [0, 0, 1, 1], [], []>} : vector<160x128xbf16>, vector<128x128xbf16>, vector<160x128xf32> -> vector<160x128xf32>
    %147 = arith.addf %142, %146 : vector<160x128xf32>
    %c8_105 = arith.constant 8 : index
    %c0_106 = arith.constant 0 : index
    %148 = vector.load %arg11[%c8_105, %c0_106] : memref<416x128xbf16, #tpu.memory_space<vmem>>, vector<160x128xbf16>
    %c1_107 = arith.constant 1 : index
    %c0_108 = arith.constant 0 : index
    %c0_109 = arith.constant 0 : index
    %149 = vector.load %arg4[%c1_107, %c0_108, %c0_109] : memref<15x128x128xbf16, #tpu.memory_space<vmem>>, vector<1x128x128xbf16>
    %150 = vector.shape_cast %149 : vector<1x128x128xbf16> to vector<128x128xbf16>
    %cst_110 = arith.constant dense<0.000000e+00> : vector<160x128xf32>
    %151 = tpu.matmul %148, %150, %cst_110 {dimension_numbers = #tpu.dot_dimension_numbers<[1], [0], [0], [1], [0, 0, 1, 1], [], []>} : vector<160x128xbf16>, vector<128x128xbf16>, vector<160x128xf32> -> vector<160x128xf32>
    %152 = arith.addf %147, %151 : vector<160x128xf32>
    %c10_111 = arith.constant 10 : index
    %c0_112 = arith.constant 0 : index
    %153 = vector.load %arg11[%c10_111, %c0_112] : memref<416x128xbf16, #tpu.memory_space<vmem>>, vector<160x128xbf16>
    %c2_113 = arith.constant 2 : index
    %c0_114 = arith.constant 0 : index
    %c0_115 = arith.constant 0 : index
    %154 = vector.load %arg4[%c2_113, %c0_114, %c0_115] : memref<15x128x128xbf16, #tpu.memory_space<vmem>>, vector<1x128x128xbf16>
    %155 = vector.shape_cast %154 : vector<1x128x128xbf16> to vector<128x128xbf16>
    %cst_116 = arith.constant dense<0.000000e+00> : vector<160x128xf32>
    %156 = tpu.matmul %153, %155, %cst_116 {dimension_numbers = #tpu.dot_dimension_numbers<[1], [0], [0], [1], [0, 0, 1, 1], [], []>} : vector<160x128xbf16>, vector<128x128xbf16>, vector<160x128xf32> -> vector<160x128xf32>
    %157 = arith.addf %152, %156 : vector<160x128xf32>
    %c26_117 = arith.constant 26 : index
    %c0_118 = arith.constant 0 : index
    %158 = vector.load %arg11[%c26_117, %c0_118] : memref<416x128xbf16, #tpu.memory_space<vmem>>, vector<160x128xbf16>
    %c3_119 = arith.constant 3 : index
    %c0_120 = arith.constant 0 : index
    %c0_121 = arith.constant 0 : index
    %159 = vector.load %arg4[%c3_119, %c0_120, %c0_121] : memref<15x128x128xbf16, #tpu.memory_space<vmem>>, vector<1x128x128xbf16>
    %160 = vector.shape_cast %159 : vector<1x128x128xbf16> to vector<128x128xbf16>
    %cst_122 = arith.constant dense<0.000000e+00> : vector<160x128xf32>
    %161 = tpu.matmul %158, %160, %cst_122 {dimension_numbers = #tpu.dot_dimension_numbers<[1], [0], [0], [1], [0, 0, 1, 1], [], []>} : vector<160x128xbf16>, vector<128x128xbf16>, vector<160x128xf32> -> vector<160x128xf32>
    %162 = arith.addf %157, %161 : vector<160x128xf32>
    %c28_123 = arith.constant 28 : index
    %c0_124 = arith.constant 0 : index
    %163 = vector.load %arg11[%c28_123, %c0_124] : memref<416x128xbf16, #tpu.memory_space<vmem>>, vector<160x128xbf16>
    %c4_125 = arith.constant 4 : index
    %c0_126 = arith.constant 0 : index
    %c0_127 = arith.constant 0 : index
    %164 = vector.load %arg4[%c4_125, %c0_126, %c0_127] : memref<15x128x128xbf16, #tpu.memory_space<vmem>>, vector<1x128x128xbf16>
    %165 = vector.shape_cast %164 : vector<1x128x128xbf16> to vector<128x128xbf16>
    %cst_128 = arith.constant dense<0.000000e+00> : vector<160x128xf32>
    %166 = tpu.matmul %163, %165, %cst_128 {dimension_numbers = #tpu.dot_dimension_numbers<[1], [0], [0], [1], [0, 0, 1, 1], [], []>} : vector<160x128xbf16>, vector<128x128xbf16>, vector<160x128xf32> -> vector<160x128xf32>
    %167 = arith.addf %162, %166 : vector<160x128xf32>
    %c30_129 = arith.constant 30 : index
    %c0_130 = arith.constant 0 : index
    %168 = vector.load %arg11[%c30_129, %c0_130] : memref<416x128xbf16, #tpu.memory_space<vmem>>, vector<160x128xbf16>
    %c5_131 = arith.constant 5 : index
    %c0_132 = arith.constant 0 : index
    %c0_133 = arith.constant 0 : index
    %169 = vector.load %arg4[%c5_131, %c0_132, %c0_133] : memref<15x128x128xbf16, #tpu.memory_space<vmem>>, vector<1x128x128xbf16>
    %170 = vector.shape_cast %169 : vector<1x128x128xbf16> to vector<128x128xbf16>
    %cst_134 = arith.constant dense<0.000000e+00> : vector<160x128xf32>
    %171 = tpu.matmul %168, %170, %cst_134 {dimension_numbers = #tpu.dot_dimension_numbers<[1], [0], [0], [1], [0, 0, 1, 1], [], []>} : vector<160x128xbf16>, vector<128x128xbf16>, vector<160x128xf32> -> vector<160x128xf32>
    %172 = arith.addf %167, %171 : vector<160x128xf32>
    %c46_135 = arith.constant 46 : index
    %c0_136 = arith.constant 0 : index
    %173 = vector.load %arg11[%c46_135, %c0_136] : memref<416x128xbf16, #tpu.memory_space<vmem>>, vector<160x128xbf16>
    %c6_137 = arith.constant 6 : index
    %c0_138 = arith.constant 0 : index
    %c0_139 = arith.constant 0 : index
    %174 = vector.load %arg4[%c6_137, %c0_138, %c0_139] : memref<15x128x128xbf16, #tpu.memory_space<vmem>>, vector<1x128x128xbf16>
    %175 = vector.shape_cast %174 : vector<1x128x128xbf16> to vector<128x128xbf16>
    %cst_140 = arith.constant dense<0.000000e+00> : vector<160x128xf32>
    %176 = tpu.matmul %173, %175, %cst_140 {dimension_numbers = #tpu.dot_dimension_numbers<[1], [0], [0], [1], [0, 0, 1, 1], [], []>} : vector<160x128xbf16>, vector<128x128xbf16>, vector<160x128xf32> -> vector<160x128xf32>
    %177 = arith.addf %172, %176 : vector<160x128xf32>
    %c48_141 = arith.constant 48 : index
    %c0_142 = arith.constant 0 : index
    %178 = vector.load %arg11[%c48_141, %c0_142] : memref<416x128xbf16, #tpu.memory_space<vmem>>, vector<160x128xbf16>
    %c7_143 = arith.constant 7 : index
    %c0_144 = arith.constant 0 : index
    %c0_145 = arith.constant 0 : index
    %179 = vector.load %arg4[%c7_143, %c0_144, %c0_145] : memref<15x128x128xbf16, #tpu.memory_space<vmem>>, vector<1x128x128xbf16>
    %180 = vector.shape_cast %179 : vector<1x128x128xbf16> to vector<128x128xbf16>
    %cst_146 = arith.constant dense<0.000000e+00> : vector<160x128xf32>
    %181 = tpu.matmul %178, %180, %cst_146 {dimension_numbers = #tpu.dot_dimension_numbers<[1], [0], [0], [1], [0, 0, 1, 1], [], []>} : vector<160x128xbf16>, vector<128x128xbf16>, vector<160x128xf32> -> vector<160x128xf32>
    %182 = arith.addf %177, %181 : vector<160x128xf32>
    %c50_147 = arith.constant 50 : index
    %c0_148 = arith.constant 0 : index
    %183 = vector.load %arg11[%c50_147, %c0_148] : memref<416x128xbf16, #tpu.memory_space<vmem>>, vector<160x128xbf16>
    %c8_149 = arith.constant 8 : index
    %c0_150 = arith.constant 0 : index
    %c0_151 = arith.constant 0 : index
    %184 = vector.load %arg4[%c8_149, %c0_150, %c0_151] : memref<15x128x128xbf16, #tpu.memory_space<vmem>>, vector<1x128x128xbf16>
    %185 = vector.shape_cast %184 : vector<1x128x128xbf16> to vector<128x128xbf16>
    %cst_152 = arith.constant dense<0.000000e+00> : vector<160x128xf32>
    %186 = tpu.matmul %183, %185, %cst_152 {dimension_numbers = #tpu.dot_dimension_numbers<[1], [0], [0], [1], [0, 0, 1, 1], [], []>} : vector<160x128xbf16>, vector<128x128xbf16>, vector<160x128xf32> -> vector<160x128xf32>
    %187 = arith.addf %182, %186 : vector<160x128xf32>
    %c66_153 = arith.constant 66 : index
    %c0_154 = arith.constant 0 : index
    %188 = vector.load %arg11[%c66_153, %c0_154] : memref<416x128xbf16, #tpu.memory_space<vmem>>, vector<160x128xbf16>
    %c9_155 = arith.constant 9 : index
    %c0_156 = arith.constant 0 : index
    %c0_157 = arith.constant 0 : index
    %189 = vector.load %arg4[%c9_155, %c0_156, %c0_157] : memref<15x128x128xbf16, #tpu.memory_space<vmem>>, vector<1x128x128xbf16>
    %190 = vector.shape_cast %189 : vector<1x128x128xbf16> to vector<128x128xbf16>
    %cst_158 = arith.constant dense<0.000000e+00> : vector<160x128xf32>
    %191 = tpu.matmul %188, %190, %cst_158 {dimension_numbers = #tpu.dot_dimension_numbers<[1], [0], [0], [1], [0, 0, 1, 1], [], []>} : vector<160x128xbf16>, vector<128x128xbf16>, vector<160x128xf32> -> vector<160x128xf32>
    %192 = arith.addf %187, %191 : vector<160x128xf32>
    %c68_159 = arith.constant 68 : index
    %c0_160 = arith.constant 0 : index
    %193 = vector.load %arg11[%c68_159, %c0_160] : memref<416x128xbf16, #tpu.memory_space<vmem>>, vector<160x128xbf16>
    %c10_161 = arith.constant 10 : index
    %c0_162 = arith.constant 0 : index
    %c0_163 = arith.constant 0 : index
    %194 = vector.load %arg4[%c10_161, %c0_162, %c0_163] : memref<15x128x128xbf16, #tpu.memory_space<vmem>>, vector<1x128x128xbf16>
    %195 = vector.shape_cast %194 : vector<1x128x128xbf16> to vector<128x128xbf16>
    %cst_164 = arith.constant dense<0.000000e+00> : vector<160x128xf32>
    %196 = tpu.matmul %193, %195, %cst_164 {dimension_numbers = #tpu.dot_dimension_numbers<[1], [0], [0], [1], [0, 0, 1, 1], [], []>} : vector<160x128xbf16>, vector<128x128xbf16>, vector<160x128xf32> -> vector<160x128xf32>
    %197 = arith.addf %192, %196 : vector<160x128xf32>
    %c70_165 = arith.constant 70 : index
    %c0_166 = arith.constant 0 : index
    %198 = vector.load %arg11[%c70_165, %c0_166] : memref<416x128xbf16, #tpu.memory_space<vmem>>, vector<160x128xbf16>
    %c11_167 = arith.constant 11 : index
    %c0_168 = arith.constant 0 : index
    %c0_169 = arith.constant 0 : index
    %199 = vector.load %arg4[%c11_167, %c0_168, %c0_169] : memref<15x128x128xbf16, #tpu.memory_space<vmem>>, vector<1x128x128xbf16>
    %200 = vector.shape_cast %199 : vector<1x128x128xbf16> to vector<128x128xbf16>
    %cst_170 = arith.constant dense<0.000000e+00> : vector<160x128xf32>
    %201 = tpu.matmul %198, %200, %cst_170 {dimension_numbers = #tpu.dot_dimension_numbers<[1], [0], [0], [1], [0, 0, 1, 1], [], []>} : vector<160x128xbf16>, vector<128x128xbf16>, vector<160x128xf32> -> vector<160x128xf32>
    %202 = arith.addf %197, %201 : vector<160x128xf32>
    %c86_171 = arith.constant 86 : index
    %c0_172 = arith.constant 0 : index
    %203 = vector.load %arg11[%c86_171, %c0_172] : memref<416x128xbf16, #tpu.memory_space<vmem>>, vector<160x128xbf16>
    %c12_173 = arith.constant 12 : index
    %c0_174 = arith.constant 0 : index
    %c0_175 = arith.constant 0 : index
    %204 = vector.load %arg4[%c12_173, %c0_174, %c0_175] : memref<15x128x128xbf16, #tpu.memory_space<vmem>>, vector<1x128x128xbf16>
    %205 = vector.shape_cast %204 : vector<1x128x128xbf16> to vector<128x128xbf16>
    %cst_176 = arith.constant dense<0.000000e+00> : vector<160x128xf32>
    %206 = tpu.matmul %203, %205, %cst_176 {dimension_numbers = #tpu.dot_dimension_numbers<[1], [0], [0], [1], [0, 0, 1, 1], [], []>} : vector<160x128xbf16>, vector<128x128xbf16>, vector<160x128xf32> -> vector<160x128xf32>
    %207 = arith.addf %202, %206 : vector<160x128xf32>
    %c88_177 = arith.constant 88 : index
    %c0_178 = arith.constant 0 : index
    %208 = vector.load %arg11[%c88_177, %c0_178] : memref<416x128xbf16, #tpu.memory_space<vmem>>, vector<160x128xbf16>
    %c13_179 = arith.constant 13 : index
    %c0_180 = arith.constant 0 : index
    %c0_181 = arith.constant 0 : index
    %209 = vector.load %arg4[%c13_179, %c0_180, %c0_181] : memref<15x128x128xbf16, #tpu.memory_space<vmem>>, vector<1x128x128xbf16>
    %210 = vector.shape_cast %209 : vector<1x128x128xbf16> to vector<128x128xbf16>
    %cst_182 = arith.constant dense<0.000000e+00> : vector<160x128xf32>
    %211 = tpu.matmul %208, %210, %cst_182 {dimension_numbers = #tpu.dot_dimension_numbers<[1], [0], [0], [1], [0, 0, 1, 1], [], []>} : vector<160x128xbf16>, vector<128x128xbf16>, vector<160x128xf32> -> vector<160x128xf32>
    %212 = arith.addf %207, %211 : vector<160x128xf32>
    %c90_183 = arith.constant 90 : index
    %c0_184 = arith.constant 0 : index
    %213 = vector.load %arg11[%c90_183, %c0_184] : memref<416x128xbf16, #tpu.memory_space<vmem>>, vector<160x128xbf16>
    %c14_185 = arith.constant 14 : index
    %c0_186 = arith.constant 0 : index
    %c0_187 = arith.constant 0 : index
    %214 = vector.load %arg4[%c14_185, %c0_186, %c0_187] : memref<15x128x128xbf16, #tpu.memory_space<vmem>>, vector<1x128x128xbf16>
    %215 = vector.shape_cast %214 : vector<1x128x128xbf16> to vector<128x128xbf16>
    %cst_188 = arith.constant dense<0.000000e+00> : vector<160x128xf32>
    %216 = tpu.matmul %213, %215, %cst_188 {dimension_numbers = #tpu.dot_dimension_numbers<[1], [0], [0], [1], [0, 0, 1, 1], [], []>} : vector<160x128xbf16>, vector<128x128xbf16>, vector<160x128xf32> -> vector<160x128xf32>
    %217 = arith.addf %212, %216 : vector<160x128xf32>
    %c0_189 = arith.constant 0 : index
    %c0_190 = arith.constant 0 : index
    %c0_191 = arith.constant 0 : index
    %218 = vector.load %arg10[%c0_189, %c0_190, %c0_191] : memref<1x320x128xf32, #tpu.memory_space<vmem>>, vector<1x160x128xf32>
    %219 = vector.shape_cast %218 : vector<1x160x128xf32> to vector<160x128xf32>
    %220 = vector.shape_cast %217 : vector<160x128xf32> to vector<1x160x128xf32>
    tpu.vector_store %arg10[%c0_189, %c0_190, %c0_191], %220 {strides = array<i32>} : memref<1x320x128xf32, #tpu.memory_space<vmem>>, vector<1x160x128xf32>,
    %cst_192 = arith.constant 0.000000e+00 : f32
    %221 = vector.broadcast %cst_192 : f32 to vector<160x128xf32>
    %c0_193 = arith.constant 0 : index
    %c0_194 = arith.constant 0 : index
    %222 = vector.load %arg9[%c0_193, %c0_194] : memref<1x128xf32, #tpu.memory_space<vmem>>, vector<1x128xf32>
    %223 = vector.broadcast %222 : vector<1x128xf32> to vector<160x128xf32>
    %224 = arith.addf %221, %223 : vector<160x128xf32>
    %c166 = arith.constant 166 : index
    %c0_195 = arith.constant 0 : index
    %225 = vector.load %arg11[%c166, %c0_195] : memref<416x128xbf16, #tpu.memory_space<vmem>>, vector<160x128xbf16>
    %c0_196 = arith.constant 0 : index
    %c0_197 = arith.constant 0 : index
    %c0_198 = arith.constant 0 : index
    %226 = vector.load %arg4[%c0_196, %c0_197, %c0_198] : memref<15x128x128xbf16, #tpu.memory_space<vmem>>, vector<1x128x128xbf16>
    %227 = vector.shape_cast %226 : vector<1x128x128xbf16> to vector<128x128xbf16>
    %cst_199 = arith.constant dense<0.000000e+00> : vector<160x128xf32>
    %228 = tpu.matmul %225, %227, %cst_199 {dimension_numbers = #tpu.dot_dimension_numbers<[1], [0], [0], [1], [0, 0, 1, 1], [], []>} : vector<160x128xbf16>, vector<128x128xbf16>, vector<160x128xf32> -> vector<160x128xf32>
    %229 = arith.addf %224, %228 : vector<160x128xf32>
    %c168 = arith.constant 168 : index
    %c0_200 = arith.constant 0 : index
    %230 = vector.load %arg11[%c168, %c0_200] : memref<416x128xbf16, #tpu.memory_space<vmem>>, vector<160x128xbf16>
    %c1_201 = arith.constant 1 : index
    %c0_202 = arith.constant 0 : index
    %c0_203 = arith.constant 0 : index
    %231 = vector.load %arg4[%c1_201, %c0_202, %c0_203] : memref<15x128x128xbf16, #tpu.memory_space<vmem>>, vector<1x128x128xbf16>
    %232 = vector.shape_cast %231 : vector<1x128x128xbf16> to vector<128x128xbf16>
    %cst_204 = arith.constant dense<0.000000e+00> : vector<160x128xf32>
    %233 = tpu.matmul %230, %232, %cst_204 {dimension_numbers = #tpu.dot_dimension_numbers<[1], [0], [0], [1], [0, 0, 1, 1], [], []>} : vector<160x128xbf16>, vector<128x128xbf16>, vector<160x128xf32> -> vector<160x128xf32>
    %234 = arith.addf %229, %233 : vector<160x128xf32>
    %c170 = arith.constant 170 : index
    %c0_205 = arith.constant 0 : index
    %235 = vector.load %arg11[%c170, %c0_205] : memref<416x128xbf16, #tpu.memory_space<vmem>>, vector<160x128xbf16>
    %c2_206 = arith.constant 2 : index
    %c0_207 = arith.constant 0 : index
    %c0_208 = arith.constant 0 : index
    %236 = vector.load %arg4[%c2_206, %c0_207, %c0_208] : memref<15x128x128xbf16, #tpu.memory_space<vmem>>, vector<1x128x128xbf16>
    %237 = vector.shape_cast %236 : vector<1x128x128xbf16> to vector<128x128xbf16>
    %cst_209 = arith.constant dense<0.000000e+00> : vector<160x128xf32>
    %238 = tpu.matmul %235, %237, %cst_209 {dimension_numbers = #tpu.dot_dimension_numbers<[1], [0], [0], [1], [0, 0, 1, 1], [], []>} : vector<160x128xbf16>, vector<128x128xbf16>, vector<160x128xf32> -> vector<160x128xf32>
    %239 = arith.addf %234, %238 : vector<160x128xf32>
    %c186 = arith.constant 186 : index
    %c0_210 = arith.constant 0 : index
    %240 = vector.load %arg11[%c186, %c0_210] : memref<416x128xbf16, #tpu.memory_space<vmem>>, vector<160x128xbf16>
    %c3_211 = arith.constant 3 : index
    %c0_212 = arith.constant 0 : index
    %c0_213 = arith.constant 0 : index
    %241 = vector.load %arg4[%c3_211, %c0_212, %c0_213] : memref<15x128x128xbf16, #tpu.memory_space<vmem>>, vector<1x128x128xbf16>
    %242 = vector.shape_cast %241 : vector<1x128x128xbf16> to vector<128x128xbf16>
    %cst_214 = arith.constant dense<0.000000e+00> : vector<160x128xf32>
    %243 = tpu.matmul %240, %242, %cst_214 {dimension_numbers = #tpu.dot_dimension_numbers<[1], [0], [0], [1], [0, 0, 1, 1], [], []>} : vector<160x128xbf16>, vector<128x128xbf16>, vector<160x128xf32> -> vector<160x128xf32>
    %244 = arith.addf %239, %243 : vector<160x128xf32>
    %c188 = arith.constant 188 : index
    %c0_215 = arith.constant 0 : index
    %245 = vector.load %arg11[%c188, %c0_215] : memref<416x128xbf16, #tpu.memory_space<vmem>>, vector<160x128xbf16>
    %c4_216 = arith.constant 4 : index
    %c0_217 = arith.constant 0 : index
    %c0_218 = arith.constant 0 : index
    %246 = vector.load %arg4[%c4_216, %c0_217, %c0_218] : memref<15x128x128xbf16, #tpu.memory_space<vmem>>, vector<1x128x128xbf16>
    %247 = vector.shape_cast %246 : vector<1x128x128xbf16> to vector<128x128xbf16>
    %cst_219 = arith.constant dense<0.000000e+00> : vector<160x128xf32>
    %248 = tpu.matmul %245, %247, %cst_219 {dimension_numbers = #tpu.dot_dimension_numbers<[1], [0], [0], [1], [0, 0, 1, 1], [], []>} : vector<160x128xbf16>, vector<128x128xbf16>, vector<160x128xf32> -> vector<160x128xf32>
    %249 = arith.addf %244, %248 : vector<160x128xf32>
    %c190 = arith.constant 190 : index
    %c0_220 = arith.constant 0 : index
    %250 = vector.load %arg11[%c190, %c0_220] : memref<416x128xbf16, #tpu.memory_space<vmem>>, vector<160x128xbf16>
    %c5_221 = arith.constant 5 : index
    %c0_222 = arith.constant 0 : index
    %c0_223 = arith.constant 0 : index
    %251 = vector.load %arg4[%c5_221, %c0_222, %c0_223] : memref<15x128x128xbf16, #tpu.memory_space<vmem>>, vector<1x128x128xbf16>
    %252 = vector.shape_cast %251 : vector<1x128x128xbf16> to vector<128x128xbf16>
    %cst_224 = arith.constant dense<0.000000e+00> : vector<160x128xf32>
    %253 = tpu.matmul %250, %252, %cst_224 {dimension_numbers = #tpu.dot_dimension_numbers<[1], [0], [0], [1], [0, 0, 1, 1], [], []>} : vector<160x128xbf16>, vector<128x128xbf16>, vector<160x128xf32> -> vector<160x128xf32>
    %254 = arith.addf %249, %253 : vector<160x128xf32>
    %c206 = arith.constant 206 : index
    %c0_225 = arith.constant 0 : index
    %255 = vector.load %arg11[%c206, %c0_225] : memref<416x128xbf16, #tpu.memory_space<vmem>>, vector<160x128xbf16>
    %c6_226 = arith.constant 6 : index
    %c0_227 = arith.constant 0 : index
    %c0_228 = arith.constant 0 : index
    %256 = vector.load %arg4[%c6_226, %c0_227, %c0_228] : memref<15x128x128xbf16, #tpu.memory_space<vmem>>, vector<1x128x128xbf16>
    %257 = vector.shape_cast %256 : vector<1x128x128xbf16> to vector<128x128xbf16>
    %cst_229 = arith.constant dense<0.000000e+00> : vector<160x128xf32>
    %258 = tpu.matmul %255, %257, %cst_229 {dimension_numbers = #tpu.dot_dimension_numbers<[1], [0], [0], [1], [0, 0, 1, 1], [], []>} : vector<160x128xbf16>, vector<128x128xbf16>, vector<160x128xf32> -> vector<160x128xf32>
    %259 = arith.addf %254, %258 : vector<160x128xf32>
    %c208 = arith.constant 208 : index
    %c0_230 = arith.constant 0 : index
    %260 = vector.load %arg11[%c208, %c0_230] : memref<416x128xbf16, #tpu.memory_space<vmem>>, vector<160x128xbf16>
    %c7_231 = arith.constant 7 : index
    %c0_232 = arith.constant 0 : index
    %c0_233 = arith.constant 0 : index
    %261 = vector.load %arg4[%c7_231, %c0_232, %c0_233] : memref<15x128x128xbf16, #tpu.memory_space<vmem>>, vector<1x128x128xbf16>
    %262 = vector.shape_cast %261 : vector<1x128x128xbf16> to vector<128x128xbf16>
    %cst_234 = arith.constant dense<0.000000e+00> : vector<160x128xf32>
    %263 = tpu.matmul %260, %262, %cst_234 {dimension_numbers = #tpu.dot_dimension_numbers<[1], [0], [0], [1], [0, 0, 1, 1], [], []>} : vector<160x128xbf16>, vector<128x128xbf16>, vector<160x128xf32> -> vector<160x128xf32>
    %264 = arith.addf %259, %263 : vector<160x128xf32>
    %c210 = arith.constant 210 : index
    %c0_235 = arith.constant 0 : index
    %265 = vector.load %arg11[%c210, %c0_235] : memref<416x128xbf16, #tpu.memory_space<vmem>>, vector<160x128xbf16>
    %c8_236 = arith.constant 8 : index
    %c0_237 = arith.constant 0 : index
    %c0_238 = arith.constant 0 : index
    %266 = vector.load %arg4[%c8_236, %c0_237, %c0_238] : memref<15x128x128xbf16, #tpu.memory_space<vmem>>, vector<1x128x128xbf16>
    %267 = vector.shape_cast %266 : vector<1x128x128xbf16> to vector<128x128xbf16>
    %cst_239 = arith.constant dense<0.000000e+00> : vector<160x128xf32>
    %268 = tpu.matmul %265, %267, %cst_239 {dimension_numbers = #tpu.dot_dimension_numbers<[1], [0], [0], [1], [0, 0, 1, 1], [], []>} : vector<160x128xbf16>, vector<128x128xbf16>, vector<160x128xf32> -> vector<160x128xf32>
    %269 = arith.addf %264, %268 : vector<160x128xf32>
    %c226 = arith.constant 226 : index
    %c0_240 = arith.constant 0 : index
    %270 = vector.load %arg11[%c226, %c0_240] : memref<416x128xbf16, #tpu.memory_space<vmem>>, vector<160x128xbf16>
    %c9_241 = arith.constant 9 : index
    %c0_242 = arith.constant 0 : index
    %c0_243 = arith.constant 0 : index
    %271 = vector.load %arg4[%c9_241, %c0_242, %c0_243] : memref<15x128x128xbf16, #tpu.memory_space<vmem>>, vector<1x128x128xbf16>
    %272 = vector.shape_cast %271 : vector<1x128x128xbf16> to vector<128x128xbf16>
    %cst_244 = arith.constant dense<0.000000e+00> : vector<160x128xf32>
    %273 = tpu.matmul %270, %272, %cst_244 {dimension_numbers = #tpu.dot_dimension_numbers<[1], [0], [0], [1], [0, 0, 1, 1], [], []>} : vector<160x128xbf16>, vector<128x128xbf16>, vector<160x128xf32> -> vector<160x128xf32>
    %274 = arith.addf %269, %273 : vector<160x128xf32>
    %c228 = arith.constant 228 : index
    %c0_245 = arith.constant 0 : index
    %275 = vector.load %arg11[%c228, %c0_245] : memref<416x128xbf16, #tpu.memory_space<vmem>>, vector<160x128xbf16>
    %c10_246 = arith.constant 10 : index
    %c0_247 = arith.constant 0 : index
    %c0_248 = arith.constant 0 : index
    %276 = vector.load %arg4[%c10_246, %c0_247, %c0_248] : memref<15x128x128xbf16, #tpu.memory_space<vmem>>, vector<1x128x128xbf16>
    %277 = vector.shape_cast %276 : vector<1x128x128xbf16> to vector<128x128xbf16>
    %cst_249 = arith.constant dense<0.000000e+00> : vector<160x128xf32>
    %278 = tpu.matmul %275, %277, %cst_249 {dimension_numbers = #tpu.dot_dimension_numbers<[1], [0], [0], [1], [0, 0, 1, 1], [], []>} : vector<160x128xbf16>, vector<128x128xbf16>, vector<160x128xf32> -> vector<160x128xf32>
    %279 = arith.addf %274, %278 : vector<160x128xf32>
    %c230 = arith.constant 230 : index
    %c0_250 = arith.constant 0 : index
    %280 = vector.load %arg11[%c230, %c0_250] : memref<416x128xbf16, #tpu.memory_space<vmem>>, vector<160x128xbf16>
    %c11_251 = arith.constant 11 : index
    %c0_252 = arith.constant 0 : index
    %c0_253 = arith.constant 0 : index
    %281 = vector.load %arg4[%c11_251, %c0_252, %c0_253] : memref<15x128x128xbf16, #tpu.memory_space<vmem>>, vector<1x128x128xbf16>
    %282 = vector.shape_cast %281 : vector<1x128x128xbf16> to vector<128x128xbf16>
    %cst_254 = arith.constant dense<0.000000e+00> : vector<160x128xf32>
    %283 = tpu.matmul %280, %282, %cst_254 {dimension_numbers = #tpu.dot_dimension_numbers<[1], [0], [0], [1], [0, 0, 1, 1], [], []>} : vector<160x128xbf16>, vector<128x128xbf16>, vector<160x128xf32> -> vector<160x128xf32>
    %284 = arith.addf %279, %283 : vector<160x128xf32>
    %c246 = arith.constant 246 : index
    %c0_255 = arith.constant 0 : index
    %285 = vector.load %arg11[%c246, %c0_255] : memref<416x128xbf16, #tpu.memory_space<vmem>>, vector<160x128xbf16>
    %c12_256 = arith.constant 12 : index
    %c0_257 = arith.constant 0 : index
    %c0_258 = arith.constant 0 : index
    %286 = vector.load %arg4[%c12_256, %c0_257, %c0_258] : memref<15x128x128xbf16, #tpu.memory_space<vmem>>, vector<1x128x128xbf16>
    %287 = vector.shape_cast %286 : vector<1x128x128xbf16> to vector<128x128xbf16>
    %cst_259 = arith.constant dense<0.000000e+00> : vector<160x128xf32>
    %288 = tpu.matmul %285, %287, %cst_259 {dimension_numbers = #tpu.dot_dimension_numbers<[1], [0], [0], [1], [0, 0, 1, 1], [], []>} : vector<160x128xbf16>, vector<128x128xbf16>, vector<160x128xf32> -> vector<160x128xf32>
    %289 = arith.addf %284, %288 : vector<160x128xf32>
    %c248 = arith.constant 248 : index
    %c0_260 = arith.constant 0 : index
    %290 = vector.load %arg11[%c248, %c0_260] : memref<416x128xbf16, #tpu.memory_space<vmem>>, vector<160x128xbf16>
    %c13_261 = arith.constant 13 : index
    %c0_262 = arith.constant 0 : index
    %c0_263 = arith.constant 0 : index
    %291 = vector.load %arg4[%c13_261, %c0_262, %c0_263] : memref<15x128x128xbf16, #tpu.memory_space<vmem>>, vector<1x128x128xbf16>
    %292 = vector.shape_cast %291 : vector<1x128x128xbf16> to vector<128x128xbf16>
    %cst_264 = arith.constant dense<0.000000e+00> : vector<160x128xf32>
    %293 = tpu.matmul %290, %292, %cst_264 {dimension_numbers = #tpu.dot_dimension_numbers<[1], [0], [0], [1], [0, 0, 1, 1], [], []>} : vector<160x128xbf16>, vector<128x128xbf16>, vector<160x128xf32> -> vector<160x128xf32>
    %294 = arith.addf %289, %293 : vector<160x128xf32>
    %c250 = arith.constant 250 : index
    %c0_265 = arith.constant 0 : index
    %295 = vector.load %arg11[%c250, %c0_265] : memref<416x128xbf16, #tpu.memory_space<vmem>>, vector<160x128xbf16>
    %c14_266 = arith.constant 14 : index
    %c0_267 = arith.constant 0 : index
    %c0_268 = arith.constant 0 : index
    %296 = vector.load %arg4[%c14_266, %c0_267, %c0_268] : memref<15x128x128xbf16, #tpu.memory_space<vmem>>, vector<1x128x128xbf16>
    %297 = vector.shape_cast %296 : vector<1x128x128xbf16> to vector<128x128xbf16>
    %cst_269 = arith.constant dense<0.000000e+00> : vector<160x128xf32>
    %298 = tpu.matmul %295, %297, %cst_269 {dimension_numbers = #tpu.dot_dimension_numbers<[1], [0], [0], [1], [0, 0, 1, 1], [], []>} : vector<160x128xbf16>, vector<128x128xbf16>, vector<160x128xf32> -> vector<160x128xf32>
    %299 = arith.addf %294, %298 : vector<160x128xf32>
    %c0_270 = arith.constant 0 : index
    %c160 = arith.constant 160 : index
    %c0_271 = arith.constant 0 : index
    %300 = vector.load %arg10[%c0_270, %c160, %c0_271] : memref<1x320x128xf32, #tpu.memory_space<vmem>>, vector<1x160x128xf32>
    %301 = vector.shape_cast %300 : vector<1x160x128xf32> to vector<160x128xf32>
    %302 = vector.shape_cast %299 : vector<160x128xf32> to vector<1x160x128xf32>
    tpu.vector_store %arg10[%c0_270, %c160, %c0_271], %302 {strides = array<i32>} : memref<1x320x128xf32, #tpu.memory_space<vmem>>, vector<1x160x128xf32>,
    return
  }
  func.func @transform_0(%arg0: i32) -> (i32, i32, i32) {
    %c0_i32 = arith.constant 0 : i32
    %c0_i32_0 = arith.constant 0 : i32
    %c0_i32_1 = arith.constant 0 : i32
    return %arg0, %c0_i32, %c0_i32_0 : i32, i32, i32
  }
  func.func @transform_1(%arg0: i32) -> (i32, i32) {
    %c0_i32 = arith.constant 0 : i32
    %c0_i32_0 = arith.constant 0 : i32
    %c0_i32_1 = arith.constant 0 : i32
    return %c0_i32, %c0_i32_0 : i32, i32
  }
  func.func @transform_2(%arg0: i32) -> (i32, i32, i32) {
    %c0_i32 = arith.constant 0 : i32
    %c0_i32_0 = arith.constant 0 : i32
    %c0_i32_1 = arith.constant 0 : i32
    %c0_i32_2 = arith.constant 0 : i32
    return %c0_i32, %c0_i32_0, %c0_i32_1 : i32, i32, i32
  }
  func.func @transform_3(%arg0: i32) -> (i32, i32, i32) {
    %c0_i32 = arith.constant 0 : i32
    %c0_i32_0 = arith.constant 0 : i32
    %c0_i32_1 = arith.constant 0 : i32
    %c0_i32_2 = arith.constant 0 : i32
    return %c0_i32, %c0_i32_0, %c0_i32_1 : i32, i32, i32
  }
  func.func @transform_4(%arg0: i32) -> (i32, i32) {
    %c0_i32 = arith.constant 0 : i32
    %c0_i32_0 = arith.constant 0 : i32
    %c0_i32_1 = arith.constant 0 : i32
    return %c0_i32, %c0_i32_0 : i32, i32
  }
  func.func @transform_5(%arg0: i32) -> (i32, i32) {
    %c0_i32 = arith.constant 0 : i32
    %c0_i32_0 = arith.constant 0 : i32
    %c0_i32_1 = arith.constant 0 : i32
    return %c0_i32, %c0_i32_0 : i32, i32
  }
  func.func @transform_6(%arg0: i32) -> (i32, i32) {
    %c0_i32 = arith.constant 0 : i32
    %c0_i32_0 = arith.constant 0 : i32
    %c0_i32_1 = arith.constant 0 : i32
    return %c0_i32, %c0_i32_0 : i32, i32
  }
  func.func @transform_7(%arg0: i32) -> (i32, i32) {
    %c0_i32 = arith.constant 0 : i32
    %c0_i32_0 = arith.constant 0 : i32
    %c0_i32_1 = arith.constant 0 : i32
    return %c0_i32, %c0_i32_0 : i32, i32
  }
  func.func @transform_8(%arg0: i32) -> (i32, i32) {
    %c0_i32 = arith.constant 0 : i32
    %c0_i32_0 = arith.constant 0 : i32
    %c0_i32_1 = arith.constant 0 : i32
    return %c0_i32, %c0_i32_0 : i32, i32
  }
  func.func @transform_9(%arg0: i32) -> (i32, i32, i32) {
    %c0_i32 = arith.constant 0 : i32
    %c0_i32_0 = arith.constant 0 : i32
    %c0_i32_1 = arith.constant 0 : i32
    return %arg0, %c0_i32, %c0_i32_0 : i32, i32, i32
  }
}

</mosaic_0001>

<bundles_post_ra>
// kernel: squeeze.1
= control target key start
LH: loop header
LB: loop body
LE: loop exit
PB: predicated region body
PF: predicated region fallthrough
CT: control target
= control target key end

     0   :  { %vm16_vm0 = vcmask 162816   ;;  %vm108_vm1 = vcmask 916480   ;;  %s167_s14 = smov 124   ;;  %vm121_vm2 = vcmask 982016   ;;  %s168_s15 = smov 16   ;;  %vm112_vm3 = vcmask 130048   ;;  %s268_s0 = inlined_call_operand.vmem [shape: f32[2,320], index: 0, kind: input, shape index: {}]   ;;  %s269_s1 = inlined_call_operand.vmem [shape: f32[2,16,20], index: 1, kind: output, shape index: {}]  }
   0x1   :  { %v13_v0 = vld [vmem:[%s268_s0] sm:$0x3]  ;;  %v132_v1 = vld [vmem:[%s268_s0 + $0x4] sm:$0x3]  ;;  %v133_v2 = vld [vmem:[%s268_s0 + $0x2] sm:$0x3] }
   0x2   :  { %14 = vst [vmem:[#allocation0] sm:$0x3] %v13_v0  ;;  %8 = vst [vmem:[#allocation0 + $0x10] sm:$0x3] %v132_v1  ;;  %s166_s0 = smov 108   ;;  %s169_s16 = smov 116  }
   0x3   :  { %12 = vst [vmem:[#allocation0 + $0x8] sm:$0x3] %v133_v2  ;;  %s170_s17 = smov 8   ;;  %s171_s18 = smov 104   ;;  %vm115_vm4 = vcmask 162944   ;;  %vm125_vm5 = vcmask 64512  }
   0x4   :  { %s172_s19 = smov 96   ;;  %s173_s20 = smov 88   ;;  %vm128_vm6 = vcmask 162880  }
   0x5   :  { %s174_s21 = smov 84   ;;  %s175_s22 = smov 76  }
   0x6   :  { %s176_s23 = smov 68   ;;  %s177_s24 = smov 56  }
   0x7   :  { %s178_s25 = smov 48   ;;  %s179_s26 = smov 36  }
   0x8   :  { %s180_s27 = smov 28  }
   0x9   :  { %v32_v3 = vld [vmem:[#allocation0] sm:$0x3]   ;;  %v107_v5 = vld [vmem:[#allocation0 + $0x10] sm:$0x3]  }
   0xa   :  { %v15_v4 = vld [vmem:[#allocation0] sm:$0x3]   ;;  %33 = vrot.lane.b32.xlu0 %v32_v3, %s166_s0  ;;  %v105_v6 = vld [vmem:[#allocation0 + $0x8] sm:$0x3]   ;;  %v19_v7 = vld [vmem:[#allocation0 + $0x10] sm:$0x3]  }
   0xb   :  { %17 = vst.msk [vmem:[%s269_s1] ss:$16 sm:$0x3] %vm16_vm0, %v15_v4   ;;  %v109_v8 = vsel %vm108_vm1, %v107_v5, %v105_v6  ;;  %20 = vrot.lane.b32.xlu1 %v19_v7, %s167_s14  ;;  %v118_v9 = vld [vmem:[#allocation0] sm:$0x3]  }
   0xc   :  { %v120_v10 = vld [vmem:[#allocation0 + $0x8] sm:$0x3]   ;;  %v39_v13 = vld [vmem:[#allocation0 + $0x10] sm:$0x3]   ;;  %v52_v15 = vld [vmem:[#allocation0] sm:$0x3]  }
   0xd   :  { %v26_v11 = vld [vmem:[#allocation0 + $0x8] sm:$0x3]   ;;  %v122_v12 = vsel %vm121_vm2, %v120_v10, %v118_v9  ;;  %v59_v16 = vld [vmem:[#allocation0 + $0x10] sm:$0x3]   ;;  %v72_v18 = vld [vmem:[#allocation0] sm:$0x3]  }
   0xe   :  { %110 = vrot.lane.b32.xlu0 %v109_v8, %s168_s15  ;;  %v46_v14 = vld [vmem:[#allocation0 + $0x8] sm:$0x3]   ;;  %v85_v20 = vld [vmem:[#allocation0] sm:$0x3]  }
   0xf   :  { %27 = vrot.lane.b32.xlu1 %v26_v11, %s169_s16  ;;  %v66_v17 = vld [vmem:[#allocation0 + $0x8] sm:$0x3]   ;;  %v98_v22 = vld [vmem:[#allocation0] sm:$0x3]  }
  0x10   :  { %v79_v19 = vld [vmem:[#allocation0 + $0x8] sm:$0x3]  }
  0x11   :  { %v92_v21 = vld [vmem:[#allocation0 + $0x8] sm:$0x3]  }
  0x12   :  { %123 = vrot.lane.b32.xlu0 %v122_v12, %s170_s17 }
  0x13   :  { %40 = vrot.lane.b32.xlu1 %v39_v13, %s171_s18 }
  0x16   :  { %47 = vrot.lane.b32.xlu0 %v46_v14, %s172_s19 }
  0x17   :  { %53 = vrot.lane.b32.xlu1 %v52_v15, %s173_s20 }
  0x1a   :  { %60 = vrot.lane.b32.xlu0 %v59_v16, %s174_s21 }
  0x1b   :  { %67 = vrot.lane.b32.xlu1 %v66_v17, %s175_s22 }
  0x1e   :  { %73 = vrot.lane.b32.xlu0 %v72_v18, %s176_s23 }
  0x1f   :  { %80 = vrot.lane.b32.xlu1 %v79_v19, %s177_s24 }
  0x22   :  { %86 = vrot.lane.b32.xlu0 %v85_v20, %s178_s25 }
  0x23   :  { %93 = vrot.lane.b32.xlu1 %v92_v21, %s179_s26 }
  0x26   :  { %99 = vrot.lane.b32.xlu0 %v98_v22, %s180_s27 }
  0x7c   :  { %v34_v23 = vpop.permute.xlu0 %33  }
  0x7d   :  { %136 = vst.msk [vmem:[%s269_s1 + $0x1] ss:$16 sm:$0x3] %vm16_vm0, %v34_v23   ;;  %v21_v24 = vpop.permute.xlu1 %20  }
  0x7e   :  { %134 = vst.msk [vmem:[%s269_s1 + $0xd] ss:$16 sm:$0x3] %vm16_vm0, %v21_v24  }
  0x80   :  { %v111_v25 = vpop.permute.xlu0 %110  }
  0x81   :  { %147 = vst.msk [vmem:[%s269_s1 + $0xc] ss:$16 sm:$0x3] %vm112_vm3, %v111_v25   ;;  %v28_v26 = vpop.permute.xlu1 %27  }
  0x82   :  { %148 = vst.msk [vmem:[%s269_s1 + $0xc] ss:$16 sm:$0x3] %vm115_vm4, %v111_v25  }
  0x83   :  { %135 = vst.msk [vmem:[%s269_s1 + $0x7] ss:$16 sm:$0x3] %vm16_vm0, %v28_v26  }
  0x84   :  { %v124_v27 = vpop.permute.xlu0 %123  }
  0x85   :  { %149 = vst.msk [vmem:[%s269_s1 + $0x6] ss:$16 sm:$0x3] %vm125_vm5, %v124_v27   ;;  %v41_v28 = vpop.permute.xlu1 %40  }
  0x86   :  { %150 = vst.msk [vmem:[%s269_s1 + $0x6] ss:$16 sm:$0x3] %vm128_vm6, %v124_v27  }
  0x87   :  { %137 = vst.msk [vmem:[%s269_s1 + $0xe] ss:$16 sm:$0x3] %vm16_vm0, %v41_v28  }
  0x88   :  { %v48_v29 = vpop.permute.xlu0 %47  }
  0x89   :  { %138 = vst.msk [vmem:[%s269_s1 + $0x8] ss:$16 sm:$0x3] %vm16_vm0, %v48_v29   ;;  %v54_v30 = vpop.permute.xlu1 %53  }
  0x8a   :  { %139 = vst.msk [vmem:[%s269_s1 + $0x2] ss:$16 sm:$0x3] %vm16_vm0, %v54_v30  }
  0x8c   :  { %v61_v31 = vpop.permute.xlu0 %60  }
  0x8d   :  { %140 = vst.msk [vmem:[%s269_s1 + $0xf] ss:$16 sm:$0x3] %vm16_vm0, %v61_v31   ;;  %v68_v32 = vpop.permute.xlu1 %67  }
  0x8e   :  { %141 = vst.msk [vmem:[%s269_s1 + $0x9] ss:$16 sm:$0x3] %vm16_vm0, %v68_v32  }
  0x90   :  { %v74_v33 = vpop.permute.xlu0 %73  }
  0x91   :  { %142 = vst.msk [vmem:[%s269_s1 + $0x3] ss:$16 sm:$0x3] %vm16_vm0, %v74_v33   ;;  %v81_v34 = vpop.permute.xlu1 %80  }
  0x92   :  { %143 = vst.msk [vmem:[%s269_s1 + $0xa] ss:$16 sm:$0x3] %vm16_vm0, %v81_v34  }
  0x94   :  { %v87_v35 = vpop.permute.xlu0 %86  }
  0x95   :  { %144 = vst.msk [vmem:[%s269_s1 + $0x4] ss:$16 sm:$0x3] %vm16_vm0, %v87_v35   ;;  %v94_v36 = vpop.permute.xlu1 %93  }
  0x96   :  { %145 = vst.msk [vmem:[%s269_s1 + $0xb] ss:$16 sm:$0x3] %vm16_vm0, %v94_v36  }
  0x98   :  { %v100_v37 = vpop.permute.xlu0 %99  }
  0x99   :  { %146 = vst.msk [vmem:[%s269_s1 + $0x5] ss:$16 sm:$0x3] %vm16_vm0, %v100_v37  }

// kernel: context_net_forward.1
= control target key start
LH: loop header
LB: loop body
LE: loop exit
PB: predicated region body
PF: predicated region fallthrough
CT: control target
= control target key end

     0   :  { %s21196_s30 = smov 0   ;;  %s26241_s0 = inlined_call_operand.vmem [shape: bf16[2,320,128], index: 0, kind: input, shape index: {}]   ;;  %s26242_s1 = inlined_call_operand.vmem [shape: bf16[128,64], index: 1, kind: input, shape index: {}]   ;;  %s26243_s2 = inlined_call_operand.vmem [shape: bf16[15,128,64], index: 2, kind: input, shape index: {}]   ;;  %s26244_s3 = inlined_call_operand.vmem [shape: bf16[15,128,128], index: 3, kind: input, shape index: {}]   ;;  %s26245_s4 = inlined_call_operand.vmem [shape: f32[1,64], index: 4, kind: input, shape index: {}]   ;;  %s26246_s5 = inlined_call_operand.vmem [shape: f32[1,64], index: 5, kind: input, shape index: {}]   ;;  %s26247_s6 = inlined_call_operand.vmem [shape: f32[1,64], index: 6, kind: input, shape index: {}]   ;;  %s26248_s7 = inlined_call_operand.vmem [shape: f32[1,64], index: 7, kind: input, shape index: {}]   ;;  %s26249_s8 = inlined_call_operand.vmem [shape: f32[1,128], index: 8, kind: input, shape index: {}]   ;;  %s26250_s9 = inlined_call_operand.vmem [shape: f32[2,320,128], index: 9, kind: output, shape index: {}]  }
   0x1 LB: > { %s15425_s10 = sadd.s32 4294967295, %s21142_s30   ;;  %p15429_p0 = scmp.ge.s32.totalorder %s21142_s30, 1  ;;  %s21142_s30 = sphi %s21196_s30, %s19_s30  }
   0x2   : > { %p287_p1 = scmp.lt.s32.totalorder %s21142_s30, 3 }
   0x4   : > { %p288_p2 = pnand %p15429_p0, %p287_p1 }
   0x6   : > { %291 = sbr.rel (%p288_p2) target bundleno = 3357 (0xd1d), region = 56 }
   0xd   : > { %v20732_v0 = vld [vmem:[%s26242_s1] sm:$0xff]   ;;  %p323_p3 = scmp.lt.s32.totalorder %s15425_s10, 1  ;;  %v20733_v1 = vld [vmem:[%s26242_s1 + $0x8] sm:$0xff]   ;;  %v20734_v2 = vld [vmem:[%s26242_s1 + $0x10] sm:$0xff]   ;;  %v334_v28 = vlaneseq  ;;  %s21145_s15 = smov 64  }
   0xe   : > { %17488 = vmatprep.subr.bf16.mxu0 %v20732_v0  ;;  %19464 = vmatprep.subr.bf16.mxu1 %v20732_v0  ;;  %v20735_v3 = vld [vmem:[%s26242_s1 + $0x18] sm:$0xff]   ;;  %v20736_v5 = vld [vmem:[%s26242_s1 + $0x20] sm:$0xff]   ;;  %v20737_v7 = vld [vmem:[%s26242_s1 + $0x28] sm:$0xff]  }
   0xf   : > { %s27546_s10 = smov (!%p323_p3, %s15425_s10), 1  ;;  %17489 = vmatpush3.bf16.msra.mxu0 %v20732_v0  ;;  %19472 = vmatpush3.bf16.msra.mxu1 %v20732_v0  ;;  %v20738_v8 = vld [vmem:[%s26242_s1 + $0x30] sm:$0xff]   ;;  %v20739_v9 = vld [vmem:[%s26242_s1 + $0x38] sm:$0xff]   ;;  %v21256_v29 = vshrl.u32 %v334_v28, 7 }
  0x10   : > { %17490 = vmatprep.subr.bf16.mxu0 %v20733_v1  ;;  %19465 = vmatprep.subr.bf16.mxu1 %v20733_v1  ;;  %s20640_s17 = smul.u32 160, %s27546_s10 }
  0x11   : > { %v337_v30 = vadd.s32 16, %v21256_v29  ;;  %v338_v33 = vadd.s32 24, %v21256_v29  ;;  %v21264_v34 = vmul.u32.u64.low 3435973837, %v21256_v29  ;;  %v21265_v35 = vmul.u32.u64.high 3435973837, %v21256_v29, %v21264_v34  ;;  %s20641_s14 = smul.u32 320, %s27546_s10 }
  0x12   : > { %s21219_s20 = scalar_lea.vmem %s26241_s0, %s20640_s17  ;;  %v336_v36 = vadd.s32 8, %v21256_v29  ;;  %v341_v39 = vadd.s32 48, %v21256_v29  ;;  %v21273_v40 = vadd.s32 32, %v21256_v29  ;;  %v21280_v44 = vadd.s32 56, %v21256_v29 }
  0x13   : > { %17491 = vmatpush3.bf16.msra.mxu0 %v20733_v1  ;;  %19473 = vmatpush3.bf16.msra.mxu1 %v20733_v1  ;;  %v20740_v4 = vld [vmem:[%s21219_s20] sm:$0xff]   ;;  %v20746_v6 = vld [vmem:[%s21219_s20 + $0x50] sm:$0xff]   ;;  %v20741_v10 = vld [vmem:[%s21219_s20 + $0x8] sm:$0xff]   ;;  %v21259_v31 = vmul.u32.u64.low 3435973837, %v337_v30  ;;  %v21260_v32 = vmul.u32.u64.high 3435973837, %v337_v30, %v21259_v31  ;;  %v381_v45 = vshrl.u32 %v21265_v35, 4  ;;  %s25790_s22 = scalar_lea.vmem %s26250_s9, %s20641_s14 }
  0x14   : > { %17492 = vmatprep.subr.bf16.mxu0 %v20734_v2  ;;  %19466 = vmatprep.subr.bf16.mxu1 %v20734_v2  ;;  %v20747_v11 = vld [vmem:[%s21219_s20 + $0x58] sm:$0xff]   ;;  %v20742_v12 = vld [vmem:[%s21219_s20 + $0x10] sm:$0xff]   ;;  %v20750_v13 = vld [vmem:[%s21219_s20 + $0x60] sm:$0xff]   ;;  %v21268_v37 = vmul.u32.u64.low 3435973837, %v338_v33  ;;  %v21269_v38 = vmul.u32.u64.high 3435973837, %v338_v33, %v21268_v37  ;;  %v21291_v50 = vadd.s32 40, %v21256_v29 }
  0x15   : > { %17504 = vmatprep.mubr.bf16.mxu0 %v20740_v4  ;;  %17524 = vmatprep.mubr.bf16.mxu1 %v20746_v6  ;;  %v20743_v14 = vld [vmem:[%s21219_s20 + $0x18] sm:$0xff]   ;;  %v20744_v15 = vld [vmem:[%s21219_s20 + $0x20] sm:$0xff]   ;;  %v20751_v16 = vld [vmem:[%s21219_s20 + $0x68] sm:$0xff]   ;;  %v21275_v41 = vmul.u32.u64.low 3435973837, %v336_v36  ;;  %v21276_v42 = vmul.u32.u64.high 3435973837, %v336_v36, %v21275_v41  ;;  %v403_v43 = vshrl.u32 %v21260_v32, 4 }
  0x16   : > { %v20754_v17 = vld [vmem:[%s21219_s20 + $0x70] sm:$0xff]   ;;  %v20745_v18 = vld [vmem:[%s21219_s20 + $0x28] sm:$0xff]   ;;  %v20755_v19 = vld [vmem:[%s21219_s20 + $0x78] sm:$0xff]   ;;  %v21283_v46 = vmul.u32.u64.low 3435973837, %v341_v39  ;;  %v21284_v47 = vmul.u32.u64.high 3435973837, %v341_v39, %v21283_v46  ;;  %v21294_v51 = vadd.s32 80, %v21256_v29 }
  0x17   : > { %17493 = vmatpush3.bf16.msra.mxu0 %v20734_v2  ;;  %19474 = vmatpush3.bf16.msra.mxu1 %v20734_v2  ;;  %v20748_v20 = vld [vmem:[%s21219_s20 + $0x30] sm:$0xff]   ;;  %v20756_v21 = vld [vmem:[%s21219_s20 + $0x80] sm:$0xff]   ;;  %v20749_v22 = vld [vmem:[%s21219_s20 + $0x38] sm:$0xff]   ;;  %v21287_v48 = vmul.u32.u64.low 3435973837, %v21273_v40  ;;  %v21288_v49 = vmul.u32.u64.high 3435973837, %v21273_v40, %v21287_v48  ;;  %v21297_v52 = vadd.s32 64, %v21256_v29 }
  0x18   : > { %17494 = vmatprep.subr.bf16.mxu0 %v20735_v3  ;;  %19467 = vmatprep.subr.bf16.mxu1 %v20735_v3  ;;  %v20757_v23 = vld [vmem:[%s21219_s20 + $0x88] sm:$0xff]   ;;  %v20752_v24 = vld [vmem:[%s21219_s20 + $0x40] sm:$0xff]   ;;  %v20758_v25 = vld [vmem:[%s21219_s20 + $0x90] sm:$0xff]   ;;  %v404_v53 = vmul.u32 20, %v403_v43  ;;  %v414_v54 = vshrl.u32 %v21269_v38, 4  ;;  %v382_v57 = vmul.u32 20, %v381_v45 }
  0x19   : > { %v20753_v26 = vld [vmem:[%s21219_s20 + $0x48] sm:$0xff]   ;;  %v20759_v27 = vld [vmem:[%s21219_s20 + $0x98] sm:$0xff]   ;;  %v21301_v55 = vmul.u32.u64.low 3435973837, %v21280_v44  ;;  %v21302_v56 = vmul.u32.u64.high 3435973837, %v21280_v44, %v21301_v55  ;;  %v21305_v58 = vadd.s32 88, %v21256_v29  ;;  %v392_v63 = vshrl.u32 %v21276_v42, 4 }
  0x1a   : > { %v21308_v59 = vmul.u32.u64.low 3435973837, %v21291_v50  ;;  %v21309_v60 = vmul.u32.u64.high 3435973837, %v21291_v50, %v21308_v59  ;;  %v21312_v61 = vmul.u32.u64.low 3435973837, %v21294_v51  ;;  %v21313_v62 = vmul.u32.u64.high 3435973837, %v21294_v51, %v21312_v61 }
  0x1b   : > { %17495 = vmatpush3.bf16.msra.mxu0 %v20735_v3  ;;  %19475 = vmatpush3.bf16.msra.mxu1 %v20735_v3  ;;  %v21317_v0 = vmul.u32.u64.low 3435973837, %v21297_v52  ;;  %v21318_v1 = vmul.u32.u64.high 3435973837, %v21297_v52, %v21317_v0  ;;  %v21321_v2 = vadd.s32 72, %v21256_v29  ;;  %v415_v3 = vmul.u32 20, %v414_v54 }
  0x1c   : > { %17496 = vmatprep.subr.bf16.mxu0 %v20736_v5  ;;  %19468 = vmatprep.subr.bf16.mxu1 %v20736_v5  ;;  %v21324_v4 = vadd.s32 112, %v21256_v29  ;;  %v21369_v28 = vadd.s32 144, %v21256_v29  ;;  %v436_v31 = vshrl.u32 %v21309_v60, 4  ;;  %v491_v35 = vshrl.u32 %v21313_v62, 4 }
  0x1d   : > { %v469_v42 = vshrl.u32 %v21318_v1, 4  ;;  %v21420_v0 = vadd.s32 160, %v21256_v29 }
  0x1e   : > { %v492_v55 = vmul.u32 20, %v491_v35 }
  0x1f   : > { %17497 = vmatpush3.bf16.msra.mxu0 %v20736_v5  ;;  %19476 = vmatpush3.bf16.msra.mxu1 %v20736_v5  ;;  %v447_v5 = vshrl.u32 %v21284_v47, 4  ;;  %v21397_v47 = vmul.u32.u64.low 3435973837, %v21369_v28  ;;  %v21398_v48 = vmul.u32.u64.high 3435973837, %v21369_v28, %v21397_v47 }
  0x20   : > { %17498 = vmatprep.subr.bf16.mxu0 %v20737_v7  ;;  %19469 = vmatprep.subr.bf16.mxu1 %v20737_v7 }
  0x23   : > { %17499 = vmatpush3.bf16.msra.mxu0 %v20737_v7  ;;  %19477 = vmatpush3.bf16.msra.mxu1 %v20737_v7  ;;  %v21328_v6 = vmul.u32.u64.low 3435973837, %v21305_v58  ;;  %v21329_v7 = vmul.u32.u64.high 3435973837, %v21305_v58, %v21328_v6 }
  0x24   : > { %17500 = vmatprep.subr.bf16.mxu0 %v20738_v8  ;;  %19470 = vmatprep.subr.bf16.mxu1 %v20738_v8  ;;  %v21427_v6 = vadd.s32 128, %v21256_v29 }
  0x25   : > { %v502_v43 = vshrl.u32 %v21329_v7, 4  ;;  %v21430_v7 = vsub.s32 %v21294_v51, %v492_v55  ;;  %v579_v51 = vshrl.u32 %v21398_v48, 4 }
  0x27   : > { %17501 = vmatpush3.bf16.msra.mxu0 %v20738_v8  ;;  %19478 = vmatpush3.bf16.msra.mxu1 %v20738_v8  ;;  %v21332_v8 = vadd.s32 96, %v21256_v29  ;;  %v503_v59 = vmul.u32 20, %v502_v43 }
  0x28   : > { %17502 = vmatprep.subr.bf16.mxu0 %v20739_v9  ;;  %19471 = vmatprep.subr.bf16.mxu1 %v20739_v9 }
  0x2b   : > { %17503 = vmatpush3.bf16.msra.mxu0 %v20739_v9  ;;  %19479 = vmatpush3.bf16.msra.mxu1 %v20739_v9  ;;  %v21334_v9 = vsub.s32 %v337_v30, %v404_v53 }
  0x2d   : > { %v21379_v34 = vadd.s32 20, %v21334_v9  ;;  %vm817_vm0 = vcmp.ne.s32.totalorder %v21334_v9, 0  ;;  %vm857_vm1 = vcmp.lt.s32.totalorder %v21334_v9, 0 }
  0x2e   : > { %17505 = vmatmul.mubr.bf16.vlgmr.msra.gmra.mrb[0].mxu0 %v20741_v10  ;;  %17525 = vmatmul.mubr.bf16.vlgmr.msra.gmra.mrb[0].mxu1 %v20747_v11  ;;  %v21337_v10 = vsub.s32 %v21256_v29, %v382_v57  ;;  %v425_v11 = vshrl.u32 %v21288_v49, 4  ;;  %v470_v57 = vmul.u32 20, %v469_v42  ;;  %v21481_v42 = vadd.s32 20, %v21430_v7  ;;  %vm21891_vm6 = vmand %vm857_vm1, %vm817_vm0 }
  0x2f   : > { %17508 = vmatprep.mubr.bf16.mxu0 %v20742_v12  ;;  %17528 = vmatprep.mubr.bf16.mxu1 %v20750_v13  ;;  %v21341_v12 = vadd.s32 120, %v21256_v29  ;;  %v393_v13 = vmul.u32 20, %v392_v63 }
  0x30   : > { %v21387_v41 = vadd.s32 20, %v21337_v10  ;;  %26483 = vst [vmem:[#allocation13_spill] sm:$0xff] %v21481_v42  ;;  %vm815_vm2 = vcmp.ne.s32.totalorder %v21337_v10, 0  ;;  %vm855_vm3 = vcmp.lt.s32.totalorder %v21337_v10, 0 }
  0x31   : > { %v21371_v30 = vsub.s32 %v336_v36, %v393_v13  ;;  %v21434_v13 = vadd.s32 184, %v21256_v29  ;;  %vm21899_vm12 = vmand %vm855_vm3, %vm815_vm2 }
  0x33   : > { %v21404_v53 = vadd.s32 20, %v21371_v30  ;;  %vm26537_vm0 = vcmp.ne.s32.totalorder %v21371_v30, 0  ;;  %vm26538_vm1 = vcmp.lt.s32.totalorder %v21371_v30, 0 }
  0x34   : > { %vm21915_vm7 = vmand %vm26538_vm1, %vm26537_vm0 }
  0x35   : > { %26474 = vst [vmem:[#allocation4_spill] sm:$0xff] %v21404_v53 }
  0x36   : > { %17509 = vmatmul.mubr.bf16.gmra.mrb[4].mxu0 %v20743_v14  ;;  %17529 = vmatmul.mubr.bf16.gmra.mrb[4].mxu1 %v20751_v16  ;;  %v21348_v16 = vadd.s32 104, %v21256_v29 }
  0x37   : > { %17512 = vmatprep.mubr.bf16.mxu0 %v20744_v15  ;;  %17532 = vmatprep.mubr.bf16.mxu1 %v20754_v17  ;;  %v21344_v14 = vmul.u32.u64.low 3435973837, %v21321_v2  ;;  %v21345_v15 = vmul.u32.u64.high 3435973837, %v21321_v2, %v21344_v14  ;;  %v21350_v17 = vsub.s32 %v338_v33, %v415_v3 }
  0x38   : > { %v21375_v32 = vmul.u32.u64.low 3435973837, %v21348_v16  ;;  %v21376_v33 = vmul.u32.u64.high 3435973837, %v21348_v16, %v21375_v32  ;;  %v21437_v14 = vsub.s32 %v21297_v52, %v470_v57 }
  0x39   : > { %v21401_v49 = vadd.s32 20, %v21350_v17  ;;  %v480_v54 = vshrl.u32 %v21345_v15, 4  ;;  %vm818_vm4 = vcmp.ne.s32.totalorder %v21350_v17, 0  ;;  %vm858_vm5 = vcmp.lt.s32.totalorder %v21350_v17, 0 }
  0x3a   : > { %26477 = vst [vmem:[#allocation7_spill] sm:$0xff] %v21437_v14  ;;  %vm21907_vm11 = vmand %vm858_vm5, %vm818_vm4 }
  0x3b   : > { %26473 = vst [vmem:[#allocation3_spill] sm:$0xff] %v21401_v49  ;;  %v481_v3 = vmul.u32 20, %v480_v54 }
  0x3e   : > { %17513 = vmatmul.mubr.bf16.gmra.mrb[8].mxu0 %v20745_v18  ;;  %17533 = vmatmul.mubr.bf16.gmra.mrb[8].mxu1 %v20755_v19  ;;  %v21353_v18 = vmul.u32.u64.low 3435973837, %v21324_v4  ;;  %v21354_v19 = vmul.u32.u64.high 3435973837, %v21324_v4, %v21353_v18 }
  0x3f   : > { %17516 = vmatprep.mubr.bf16.mxu0 %v20748_v20  ;;  %17536 = vmatprep.mubr.bf16.mxu1 %v20756_v21  ;;  %v21357_v20 = vadd.s32 176, %v21256_v29  ;;  %v448_v21 = vmul.u32 20, %v447_v5  ;;  %v524_v5 = vshrl.u32 %v21376_v33, 4  ;;  %v21443_v18 = vadd.s32 152, %v21256_v29 }
  0x41   : > { %v21383_v37 = vmul.u32.u64.low 3435973837, %v21357_v20  ;;  %v21384_v38 = vmul.u32.u64.high 3435973837, %v21357_v20, %v21383_v37  ;;  %v21389_v36 = vsub.s32 %v341_v39, %v448_v21  ;;  %v437_v39 = vmul.u32 20, %v436_v31 }
  0x43   : > { %v21423_v1 = vsub.s32 %v21291_v50, %v437_v39  ;;  %v21440_v50 = vsub.s32 %v21305_v58, %v503_v59  ;;  %vm26543_vm3 = vcmp.ne.s32.totalorder %v21389_v36, 0  ;;  %vm26544_vm4 = vcmp.lt.s32.totalorder %v21389_v36, 0 }
  0x44   : > { %vm21930_vm5 = vmand %vm26544_vm4, %vm26543_vm3  ;;  %vm26557_vm4 = vcmp.ne.s32.totalorder %v21430_v7, 0 }
  0x45   : > { %26478 = vst [vmem:[#allocation8_spill] sm:$0xff] %v21440_v50  ;;  %v21475_v37 = vadd.s32 20, %v21423_v1  ;;  %v21487_v43 = vadd.s32 20, %v21440_v50  ;;  %vm820_vm14 = vcmp.ne.s32.totalorder %v21423_v1, 0  ;;  %vm860_vm15 = vcmp.lt.s32.totalorder %v21423_v1, 0 }
  0x46   : > { %17517 = vmatmul.mubr.bf16.gmra.mrb[12].mxu0 %v20749_v22  ;;  %17537 = vmatmul.mubr.bf16.gmra.mrb[12].mxu1 %v20757_v23  ;;  %v458_v22 = vshrl.u32 %v21302_v56, 4  ;;  %v535_v56 = vshrl.u32 %v21354_v19, 4  ;;  %vm21954_vm3 = vmand %vm860_vm15, %vm820_vm14  ;;  %vm26565_vm14 = vcmp.ne.s32.totalorder %v21440_v50, 0  ;;  %vm26566_vm15 = vcmp.lt.s32.totalorder %v21440_v50, 0 }
  0x47   : > { %17520 = vmatprep.mubr.bf16.mxu0 %v20752_v24  ;;  %17540 = vmatprep.mubr.bf16.mxu1 %v20758_v25  ;;  %v21361_v23 = vmul.u32.u64.low 3435973837, %v21332_v8  ;;  %v21362_v24 = vmul.u32.u64.high 3435973837, %v21332_v8, %v21361_v23  ;;  %v426_v25 = vmul.u32 20, %v425_v11  ;;  %26482 = vst [vmem:[#allocation12_spill] sm:$0xff] %v21475_v37  ;;  %26485 = vst [vmem:[#allocation15_spill] sm:$0xff] %v21487_v43  ;;  %v21601_v43 = vadd.s32 256, %v21256_v29 }
  0x48   : > { %v459_v46 = vmul.u32 20, %v458_v22  ;;  %v536_v11 = vmul.u32 20, %v535_v56  ;;  %v21451_v23 = vsub.s32 %v21321_v2, %v481_v3  ;;  %v26736_v50 = vmov 0 }
  0x49   : > { %v21394_v45 = vsub.s32 %v21273_v40, %v426_v25  ;;  %v21409_v40 = vadd.s32 20, %v21389_v36  ;;  %v513_v60 = vshrl.u32 %v21362_v24, 4  ;;  %v525_v24 = vmul.u32 20, %v524_v5 }
  0x4a   : > { %v21416_v62 = vsub.s32 %v21280_v44, %v459_v46  ;;  %v623_v44 = vshrl.u32 %v21384_v38, 4  ;;  %v21447_v21 = vmul.u32.u64.low 3435973837, %v21420_v0  ;;  %v21448_v22 = vmul.u32.u64.high 3435973837, %v21420_v0, %v21447_v21 }
  0x4b   : > { %26475 = vst [vmem:[#allocation5_spill] sm:$0xff] %v21409_v40  ;;  %v21413_v61 = vadd.s32 20, %v21394_v45  ;;  %v514_v15 = vmul.u32 20, %v513_v60  ;;  %v21454_v52 = vmul.u32.u64.low 3435973837, %v21427_v6  ;;  %v21455_v25 = vmul.u32.u64.high 3435973837, %v21427_v6, %v21454_v52 }
  0x4c   : > { %v21458_v58 = vsub.s32 %v21324_v4, %v536_v11  ;;  %v21468_v33 = vmul.u32.u64.low 3435973837, %v21443_v18  ;;  %v21469_v2 = vmul.u32.u64.high 3435973837, %v21443_v18, %v21468_v33  ;;  %v21472_v35 = vadd.s32 20, %v21416_v62 }
  0x4d   : > { %26476 = vst [vmem:[#allocation6_spill] sm:$0xff] %v21413_v61  ;;  %v21465_v32 = vsub.s32 %v21332_v8, %v514_v15  ;;  %v580_v4 = vmul.u32 20, %v579_v51  ;;  %v21478_v38 = vadd.s32 168, %v21256_v29  ;;  %v21484_v8 = vadd.s32 20, %v21437_v14 }
  0x4e   : > { %17521 = vmatmul.mubr.bf16.gmra.mrb[16].mxu0 %v20753_v26  ;;  %17541 = vmatmul.mubr.bf16.gmra.mrb[16].mxu1 %v20759_v27  ;;  %v21365_v26 = vmul.u32.u64.low 3435973837, %v21341_v12  ;;  %v21366_v27 = vmul.u32.u64.high 3435973837, %v21341_v12, %v21365_v26  ;;  %26479 = vst [vmem:[#allocation9_spill] sm:$0xff] %v21458_v58  ;;  %26481 = vst [vmem:[#allocation11_spill] sm:$0xff] %v21472_v35  ;;  %v21490_v46 = vadd.s32 136, %v21256_v29  ;;  %v21493_v47 = vadd.s32 20, %v21451_v23 }
  0x4f   : > { %v624_v26 = vmul.u32 20, %v623_v44  ;;  %26480 = vst [vmem:[#allocation10_spill] sm:$0xff] %v21465_v32  ;;  %26484 = vst [vmem:[#allocation14_spill] sm:$0xff] %v21484_v8  ;;  %v21496_v48 = vadd.s32 20, %v21458_v58  ;;  %v21499_v39 = vadd.s32 20, %v21465_v32  ;;  %v21505_v55 = vsub.s32 %v21348_v16, %v525_v24 }
  0x50   : > { %v546_v63 = vshrl.u32 %v21366_v27, 4  ;;  %v21461_v27 = vmul.u32.u64.low 3435973837, %v21434_v13  ;;  %v21462_v31 = vmul.u32.u64.high 3435973837, %v21434_v13, %v21461_v27  ;;  %26486 = vst [vmem:[#allocation16_spill] sm:$0xff] %v21493_v47  ;;  %v21511_v57 = vsub.s32 %v21369_v28, %v580_v4 }
  0x51   : > { %26487 = vst [vmem:[#allocation17_spill] sm:$0xff] %v21496_v48  ;;  %26488 = vst [vmem:[#allocation18_spill] sm:$0xff] %v21499_v39  ;;  %v21508_v56 = vsub.s32 %v21357_v20, %v624_v26  ;;  %v601_v59 = vshrl.u32 %v21448_v22, 4  ;;  %v557_v3 = vshrl.u32 %v21455_v25, 4  ;;  %v21524_v16 = vadd.s32 208, %v21256_v29 }
  0x52   : > { %v547_v19 = vmul.u32 20, %v546_v63  ;;  %26489 = vst [vmem:[#allocation19_spill] sm:$0xff] %v21505_v55  ;;  %26490 = vst [vmem:[#allocation20_spill] sm:$0xff] %v21511_v57  ;;  %v21515_v60 = vmul.u32.u64.low 3435973837, %v21478_v38  ;;  %v21516_v63 = vmul.u32.u64.high 3435973837, %v21478_v38, %v21515_v60  ;;  %v634_v20 = vshrl.u32 %v21462_v31, 4 }
  0x53   : > { %v21528_v28 = vadd.s32 192, %v21256_v29  ;;  %v21534_v44 = vadd.s32 20, %v21505_v55  ;;  %v590_v15 = vshrl.u32 %v21469_v2, 4  ;;  %v21541_v51 = vadd.s32 20, %v21508_v56 }
  0x54   : > { %v21502_v54 = vsub.s32 %v21341_v12, %v547_v19  ;;  %v21520_v12 = vmul.u32.u64.low 3435973837, %v21490_v46  ;;  %v21521_v5 = vmul.u32.u64.high 3435973837, %v21490_v46, %v21520_v12  ;;  %v21538_v19 = vadd.s32 216, %v21256_v29 }
  0x55   : > { %26492 = vst [vmem:[#allocation22_spill] sm:$0xff] %v21534_v44  ;;  %26493 = vst [vmem:[#allocation23_spill] sm:$0xff] %v21541_v51  ;;  %v21544_v21 = vadd.s32 20, %v21511_v57  ;;  %v602_v22 = vmul.u32 20, %v601_v59  ;;  %v21547_v24 = vadd.s32 200, %v21256_v29  ;;  %v558_v52 = vmul.u32 20, %v557_v3 }
  0x56   : > { %v21531_v11 = vadd.s32 20, %v21502_v54  ;;  %v21550_v25 = vmul.u32.u64.low 3435973837, %v21524_v16  ;;  %v21551_v26 = vmul.u32.u64.high 3435973837, %v21524_v16, %v21550_v25  ;;  %v21554_v27 = vadd.s32 240, %v21256_v29 }
  0x57   : > { %26494 = vst [vmem:[#allocation24_spill] sm:$0xff] %v21544_v21  ;;  %v635_v31 = vmul.u32 20, %v634_v20  ;;  %v21557_v33 = vmul.u32.u64.low 3435973837, %v21528_v28  ;;  %v21558_v2 = vmul.u32.u64.high 3435973837, %v21528_v28, %v21557_v33  ;;  %v21561_v4 = vadd.s32 224, %v21256_v29 }
  0x58   : > { %26491 = vst [vmem:[#allocation21_spill] sm:$0xff] %v21531_v11  ;;  %v591_v59 = vmul.u32 20, %v590_v15  ;;  %v21564_v60 = vmul.u32.u64.low 3435973837, %v21538_v19  ;;  %v21565_v12 = vmul.u32.u64.high 3435973837, %v21538_v19, %v21564_v60  ;;  %v21568_v3 = vadd.s32 248, %v21256_v29 }
  0x59   : > { %v612_v25 = vshrl.u32 %v21516_v63, 4  ;;  %v21572_v21 = vmul.u32.u64.low 3435973837, %v21547_v24  ;;  %v21573_v20 = vmul.u32.u64.high 3435973837, %v21547_v24, %v21572_v21  ;;  %v21576_v44 = vadd.s32 232, %v21256_v29 }
  0x5a   : > { %v568_v33 = vshrl.u32 %v21521_v5, 4  ;;  %v21580_v15 = vmul.u32.u64.low 3435973837, %v21554_v27  ;;  %v21581_v11 = vmul.u32.u64.high 3435973837, %v21554_v27, %v21580_v15  ;;  %v21584_v60 = vadd.s32 272, %v21256_v29 }
  0x5b   : > { %v21587_v39 = vsub.s32 %v21420_v0, %v602_v22  ;;  %v21590_v63 = vmul.u32.u64.low 3435973837, %v21561_v4  ;;  %v21591_v48 = vmul.u32.u64.high 3435973837, %v21561_v4, %v21590_v63  ;;  %v21594_v21 = vsub.s32 %v21427_v6, %v558_v52 }
  0x5c   : > { %v21597_v47 = vmul.u32.u64.low 3435973837, %v21568_v3  ;;  %v21598_v5 = vmul.u32.u64.high 3435973837, %v21568_v3, %v21597_v47  ;;  %v613_v15 = vmul.u32 20, %v612_v25  ;;  %v21608_v0 = vadd.s32 280, %v21256_v29 }
  0x5d   : > { %26495 = vst [vmem:[#allocation25_spill] sm:$0xff] %v21594_v21  ;;  %v21604_v8 = vmul.u32.u64.low 3435973837, %v21576_v44  ;;  %v21605_v42 = vmul.u32.u64.high 3435973837, %v21576_v44, %v21604_v8  ;;  %v569_v22 = vmul.u32 20, %v568_v33  ;;  %v21615_v52 = vadd.s32 264, %v21256_v29 }
  0x5e   : > { %v21611_v63 = vmul.u32.u64.low 3435973837, %v21584_v60  ;;  %v21612_v6 = vmul.u32.u64.high 3435973837, %v21584_v60, %v21611_v63  ;;  %v21618_v47 = vsub.s32 %v21434_v13, %v635_v31  ;;  %v21621_v25 = vsub.s32 %v21443_v18, %v591_v59 }
  0x5f   : > { %v667_v37 = vshrl.u32 %v21551_v26, 4  ;;  %v21625_v8 = vadd.s32 304, %v21256_v29  ;;  %v645_v33 = vshrl.u32 %v21558_v2, 4  ;;  %v678_v51 = vshrl.u32 %v21565_v12, 4 }
  0x60   : > { %26496 = vst [vmem:[#allocation26_spill] sm:$0xff] %v21621_v25  ;;  %v21630_v63 = vmul.u32.u64.low 3435973837, %v21601_v43  ;;  %v21631_v35 = vmul.u32.u64.high 3435973837, %v21601_v43, %v21630_v63  ;;  %v21634_v61 = vsub.s32 %v21478_v38, %v613_v15  ;;  %v656_v13 = vshrl.u32 %v21573_v20, 4 }
  0x61   : > { %v21638_v18 = vmul.u32.u64.low 3435973837, %v21608_v0  ;;  %v21639_v31 = vmul.u32.u64.high 3435973837, %v21608_v0, %v21638_v18  ;;  %v21642_v26 = vsub.s32 %v21490_v46, %v569_v22  ;;  %v668_v12 = vmul.u32 20, %v667_v37 }
  0x62   : > { %v21645_v2 = vmul.u32.u64.low 3435973837, %v21615_v52  ;;  %v21646_v59 = vmul.u32.u64.high 3435973837, %v21615_v52, %v21645_v2  ;;  %v711_v40 = vshrl.u32 %v21581_v11, 4  ;;  %v21654_v20 = vadd.s32 20, %v21587_v39 }
  0x63   : > { %26497 = vst [vmem:[#allocation27_spill] sm:$0xff] %v21642_v26  ;;  %v21650_v63 = vmul.u32.u64.low 3435973837, %v21625_v8  ;;  %v21651_v38 = vmul.u32.u64.high 3435973837, %v21625_v8, %v21650_v63  ;;  %v21657_v15 = vadd.s32 20, %v21594_v21  ;;  %v646_v18 = vmul.u32 20, %v645_v33 }
  0x64   : > { %26498 = vst [vmem:[#allocation28_spill] sm:$0xff] %v21654_v20  ;;  %v679_v46 = vmul.u32 20, %v678_v51  ;;  %v21660_v22 = vadd.s32 20, %v21618_v47  ;;  %v21663_v2 = vadd.s32 20, %v21621_v25  ;;  %v21666_v37 = vadd.s32 20, %v21634_v61 }
  0x65   : > { %26499 = vst [vmem:[#allocation29_spill] sm:$0xff] %v21657_v15  ;;  %v21669_v11 = vadd.s32 288, %v21256_v29  ;;  %v21672_v63 = vadd.s32 20, %v21642_v26  ;;  %v657_v20 = vmul.u32 20, %v656_v13  ;;  %v689_v15 = vshrl.u32 %v21591_v48, 4 }
  0x66   : > { %26500 = vst [vmem:[#allocation30_spill] sm:$0xff] %v21660_v22  ;;  %26501 = vst [vmem:[#allocation31_spill] sm:$0xff] %v21663_v2  ;;  %v722_v51 = vshrl.u32 %v21598_v5, 4  ;;  %v21677_v33 = vsub.s32 %v21524_v16, %v668_v12  ;;  %v712_v22 = vmul.u32 20, %v711_v40  ;;  %v700_v2 = vshrl.u32 %v21605_v42, 4 }
  0x67   : > { %26502 = vst [vmem:[#allocation32_spill] sm:$0xff] %v21666_v37  ;;  %26503 = vst [vmem:[#allocation33_spill] sm:$0xff] %v21672_v63  ;;  %v755_v53 = vshrl.u32 %v21612_v6, 4  ;;  %v21682_v37 = vsub.s32 %v21528_v28, %v646_v18  ;;  %v21685_v49 = vsub.s32 %v21538_v19, %v679_v46  ;;  %v733_v13 = vshrl.u32 %v21631_v35, 4  ;;  %v20760_v35 = vld [vmem:[%s26243_s2 + $0x40] sm:$0xff]  }
  0x68   : > { %26504 = vst [vmem:[#allocation34_spill] sm:$0xff] %v21677_v33  ;;  %v21689_v48 = vadd.s32 312, %v21256_v29  ;;  %v766_v5 = vshrl.u32 %v21639_v31, 4  ;;  %v21693_v16 = vmul.u32.u64.low 3435973837, %v21669_v11  ;;  %v21694_v40 = vmul.u32.u64.high 3435973837, %v21669_v11, %v21693_v16  ;;  %17544 = vmatprep.subr.bf16.mxu1 %v20760_v35 }
  0x69   : > { %26505 = vst [vmem:[#allocation35_spill] sm:$0xff] %v21682_v37  ;;  %26506 = vst [vmem:[#allocation36_spill] sm:$0xff] %v21685_v49  ;;  %v21697_v42 = vsub.s32 %v21547_v24, %v657_v20  ;;  %v690_v6 = vmul.u32 20, %v689_v15  ;;  %v21699_v28 = vmul.u32 20, %v722_v51  ;;  %v744_v19 = vshrl.u32 %v21646_v59, 4  ;;  %v21708_v24 = vld [vmem:[%s26243_s2 + $0x48] sm:$0xff]   ;;  %17545 = vmatpush3.bf16.msra.mxu1 %v20760_v35 }
  0x6a   : > { %v21144_v12 = vmov 0   ;;  %v21711_v31 = vsub.s32 %v21554_v27, %v712_v22  ;;  %v701_v59 = vmul.u32 20, %v700_v2  ;;  %v756_v20 = vmul.u32 20, %v755_v53  ;;  %17546 = vmatprep.subr.bf16.mxu1 %v21708_v24 }
  0x6b   : > { %26507 = vst [vmem:[#allocation37_spill] sm:$0xff] %v21697_v42  ;;  %1077 = vst [vmem:[#allocation2 + $0xb0] sm:$0xff] %v21144_v12  ;;  %v799_v15 = vshrl.u32 %v21651_v38, 4  ;;  %v21715_v18 = vadd.s32 20, %v21677_v33  ;;  %v734_v46 = vmul.u32 20, %v733_v13  ;;  %v21725_v63 = vadd.s32 20, %v21685_v49 }
  0x6c   : > { %1055 = vst [vmem:[#allocation2] sm:$0xff] %v21144_v12  ;;  %1056 = vst [vmem:[#allocation2 + $0x8] sm:$0xff] %v21144_v12  ;;  %v21718_v51 = vmul.u32.u64.low 3435973837, %v21689_v48  ;;  %v21719_v16 = vmul.u32.u64.high 3435973837, %v21689_v48, %v21718_v51  ;;  %v767_v27 = vmul.u32 20, %v766_v5  ;;  %v777_v53 = vshrl.u32 %v21694_v40, 4 }
  0x6d   : > { %1057 = vst [vmem:[#allocation2 + $0x10] sm:$0xff] %v21144_v12  ;;  %1058 = vst [vmem:[#allocation2 + $0x18] sm:$0xff] %v21144_v12  ;;  %v21737_v38 = vadd.s32 20, %v21697_v42  ;;  %v21740_v22 = vsub.s32 %v21561_v4, %v690_v6  ;;  %v745_v2 = vmul.u32 20, %v744_v19  ;;  %v21743_v13 = vadd.s32 296, %v21256_v29  ;;  %v21749_v5 = vld [vmem:[%s26243_s2 + $0x50] sm:$0xff]   ;;  %17547 = vmatpush3.bf16.msra.mxu1 %v21708_v24 }
  0x6e   : > { %1059 = vst [vmem:[#allocation2 + $0x20] sm:$0xff] %v21144_v12  ;;  %1060 = vst [vmem:[#allocation2 + $0x28] sm:$0xff] %v21144_v12  ;;  %v21758_v29 = vadd.s32 20, %v21711_v31  ;;  %v21762_v4 = vsub.s32 %v21568_v3, %v21699_v28  ;;  %v21765_v40 = vsub.s32 %v21576_v44, %v701_v59  ;;  %v800_v6 = vmul.u32 20, %v799_v15  ;;  %17548 = vmatprep.subr.bf16.mxu1 %v21749_v5  ;;  %v20763_v59 = vld [vmem:[%s26243_s2 + $0x58] sm:$0xff]  }
  0x6f   : > { %1061 = vst [vmem:[#allocation2 + $0x30] sm:$0xff] %v21144_v12  ;;  %1062 = vst [vmem:[#allocation2 + $0x38] sm:$0xff] %v21144_v12  ;;  %v21778_v44 = vsub.s32 %v21584_v60, %v756_v20  ;;  %v21781_v3 = vsub.s32 %v21601_v43, %v734_v46  ;;  %v778_v28 = vmul.u32 20, %v777_v53  ;;  %v810_v19 = vshrl.u32 %v21719_v16, 4 }
  0x70   : > { %1063 = vst [vmem:[#allocation2 + $0x40] sm:$0xff] %v21144_v12  ;;  %1064 = vst [vmem:[#allocation2 + $0x48] sm:$0xff] %v21144_v12  ;;  %v21793_v43 = vsub.s32 %v21608_v0, %v767_v27  ;;  %v21796_v60 = vmul.u32.u64.low 3435973837, %v21743_v13  ;;  %v21797_v35 = vmul.u32.u64.high 3435973837, %v21743_v13, %v21796_v60  ;;  %v21809_v0 = vadd.s32 20, %v21740_v22 }
  0x71   : > { %1065 = vst [vmem:[#allocation2 + $0x50] sm:$0xff] %v21144_v12  ;;  %1066 = vst [vmem:[#allocation2 + $0x58] sm:$0xff] %v21144_v12  ;;  %v21812_v24 = vsub.s32 %v21615_v52, %v745_v2  ;;  %v21827_v52 = vadd.s32 20, %v21762_v4  ;;  %v21830_v20 = vadd.s32 20, %v21765_v40  ;;  %v21833_v15 = vsub.s32 %v21625_v8, %v800_v6  ;;  %17549 = vmatpush3.bf16.msra.mxu1 %v21749_v5  ;;  %v20764_v2 = vld [vmem:[%s26243_s2 + $0x60] sm:$0xff]  }
  0x72   : > { %1067 = vst [vmem:[#allocation2 + $0x60] sm:$0xff] %v21144_v12  ;;  %1068 = vst [vmem:[#allocation2 + $0x68] sm:$0xff] %v21144_v12  ;;  %v811_v46 = vmul.u32 20, %v810_v19  ;;  %v21844_v8 = vadd.s32 20, %v21778_v44  ;;  %v21847_v51 = vadd.s32 20, %v21781_v3  ;;  %v21858_v16 = vadd.s32 20, %v21793_v43  ;;  %17550 = vmatprep.subr.bf16.mxu1 %v20763_v59 }
  0x73   : > { %1069 = vst [vmem:[#allocation2 + $0x70] sm:$0xff] %v21144_v12  ;;  %1070 = vst [vmem:[#allocation2 + $0x78] sm:$0xff] %v21144_v12  ;;  %v21861_v27 = vsub.s32 %v21669_v11, %v778_v28  ;;  %v788_v53 = vshrl.u32 %v21797_v35, 4  ;;  %v21874_v11 = vadd.s32 20, %v21812_v24  ;;  %v20765_v28 = vld [vmem:[%s26243_s2 + $0x68] sm:$0xff]   ;;  %vm26547_vm0 = vcmp.ne.s32.totalorder %v21394_v45, 0 }
  0x74   : > { %1071 = vst [vmem:[#allocation2 + $0x80] sm:$0xff] %v21144_v12  ;;  %1072 = vst [vmem:[#allocation2 + $0x88] sm:$0xff] %v21144_v12  ;;  %v21882_v5 = vsub.s32 %v21689_v48, %v811_v46  ;;  %v21920_v46 = vadd.s32 20, %v21833_v15  ;;  %vm26548_vm1 = vcmp.lt.s32.totalorder %v21394_v45, 0  ;;  %vm26551_vm2 = vcmp.ne.s32.totalorder %v21416_v62, 0  ;;  %v26718_v19 = vld [vmem:[#allocation23_spill] sm:$0xff] }
  0x75   : > { %1073 = vst [vmem:[#allocation2 + $0x90] sm:$0xff] %v21144_v12  ;;  %1074 = vst [vmem:[#allocation2 + $0x98] sm:$0xff] %v21144_v12  ;;  %v789_v6 = vmul.u32 20, %v788_v53  ;;  %17551 = vmatpush3.bf16.msra.mxu1 %v20763_v59  ;;  %vm26552_vm13 = vcmp.lt.s32.totalorder %v21416_v62, 0  ;;  %v26555_v59 = vmov 0  ;;  %v26720_v48 = vld [vmem:[#allocation12_spill] sm:$0xff] }
  0x76   : > { %1075 = vst [vmem:[#allocation2 + $0xa0] sm:$0xff] %v21144_v12  ;;  %1076 = vst [vmem:[#allocation2 + $0xa8] sm:$0xff] %v21144_v12  ;;  %17552 = vmatprep.subr.bf16.mxu1 %v20764_v2  ;;  %v26556_v59 = vsel %vm21954_vm3, 4294967295, %v26555_v59  ;;  %v26722_v35 = vld [vmem:[#allocation13_spill] sm:$0xff] }
  0x77   : > { %1078 = vst [vmem:[#allocation2 + $0xb8] sm:$0xff] %v21144_v12  ;;  %1079 = vst [vmem:[#allocation2 + $0xc0] sm:$0xff] %v21144_v12  ;;  %v21924_v53 = vsub.s32 %v21743_v13, %v789_v6  ;;  %v26559_v6 = vmov 0  ;;  %v26730_v60 = vld [vmem:[#allocation17_spill] sm:$0xff]  ;;  %v26838_v13 = vmov 0 }
  0x78   : > { %1080 = vst [vmem:[#allocation2 + $0xc8] sm:$0xff] %v21144_v12  ;;  %26508 = vst [vmem:[#allocation38_spill] sm:$0xff] %v21711_v31  ;;  %v21722_v12 = vadd.s32 20, %v21682_v37 }
  0x79   : > { %26509 = vst [vmem:[#allocation39_spill] sm:$0xff] %v21715_v18  ;;  %26511 = vst [vmem:[#allocation41_spill] sm:$0xff] %v21725_v63  ;;  %v26594_v63 = vmov 0  ;;  %v26609_v18 = vmov 0  ;;  %17553 = vmatpush3.bf16.msra.mxu1 %v20764_v2  ;;  %v26624_v2 = vmov 0 }
  0x7a   : > { %26510 = vst [vmem:[#allocation40_spill] sm:$0xff] %v21722_v12  ;;  %26512 = vst [vmem:[#allocation42_spill] sm:$0xff] %v21737_v38  ;;  %v22029_v38 = vadd.s32 20, %v21882_v5  ;;  %v26599_v12 = vmov 0  ;;  %17554 = vmatprep.subr.bf16.mxu1 %v20765_v28 }
  0x7b   : > { %26513 = vst [vmem:[#allocation43_spill] sm:$0xff] %v21740_v22  ;;  %26514 = vst [vmem:[#allocation44_spill] sm:$0xff] %v21758_v29  ;;  %v26589_v29 = vmov 0 }
  0x7c   : > { %26515 = vst [vmem:[#allocation45_spill] sm:$0xff] %v21762_v4  ;;  %26516 = vst [vmem:[#allocation46_spill] sm:$0xff] %v21765_v40 }
  0x7d   : > { %26517 = vst [vmem:[#allocation47_spill] sm:$0xff] %v21778_v44  ;;  %26518 = vst [vmem:[#allocation48_spill] sm:$0xff] %v21781_v3  ;;  %17555 = vmatpush3.bf16.msra.mxu1 %v20765_v28  ;;  %v26705_v28 = vmov 0 }
  0x7e   : > { %26519 = vst [vmem:[#allocation49_spill] sm:$0xff] %v21793_v43  ;;  %26520 = vst [vmem:[#allocation50_spill] sm:$0xff] %v21809_v0  ;;  %v26580_v0 = vmov 0 }
  0x7f   : > { %26521 = vst [vmem:[#allocation51_spill] sm:$0xff] %v21812_v24  ;;  %26522 = vst [vmem:[#allocation52_spill] sm:$0xff] %v21827_v52  ;;  %v26576_v52 = vmov 0 }
  0x80   : > { %26523 = vst [vmem:[#allocation53_spill] sm:$0xff] %v21830_v20  ;;  %26524 = vst [vmem:[#allocation54_spill] sm:$0xff] %v21833_v15  ;;  %v21992_v20 = vadd.s32 20, %v21861_v27 }
  0x81   : > { %26525 = vst [vmem:[#allocation55_spill] sm:$0xff] %v21844_v8  ;;  %26526 = vst [vmem:[#allocation56_spill] sm:$0xff] %v21847_v51  ;;  %v26567_v51 = vmov 0  ;;  %v26571_v8 = vmov 0 }
  0x82   : > { %26527 = vst [vmem:[#allocation57_spill] sm:$0xff] %v21858_v16  ;;  %26528 = vst [vmem:[#allocation58_spill] sm:$0xff] %v21861_v27  ;;  %v26563_v16 = vmov 0 }
  0x83   : > { %26529 = vst [vmem:[#allocation59_spill] sm:$0xff] %v21874_v11  ;;  %26530 = vst [vmem:[#allocation60_spill] sm:$0xff] %v21882_v5 }
  0x84   : > { %26541 = vst [vmem:[#allocation61_spill] sm:$0xff] %v21920_v46  ;;  %26542 = vst [vmem:[#allocation62_spill] sm:$0xff] %v21924_v53 }
  0x85   : > { %vm21938_vm8 = vmand %vm26548_vm1, %vm26547_vm0  ;;  %vm26558_vm0 = vcmp.lt.s32.totalorder %v21430_v7, 0  ;;  %26573 = vst [vmem:[#allocation63_spill] sm:$0xff] %v21992_v20  ;;  %v26584_v20 = vmov 0 }
  0x86   : > { %vm21946_vm10 = vmand %vm26552_vm13, %vm26551_vm2  ;;  %vm26561_vm13 = vcmp.ne.s32.totalorder %v21437_v14, 0  ;;  %vm26562_vm2 = vcmp.lt.s32.totalorder %v21437_v14, 0  ;;  %26591 = vst [vmem:[#allocation65_spill] sm:$0xff] %v22029_v38  ;;  %v26604_v38 = vmov 0  ;;  %v26734_v14 = vld [vmem:[#allocation28_spill] sm:$0xff] }
  0x87   : > { %vm21962_vm1 = vmand %vm26558_vm0, %vm26557_vm4  ;;  %vm26569_vm4 = vcmp.ne.s32.totalorder %v21508_v56, 0  ;;  %vm26570_vm0 = vcmp.lt.s32.totalorder %v21508_v56, 0 }
  0x88   : > { %v26560_v6 = vsel %vm21962_vm1, 4294967295, %v26559_v6  ;;  %vm21970_vm9 = vmand %vm26562_vm2, %vm26561_vm13  ;;  %vm26582_vm2 = vcmp.ne.s32.totalorder %v21465_v32, 0 }
  0x89   : > { %v26564_v16 = vsel %vm21970_vm9, 4294967295, %v26563_v16  ;;  %vm21978_vm3 = vmand %vm26566_vm15, %vm26565_vm14  ;;  %vm26574_vm15 = vcmp.ne.s32.totalorder %v21451_v23, 0  ;;  %vm26583_vm14 = vcmp.lt.s32.totalorder %v21465_v32, 0 }
  0x8a   : > { %v26568_v51 = vsel %vm21978_vm3, 4294967295, %v26567_v51  ;;  %vm21986_vm1 = vmand %vm26570_vm0, %vm26569_vm4  ;;  %vm26575_vm3 = vcmp.lt.s32.totalorder %v21451_v23, 0  ;;  %vm26578_vm4 = vcmp.ne.s32.totalorder %v21458_v58, 0  ;;  %vm26579_vm0 = vcmp.lt.s32.totalorder %v21458_v58, 0 }
  0x8b   : > { %v26572_v8 = vsel %vm21986_vm1, 4294967295, %v26571_v8  ;;  %vm22000_vm9 = vmand %vm26575_vm3, %vm26574_vm15  ;;  %vm26587_vm3 = vcmp.ne.s32.totalorder %v21587_v39, 0  ;;  %vm26588_vm15 = vcmp.lt.s32.totalorder %v21587_v39, 0 }
  0x8c   : > { %v26577_v52 = vsel %vm22000_vm9, 4294967295, %v26576_v52  ;;  %vm22008_vm13 = vmand %vm26579_vm0, %vm26578_vm4  ;;  %vm26592_vm0 = vcmp.ne.s32.totalorder %v21502_v54, 0  ;;  %vm26603_vm4 = vcmp.lt.s32.totalorder %v21511_v57, 0 }
  0x8d   : > { %v26581_v0 = vsel %vm22008_vm13, 4294967295, %v26580_v0  ;;  %vm22016_vm1 = vmand %vm26583_vm14, %vm26582_vm2  ;;  %vm26593_vm2 = vcmp.lt.s32.totalorder %v21502_v54, 0 }
  0x8e   : > { %v26585_v20 = vsel %vm22016_vm1, 4294967295, %v26584_v20  ;;  %vm22024_vm9 = vmand %vm26588_vm15, %vm26587_vm3  ;;  %vm26597_vm1 = vcmp.ne.s32.totalorder %v21505_v55, 0  ;;  %vm26598_vm3 = vcmp.lt.s32.totalorder %v21505_v55, 0 }
  0x8f   : > { %26586 = vst [vmem:[#allocation64_spill] sm:$0xff] %v26585_v20  ;;  %v26590_v29 = vsel %vm22024_vm9, 4294967295, %v26589_v29  ;;  %vm22036_vm14 = vmand %vm26593_vm2, %vm26592_vm0  ;;  %vm26602_vm9 = vcmp.ne.s32.totalorder %v21511_v57, 0  ;;  %vm26607_vm0 = vcmp.ne.s32.totalorder %v21594_v21, 0  ;;  %vm26608_vm2 = vcmp.lt.s32.totalorder %v21594_v21, 0  ;;  %v26774_v21 = vld [vmem:[#allocation40_spill] sm:$0xff] }
  0x90   : > { %v26595_v63 = vsel %vm22036_vm14, 4294967295, %v26594_v63  ;;  %vm22044_vm15 = vmand %vm26598_vm3, %vm26597_vm1  ;;  %vm26612_vm1 = vcmp.ne.s32.totalorder %v21618_v47, 0  ;;  %vm26613_vm3 = vcmp.lt.s32.totalorder %v21618_v47, 0  ;;  %v26751_v20 = vmov 0 }
  0x91   : > { %26596 = vst [vmem:[#allocation66_spill] sm:$0xff] %v26595_v63  ;;  %v26600_v12 = vsel %vm22044_vm15, 4294967295, %v26599_v12  ;;  %vm22052_vm13 = vmand %vm26603_vm4, %vm26602_vm9  ;;  %vm26617_vm9 = vcmp.ne.s32.totalorder %v21621_v25, 0  ;;  %vm26618_vm4 = vcmp.lt.s32.totalorder %v21621_v25, 0  ;;  %v26786_v25 = vld [vmem:[#allocation44_spill] sm:$0xff] }
  0x92   : > { %26601 = vst [vmem:[#allocation67_spill] sm:$0xff] %v26600_v12  ;;  %v26605_v38 = vsel %vm22052_vm13, 4294967295, %v26604_v38  ;;  %vm22060_vm14 = vmand %vm26608_vm2, %vm26607_vm0  ;;  %v26614_v12 = vmov 0  ;;  %vm26622_vm0 = vcmp.ne.s32.totalorder %v21634_v61, 0  ;;  %vm26623_vm2 = vcmp.lt.s32.totalorder %v21634_v61, 0 }
  0x93   : > { %26606 = vst [vmem:[#allocation68_spill] sm:$0xff] %v26605_v38  ;;  %v26610_v18 = vsel %vm22060_vm14, 4294967295, %v26609_v18  ;;  %vm22068_vm15 = vmand %vm26613_vm3, %vm26612_vm1  ;;  %v26619_v38 = vmov 0  ;;  %vm26627_vm1 = vcmp.ne.s32.totalorder %v21642_v26, 0  ;;  %vm26628_vm3 = vcmp.lt.s32.totalorder %v21642_v26, 0 }
  0x94   : > { %26611 = vst [vmem:[#allocation69_spill] sm:$0xff] %v26610_v18  ;;  %v26615_v12 = vsel %vm22068_vm15, 4294967295, %v26614_v12  ;;  %vm22076_vm13 = vmand %vm26618_vm4, %vm26617_vm9  ;;  %vm26633_vm4 = vcmp.ne.s32.totalorder %v21677_v33, 0  ;;  %vm26643_vm9 = vcmp.ne.s32.totalorder %v21685_v49, 0 }
  0x95   : > { %26616 = vst [vmem:[#allocation70_spill] sm:$0xff] %v26615_v12  ;;  %v26620_v38 = vsel %vm22076_vm13, 4294967295, %v26619_v38  ;;  %vm22084_vm14 = vmand %vm26623_vm2, %vm26622_vm0  ;;  %v26629_v12 = vmov 0  ;;  %vm26634_vm0 = vcmp.lt.s32.totalorder %v21677_v33, 0  ;;  %v26823_v33 = vmov 0 }
  0x96   : > { %26621 = vst [vmem:[#allocation71_spill] sm:$0xff] %v26620_v38  ;;  %v26625_v2 = vsel %vm22084_vm14, 4294967295, %v26624_v2  ;;  %vm22092_vm15 = vmand %vm26628_vm3, %vm26627_vm1  ;;  %v22098_v38 = vadd.s32 20, %v21924_v53  ;;  %vm26638_vm14 = vcmp.ne.s32.totalorder %v21682_v37, 0  ;;  %vm26639_vm1 = vcmp.lt.s32.totalorder %v21682_v37, 0 }
  0x97   : > { %26626 = vst [vmem:[#allocation72_spill] sm:$0xff] %v26625_v2  ;;  %v26630_v12 = vsel %vm22092_vm15, 4294967295, %v26629_v12  ;;  %vm22104_vm2 = vmand %vm26634_vm0, %vm26633_vm4  ;;  %v26635_v2 = vmov 0  ;;  %vm26644_vm15 = vcmp.lt.s32.totalorder %v21685_v49, 0  ;;  %vm26648_vm4 = vcmp.ne.s32.totalorder %v21697_v42, 0 }
  0x98   : > { %26631 = vst [vmem:[#allocation73_spill] sm:$0xff] %v26630_v12  ;;  %26632 = vst [vmem:[#allocation74_spill] sm:$0xff] %v22098_v38  ;;  %v26636_v2 = vsel %vm22104_vm2, 4294967295, %v26635_v2  ;;  %v26640_v12 = vmov 0  ;;  %v26645_v38 = vmov 0  ;;  %vm26649_vm0 = vcmp.lt.s32.totalorder %v21697_v42, 0 }
  0x99   : > { %26637 = vst [vmem:[#allocation75_spill] sm:$0xff] %v26636_v2  ;;  %vm22112_vm3 = vmand %vm26639_vm1, %vm26638_vm14  ;;  %v26650_v2 = vmov 0  ;;  %vm26653_vm14 = vcmp.ne.s32.totalorder %v21711_v31, 0  ;;  %vm26654_vm1 = vcmp.lt.s32.totalorder %v21711_v31, 0 }
  0x9a   : > { %v26641_v12 = vsel %vm22112_vm3, 4294967295, %v26640_v12  ;;  %vm22120_vm13 = vmand %vm26644_vm15, %vm26643_vm9  ;;  %vm26658_vm15 = vcmp.ne.s32.totalorder %v21740_v22, 0  ;;  %vm26659_vm9 = vcmp.lt.s32.totalorder %v21740_v22, 0 }
  0x9b   : > { %26642 = vst [vmem:[#allocation76_spill] sm:$0xff] %v26641_v12  ;;  %v26646_v38 = vsel %vm22120_vm13, 4294967295, %v26645_v38  ;;  %vm22128_vm2 = vmand %vm26649_vm0, %vm26648_vm4  ;;  %v26655_v12 = vmov 0  ;;  %vm26663_vm4 = vcmp.ne.s32.totalorder %v21762_v4, 0  ;;  %vm26664_vm0 = vcmp.lt.s32.totalorder %v21762_v4, 0 }
  0x9c   : > { %26647 = vst [vmem:[#allocation77_spill] sm:$0xff] %v26646_v38  ;;  %v26651_v2 = vsel %vm22128_vm2, 4294967295, %v26650_v2  ;;  %vm22136_vm3 = vmand %vm26654_vm1, %vm26653_vm14  ;;  %v26660_v38 = vmov 0  ;;  %vm26668_vm14 = vcmp.ne.s32.totalorder %v21765_v40, 0  ;;  %vm26669_vm1 = vcmp.lt.s32.totalorder %v21765_v40, 0 }
  0x9d   : > { %26652 = vst [vmem:[#allocation78_spill] sm:$0xff] %v26651_v2  ;;  %v26656_v12 = vsel %vm22136_vm3, 4294967295, %v26655_v12  ;;  %vm22144_vm13 = vmand %vm26659_vm9, %vm26658_vm15  ;;  %v26665_v2 = vmov 0  ;;  %vm26673_vm15 = vcmp.ne.s32.totalorder %v21778_v44, 0  ;;  %vm26674_vm9 = vcmp.lt.s32.totalorder %v21778_v44, 0 }
  0x9e   : > { %26657 = vst [vmem:[#allocation79_spill] sm:$0xff] %v26656_v12  ;;  %v26661_v38 = vsel %vm22144_vm13, 4294967295, %v26660_v38  ;;  %vm22152_vm2 = vmand %vm26664_vm0, %vm26663_vm4  ;;  %v26670_v12 = vmov 0  ;;  %vm26678_vm4 = vcmp.ne.s32.totalorder %v21781_v3, 0  ;;  %vm26679_vm0 = vcmp.lt.s32.totalorder %v21781_v3, 0  ;;  %v26760_v57 = vld [vmem:[#allocation72_spill] sm:$0xff] }
  0x9f   : > { %26662 = vst [vmem:[#allocation80_spill] sm:$0xff] %v26661_v38  ;;  %v26666_v2 = vsel %vm22152_vm2, 4294967295, %v26665_v2  ;;  %vm22160_vm3 = vmand %vm26669_vm1, %vm26668_vm14  ;;  %v26675_v38 = vmov 0  ;;  %vm26683_vm14 = vcmp.ne.s32.totalorder %v21793_v43, 0  ;;  %vm26684_vm1 = vcmp.lt.s32.totalorder %v21793_v43, 0 }
  0xa0   : > { %26667 = vst [vmem:[#allocation81_spill] sm:$0xff] %v26666_v2  ;;  %v26671_v12 = vsel %vm22160_vm3, 4294967295, %v26670_v12  ;;  %vm22168_vm13 = vmand %vm26674_vm9, %vm26673_vm15  ;;  %v26680_v2 = vmov 0  ;;  %vm26688_vm15 = vcmp.ne.s32.totalorder %v21812_v24, 0  ;;  %vm26689_vm9 = vcmp.lt.s32.totalorder %v21812_v24, 0  ;;  %v26772_v18 = vld [vmem:[#allocation75_spill] sm:$0xff] }
  0xa1   : > { %26672 = vst [vmem:[#allocation82_spill] sm:$0xff] %v26671_v12  ;;  %v26676_v38 = vsel %vm22168_vm13, 4294967295, %v26675_v38  ;;  %vm22176_vm2 = vmand %vm26679_vm0, %vm26678_vm4  ;;  %v26685_v12 = vmov 0  ;;  %vm26693_vm4 = vcmp.ne.s32.totalorder %v21833_v15, 0  ;;  %vm26694_vm0 = vcmp.lt.s32.totalorder %v21833_v15, 0  ;;  %v26715_v15 = vld [vmem:[#allocation5_spill] sm:$0xff] }
  0xa2   : > { %26677 = vst [vmem:[#allocation83_spill] sm:$0xff] %v26676_v38  ;;  %v26681_v2 = vsel %vm22176_vm2, 4294967295, %v26680_v2  ;;  %vm22184_vm3 = vmand %vm26684_vm1, %vm26683_vm14  ;;  %v26690_v38 = vmov 0  ;;  %vm26698_vm14 = vcmp.ne.s32.totalorder %v21861_v27, 0  ;;  %vm26699_vm1 = vcmp.lt.s32.totalorder %v21861_v27, 0 }
  0xa3   : > { %26682 = vst [vmem:[#allocation84_spill] sm:$0xff] %v26681_v2  ;;  %v26686_v12 = vsel %vm22184_vm3, 4294967295, %v26685_v12  ;;  %vm22192_vm13 = vmand %vm26689_vm9, %vm26688_vm15  ;;  %v26695_v2 = vmov 0  ;;  %vm26703_vm15 = vcmp.ne.s32.totalorder %v21882_v5, 0  ;;  %vm26704_vm9 = vcmp.lt.s32.totalorder %v21882_v5, 0 }
  0xa4   : > { %26687 = vst [vmem:[#allocation85_spill] sm:$0xff] %v26686_v12  ;;  %v26691_v38 = vsel %vm22192_vm13, 4294967295, %v26690_v38  ;;  %vm22200_vm2 = vmand %vm26694_vm0, %vm26693_vm4  ;;  %v26700_v12 = vmov 0  ;;  %vm26708_vm4 = vcmp.ne.s32.totalorder %v21924_v53, 0  ;;  %vm26709_vm0 = vcmp.lt.s32.totalorder %v21924_v53, 0  ;;  %v26714_v53 = vld [vmem:[#allocation4_spill] sm:$0xff] }
  0xa5   : > { %26692 = vst [vmem:[#allocation86_spill] sm:$0xff] %v26691_v38  ;;  %v26696_v2 = vsel %vm22200_vm2, 4294967295, %v26695_v2  ;;  %vm22208_vm3 = vmand %vm26699_vm1, %vm26698_vm14  ;;  %v975_v5 = vsel %vm21899_vm12, %v21387_v41, %v21337_v10  ;;  %v26717_v41 = vld [vmem:[#allocation11_spill] sm:$0xff] }
  0xa6   : > { %26697 = vst [vmem:[#allocation87_spill] sm:$0xff] %v26696_v2  ;;  %v26701_v12 = vsel %vm22208_vm3, 4294967295, %v26700_v12  ;;  %vm22216_vm13 = vmand %vm26704_vm9, %vm26703_vm15  ;;  %v26710_v2 = vmov 0  ;;  %v26726_v10 = vld [vmem:[#allocation15_spill] sm:$0xff] }
  0xa7   : > { %26702 = vst [vmem:[#allocation88_spill] sm:$0xff] %v26701_v12  ;;  %v26706_v28 = vsel %vm22216_vm13, 4294967295, %v26705_v28  ;;  %vm22224_vm2 = vmand %vm26709_vm0, %vm26708_vm4  ;;  %v977_v12 = vsel %vm21891_vm6, %v21379_v34, %v21334_v9  ;;  %v26716_v34 = vld [vmem:[#allocation6_spill] sm:$0xff]  ;;  %vm26719_vm6 = vnez %v26572_v8  ;;  %v26728_v8 = vld [vmem:[#allocation16_spill] sm:$0xff]  ;;  %vm26735_vm4 = vnez %v26590_v29 }
  0xa8   : > { %26707 = vst [vmem:[#allocation89_spill] sm:$0xff] %v26706_v28  ;;  %v26711_v2 = vsel %vm22224_vm2, 4294967295, %v26710_v2  ;;  %v26713_v28 = vld [vmem:[#allocation3_spill] sm:$0xff]  ;;  %vm22292_vm0 = vcmp.lt.s32.totalorder %v977_v12, 16  ;;  %v26753_v29 = vld [vmem:[#allocation30_spill] sm:$0xff]  ;;  %v26759_v9 = vld [vmem:[#allocation32_spill] sm:$0xff] }
  0xa9   : > { %26712 = vst [vmem:[#allocation90_spill] sm:$0xff] %v26711_v2  ;;  %v978_v27 = vsel %vm21907_vm11, %v26713_v28, %v21350_v17  ;;  %v976_v2 = vsel %vm21915_vm7, %v26714_v53, %v21371_v30  ;;  %v997_v30 = vsel %vm26719_vm6, %v26718_v19, %v21508_v56  ;;  %vm26721_vm7 = vnez %v26556_v59  ;;  %v26724_v28 = vld [vmem:[#allocation14_spill] sm:$0xff]  ;;  %v22299_v19 = vld [vmem:[%s26245_s4] ss:$0 sm:$0xff]  ;;  %v26771_v12 = vld [vmem:[#allocation39_spill] sm:$0xff] }
  0xaa   : > { %v995_v56 = vsel %vm26735_vm4, %v26734_v14, %v21587_v39  ;;  %v26737_v50 = vsel %vm22292_vm0, 4294967295, %v26736_v50  ;;  %v26738_v53 = vld [vmem:[#allocation21_spill] sm:$0xff]  ;;  %vm22309_vm4 = vcmp.lt.s32.totalorder %v997_v30, 16  ;;  %v26743_v14 = vmov 0  ;;  %v26754_v30 = vld [vmem:[#allocation70_spill] sm:$0xff]  ;;  %v26799_v26 = vld [vmem:[#allocation83_spill] sm:$0xff] }
  0xab   : > { %v26744_v14 = vsel %vm22309_vm4, 4294967295, %v26743_v14  ;;  %vm22321_vm6 = vcmp.lt.s32.totalorder %v975_v5, 16  ;;  %vm26755_vm9 = vnez %v26754_v30  ;;  %v22344_v30 = vld [vmem:[%s26246_s5] ss:$0 sm:$0xff]  ;;  %vm22350_vm14 = vcmp.lt.s32.totalorder %v995_v56, 16  ;;  %v26789_v5 = vld [vmem:[#allocation50_spill] sm:$0xff] }
  0xac   : > { %26745 = vst [vmem:[#allocation3_spill] sm:$0xff] %v26744_v14  ;;  %v26752_v20 = vsel %vm22321_vm6, 4294967295, %v26751_v20  ;;  %v998_v55 = vsel %vm26755_vm9, %v26753_v29, %v21618_v47  ;;  %vm22346_vm9 = vcmp.lt.s32.totalorder %v978_v27, 16  ;;  %v26765_v47 = vmov 0  ;;  %v26819_v17 = vld [vmem:[#allocation62_spill] sm:$0xff] }
  0xad   : > { %v26766_v47 = vsel %vm22346_vm9, 4294967295, %v26765_v47  ;;  %v26768_v29 = vmov 0  ;;  %v26783_v39 = vmov 0  ;;  %vm26800_vm15 = vnez %v26799_v26  ;;  %v26811_v22 = vld [vmem:[#allocation87_spill] sm:$0xff] }
  0xae   : > { %26767 = vst [vmem:[#allocation4_spill] sm:$0xff] %v26766_v47  ;;  %v26769_v29 = vsel %vm22350_vm14, 4294967295, %v26768_v29  ;;  %vm22370_vm14 = vcmp.lt.s32.totalorder %v976_v2, 16  ;;  %vm26808_vm11 = vnez %v26691_v38  ;;  %vm26812_vm1 = vnez %v26811_v22  ;;  %v26816_v38 = vld [vmem:[#allocation60_spill] sm:$0xff]  ;;  %v26820_v22 = vld [vmem:[#allocation74_spill] sm:$0xff] }
  0xaf   : > { %26770 = vst [vmem:[#allocation5_spill] sm:$0xff] %v26769_v29  ;;  %v26784_v39 = vsel %vm22370_vm14, 4294967295, %v26783_v39  ;;  %v26822_v26 = vsel %vm21930_vm5, %v26715_v15, %v21389_v36  ;;  %vm22442_vm14 = vcmp.lt.s32.totalorder %v998_v55, 16  ;;  %v26829_v36 = vsel %vm21938_vm8, %v26716_v34, %v21394_v45 }
  0xb0   : > { %26785 = vst [vmem:[#allocation6_spill] sm:$0xff] %v26784_v39  ;;  %v26821_v3 = vld [vmem:[#allocation90_spill] sm:$0xff]  ;;  %vm22437_vm12 = vcmp.lt.s32.totalorder %v26822_v26, 16  ;;  %vm22453_vm5 = vcmp.lt.s32.totalorder %v26829_v36, 16  ;;  %v26830_v26 = vmov 0  ;;  %v26833_v45 = vsel %vm21946_vm10, %v26717_v41, %v21416_v62 }
  0xb1   : > { %v26824_v33 = vsel %vm22437_vm12, 4294967295, %v26823_v33  ;;  %v26831_v26 = vsel %vm22453_vm5, 4294967295, %v26830_v26  ;;  %vm22469_vm8 = vcmp.lt.s32.totalorder %v26833_v45, 16  ;;  %v26834_v15 = vmov 0 }
  0xb2   : > { %26825 = vst [vmem:[#allocation11_spill] sm:$0xff] %v26824_v33  ;;  %26832 = vst [vmem:[#allocation12_spill] sm:$0xff] %v26831_v26  ;;  %v26835_v15 = vsel %vm22469_vm8, 4294967295, %v26834_v15  ;;  %vm26843_vm10 = vnez %v26560_v6 }
  0xb3   : > { %26836 = vst [vmem:[#allocation13_spill] sm:$0xff] %v26835_v15  ;;  %v26957_v15 = vld [vmem:[#allocation76_spill] sm:$0xff] }
 0x101   : > { %v17506_v56 = vpop.f32.mrb[0].mxu0  ;;  %v17526_v63 = vpop.f32.mrb[0].mxu1 }
 0x102   : > { %v1507_v40 = vmul.f32 %v17506_v56, %v22299_v19  ;;  %v1339_v2 = vpop.f32.mrb[1].mxu0  ;;  %v1527_v31 = vmul.f32 %v17526_v63, %v22299_v19  ;;  %v1419_v44 = vpop.f32.mrb[1].mxu1  ;;  %v26817_v63 = vld [vmem:[#allocation65_spill] sm:$0xff] }
 0x103   : > { %v1505_v42 = vmul.f32 %v22299_v19, %v1339_v2  ;;  %v17507_v24 = vpop.f32.mrb[2].mxu0  ;;  %v1525_v56 = vmul.f32 %v22299_v19, %v1419_v44  ;;  %v17527_v58 = vpop.f32.mrb[2].mxu1 }
 0x104   : > { %v1554_v4 = vadd.f32 %v22344_v30, %v1507_v40  ;;  %v1508_v43 = vmul.f32 %v17507_v24, %v22299_v19  ;;  %v1342_v37 = vpop.f32.mrb[3].mxu0  ;;  %v1574_v2 = vadd.f32 %v22344_v30, %v1527_v31  ;;  %v1528_v44 = vmul.f32 %v17527_v58, %v22299_v19  ;;  %v1422_v32 = vpop.f32.mrb[3].mxu1 }
 0x105   : > { %v1552_v27 = vadd.f32 %v22344_v30, %v1505_v42  ;;  %v1506_v49 = vmul.f32 %v22299_v19, %v1342_v37  ;;  %v1572_v40 = vadd.f32 %v22344_v30, %v1525_v56  ;;  %v26826_v31 = vmov 0 }
 0x106   : > { %v26827_v31 = vsel %vm22442_vm14, 4294967295, %v26826_v31  ;;  %v1526_v58 = vmul.f32 %v22299_v19, %v1422_v32  ;;  %v1594_v42 = vmax.f32 %v1554_v4, 0.0  ;;  %v1555_v37 = vadd.f32 %v22344_v30, %v1508_v43  ;;  %v20766_v32 = vld [vmem:[%s26243_s2 + $0x70] sm:$0xff]  }
 0x107   : > { %26828 = vst [vmem:[#allocation23_spill] sm:$0xff] %v26827_v31  ;;  %v1614_v24 = vmax.f32 %v1574_v2, 0.0  ;;  %v22458_v55 = vadd.f32 %v22344_v30, %v1528_v44  ;;  %v1592_v4 = vmax.f32 %v1552_v27, 0.0  ;;  %v1553_v43 = vadd.f32 %v22344_v30, %v1506_v49  ;;  %17556 = vmatprep.subr.bf16.mxu1 %v20766_v32 }
 0x108   : > { %v1612_v11 = vmax.f32 %v1572_v40, 0.0  ;;  %v22474_v46 = vadd.f32 %v22344_v30, %v1526_v58  ;;  %v1714_v34 = vsel %vm22292_vm0, %v1594_v42, 0.0  ;;  %v1595_v56 = vmax.f32 %v1555_v37, 0.0  ;;  %17557 = vmatpush3.bf16.msra.mxu1 %v20766_v32 }
 0x109   : > { %v26837_v49 = vsel %vm26721_vm7, %v26720_v48, %v21423_v1  ;;  %v22489_v62 = vsel %vm22309_vm4, %v1614_v24, 0.0  ;;  %v1615_v41 = vmax.f32 %v22458_v55, 0.0  ;;  %v1837_v27 = vrot.slane %v1714_v34, 7  ;;  %v17510_v59 = vpop.f32.mrb[4].mxu0  ;;  %v22495_v1 = vpop.f32.mrb[4].mxu1  ;;  %v20767_v55 = vld [vmem:[%s26243_s2 + $0x78] sm:$0xff]  }
 0x10a   : > { %vm22483_vm2 = vcmp.lt.s32.totalorder %v26837_v49, 16  ;;  %v1712_v2 = vsel %vm22321_vm6, %v1592_v4, 0.0  ;;  %v1593_v44 = vmax.f32 %v1553_v43, 0.0  ;;  %v22499_v48 = vsel %vm22346_vm9, %v1595_v56, 0.0  ;;  %v1355_v42 = vpop.f32.mrb[5].mxu0  ;;  %v22506_v24 = vpop.f32.mrb[5].mxu1  ;;  %17558 = vmatprep.subr.bf16.mxu1 %v20767_v55 }
 0x10b   : > { %v26839_v13 = vsel %vm22483_vm2, 4294967295, %v26838_v13  ;;  %v1511_v58 = vmul.f32 %v17510_v59, %v22299_v19  ;;  %v1834_v37 = vrot.slane %v1712_v2, 7  ;;  %vm26841_vm7 = vnez %v26769_v29  ;;  %v17511_v56 = vpop.f32.mrb[6].mxu0  ;;  %v22516_v49 = vpop.f32.mrb[6].mxu1 }
 0x10c   : > { %26840 = vst [vmem:[#allocation14_spill] sm:$0xff] %v26839_v13  ;;  %v22504_v36 = vsel %vm26841_vm7, %v1612_v11, 0.0  ;;  %v1753_v32 = vpack.c.bf16 %v22499_v48, %v1714_v34  ;;  %vm26842_vm4 = vnez %v26784_v39  ;;  %v1509_v45 = vmul.f32 %v22299_v19, %v1355_v42  ;;  %v1358_v14 = vpop.f32.mrb[7].mxu0  ;;  %v22520_v47 = vpop.f32.mrb[7].mxu1  ;;  %17559 = vmatpush3.bf16.msra.mxu1 %v20767_v55 }
 0x10d   : > { %v1713_v43 = vsel %vm26842_vm4, %v1593_v44, 0.0  ;;  %v1558_v40 = vadd.f32 %v22344_v30, %v1511_v58  ;;  %v1512_v29 = vmul.f32 %v17511_v56, %v22299_v19  ;;  %v1510_v4 = vmul.f32 %v22299_v19, %v1358_v14 }
 0x10e   : > { %v1752_v11 = vpack.c.bf16 %v1713_v43, %v1712_v2  ;;  %v1835_v59 = vrot.slane %v1713_v43, 7  ;;  %v1556_v34 = vadd.f32 %v22344_v30, %v1509_v45  ;;  %v26844_v44 = vsel %vm26843_vm10, %v26722_v35, %v21430_v7  ;;  %v26853_v7 = vld [vmem:[#allocation7_spill] sm:$0xff] }
 0x10f   : > { %vm22529_vm7 = vcmp.lt.s32.totalorder %v26844_v44, 16  ;;  %v26845_v2 = vmov 0  ;;  %vm26848_vm4 = vcmask 1040384   ;;  %v26849_v42 = vrot.slane %v22499_v48, 7 }
 0x110   : > { %v26846_v2 = vsel %vm22529_vm7, 4294967295, %v26845_v2  ;;  %v1953_v58 = vsel %vm26848_vm4, 0.0, %v1834_v37  ;;  %vm26850_vm9 = vmmov %vm26848_vm4  ;;  %vm26851_vm6 = vcmask 523264   ;;  %v1598_v45 = vmax.f32 %v1558_v40, 0.0 }
 0x111   : > { %26847 = vst [vmem:[#allocation15_spill] sm:$0xff] %v26846_v2  ;;  %v1840_v43 = vsel %vm26850_vm9, %v1837_v27, %v26849_v42  ;;  %1774 = vst.msk [vmem:[#allocation2 + $0x20] sm:$0xff] %vm26851_vm6, %v1753_v32  ;;  %v1559_v14 = vadd.f32 %v22344_v30, %v1512_v29  ;;  %vm26852_vm0 = vnez %v26564_v16  ;;  %v26855_v35 = vmov 0  ;;  %v26861_v16 = vld [vmem:[#allocation8_spill] sm:$0xff] }
 0x112   : > { %v26854_v6 = vsel %vm26852_vm0, %v26724_v28, %v26853_v7  ;;  %v1836_v56 = vsel %vm26848_vm4, %v1834_v37, %v1835_v59  ;;  %vm26858_vm13 = vmmov %vm26848_vm4  ;;  %v1596_v32 = vmax.f32 %v1556_v34, 0.0  ;;  %v1557_v40 = vadd.f32 %v22344_v30, %v1510_v4 }
 0x113   : > { %vm22544_vm10 = vcmp.lt.s32.totalorder %v26854_v6, 16  ;;  %v1838_v44 = vsel %vm26858_vm13, %v1835_v59, %v1837_v27  ;;  %vm26859_vm9 = vmmov %vm26851_vm6  ;;  %v1954_v55 = vpack.c.bf16 %v1836_v56, %v1953_v58  ;;  %vm26860_vm6 = vnez %v26568_v51  ;;  %v20768_v56 = vld [vmem:[%s26243_s2] sm:$0xff]  }
 0x114   : > { %v26856_v35 = vsel %vm22544_vm10, 4294967295, %v26855_v35  ;;  %1773 = vst.msk [vmem:[#allocation2 + $0x18] sm:$0xff] %vm26859_vm9, %v1752_v11  ;;  %v26862_v29 = vsel %vm26860_vm6, %v26726_v10, %v26861_v16  ;;  %v26863_v28 = vmov 0  ;;  %v1955_v42 = vpack.c.bf16 %v1840_v43, %v1838_v44  ;;  %v17514_v43 = vpop.f32.mrb[8].mxu0  ;;  %17600 = vmatprep.subr.bf16.mxu1 %v20768_v56 }
 0x115   : > { %26857 = vst [vmem:[#allocation16_spill] sm:$0xff] %v26856_v35  ;;  %vm22557_vm0 = vcmp.lt.s32.totalorder %v26862_v29, 16  ;;  %v1718_v37 = vsel %vm22437_vm12, %v1598_v45, 0.0  ;;  %v1599_v27 = vmax.f32 %v1559_v14, 0.0  ;;  %vm26866_vm13 = vnez %v26577_v52  ;;  %v22579_v45 = vpop.f32.mrb[8].mxu1  ;;  %v1371_v7 = vpop.f32.mrb[9].mxu0 }
 0x116   : > { %v26864_v28 = vsel %vm22557_vm0, 4294967295, %v26863_v28  ;;  %v26867_v4 = vsel %vm26866_vm13, %v26728_v8, %v21451_v23  ;;  %v26868_v11 = vmov 0  ;;  %v22575_v10 = vsel %vm22442_vm14, %v1615_v41, 0.0  ;;  %v22588_v41 = vpop.f32.mrb[9].mxu1  ;;  %v17515_v16 = vpop.f32.mrb[10].mxu0 }
 0x117   : > { %26865 = vst [vmem:[#allocation17_spill] sm:$0xff] %v26864_v28  ;;  %vm22568_vm4 = vcmp.lt.s32.totalorder %v26867_v4, 16  ;;  %v1845_v59 = vrot.slane %v1718_v37, 7  ;;  %v1716_v34 = vsel %vm22453_vm5, %v1596_v32, 0.0  ;;  %v1597_v58 = vmax.f32 %v1557_v40, 0.0  ;;  %v22599_v29 = vpop.f32.mrb[10].mxu1 }
 0x118   : > { %v26869_v11 = vsel %vm22568_vm4, 4294967295, %v26868_v11  ;;  %v1995_v52 = vrot.slane %v1954_v55, 1  ;;  %v1841_v23 = vrot.slane %v1716_v34, 7  ;;  %v22583_v8 = vsel %vm22469_vm8, %v1599_v27, 0.0  ;;  %v22603_v51 = vpop.f32.mrb[11].mxu1 }
 0x119   : > { %26870 = vst [vmem:[#allocation28_spill] sm:$0xff] %v26869_v11  ;;  %v1515_v14 = vmul.f32 %v17514_v43, %v22299_v19  ;;  %v22586_v6 = vrot.slane %v1955_v42, 1  ;;  %v1755_v44 = vpack.c.bf16 %v22583_v8, %v1718_v37  ;;  %v1717_v40 = vsel %vm22483_vm2, %v1597_v58, 0.0  ;;  %v1374_v37 = vpop.f32.mrb[11].mxu0  ;;  %v26916_v11 = vld [vmem:[#allocation68_spill] sm:$0xff] }
 0x11a   : > { %v1513_v55 = vmul.f32 %v22299_v19, %v1371_v7  ;;  %2034 = vrot.lane.b32.xlu0 %v1995_v52, %s21145_s15  ;;  %v1754_v42 = vpack.c.bf16 %v1717_v40, %v1716_v34  ;;  %v1843_v27 = vrot.slane %v1717_v40, 7  ;;  %v1516_v43 = vmul.f32 %v17515_v16, %v22299_v19  ;;  %v26873_v34 = vld [vmem:[#allocation9_spill] sm:$0xff] }
 0x11b   : > { %v1562_v4 = vadd.f32 %v22344_v30, %v1515_v14  ;;  %v1514_v7 = vmul.f32 %v22299_v19, %v1374_v37  ;;  %vm26871_vm9 = vcmask 1046528   ;;  %vm26872_vm6 = vnez %v26581_v0  ;;  %v26886_v37 = vld [vmem:[#allocation64_spill] sm:$0xff] }
 0x11c   : > { %v1560_v58 = vadd.f32 %v22344_v30, %v1513_v55  ;;  %v1997_v32 = vsel %vm26871_vm9, %v1995_v52, %v22586_v6  ;;  %v26874_v40 = vsel %vm26872_vm6, %v26730_v60, %v26873_v34  ;;  %v26875_v14 = vmov 0  ;;  %v26888_v34 = vld [vmem:[#allocation18_spill] sm:$0xff] }
 0x11d   : > { %vm22614_vm13 = vcmp.lt.s32.totalorder %v26874_v40, 16  ;;  %v26878_v16 = vrot.slane %v22499_v48, 7  ;;  %vm26879_vm14 = vcmask 1040384   ;;  %vm26880_vm2 = vnez %v26760_v57  ;;  %v26889_v48 = vld [vmem:[#allocation10_spill] sm:$0xff] }
 0x11e   : > { %v26876_v14 = vsel %vm22614_vm13, 4294967295, %v26875_v14  ;;  %v26881_v55 = vsel %vm26880_vm2, %v26759_v9, %v21634_v61  ;;  %v26882_v52 = vmov 0  ;;  %vm26885_vm9 = vcmask 523264   ;;  %2036 = vrot.lane.b32.xlu0 %v1997_v32, %s21145_s15  ;;  %v26905_v32 = vld [vmem:[#allocation67_spill] sm:$0xff] }
 0x11f   : > { %26877 = vst [vmem:[#allocation21_spill] sm:$0xff] %v26876_v14  ;;  %v1842_v56 = vsel %vm26879_vm14, %v26878_v16, %v1841_v23  ;;  %vm22626_vm8 = vcmp.lt.s32.totalorder %v26881_v55, 16  ;;  %1776 = vst.msk [vmem:[#allocation2 + $0x30] sm:$0xff] %vm26885_vm9, %v1755_v44  ;;  %v1602_v0 = vmax.f32 %v1562_v4, 0.0  ;;  %v1563_v60 = vadd.f32 %v22344_v30, %v1516_v43  ;;  %v26897_v4 = vld [vmem:[#allocation66_spill] sm:$0xff] }
 0x120   : > { %v26883_v52 = vsel %vm22626_vm8, 4294967295, %v26882_v52  ;;  %vm26887_vm6 = vnez %v26886_v37  ;;  %v26891_v16 = vmov 0  ;;  %vm26894_vm5 = vcmask 1040384   ;;  %vm26896_vm12 = vmmov %vm26885_vm9 }
 0x121   : > { %26884 = vst [vmem:[#allocation30_spill] sm:$0xff] %v26883_v52  ;;  %v26890_v40 = vsel %vm26887_vm6, %v26888_v34, %v26889_v48  ;;  %v1844_v61 = vsel %vm26894_vm5, %v1841_v23, %v1843_v27  ;;  %vm26895_vm2 = vmmov %vm26894_vm5  ;;  %v1600_v9 = vmax.f32 %v1560_v58, 0.0  ;;  %v1561_v44 = vadd.f32 %v22344_v30, %v1514_v7  ;;  %v26907_v7 = vld [vmem:[#allocation22_spill] sm:$0xff]  ;;  %v26908_v34 = vld [vmem:[#allocation19_spill] sm:$0xff] }
 0x122   : > { %vm22637_vm14 = vcmp.lt.s32.totalorder %v26890_v40, 16  ;;  %v1846_v57 = vsel %vm26895_vm2, %v1843_v27, %v1845_v59  ;;  %1775 = vst.msk [vmem:[#allocation2 + $0x28] sm:$0xff] %vm26896_vm12, %v1754_v42  ;;  %vm26898_vm9 = vnez %v26897_v4  ;;  %v26900_v55 = vmov 0  ;;  %vm26904_vm5 = vmmov %vm26895_vm2  ;;  %v22676_v4 = vpop.f32.mrb[12].mxu1 }
 0x123   : > { %v26892_v16 = vsel %vm22637_vm14, 4294967295, %v26891_v16  ;;  %v26899_v43 = vsel %vm26898_vm9, %v26738_v53, %v21502_v54  ;;  %v1956_v37 = vpack.c.bf16 %v1844_v61, %v1842_v56  ;;  %v26903_v23 = vrot.slane %v22583_v8, 7 }
 0x124   : > { %26893 = vst [vmem:[#allocation70_spill] sm:$0xff] %v26892_v16  ;;  %vm22651_vm6 = vcmp.lt.s32.totalorder %v26899_v43, 16  ;;  %v22660_v42 = vsel %vm22529_vm7, %v1602_v0, 0.0  ;;  %v1603_v58 = vmax.f32 %v1563_v60, 0.0  ;;  %vm26906_vm12 = vnez %v26905_v32  ;;  %v17518_v60 = vpop.f32.mrb[12].mxu0 }
 0x125   : > { %v26901_v55 = vsel %vm22651_vm6, 4294967295, %v26900_v55  ;;  %v1848_v27 = vsel %vm26904_vm5, %v1845_v59, %v26903_v23  ;;  %v26909_v48 = vsel %vm26906_vm12, %v26907_v7, %v26908_v34  ;;  %v26910_v54 = vmov 0  ;;  %v22685_v7 = vpop.f32.mrb[13].mxu1 }
 0x126   : > { %26902 = vst [vmem:[#allocation32_spill] sm:$0xff] %v26901_v55  ;;  %vm22667_vm2 = vcmp.lt.s32.totalorder %v26909_v48, 16  ;;  %v1957_v53 = vpack.c.bf16 %v1848_v27, %v1846_v57  ;;  %v1763_v56 = vpack.c.bf16 %v22575_v10, %v22489_v62  ;;  %v1720_v0 = vsel %vm22544_vm10, %v1600_v9, 0.0  ;;  %v1387_v27 = vpop.f32.mrb[13].mxu0  ;;  %v22694_v48 = vpop.f32.mrb[14].mxu1 }
 0x127   : > { %v26911_v54 = vsel %vm22667_vm2, 4294967295, %v26910_v54  ;;  %v1601_v40 = vmax.f32 %v1561_v44, 0.0  ;;  %v1998_v61 = vrot.slane %v1956_v37, 1  ;;  %v1849_v43 = vrot.slane %v1720_v0, 7  ;;  %v17519_v34 = vpop.f32.mrb[14].mxu0  ;;  %v22698_v28 = vpop.f32.mrb[15].mxu1 }
 0x128   : > { %26912 = vst [vmem:[#allocation72_spill] sm:$0xff] %v26911_v54  ;;  %v22680_v23 = vsel %vm22557_vm0, %v1603_v58, 0.0  ;;  %v1519_v57 = vmul.f32 %v17518_v60, %v22299_v19  ;;  %v22683_v32 = vrot.slane %v1957_v53, 1  ;;  %vm26913_vm9 = vcmask 523264  }
 0x129   : > { %1784 = vst.msk [vmem:[#allocation2 + $0x70] sm:$0xff] %vm26913_vm9, %v1763_v56  ;;  %v1757_v9 = vpack.c.bf16 %v22680_v23, %v22660_v42  ;;  %v1721_v37 = vsel %vm22568_vm4, %v1601_v40, 0.0  ;;  %v1517_v58 = vmul.f32 %v22299_v19, %v1387_v27  ;;  %v1520_v31 = vmul.f32 %v17519_v34, %v22299_v19  ;;  %v1390_v56 = vpop.f32.mrb[15].mxu0 }
 0x12a   : > { %v1756_v60 = vpack.c.bf16 %v1721_v37, %v1720_v0  ;;  %v1851_v53 = vrot.slane %v1721_v37, 7  ;;  %v1566_v59 = vadd.f32 %v22344_v30, %v1519_v57  ;;  %vm26914_vm5 = vcmask 1046528   ;;  %v26918_v0 = vld [vmem:[#allocation24_spill] sm:$0xff] }
 0x12b   : > { %v1564_v35 = vadd.f32 %v22344_v30, %v1517_v58  ;;  %v1999_v44 = vsel %vm26914_vm5, %v22586_v6, %v1998_v61  ;;  %v1518_v40 = vmul.f32 %v22299_v19, %v1390_v56  ;;  %vm26915_vm12 = vmmov %vm26914_vm5  ;;  %vm26917_vm9 = vnez %v26916_v11  ;;  %v26919_v37 = vld [vmem:[#allocation20_spill] sm:$0xff]  ;;  %v26924_v6 = vld [vmem:[#allocation69_spill] sm:$0xff] }
 0x12c   : > { %v2001_v27 = vsel %vm26915_vm12, %v1998_v61, %v22683_v32  ;;  %v26920_v57 = vsel %vm26917_vm9, %v26918_v0, %v26919_v37  ;;  %v26921_v34 = vmov 0  ;;  %vm26923_vm0 = vcmask 523264   ;;  %2038 = vrot.lane.b32.xlu1 %v1999_v44, %s21145_s15  ;;  %v26926_v56 = vld [vmem:[#allocation29_spill] sm:$0xff]  ;;  %v26934_v44 = vld [vmem:[#allocation31_spill] sm:$0xff]  ;;  %v17522_v0 = vpop.f32.mrb[16].mxu0 }
 0x12d   : > { %vm22711_vm4 = vcmp.lt.s32.totalorder %v26920_v57, 16  ;;  %1778 = vst.msk [vmem:[#allocation2 + $0x40] sm:$0xff] %vm26923_vm0, %v1757_v9  ;;  %v1606_v58 = vmax.f32 %v1566_v59, 0.0  ;;  %v1567_v2 = vadd.f32 %v22344_v30, %v1520_v31  ;;  %vm26925_vm5 = vnez %v26924_v6  ;;  %v26927_v61 = vld [vmem:[#allocation25_spill] sm:$0xff]  ;;  %vm26931_vm9 = vmmov %vm26923_vm0  ;;  %v26932_v9 = vld [vmem:[#allocation71_spill] sm:$0xff] }
 0x12e   : > { %v26922_v34 = vsel %vm22711_vm4, 4294967295, %v26921_v34  ;;  %v26928_v13 = vsel %vm26925_vm5, %v26926_v56, %v26927_v61  ;;  %v26929_v11 = vmov 0  ;;  %v1613_v37 = vmax.f32 %v22474_v46, 0.0  ;;  %1777 = vst.msk [vmem:[#allocation2 + $0x38] sm:$0xff] %vm26931_vm9, %v1756_v60  ;;  %v26935_v57 = vld [vmem:[#allocation26_spill] sm:$0xff] }
 0x12f   : > { %vm22723_vm12 = vcmp.lt.s32.totalorder %v26928_v13, 16  ;;  %v1604_v59 = vmax.f32 %v1564_v35, 0.0  ;;  %v1565_v31 = vadd.f32 %v22344_v30, %v1518_v40  ;;  %vm26933_vm0 = vnez %v26932_v9 }
 0x130   : > { %v26930_v11 = vsel %vm22723_vm12, 4294967295, %v26929_v11  ;;  %v26936_v6 = vsel %vm26933_vm0, %v26934_v44, %v26935_v57  ;;  %v26937_v56 = vmov 0  ;;  %v26939_v13 = vrot.slane %v22583_v8, 7  ;;  %v26944_v57 = vld [vmem:[#allocation73_spill] sm:$0xff]  ;;  %2040 = vrot.lane.b32.xlu1 %v2001_v27, %s21145_s15 }
 0x131   : > { %vm22736_vm10 = vcmp.lt.s32.totalorder %v26936_v6, 16  ;;  %vm26940_vm5 = vcmask 1040384   ;;  %v22746_v35 = vsel %vm22614_vm13, %v1606_v58, 0.0  ;;  %v1607_v60 = vmax.f32 %v1567_v2, 0.0  ;;  %v26946_v8 = vld [vmem:[#allocation33_spill] sm:$0xff]  ;;  %v26947_v6 = vld [vmem:[#allocation27_spill] sm:$0xff] }
 0x132   : > { %v26938_v56 = vsel %vm22736_vm10, 4294967295, %v26937_v56  ;;  %v1850_v61 = vsel %vm26940_vm5, %v26939_v13, %v1849_v43  ;;  %vm26941_vm7 = vmmov %vm26940_vm5  ;;  %v22750_v40 = vsel %vm22626_vm8, %v1613_v37, 0.0  ;;  %v26942_v9 = vrot.slane %v22660_v42, 7 }
 0x133   : > { %v1852_v46 = vsel %vm26941_vm7, %v1849_v43, %v1851_v53  ;;  %vm26943_vm9 = vmmov %vm26940_vm5  ;;  %vm26945_vm0 = vnez %v26944_v57  ;;  %v26949_v43 = vmov 0  ;;  %v22767_v2 = vsel %vm22637_vm14, %v1604_v59, 0.0 }
 0x134   : > { %v1854_v44 = vsel %vm26943_vm9, %v1851_v53, %v26942_v9  ;;  %v26948_v13 = vsel %vm26945_vm0, %v26946_v8, %v26947_v6  ;;  %v1605_v37 = vmax.f32 %v1565_v31, 0.0  ;;  %v1762_v53 = vpack.c.bf16 %v22750_v40, %v22504_v36  ;;  %v26952_v9 = vld [vmem:[#allocation34_spill] sm:$0xff]  ;;  %v22780_v6 = vpop.f32.mrb[16].mxu1 }
 0x135   : > { %vm22760_vm5 = vcmp.lt.s32.totalorder %v26948_v13, 16  ;;  %vm26951_vm7 = vnez %v26772_v18  ;;  %v26954_v8 = vmov 0  ;;  %v22785_v59 = vsel %vm22651_vm6, %v1607_v60, 0.0  ;;  %v1403_v18 = vpop.f32.mrb[17].mxu0 }
 0x136   : > { %v26950_v43 = vsel %vm22760_vm5, 4294967295, %v26949_v43  ;;  %v26953_v57 = vsel %vm26951_vm7, %v26771_v12, %v26952_v9  ;;  %v1523_v31 = vmul.f32 %v17522_v0, %v22299_v19  ;;  %v22790_v12 = vpop.f32.mrb[17].mxu1  ;;  %v1759_v9 = vpack.c.bf16 %v22785_v59, %v22746_v35  ;;  %v17523_v52 = vpop.f32.mrb[18].mxu0 }
 0x137   : > { %vm22776_vm9 = vcmp.lt.s32.totalorder %v26953_v57, 16  ;;  %v1725_v13 = vsel %vm22667_vm2, %v1605_v37, 0.0  ;;  %v1521_v60 = vmul.f32 %v22299_v19, %v1403_v18  ;;  %v22798_v55 = vpop.f32.mrb[18].mxu1  ;;  %vm26956_vm0 = vcmask 523264   ;;  %v1406_v14 = vpop.f32.mrb[19].mxu0  ;;  %v26959_v57 = vld [vmem:[#allocation35_spill] sm:$0xff] }
 0x138   : > { %v26955_v8 = vsel %vm22776_vm9, 4294967295, %v26954_v8  ;;  %1783 = vst.msk [vmem:[#allocation2 + $0x68] sm:$0xff] %vm26956_vm0, %v1762_v53  ;;  %v1758_v27 = vpack.c.bf16 %v1725_v13, %v22767_v2  ;;  %v1859_v0 = vrot.slane %v1725_v13, 7  ;;  %v1570_v58 = vadd.f32 %v22344_v30, %v1523_v31  ;;  %v22813_v54 = vpop.f32.mrb[19].mxu1 }
 0x139   : > { %v1524_v16 = vmul.f32 %v17523_v52, %v22299_v19  ;;  %vm26958_vm7 = vnez %v26957_v15  ;;  %v1568_v53 = vadd.f32 %v22344_v30, %v1521_v60  ;;  %v26963_v13 = vrot.slane %v22680_v23, 7 }
 0x13a   : > { %v26960_v37 = vsel %vm26958_vm7, %v26774_v21, %v26959_v57  ;;  %v26964_v31 = vrot.slane %v22660_v42, 7  ;;  %vm26965_vm0 = vcmask 1040384   ;;  %v1958_v26 = vpack.c.bf16 %v1852_v46, %v1850_v61  ;;  %v26968_v46 = vld [vmem:[#allocation77_spill] sm:$0xff] }
 0x13b   : > { %vm22809_vm8 = vcmp.lt.s32.totalorder %v26960_v37, 16  ;;  %v1522_v15 = vmul.f32 %v22299_v19, %v1406_v14  ;;  %vm26966_vm2 = vcmask 523264   ;;  %v1610_v21 = vmax.f32 %v1570_v58, 0.0  ;;  %v26970_v14 = vld [vmem:[#allocation41_spill] sm:$0xff] }
 0x13c   : > { %v1856_v52 = vsel %vm26965_vm0, %v26964_v31, %v26963_v13  ;;  %1780 = vst.msk [vmem:[#allocation2 + $0x50] sm:$0xff] %vm26966_vm2, %v1759_v9  ;;  %v1571_v57 = vadd.f32 %v22344_v30, %v1524_v16  ;;  %v1531_v33 = vmul.f32 %v22495_v1, %v22299_v19  ;;  %vm26967_vm7 = vmmov %vm26966_vm2  ;;  %v1608_v60 = vmax.f32 %v1568_v53, 0.0  ;;  %v26971_v9 = vld [vmem:[#allocation36_spill] sm:$0xff]  ;;  %v26975_v53 = vld [vmem:[#allocation78_spill] sm:$0xff] }
 0x13d   : > { %v1959_v37 = vpack.c.bf16 %v1856_v52, %v1854_v44  ;;  %1779 = vst.msk [vmem:[#allocation2 + $0x48] sm:$0xff] %vm26967_vm7, %v1758_v27  ;;  %v2002_v39 = vrot.slane %v1958_v26, 1  ;;  %v1569_v42 = vadd.f32 %v22344_v30, %v1522_v15  ;;  %v1529_v61 = vmul.f32 %v22299_v19, %v22506_v24  ;;  %v26977_v24 = vld [vmem:[#allocation42_spill] sm:$0xff]  ;;  %v26978_v13 = vld [vmem:[#allocation37_spill] sm:$0xff] }
 0x13e   : > { %vm26969_vm0 = vnez %v26968_v46  ;;  %v26973_v16 = vmov 0  ;;  %v22841_v1 = vsel %vm22711_vm4, %v1610_v21, 0.0  ;;  %v1611_v44 = vmax.f32 %v1571_v57, 0.0  ;;  %v27007_v15 = vld [vmem:[#allocation81_spill] sm:$0xff] }
 0x13f   : > { %v26972_v58 = vsel %vm26969_vm0, %v26970_v14, %v26971_v9  ;;  %v22843_v26 = vrot.slane %v1959_v37, 1  ;;  %v1578_v27 = vadd.f32 %v22344_v30, %v1531_v33  ;;  %vm26976_vm7 = vnez %v26975_v53 }
 0x140   : > { %vm22835_vm2 = vcmp.lt.s32.totalorder %v26972_v58, 16  ;;  %v26979_v31 = vsel %vm26976_vm7, %v26977_v24, %v26978_v13  ;;  %v22858_v21 = vsel %vm22723_vm12, %v1608_v60, 0.0  ;;  %vm26982_vm0 = vcmask 1046528   ;;  %v27018_v13 = vld [vmem:[#allocation46_spill] sm:$0xff] }
 0x141   : > { %v26974_v16 = vsel %vm22835_vm2, 4294967295, %v26973_v16  ;;  %vm22851_vm6 = vcmp.lt.s32.totalorder %v26979_v31, 16  ;;  %v2003_v57 = vsel %vm26982_vm0, %v22683_v32, %v2002_v39  ;;  %v1609_v37 = vmax.f32 %v1569_v42, 0.0  ;;  %vm26983_vm7 = vmmov %vm26982_vm0 }
 0x142   : > { %v26430_v33 = vrot.slane %v22858_v21, 7  ;;  %v22865_v46 = vsel %vm22736_vm10, %v1611_v44, 0.0  ;;  %v2005_v14 = vsel %vm26983_vm7, %v2002_v39, %v22843_v26  ;;  %2042 = vrot.lane.b32.xlu0 %v2003_v57, %s21145_s15  ;;  %v1618_v9 = vmax.f32 %v1578_v27, 0.0  ;;  %v26984_v44 = vld [vmem:[#allocation79_spill] sm:$0xff]  ;;  %v26986_v39 = vld [vmem:[#allocation38_spill] sm:$0xff]  ;;  %v26990_v57 = vld [vmem:[#allocation80_spill] sm:$0xff] }
 0x143   : > { %v1761_v60 = vpack.c.bf16 %v22865_v46, %v22841_v1  ;;  %2044 = vrot.lane.b32.xlu1 %v2005_v14, %s21145_s15  ;;  %v22876_v32 = vsel %vm22760_vm5, %v1609_v37, 0.0  ;;  %v1576_v42 = vadd.f32 %v22344_v30, %v1529_v61  ;;  %vm26985_vm0 = vnez %v26984_v44 }
 0x144   : > { %v26987_v53 = vsel %vm26985_vm0, %v26786_v25, %v26986_v39  ;;  %v26988_v27 = vmov 0  ;;  %v1760_v24 = vpack.c.bf16 %v22876_v32, %v22858_v21  ;;  %v22893_v31 = vsel %vm22776_vm9, %v1618_v9, 0.0  ;;  %v26992_v25 = vld [vmem:[#allocation43_spill] sm:$0xff] }
 0x145   : > { %vm22884_vm7 = vcmp.lt.s32.totalorder %v26987_v53, 16  ;;  %v1532_v61 = vmul.f32 %v22516_v49, %v22299_v19  ;;  %vm26991_vm5 = vnez %v26990_v57  ;;  %v26994_v14 = vmov 0 }
 0x146   : > { %v26989_v27 = vsel %vm22884_vm7, 4294967295, %v26988_v27  ;;  %v26993_v37 = vsel %vm26991_vm5, %v26789_v5, %v26992_v25  ;;  %v1616_v39 = vmax.f32 %v1576_v42, 0.0  ;;  %v1530_v53 = vmul.f32 %v22299_v19, %v22520_v47 }
 0x147   : > { %vm22902_vm0 = vcmp.lt.s32.totalorder %v26993_v37, 16  ;;  %v26996_v9 = vrot.slane %v22767_v2, 7  ;;  %v26997_v58 = vrot.slane %v22680_v23, 7  ;;  %vm26998_vm9 = vcmask 1040384   ;;  %v27015_v2 = vld [vmem:[#allocation82_spill] sm:$0xff] }
 0x148   : > { %v26995_v14 = vsel %vm22902_vm0, 4294967295, %v26994_v14  ;;  %vm26999_vm10 = vcmask 523264   ;;  %v1579_v5 = vadd.f32 %v22344_v30, %v1532_v61  ;;  %vm27001_vm5 = vmmov %vm26998_vm9  ;;  %v27002_v37 = vrot.slane %v22746_v35, 7 }
 0x149   : > { %v1858_v49 = vsel %vm26998_vm9, %v26997_v58, %v26996_v9  ;;  %1782 = vst.msk [vmem:[#allocation2 + $0x60] sm:$0xff] %vm26999_vm10, %v1761_v60  ;;  %v27000_v57 = vmov %v26996_v9  ;;  %vm27003_vm12 = vmmov %vm27001_vm5  ;;  %v27004_v47 = vrot.slane %v22785_v59, 7  ;;  %vm27008_vm9 = vnez %v27007_v15  ;;  %v27009_v58 = vld [vmem:[#allocation52_spill] sm:$0xff]  ;;  %v27010_v60 = vld [vmem:[#allocation45_spill] sm:$0xff] }
 0x14a   : > { %v1860_v25 = vsel %vm27001_vm5, %v27000_v57, %v1859_v0  ;;  %v1862_v42 = vsel %vm27003_vm12, %v1859_v0, %v27002_v37  ;;  %v27005_v44 = vmov %v27002_v37  ;;  %vm27006_vm4 = vmmov %vm27001_vm5  ;;  %v27011_v9 = vsel %vm27008_vm9, %v27009_v58, %v27010_v60  ;;  %v27017_v57 = vld [vmem:[#allocation53_spill] sm:$0xff] }
 0x14b   : > { %v1864_v23 = vsel %vm27006_vm4, %v27005_v44, %v27004_v47  ;;  %vm22932_vm10 = vcmp.lt.s32.totalorder %v27011_v9, 16  ;;  %v27012_v61 = vmov 0  ;;  %vm27016_vm5 = vnez %v27015_v2 }
 0x14c   : > { %v27013_v61 = vsel %vm22932_vm10, 4294967295, %v27012_v61  ;;  %v27019_v0 = vsel %vm27016_vm5, %v27017_v57, %v27018_v13  ;;  %v27020_v37 = vmov 0  ;;  %vm27023_vm14 = vcmask 523264  }
 0x14d   : > { %27014 = vst [vmem:[#allocation39_spill] sm:$0xff] %v27013_v61  ;;  %vm22941_vm12 = vcmp.lt.s32.totalorder %v27019_v0, 16  ;;  %1781 = vst.msk [vmem:[#allocation2 + $0x58] sm:$0xff] %vm27023_vm14, %v1760_v24  ;;  %v22948_v35 = vsel %vm22809_vm8, %v1616_v39, 0.0  ;;  %v1577_v15 = vadd.f32 %v22344_v30, %v1530_v53  ;;  %v1960_v44 = vpack.c.bf16 %v1860_v25, %v1858_v49  ;;  %v27069_v61 = vld [vmem:[#allocation89_spill] sm:$0xff] }
 0x14e   : > { %v27021_v37 = vsel %vm22941_vm12, 4294967295, %v27020_v37  ;;  %v1961_v47 = vpack.c.bf16 %v1864_v23, %v1862_v42  ;;  %v1619_v60 = vmax.f32 %v1579_v5, 0.0  ;;  %v1535_v13 = vmul.f32 %v22579_v45, %v22299_v19  ;;  %v27026_v42 = vld [vmem:[#allocation47_spill] sm:$0xff] }
 0x14f   : > { %27022 = vst [vmem:[#allocation75_spill] sm:$0xff] %v27021_v37  ;;  %v1533_v9 = vmul.f32 %v22299_v19, %v22588_v41  ;;  %v1617_v2 = vmax.f32 %v1577_v15, 0.0  ;;  %v2006_v57 = vrot.slane %v1960_v44, 1  ;;  %v1536_v39 = vmul.f32 %v22599_v29, %v22299_v19  ;;  %v27025_v41 = vld [vmem:[#allocation55_spill] sm:$0xff]  ;;  %v27030_v29 = vld [vmem:[#allocation84_spill] sm:$0xff] }
 0x150   : > { %v22956_v24 = vrot.slane %v1961_v47, 1  ;;  %v22962_v53 = vsel %vm22835_vm2, %v1619_v60, 0.0  ;;  %v1582_v49 = vadd.f32 %v22344_v30, %v1535_v13  ;;  %v1534_v45 = vmul.f32 %v22299_v19, %v22603_v51  ;;  %v27032_v15 = vld [vmem:[#allocation56_spill] sm:$0xff]  ;;  %v27037_v13 = vld [vmem:[#allocation85_spill] sm:$0xff] }
 0x151   : > { %v1580_v5 = vadd.f32 %v22344_v30, %v1533_v9  ;;  %v27027_v23 = vsel %vm26800_vm15, %v27025_v41, %v27026_v42  ;;  %vm27031_vm14 = vnez %v27030_v29  ;;  %v27033_v44 = vld [vmem:[#allocation48_spill] sm:$0xff]  ;;  %vm27038_vm5 = vnez %v27037_v13  ;;  %v27039_v51 = vld [vmem:[#allocation57_spill] sm:$0xff]  ;;  %v27046_v29 = vld [vmem:[#allocation51_spill] sm:$0xff] }
 0x152   : > { %vm22973_vm4 = vcmp.lt.s32.totalorder %v27027_v23, 16  ;;  %v27034_v47 = vsel %vm27031_vm14, %v27032_v15, %v27033_v44  ;;  %v27040_v9 = vld [vmem:[#allocation49_spill] sm:$0xff]  ;;  %v27045_v23 = vld [vmem:[#allocation59_spill] sm:$0xff]  ;;  %v1765_v44 = vpack.c.bf16 %v22962_v53, %v22893_v31  ;;  %v23009_v13 = vsel %vm22851_vm6, %v1617_v2, 0.0 }
 0x153   : > { %vm22982_vm9 = vcmp.lt.s32.totalorder %v27034_v47, 16  ;;  %v27041_v25 = vsel %vm27038_vm5, %v27039_v51, %v27040_v9  ;;  %v27047_v58 = vsel %vm26808_vm11, %v27045_v23, %v27046_v29  ;;  %vm27050_vm14 = vcmask 1046528  }
 0x154   : > { %vm22991_vm2 = vcmp.lt.s32.totalorder %v27041_v25, 16  ;;  %vm23000_vm15 = vcmp.lt.s32.totalorder %v27047_v58, 16  ;;  %v2009_v51 = vsel %vm27050_vm14, %v2006_v57, %v22956_v24  ;;  %v1764_v9 = vpack.c.bf16 %v23009_v13, %v22948_v35  ;;  %vm27051_vm11 = vmmov %vm27050_vm14 }
 0x155   : > { %2048 = vrot.lane.b32.xlu1 %v2009_v51, %s21145_s15  ;;  %v2007_v25 = vsel %vm27051_vm11, %v22843_v26, %v2006_v57  ;;  %v1622_v42 = vmax.f32 %v1582_v49, 0.0  ;;  %v1620_v23 = vmax.f32 %v1580_v5, 0.0  ;;  %v1583_v2 = vadd.f32 %v22344_v30, %v1536_v39 }
 0x156   : > { %2046 = vrot.lane.b32.xlu0 %v2007_v25, %s21145_s15  ;;  %v1581_v29 = vadd.f32 %v22344_v30, %v1534_v45  ;;  %v1539_v47 = vmul.f32 %v22676_v4, %v22299_v19  ;;  %vm27052_vm5 = vcmask 523264   ;;  %v1537_v26 = vmul.f32 %v22299_v19, %v22685_v7 }
 0x157   : > { %1786 = vst.msk [vmem:[#allocation2 + $0x80] sm:$0xff] %vm27052_vm5, %v1765_v44  ;;  %v23027_v58 = vsel %vm22884_vm7, %v1622_v42, 0.0  ;;  %v1540_v57 = vmul.f32 %v22694_v48, %v22299_v19  ;;  %v1538_v39 = vmul.f32 %v22299_v19, %v22698_v28  ;;  %vm27053_vm14 = vmmov %vm27052_vm5  ;;  %v23039_v4 = vsel %vm22902_vm0, %v1620_v23, 0.0 }
 0x158   : > { %1785 = vst.msk [vmem:[#allocation2 + $0x78] sm:$0xff] %vm27053_vm14, %v1764_v9  ;;  %v1623_v5 = vmax.f32 %v1583_v2, 0.0  ;;  %v1621_v45 = vmax.f32 %v1581_v29, 0.0  ;;  %v1586_v7 = vadd.f32 %v22344_v30, %v1539_v47  ;;  %v1584_v51 = vadd.f32 %v22344_v30, %v1537_v26  ;;  %v27057_v2 = vld [vmem:[#allocation61_spill] sm:$0xff]  ;;  %v27058_v29 = vld [vmem:[#allocation54_spill] sm:$0xff] }
 0x159   : > { %v1587_v48 = vadd.f32 %v22344_v30, %v1540_v57  ;;  %v1585_v25 = vadd.f32 %v22344_v30, %v1538_v39  ;;  %v27054_v42 = vrot.slane %v22785_v59, 7  ;;  %vm27055_vm11 = vcmask 1040384  }
 0x15a   : > { %v23047_v28 = vsel %vm22932_vm10, %v1623_v5, 0.0  ;;  %v23051_v9 = vsel %vm22941_vm12, %v1621_v45, 0.0  ;;  %v27059_v26 = vsel %vm26812_vm1, %v27057_v2, %v27058_v29  ;;  %v1624_v49 = vmax.f32 %v1584_v51, 0.0  ;;  %v27063_v2 = vld [vmem:[#allocation63_spill] sm:$0xff]  ;;  %v27064_v29 = vld [vmem:[#allocation58_spill] sm:$0xff] }
 0x15b   : > { %v1866_v47 = vsel %vm27055_vm11, %v27054_v42, %v26430_v33  ;;  %vm23064_vm5 = vcmp.lt.s32.totalorder %v27059_v26, 16  ;;  %v1767_v5 = vpack.c.bf16 %v23047_v28, %v23027_v58  ;;  %v1766_v45 = vpack.c.bf16 %v23051_v9, %v23039_v4 }
 0x15c   : > { %v1626_v42 = vmax.f32 %v1586_v7, 0.0  ;;  %v1627_v23 = vmax.f32 %v1587_v48, 0.0  ;;  %v1625_v44 = vmax.f32 %v1585_v25, 0.0  ;;  %v27065_v26 = vsel %vm22208_vm3, %v27063_v2, %v27064_v29 }
 0x15d   : > { %vm23079_vm1 = vcmp.lt.s32.totalorder %v27065_v26, 16  ;;  %v27066_v37 = vmov 0  ;;  %vm27070_vm14 = vnez %v27069_v61  ;;  %v27072_v59 = vmov 0 }
 0x15e   : > { %v27067_v37 = vsel %vm23079_vm1, 4294967295, %v27066_v37  ;;  %v27071_v39 = vsel %vm27070_vm14, %v26817_v63, %v26816_v38  ;;  %vm27075_vm12 = vnez %v26821_v3  ;;  %v27077_v7 = vmov 0 }
 0x15f   : > { %27068 = vst [vmem:[#allocation40_spill] sm:$0xff] %v27067_v37  ;;  %vm23088_vm11 = vcmp.lt.s32.totalorder %v27071_v39, 16  ;;  %v27076_v33 = vsel %vm27075_vm12, %v26820_v22, %v26819_v17  ;;  %v27080_v51 = vrot.slane %v22876_v32, 7  ;;  %v27081_v61 = vrot.slane %v22858_v21, 7  ;;  %v20793_v37 = vld [vmem:[%s26243_s2 + $0x108] sm:$0xff]  }
 0x160   : > { %v27073_v59 = vsel %vm23088_vm11, 4294967295, %v27072_v59  ;;  %vm23097_vm10 = vcmp.lt.s32.totalorder %v27076_v33, 16  ;;  %vm27082_vm3 = vcmask 1040384   ;;  %v27083_v38 = vrot.slane %v22841_v1, 7 }
 0x161   : > { %27074 = vst [vmem:[#allocation44_spill] sm:$0xff] %v27073_v59  ;;  %v27078_v7 = vsel %vm23097_vm10, 4294967295, %v27077_v7  ;;  %v1868_v48 = vsel %vm27082_vm3, %v27081_v61, %v27080_v51  ;;  %v27084_v63 = vmov %v27080_v51  ;;  %vm27085_vm14 = vmmov %vm27082_vm3  ;;  %v27086_v3 = vrot.slane %v22865_v46, 7 }
 0x162   : > { %27079 = vst [vmem:[#allocation50_spill] sm:$0xff] %v27078_v7  ;;  %v1870_v25 = vsel %vm27085_vm14, %v27084_v63, %v27083_v38  ;;  %v27087_v22 = vmov %v27083_v38  ;;  %vm27088_vm12 = vmmov %vm27082_vm3  ;;  %v1543_v39 = vmul.f32 %v22780_v6, %v22299_v19  ;;  %vm27089_vm0 = vcmask 523264  }
 0x163   : > { %v1872_v17 = vsel %vm27088_vm12, %v27087_v22, %v27086_v3  ;;  %1787 = vst.msk [vmem:[#allocation2 + $0x88] sm:$0xff] %vm27089_vm0, %v1766_v45  ;;  %vm27090_vm7 = vmmov %vm27089_vm0  ;;  %v23122_v21 = vsel %vm22973_vm4, %v1626_v42, 0.0  ;;  %v23126_v32 = vsel %vm22982_vm9, %v1624_v49, 0.0  ;;  %v23130_v1 = vsel %vm22991_vm2, %v1627_v23, 0.0 }
 0x164   : > { %1788 = vst.msk [vmem:[#allocation2 + $0x90] sm:$0xff] %vm27090_vm7, %v1767_v5  ;;  %v23134_v2 = vsel %vm23000_vm15, %v1625_v44, 0.0  ;;  %v1901_v6 = vrot.slane %v23122_v21, 7  ;;  %v1897_v5 = vrot.slane %v23126_v32, 7  ;;  %v1769_v45 = vpack.c.bf16 %v23130_v1, %v23122_v21  ;;  %vm27091_vm7 = vmmov %vm27089_vm0 }
 0x165   : > { %v1903_v42 = vrot.slane %v23130_v1, 7  ;;  %v1768_v49 = vpack.c.bf16 %v23134_v2, %v23126_v32  ;;  %v1899_v29 = vrot.slane %v23134_v2, 7  ;;  %v1962_v23 = vpack.c.bf16 %v1868_v48, %v1866_v47  ;;  %vm27096_vm14 = vmmov %vm27082_vm3 }
 0x166   : > { %v1963_v26 = vpack.c.bf16 %v1872_v17, %v1870_v25  ;;  %v1590_v33 = vadd.f32 %v22344_v30, %v1543_v39  ;;  %v1541_v44 = vmul.f32 %v22299_v19, %v22790_v12  ;;  %v1544_v51 = vmul.f32 %v22798_v55, %v22299_v19  ;;  %1790 = vst.msk [vmem:[#allocation2 + $0xa0] sm:$0xff] %vm27091_vm7, %v1769_v45 }
 0x167   : > { %v1542_v61 = vmul.f32 %v22299_v19, %v22813_v54  ;;  %v2010_v38 = vrot.slane %v1962_v23, 1  ;;  %1789 = vst.msk [vmem:[#allocation2 + $0x98] sm:$0xff] %vm27089_vm0, %v1768_v49  ;;  %v27092_v47 = vrot.slane %v22504_v36, 7  ;;  %v27093_v48 = vmov %v27086_v3  ;;  %vm27101_vm0 = vmmov %vm27082_vm3 }
 0x168   : > { %v2012_v63 = vrot.slane %v1963_v26, 1  ;;  %v27094_v12 = vrot.slane %v22750_v40, 7  ;;  %v1630_v22 = vmax.f32 %v1590_v33, 0.0  ;;  %v1588_v19 = vadd.f32 %v22344_v30, %v1541_v44 }
 0x169   : > { %v1874_v25 = vsel %vm27082_vm3, %v27093_v48, %v27092_v47  ;;  %v27095_v3 = vmov %v27092_v47  ;;  %v1591_v54 = vadd.f32 %v22344_v30, %v1544_v51  ;;  %v1589_v17 = vadd.f32 %v22344_v30, %v1542_v61  ;;  %vm27104_vm3 = vmmov %vm27101_vm0 }
 0x16a   : > { %v1876_v55 = vsel %vm27096_vm14, %v27095_v3, %v27094_v12  ;;  %vm27097_vm12 = vcmask 1046528   ;;  %v27099_v45 = vrot.slane %v22489_v62, 7  ;;  %v27100_v49 = vmov %v27094_v12  ;;  %vm27107_vm14 = vmmov %vm27101_vm0 }
 0x16b   : > { %v2013_v39 = vsel %vm27097_vm12, %v2010_v38, %v2012_v63  ;;  %vm27098_vm7 = vmmov %vm27097_vm12  ;;  %v27102_v23 = vrot.slane %v22575_v10, 7  ;;  %v1750_v30 = vsel %vm23064_vm5, %v1630_v22, 0.0  ;;  %v1631_v44 = vmax.f32 %v1591_v54, 0.0 }
 0x16c   : > { %v2011_v46 = vsel %vm27098_vm7, %v22956_v24, %v2010_v38  ;;  %v1878_v36 = vsel %vm27101_vm0, %v27100_v49, %v27099_v45  ;;  %v27103_v26 = vmov %v27099_v45  ;;  %2052 = vrot.lane.b32.xlu1 %v2013_v39, %s21145_s15  ;;  %v1628_v24 = vmax.f32 %v1588_v19, 0.0  ;;  %vm27110_vm12 = vmmov %vm27101_vm0 }
 0x16d   : > { %v1880_v33 = vsel %vm27104_vm3, %v27103_v26, %v27102_v23  ;;  %2050 = vrot.lane.b32.xlu0 %v2011_v46, %s21145_s15  ;;  %v1629_v51 = vmax.f32 %v1589_v17, 0.0  ;;  %v1909_v61 = vrot.slane %v1750_v30, 7  ;;  %v1964_v40 = vpack.c.bf16 %v1876_v55, %v1874_v25  ;;  %vm27113_vm7 = vmmov %vm27101_vm0 }
 0x16e   : > { %v1965_v38 = vpack.c.bf16 %v1880_v33, %v1878_v36  ;;  %v27105_v47 = vrot.slane %v22948_v35, 7  ;;  %v27106_v48 = vmov %v27102_v23  ;;  %v1748_v12 = vsel %vm23079_vm1, %v1628_v24, 0.0 }
 0x16f   : > { %v1751_v3 = vsel %vm23088_vm11, %v1631_v44, 0.0  ;;  %v1749_v22 = vsel %vm23097_vm10, %v1629_v51, 0.0  ;;  %v27108_v19 = vrot.slane %v23009_v13, 7  ;;  %v1905_v54 = vrot.slane %v1748_v12, 7 }
 0x170   : > { %v1882_v62 = vsel %vm27107_vm14, %v27106_v48, %v27105_v47  ;;  %v27109_v25 = vmov %v27105_v47  ;;  %v1771_v17 = vpack.c.bf16 %v1751_v3, %v1750_v30  ;;  %v1911_v10 = vrot.slane %v1751_v3, 7  ;;  %vm27118_vm14 = vmmov %vm27113_vm7 }
 0x171   : > { %v1884_v55 = vsel %vm27110_vm12, %v27109_v25, %v27108_v19  ;;  %v1770_v39 = vpack.c.bf16 %v1749_v22, %v1748_v12  ;;  %v1907_v46 = vrot.slane %v1749_v22, 7  ;;  %v2014_v45 = vrot.slane %v1964_v40, 1  ;;  %vm27121_vm12 = vmmov %vm27113_vm7 }
 0x172   : > { %v2016_v49 = vrot.slane %v1965_v38, 1  ;;  %v27111_v36 = vrot.slane %v22893_v31, 7  ;;  %v27112_v23 = vmov %v27108_v19  ;;  %vm27114_vm0 = vcmask 523264  }
 0x173   : > { %1792 = vst.msk [vmem:[#allocation2 + $0xb0] sm:$0xff] %vm27114_vm0, %v1771_v17  ;;  %vm27115_vm3 = vmmov %vm27114_vm0  ;;  %v27116_v35 = vrot.slane %v22962_v53, 7  ;;  %v1966_v24 = vpack.c.bf16 %v1884_v55, %v1882_v62  ;;  %v27119_v44 = vrot.slane %v23039_v4, 7  ;;  %v27122_v13 = vrot.slane %v23051_v9, 7 }
 0x174   : > { %v1886_v26 = vsel %vm27113_vm7, %v27112_v23, %v27111_v36  ;;  %1791 = vst.msk [vmem:[#allocation2 + $0xa8] sm:$0xff] %vm27115_vm3, %v1770_v39  ;;  %v27117_v33 = vmov %v27111_v36  ;;  %vm27124_vm0 = vcmask 1046528   ;;  %v27126_v53 = vrot.slane %v23027_v58, 7 }
 0x175   : > { %v1888_v30 = vsel %vm27118_vm14, %v27117_v33, %v27116_v35  ;;  %v27120_v51 = vmov %v27116_v35  ;;  %v27123_v38 = vmov %v27119_v44  ;;  %v2017_v48 = vsel %vm27124_vm0, %v2014_v45, %v2016_v49  ;;  %vm27125_vm3 = vmmov %vm27124_vm0  ;;  %v2158_v35 = vld [vmem:[#allocation2] sm:$0xf0] }
 0x176   : > { %v1890_v40 = vsel %vm27121_vm12, %v27120_v51, %v27119_v44  ;;  %v1892_v47 = vsel %vm27113_vm7, %v27123_v38, %v27122_v13  ;;  %v2015_v12 = vsel %vm27125_vm3, %v2012_v63, %v2014_v45  ;;  %v1967_v31 = vpack.c.bf16 %v1888_v30, %v1886_v26  ;;  %2056 = vrot.lane.b32.xlu1 %v2017_v48, %s21145_s15  ;;  %vm27128_vm14 = vmmov %vm27113_vm7  ;;  %v23269_v48 = vld [vmem:[#allocation2] sm:$0xff] }
 0x177   : > { %v1968_v3 = vpack.c.bf16 %v1892_v47, %v1890_v40  ;;  %2054 = vrot.lane.b32.xlu0 %v2015_v12, %s21145_s15  ;;  %v2018_v62 = vrot.slane %v1966_v24, 1  ;;  %v27127_v22 = vmov %v27122_v13  ;;  %v27129_v4 = vrot.slane %v23047_v28, 7  ;;  %vm27131_vm12 = vmmov %vm27113_vm7 }
 0x178   : > { %v1894_v19 = vsel %vm27128_vm14, %v27127_v22, %v27126_v53  ;;  %v27130_v25 = vmov %v27126_v53  ;;  %v2020_v39 = vrot.slane %v1967_v31, 1  ;;  %vm27133_vm0 = vmmov %vm27113_vm7  ;;  %vm26448_vm11 = vcmask 1043456   ;;  %v20769_v53 = vld [vmem:[%s26243_s2 + $0x8] sm:$0xff]  }
 0x179   : > { %v1896_v55 = vsel %vm27131_vm12, %v27130_v25, %v27129_v4  ;;  %v27132_v63 = vmov %v27129_v4  ;;  %v2022_v45 = vrot.slane %v1968_v3, 1  ;;  %v1900_v9 = vsel %vm27133_vm0, %v1897_v5, %v1899_v29  ;;  %vm27134_vm14 = vmmov %vm27133_vm0  ;;  %v21121_v25 = vld [vmem:[%s26243_s2] sm:$0xff]  }
 0x17a   : > { %v1898_v17 = vsel %vm27113_vm7, %v27132_v63, %v1897_v5  ;;  %v1969_v36 = vpack.c.bf16 %v1896_v55, %v1894_v19  ;;  %v2019_v23 = vsel %vm27125_vm3, %v2016_v49, %v2018_v62  ;;  %v1902_v28 = vsel %vm27134_vm14, %v1899_v29, %v1901_v6  ;;  %vm27135_vm12 = vmmov %vm27133_vm0  ;;  %v20770_v63 = vld [vmem:[%s26243_s2 + $0x10] sm:$0xff]  }
 0x17b   : > { %v1970_v58 = vpack.c.bf16 %v1900_v9, %v1898_v17  ;;  %v1904_v26 = vsel %vm27135_vm12, %v1901_v6, %v1903_v42  ;;  %vm27136_vm7 = vmmov %vm27125_vm3  ;;  %2058 = vrot.lane.b32.xlu0 %v2019_v23, %s21145_s15  ;;  %v1906_v29 = vsel %vm27133_vm0, %v1903_v42, %v1905_v54  ;;  %v2199_v1 = vrot.slane %v2158_v35, 4 }
 0x17c   : > { %v2021_v32 = vsel %vm27136_vm7, %v2018_v62, %v2020_v39  ;;  %vm27137_vm10 = vmmov %vm27125_vm3  ;;  %v2024_v33 = vrot.slane %v1969_v36, 1  ;;  %v1971_v49 = vpack.c.bf16 %v1904_v26, %v1902_v28  ;;  %v2200_v42 = vrot.slane %v23269_v48, 4 }
 0x17d   : > { %v2023_v5 = vsel %vm27137_vm10, %v2020_v39, %v2022_v45  ;;  %2060 = vrot.lane.b32.xlu1 %v2021_v32, %s21145_s15  ;;  %v2026_v2 = vrot.slane %v1970_v58, 1  ;;  %vm27138_vm3 = vmmov %vm27133_vm0  ;;  %v20772_v58 = vld [vmem:[%s26243_s2 + $0x20] sm:$0xff]  }
 0x17e   : > { %v1908_v21 = vsel %vm27138_vm3, %v1905_v54, %v1907_v46  ;;  %vm27139_vm14 = vmmov %vm27133_vm0  ;;  %v2028_v24 = vrot.slane %v1971_v49, 1  ;;  %v20774_v49 = vld [vmem:[%s26243_s2 + $0x30] sm:$0xff]  }
 0x17f   : > { %v1910_v6 = vsel %vm27139_vm14, %v1907_v46, %v1909_v61  ;;  %vm27140_vm12 = vmmov %vm27136_vm7  ;;  %v1972_v44 = vpack.c.bf16 %v1908_v21, %v1906_v29  ;;  %v2027_v40 = vsel %vm27136_vm7, %v2024_v33, %v2026_v2  ;;  %2062 = vrot.lane.b32.xlu0 %v2023_v5, %s21145_s15  ;;  %vm26444_vm14 = vcmask 1048064  }
 0x180   : > { %v2025_v30 = vsel %vm27140_vm12, %v2022_v45, %v2024_v33  ;;  %vm27141_vm10 = vmmov %vm27133_vm0  ;;  %v20771_v45 = vld [vmem:[%s26243_s2 + $0x18] sm:$0xff]   ;;  %v20773_v33 = vld [vmem:[%s26243_s2 + $0x28] sm:$0xff]   ;;  %vm26443_vm12 = vcmask 1047040  }
 0x181   : > { %v1912_v51 = vsel %vm27141_vm10, %v1909_v61, %v1911_v10  ;;  %vm27142_vm1 = vmmov %vm27136_vm7  ;;  %v2030_v47 = vrot.slane %v1972_v44, 1  ;;  %2064 = vrot.lane.b32.xlu1 %v2025_v30, %s21145_s15  ;;  %v2201_v61 = vsel %vm26448_vm11, %v2199_v1, %v2200_v42  ;;  %vm2503_vm10 = vcmask 1044480  }
 0x182   : > { %v1973_v13 = vpack.c.bf16 %v1912_v51, %v1910_v6  ;;  %v2029_v38 = vsel %vm27142_vm1, %v2026_v2, %v2028_v24  ;;  %vm27143_vm0 = vmmov %vm27142_vm1  ;;  %17560 = vmatprep.mubr.bf16.mxu1 %v2201_v61  ;;  %vm26446_vm1 = vcmask 1048071   ;;  %v20775_v51 = vld [vmem:[%s26243_s2 + $0x38] sm:$0xff]   ;;  %vm26447_vm7 = vcmask 1042432  }
 0x183   : > { %v2031_v46 = vsel %vm27143_vm0, %v2028_v24, %v2030_v47  ;;  %vm27144_vm3 = vmmov %vm27143_vm0  ;;  %2066 = vrot.lane.b32.xlu0 %v2027_v40, %s21145_s15  ;;  %vm26445_vm0 = vcmask 1041408  }
 0x184   : > { %v2032_v54 = vrot.slane %v1973_v13, 1  ;;  %v23341_v13 = vld [vmem:[%s26243_s2 + $0x80] sm:$0xff]  }
 0x185   : > { %2068 = vrot.lane.b32.xlu1 %v2029_v38, %s21145_s15 }
 0x186   : > { %v2033_v10 = vsel %vm27144_vm3, %v2030_v47, %v2032_v54  ;;  %vm27145_vm3 = vcmask 1040384  }
 0x187   : > { %2070 = vrot.lane.b32.xlu0 %v2031_v46, %s21145_s15 }
 0x189   : > { %2072 = vrot.lane.b32.xlu1 %v2033_v10, %s21145_s15 }
 0x18b   : > { %2074 = vrot.lane.b32.xlu0 %v2032_v54, %s21145_s15 }
 0x18c   : > { %v2035_v12 = vpop.permute.xlu0 %2034 }
 0x18d   : > { %2098 = vst.msk [vmem:[#allocation2 + $0x10] sm:$0x80] %vm26446_vm1, %v2035_v12 }
 0x190   : > { %v2037_v31 = vpop.permute.xlu0 %2036 }
 0x191   : > { %2100 = vst.msk [vmem:[#allocation2 + $0x18] sm:$0xff] %vm26444_vm14, %v2037_v31 }
 0x194   : > { %v23284_v3 = vld [vmem:[#allocation2 + $0x10] sm:$0xff] }
 0x195   : > { %v2202_v62 = vrot.slane %v23284_v3, 4 }
 0x197   : > { %v2203_v19 = vsel %vm26448_vm11, %v2200_v42, %v2202_v62 }
 0x198   : > { %17561 = vmatmul.mubr.bf16.vlgmr.msra.gmra.mrb[20].mxu1 %v2203_v19  ;;  %v23292_v4 = vld [vmem:[#allocation2 + $0x18] sm:$0xff] }
 0x199   : > { %17601 = vmatpush3.bf16.msra.mxu1 %v21121_v25  ;;  %v2204_v55 = vrot.slane %v23292_v4, 4 }
 0x19a   : > { %17602 = vmatprep.subr.bf16.mxu1 %v20769_v53 }
 0x19b   : > { %v2205_v39 = vsel %vm26448_vm11, %v2202_v62, %v2204_v55 }
 0x19c   : > { %17564 = vmatprep.mubr.bf16.mxu1 %v2205_v39 }
 0x19d   : > { %17603 = vmatpush3.bf16.msra.mxu1 %v20769_v53 }
 0x19e   : > { %v2039_v22 = vpop.permute.xlu1 %2038  ;;  %17604 = vmatprep.subr.bf16.mxu1 %v20770_v63 }
 0x19f   : > { %2101 = vst.msk [vmem:[#allocation2 + $0x20] sm:$0xff] %vm26444_vm14, %v2039_v22 }
 0x1a1   : > { %17605 = vmatpush3.bf16.msra.mxu1 %v20770_v63 }
 0x1a2   : > { %v2041_v17 = vpop.permute.xlu1 %2040  ;;  %17606 = vmatprep.subr.bf16.mxu1 %v20771_v45 }
 0x1a3   : > { %2102 = vst.msk [vmem:[#allocation2 + $0x28] sm:$0xff] %vm26444_vm14, %v2041_v17 }
 0x1a5   : > { %17607 = vmatpush3.bf16.msra.mxu1 %v20771_v45 }
 0x1a6   : > { %v23306_v36 = vld [vmem:[#allocation2 + $0x20] sm:$0xff]  ;;  %17608 = vmatprep.subr.bf16.mxu1 %v20772_v58 }
 0x1a7   : > { %v2206_v9 = vrot.slane %v23306_v36, 4 }
 0x1a9   : > { %v2207_v23 = vsel %vm26448_vm11, %v2204_v55, %v2206_v9  ;;  %17609 = vmatpush3.bf16.msra.mxu1 %v20772_v58 }
 0x1aa   : > { %17565 = vmatmul.mubr.bf16.gmra.mrb[24].mxu1 %v2207_v23  ;;  %v23313_v26 = vld [vmem:[#allocation2 + $0x28] sm:$0xff]  ;;  %17610 = vmatprep.subr.bf16.mxu1 %v20773_v33 }
 0x1ab   : > { %v2208_v32 = vrot.slane %v23313_v26, 4 }
 0x1ad   : > { %v2209_v5 = vsel %vm26448_vm11, %v2206_v9, %v2208_v32  ;;  %17611 = vmatpush3.bf16.msra.mxu1 %v20773_v33 }
 0x1ae   : > { %17568 = vmatprep.mubr.bf16.mxu1 %v2209_v5  ;;  %17612 = vmatprep.subr.bf16.mxu1 %v20774_v49 }
 0x1b1   : > { %17613 = vmatpush3.bf16.msra.mxu1 %v20774_v49 }
 0x1b2   : > { %17614 = vmatprep.subr.bf16.mxu1 %v20775_v51 }
 0x1b4   : > { %v2043_v28 = vpop.permute.xlu0 %2042 }
 0x1b5   : > { %v2045_v35 = vpop.permute.xlu1 %2044  ;;  %2103 = vst.msk [vmem:[#allocation2 + $0x30] sm:$0xff] %vm26444_vm14, %v2043_v28  ;;  %17615 = vmatpush3.bf16.msra.mxu1 %v20775_v51 }
 0x1b6   : > { %2104 = vst.msk [vmem:[#allocation2 + $0x38] sm:$0xff] %vm26444_vm14, %v2045_v35  ;;  %17656 = vmatprep.subr.bf16.mxu1 %v23341_v13 }
 0x1bc   : > { %v23325_v2 = vld [vmem:[#allocation2 + $0x30] sm:$0xff] }
 0x1bd   : > { %v2210_v29 = vrot.slane %v23325_v2, 4  ;;  %v23328_v21 = vld [vmem:[#allocation2 + $0x38] sm:$0xff] }
 0x1be   : > { %v2212_v30 = vrot.slane %v23328_v21, 4 }
 0x1bf   : > { %v2211_v44 = vsel %vm26448_vm11, %v2208_v32, %v2210_v29 }
 0x1c0   : > { %17569 = vmatmul.mubr.bf16.gmra.mrb[28].mxu1 %v2211_v44  ;;  %v2213_v40 = vsel %vm26448_vm11, %v2210_v29, %v2212_v30 }
 0x1c1   : > { %17572 = vmatprep.mubr.bf16.mxu1 %v2213_v40 }
 0x1c7   : > { %v2049_v6 = vpop.permute.xlu1 %2048 }
 0x1c8   : > { %2106 = vst.msk [vmem:[#allocation2 + $0x48] sm:$0xff] %vm26444_vm14, %v2049_v6  ;;  %v2047_v24 = vpop.permute.xlu0 %2046 }
 0x1c9   : > { %2105 = vst.msk [vmem:[#allocation2 + $0x40] sm:$0xff] %vm26444_vm14, %v2047_v24 }
 0x1cf   : > { %v23343_v38 = vld [vmem:[#allocation2 + $0x48] sm:$0xff] }
 0x1d0   : > { %v23345_v47 = vld [vmem:[#allocation2 + $0x40] sm:$0xff]  ;;  %v2216_v1 = vrot.slane %v23343_v38, 4 }
 0x1d1   : > { %v2214_v42 = vrot.slane %v23345_v47, 4 }
 0x1d3   : > { %v2215_v54 = vsel %vm26448_vm11, %v2212_v30, %v2214_v42  ;;  %v2217_v46 = vsel %vm26448_vm11, %v2214_v42, %v2216_v1 }
 0x1d4   : > { %17573 = vmatmul.mubr.bf16.gmra.mrb[32].mxu1 %v2215_v54 }
 0x1d5   : > { %17576 = vmatprep.mubr.bf16.mxu1 %v2217_v46 }
 0x1de   : > { %v2053_v61 = vpop.permute.xlu1 %2052 }
 0x1df   : > { %v2051_v10 = vpop.permute.xlu0 %2050  ;;  %2108 = vst.msk [vmem:[#allocation2 + $0x58] sm:$0xff] %vm26444_vm14, %v2053_v61 }
 0x1e0   : > { %2107 = vst.msk [vmem:[#allocation2 + $0x50] sm:$0xff] %vm26444_vm14, %v2051_v10 }
 0x1e6   : > { %v23358_v53 = vld [vmem:[#allocation2 + $0x58] sm:$0xff] }
 0x1e7   : > { %v23356_v62 = vld [vmem:[#allocation2 + $0x50] sm:$0xff]  ;;  %v2220_v19 = vrot.slane %v23358_v53, 4 }
 0x1e8   : > { %v2057_v12 = vpop.permute.xlu1 %2056  ;;  %v2218_v22 = vrot.slane %v23356_v62, 4 }
 0x1e9   : > { %v2055_v31 = vpop.permute.xlu0 %2054  ;;  %2110 = vst.msk [vmem:[#allocation2 + $0x68] sm:$0xff] %vm26444_vm14, %v2057_v12 }
 0x1ea   : > { %2109 = vst.msk [vmem:[#allocation2 + $0x60] sm:$0xff] %vm26444_vm14, %v2055_v31  ;;  %v2219_v63 = vsel %vm26448_vm11, %v2216_v1, %v2218_v22  ;;  %v2221_v17 = vsel %vm26448_vm11, %v2218_v22, %v2220_v19 }
 0x1eb   : > { %17577 = vmatmul.mubr.bf16.gmra.mrb[36].mxu1 %v2219_v63  ;;  %v2121_v63 = vld [vmem:[#allocation2] sm:$0xf8] }
 0x1ec   : > { %17580 = vmatprep.mubr.bf16.mxu1 %v2221_v17 }
 0x1ed   : > { %v2059_v55 = vpop.permute.xlu0 %2058 }
 0x1ee   : > { %2111 = vst.msk [vmem:[#allocation2 + $0x70] sm:$0xff] %vm26444_vm14, %v2059_v55 }
 0x1ef   : > { %v2061_v25 = vpop.permute.xlu1 %2060 }
 0x1f0   : > { %2112 = vst.msk [vmem:[#allocation2 + $0x78] sm:$0xff] %vm26444_vm14, %v2061_v25  ;;  %v23368_v23 = vld [vmem:[#allocation2 + $0x68] sm:$0xff] }
 0x1f1   : > { %v2063_v39 = vpop.permute.xlu0 %2062  ;;  %v23366_v9 = vld [vmem:[#allocation2 + $0x60] sm:$0xff]  ;;  %v2224_v28 = vrot.slane %v23368_v23, 4 }
 0x1f2   : > { %2113 = vst.msk [vmem:[#allocation2 + $0x80] sm:$0xff] %vm26444_vm14, %v2063_v39  ;;  %v2222_v58 = vrot.slane %v23366_v9, 4 }
 0x1f3   : > { %v2065_v45 = vpop.permute.xlu1 %2064 }
 0x1f4   : > { %2114 = vst.msk [vmem:[#allocation2 + $0x88] sm:$0xff] %vm26444_vm14, %v2065_v45  ;;  %v2223_v5 = vsel %vm26448_vm11, %v2220_v19, %v2222_v58  ;;  %v2225_v33 = vsel %vm26448_vm11, %v2222_v58, %v2224_v28  ;;  %v2504_v45 = vrot.slane %v2121_v63, 3  ;;  %v20782_v63 = vld [vmem:[%s26243_s2 + $0xb0] sm:$0xff]  }
 0x1f5   : > { %v2067_v35 = vpop.permute.xlu0 %2066  ;;  %17581 = vmatmul.mubr.bf16.gmra.mrb[40].mxu1 %v2223_v5  ;;  %v23378_v49 = vld [vmem:[#allocation2 + $0x70] sm:$0xff]  ;;  %v2507_v5 = vrot.slane %v23284_v3, 3 }
 0x1f6   : > { %2115 = vst.msk [vmem:[#allocation2 + $0x90] sm:$0xff] %vm26444_vm14, %v2067_v35  ;;  %17584 = vmatprep.mubr.bf16.mxu1 %v2225_v33  ;;  %v2226_v24 = vrot.slane %v23378_v49, 4  ;;  %v2509_v33 = vrot.slane %v23292_v4, 3 }
 0x1f7   : > { %v2069_v32 = vpop.permute.xlu1 %2068  ;;  %v23380_v29 = vld [vmem:[#allocation2 + $0x78] sm:$0xff] }
 0x1f8   : > { %2116 = vst.msk [vmem:[#allocation2 + $0x98] sm:$0xff] %vm26444_vm14, %v2069_v32  ;;  %v2228_v44 = vrot.slane %v23380_v29, 4  ;;  %v2227_v40 = vsel %vm26448_vm11, %v2224_v28, %v2226_v24  ;;  %v2505_v28 = vrot.slane %v23269_v48, 3 }
 0x1f9   : > { %v2071_v6 = vpop.permute.xlu0 %2070  ;;  %v23389_v42 = vld [vmem:[#allocation2 + $0x80] sm:$0xff] }
 0x1fa   : > { %2117 = vst.msk [vmem:[#allocation2 + $0xa0] sm:$0xff] %vm26444_vm14, %v2071_v6  ;;  %v2229_v1 = vsel %vm26448_vm11, %v2226_v24, %v2228_v44  ;;  %v2230_v46 = vrot.slane %v23389_v42, 4  ;;  %v2506_v35 = vsel %vm2503_vm10, %v2504_v45, %v2505_v28  ;;  %v20777_v6 = vld [vmem:[%s26243_s2 + $0x88] sm:$0xff]   ;;  %v2510_v24 = vsel %vm2503_vm10, %v2507_v5, %v2509_v33  ;;  %v20783_v45 = vld [vmem:[%s26243_s2 + $0xb8] sm:$0xff]  }
 0x1fb   : > { %v2073_v30 = vpop.permute.xlu1 %2072  ;;  %v23391_v54 = vld [vmem:[#allocation2 + $0x88] sm:$0xff] }
 0x1fc   : > { %2118 = vst.msk [vmem:[#allocation2 + $0xa8] sm:$0xff] %vm26444_vm14, %v2073_v30  ;;  %v2232_v61 = vrot.slane %v23391_v54, 4  ;;  %v2231_v10 = vsel %vm26448_vm11, %v2228_v44, %v2230_v46  ;;  %v2508_v30 = vsel %vm2503_vm10, %v2505_v28, %v2507_v5  ;;  %v20778_v44 = vld [vmem:[%s26243_s2 + $0x90] sm:$0xff]   ;;  %v2525_v5 = vrot.slane %v23358_v53, 3  ;;  %vm27147_vm14 = vmmov %vm27145_vm3 }
 0x1fd   : > { %v2075_v51 = vpop.permute.xlu0 %2074  ;;  %17585 = vmatmul.mubr.bf16.gmra.mrb[44].mxu1 %v2227_v40  ;;  %v23397_v31 = vld [vmem:[#allocation2 + $0x90] sm:$0xff]  ;;  %v2513_v40 = vrot.slane %v23313_v26, 3 }
 0x1fe   : > { %2120 = vst.msk [vmem:[#allocation2 + $0xb0] sm:$0x7f] %vm26443_vm12, %v2075_v51  ;;  %17588 = vmatprep.mubr.bf16.mxu1 %v2229_v1  ;;  %v2233_v12 = vsel %vm26448_vm11, %v2230_v46, %v2232_v61  ;;  %v2234_v19 = vrot.slane %v23397_v31, 4  ;;  %v2511_v51 = vrot.slane %v23306_v36, 3  ;;  %v20779_v1 = vld [vmem:[%s26243_s2 + $0x98] sm:$0xff]   ;;  %vm27146_vm12 = vmmov %vm27145_vm3 }
 0x1ff   : > { %v23399_v22 = vld [vmem:[#allocation2 + $0x98] sm:$0xff] }
 0x200   : > { %v2236_v25 = vrot.slane %v23399_v22, 4  ;;  %v2235_v55 = vsel %vm26448_vm11, %v2232_v61, %v2234_v19  ;;  %v2512_v46 = vsel %vm2503_vm10, %v2509_v33, %v2511_v51  ;;  %v20780_v61 = vld [vmem:[%s26243_s2 + $0xa0] sm:$0xff]  }
 0x201   : > { %v2159_v39 = vld [vmem:[#allocation2 + $0xa0] sm:$0xf] }
 0x202   : > { %v2237_v17 = vsel %vm26448_vm11, %v2234_v19, %v2236_v25  ;;  %v2238_v58 = vrot.slane %v2159_v39, 4  ;;  %v20781_v19 = vld [vmem:[%s26243_s2 + $0xa8] sm:$0xff]   ;;  %v2521_v39 = vrot.slane %v23343_v38, 3 }
 0x204   : > { %v2239_v32 = vsel %vm26448_vm11, %v2236_v25, %v2238_v58 }
 0x205   : > { %17589 = vmatmul.mubr.bf16.gmra.mrb[48].mxu1 %v2231_v10  ;;  %v2515_v10 = vrot.slane %v23325_v2, 3 }
 0x206   : > { %17592 = vmatprep.mubr.bf16.mxu1 %v2233_v12  ;;  %v2517_v12 = vrot.slane %v23328_v21, 3 }
 0x207   : > { %v2516_v25 = vsel %vm2503_vm10, %v2513_v40, %v2515_v10 }
 0x20d   : > { %17593 = vmatmul.mubr.bf16.gmra.mrb[52].mxu1 %v2235_v55  ;;  %v2518_v55 = vsel %vm2503_vm10, %v2515_v10, %v2517_v12  ;;  %v2537_v10 = vrot.slane %v23391_v54, 3 }
 0x20e   : > { %17596 = vmatprep.mubr.bf16.mxu1 %v2237_v17  ;;  %v2519_v17 = vrot.slane %v23345_v47, 3 }
 0x210   : > { %v2520_v58 = vsel %vm2503_vm10, %v2517_v12, %v2519_v17  ;;  %v2522_v28 = vsel %vm2503_vm10, %v2519_v17, %v2521_v39  ;;  %v2806_v17 = vld [vmem:[#allocation2] sm:$0xe0] }
 0x215   : > { %17597 = vmatmul.mubr.bf16.gmra.mrb[56].mxu1 %v2239_v32  ;;  %v2523_v32 = vrot.slane %v23356_v62, 3 }
 0x216   : > { %17616 = vmatprep.mubr.bf16.mxu1 %v2506_v35  ;;  %v20784_v35 = vld [vmem:[%s26243_s2 + $0xc0] sm:$0xff]  }
 0x217   : > { %v2524_v33 = vsel %vm2503_vm10, %v2521_v39, %v2523_v32 }
 0x21d   : > { %17617 = vmatmul.mubr.bf16.vlgmr.msra.gmra.mrb[20].mxu1 %v2508_v30  ;;  %v2527_v30 = vrot.slane %v23366_v9, 3 }
 0x21e   : > { %17657 = vmatpush3.bf16.msra.mxu1 %v23341_v13  ;;  %17620 = vmatprep.mubr.bf16.mxu1 %v2510_v24  ;;  %v2514_v13 = vsel %vm2503_vm10, %v2511_v51, %v2513_v40  ;;  %v2529_v24 = vrot.slane %v23368_v23, 3  ;;  %v2531_v40 = vrot.slane %v23378_v49, 3 }
 0x21f   : > { %17658 = vmatprep.subr.bf16.mxu1 %v20777_v6 }
 0x220   : > { %v2530_v51 = vsel %vm2503_vm10, %v2527_v30, %v2529_v24 }
 0x222   : > { %17659 = vmatpush3.bf16.msra.mxu1 %v20777_v6  ;;  %v2526_v6 = vsel %vm2503_vm10, %v2523_v32, %v2525_v5  ;;  %v2829_v32 = vrot.slane %v23269_v48, 5 }
 0x223   : > { %17660 = vmatprep.subr.bf16.mxu1 %v20778_v44 }
 0x225   : > { %17621 = vmatmul.mubr.bf16.gmra.mrb[24].mxu1 %v2512_v46  ;;  %v2532_v46 = vsel %vm2503_vm10, %v2529_v24, %v2531_v40  ;;  %v20785_v24 = vld [vmem:[%s26243_s2 + $0xc8] sm:$0xff]  }
 0x226   : > { %17624 = vmatprep.mubr.bf16.mxu1 %v2514_v13  ;;  %17661 = vmatpush3.bf16.msra.mxu1 %v20778_v44  ;;  %v2528_v44 = vsel %vm2503_vm10, %v2525_v5, %v2527_v30  ;;  %v2833_v30 = vrot.slane %v23292_v4, 5 }
 0x227   : > { %17662 = vmatprep.subr.bf16.mxu1 %v20779_v1 }
 0x22a   : > { %17663 = vmatpush3.bf16.msra.mxu1 %v20779_v1  ;;  %v2533_v1 = vrot.slane %v23380_v29, 3 }
 0x22b   : > { %17664 = vmatprep.subr.bf16.mxu1 %v20780_v61 }
 0x22c   : > { %v2534_v13 = vsel %vm2503_vm10, %v2531_v40, %v2533_v1  ;;  %v2835_v40 = vrot.slane %v23306_v36, 5 }
 0x22d   : > { %17625 = vmatmul.mubr.bf16.gmra.mrb[28].mxu1 %v2516_v25  ;;  %v2539_v25 = vrot.slane %v23397_v31, 3 }
 0x22e   : > { %17628 = vmatprep.mubr.bf16.mxu1 %v2518_v55  ;;  %17665 = vmatpush3.bf16.msra.mxu1 %v20780_v61  ;;  %v2535_v61 = vrot.slane %v23389_v42, 3  ;;  %v2541_v55 = vrot.slane %v23399_v22, 3 }
 0x22f   : > { %17666 = vmatprep.subr.bf16.mxu1 %v20781_v19 }
 0x230   : > { %v2536_v12 = vsel %vm2503_vm10, %v2533_v1, %v2535_v61  ;;  %v2542_v39 = vsel %vm2503_vm10, %v2539_v25, %v2541_v55  ;;  %v2837_v1 = vrot.slane %v23313_v26, 5 }
 0x232   : > { %17667 = vmatpush3.bf16.msra.mxu1 %v20781_v19  ;;  %v2538_v19 = vsel %vm2503_vm10, %v2535_v61, %v2537_v10  ;;  %v20788_v61 = vld [vmem:[%s26243_s2 + $0xe0] sm:$0xff]  }
 0x233   : > { %17668 = vmatprep.subr.bf16.mxu1 %v20782_v63 }
 0x235   : > { %17629 = vmatmul.mubr.bf16.gmra.mrb[32].mxu1 %v2520_v58  ;;  %v2828_v58 = vrot.slane %v2806_v17, 5  ;;  %v2843_v17 = vrot.slane %v23345_v47, 5 }
 0x236   : > { %17632 = vmatprep.mubr.bf16.mxu1 %v2522_v28  ;;  %17669 = vmatpush3.bf16.msra.mxu1 %v20782_v63  ;;  %v2540_v63 = vsel %vm2503_vm10, %v2537_v10, %v2539_v25  ;;  %v2839_v10 = vrot.slane %v23325_v2, 5 }
 0x237   : > { %17670 = vmatprep.subr.bf16.mxu1 %v20783_v45  ;;  %v2830_v5 = vsel %vm26447_vm7, %v2828_v58, %v2829_v32 }
 0x238   : > { %v23511_v25 = vsel %vm26447_vm7, %v2837_v1, %v2839_v10 }
 0x23a   : > { %17671 = vmatpush3.bf16.msra.mxu1 %v20783_v45  ;;  %v2141_v45 = vld [vmem:[#allocation2 + $0xa0] sm:$0x7] }
 0x23b   : > { %17712 = vmatprep.subr.bf16.mxu1 %v20784_v35  ;;  %v2543_v28 = vrot.slane %v2141_v45, 3  ;;  %v20791_v45 = vld [vmem:[%s26243_s2 + $0xf8] sm:$0xff]  }
 0x23d   : > { %17633 = vmatmul.mubr.bf16.gmra.mrb[36].mxu1 %v2524_v33  ;;  %v2544_v33 = vsel %vm2503_vm10, %v2541_v55, %v2543_v28 }
 0x23e   : > { %17636 = vmatprep.mubr.bf16.mxu1 %v2526_v6  ;;  %v23473_v6 = vrot.slane %v23284_v3, 5 }
 0x240   : > { %v23483_v48 = vsel %vm26447_vm7, %v23473_v6, %v2833_v30 }
 0x245   : > { %17637 = vmatmul.mubr.bf16.gmra.mrb[40].mxu1 %v2528_v44  ;;  %v2832_v44 = vsel %vm26447_vm7, %v2829_v32, %v23473_v6  ;;  %v20792_v32 = vld [vmem:[%s26243_s2 + $0x100] sm:$0xff]  }
 0x246   : > { %17640 = vmatprep.mubr.bf16.mxu1 %v2530_v51  ;;  %v20786_v51 = vld [vmem:[%s26243_s2 + $0xd0] sm:$0xff]  }
 0x24d   : > { %17641 = vmatmul.mubr.bf16.gmra.mrb[44].mxu1 %v2532_v46  ;;  %v20787_v46 = vld [vmem:[%s26243_s2 + $0xd8] sm:$0xff]  }
 0x24e   : > { %17644 = vmatprep.mubr.bf16.mxu1 %v2534_v13  ;;  %v23495_v13 = vsel %vm26447_vm7, %v2833_v30, %v2835_v40 }
 0x255   : > { %17645 = vmatmul.mubr.bf16.gmra.mrb[48].mxu1 %v2536_v12  ;;  %v2841_v12 = vrot.slane %v23328_v21, 5 }
 0x256   : > { %17648 = vmatprep.mubr.bf16.mxu1 %v2538_v19  ;;  %v20789_v19 = vld [vmem:[%s26243_s2 + $0xe8] sm:$0xff]  }
 0x257   : > { %v23515_v55 = vsel %vm26447_vm7, %v2839_v10, %v2841_v12  ;;  %v23527_v58 = vsel %vm26447_vm7, %v2841_v12, %v2843_v17 }
 0x25d   : > { %17649 = vmatmul.mubr.bf16.gmra.mrb[52].mxu1 %v2540_v63  ;;  %v20790_v63 = vld [vmem:[%s26243_s2 + $0xf0] sm:$0xff]  }
 0x25e   : > { %17652 = vmatprep.mubr.bf16.mxu1 %v2542_v39  ;;  %v2845_v39 = vrot.slane %v23343_v38, 5 }
 0x260   : > { %v23531_v28 = vsel %vm26447_vm7, %v2843_v17, %v2845_v39 }
 0x265   : > { %17653 = vmatmul.mubr.bf16.gmra.mrb[56].mxu1 %v2544_v33  ;;  %v2849_v33 = vrot.slane %v23358_v53, 5 }
 0x266   : > { %17672 = vmatprep.mubr.bf16.mxu1 %v2830_v5  ;;  %v2847_v5 = vrot.slane %v23356_v62, 5 }
 0x268   : > { %v2848_v30 = vsel %vm26447_vm7, %v2845_v39, %v2847_v5 }
 0x26d   : > { %17673 = vmatmul.mubr.bf16.vlgmr.msra.gmra.mrb[20].mxu1 %v2832_v44  ;;  %v2851_v44 = vrot.slane %v23366_v9, 5 }
 0x26e   : > { %17713 = vmatpush3.bf16.msra.mxu1 %v20784_v35  ;;  %17676 = vmatprep.mubr.bf16.mxu1 %v23483_v48  ;;  %v23499_v35 = vsel %vm26447_vm7, %v2835_v40, %v2837_v1 }
 0x26f   : > { %17714 = vmatprep.subr.bf16.mxu1 %v20785_v24  ;;  %v2852_v40 = vsel %vm26447_vm7, %v2849_v33, %v2851_v44 }
 0x272   : > { %17715 = vmatpush3.bf16.msra.mxu1 %v20785_v24  ;;  %v23541_v24 = vsel %vm26447_vm7, %v2847_v5, %v2849_v33  ;;  %v2865_v5 = vrot.slane %v23399_v22, 5 }
 0x273   : > { %17716 = vmatprep.subr.bf16.mxu1 %v20786_v51 }
 0x275   : > { %17677 = vmatmul.mubr.bf16.gmra.mrb[24].mxu1 %v23495_v13 }
 0x276   : > { %17680 = vmatprep.mubr.bf16.mxu1 %v23499_v35  ;;  %17717 = vmatpush3.bf16.msra.mxu1 %v20786_v51  ;;  %v2853_v51 = vrot.slane %v23368_v23, 5 }
 0x277   : > { %17718 = vmatprep.subr.bf16.mxu1 %v20787_v46 }
 0x278   : > { %v2854_v1 = vsel %vm26447_vm7, %v2851_v44, %v2853_v51 }
 0x27a   : > { %17719 = vmatpush3.bf16.msra.mxu1 %v20787_v46  ;;  %v2855_v46 = vrot.slane %v23378_v49, 5 }
 0x27b   : > { %17720 = vmatprep.subr.bf16.mxu1 %v20788_v61 }
 0x27c   : > { %v2856_v10 = vsel %vm26447_vm7, %v2853_v51, %v2855_v46  ;;  %v2807_v51 = vld [vmem:[#allocation2 + $0xa0] sm:$0x1f] }
 0x27d   : > { %17681 = vmatmul.mubr.bf16.gmra.mrb[28].mxu1 %v23511_v25  ;;  %v2867_v7 = vrot.slane %v2807_v51, 5  ;;  %v20803_v51 = vld [vmem:[%s26243_s2 + $0x158] sm:$0xff]  }
 0x27e   : > { %17684 = vmatprep.mubr.bf16.mxu1 %v23515_v55  ;;  %17721 = vmatpush3.bf16.msra.mxu1 %v20788_v61  ;;  %v2857_v61 = vrot.slane %v23380_v29, 5 }
 0x27f   : > { %17722 = vmatprep.subr.bf16.mxu1 %v20789_v19 }
 0x280   : > { %v2858_v12 = vsel %vm26447_vm7, %v2855_v46, %v2857_v61  ;;  %v3170_v46 = vld [vmem:[#allocation2 + $0x8] sm:$0xe0] }
 0x281   : > { %v3229_v59 = vrot.slane %v3170_v46, 5 }
 0x282   : > { %17723 = vmatpush3.bf16.msra.mxu1 %v20789_v19  ;;  %v2859_v19 = vrot.slane %v23389_v42, 5 }
 0x283   : > { %17724 = vmatprep.subr.bf16.mxu1 %v20790_v63 }
 0x284   : > { %v2860_v17 = vsel %vm26447_vm7, %v2857_v61, %v2859_v19  ;;  %v2868_v61 = vsel %vm26447_vm7, %v2865_v5, %v2867_v7  ;;  %v20796_v7 = vld [vmem:[%s26243_s2 + $0x120] sm:$0xff]  }
 0x285   : > { %17685 = vmatmul.mubr.bf16.gmra.mrb[32].mxu1 %v23527_v58 }
 0x286   : > { %17688 = vmatprep.mubr.bf16.mxu1 %v23531_v28  ;;  %17725 = vmatpush3.bf16.msra.mxu1 %v20790_v63  ;;  %v2861_v63 = vrot.slane %v23391_v54, 5 }
 0x287   : > { %17726 = vmatprep.subr.bf16.mxu1 %v20791_v45 }
 0x288   : > { %v2862_v39 = vsel %vm26447_vm7, %v2859_v19, %v2861_v63  ;;  %v3231_v19 = vsel %vm26447_vm7, %v3229_v59, %v23473_v6  ;;  %v20795_v59 = vld [vmem:[%s26243_s2 + $0x118] sm:$0xff]   ;;  %v20798_v6 = vld [vmem:[%s26243_s2 + $0x130] sm:$0xff]  }
 0x28a   : > { %17727 = vmatpush3.bf16.msra.mxu1 %v20791_v45  ;;  %v2863_v45 = vrot.slane %v23397_v31, 5 }
 0x28b   : > { %17768 = vmatprep.subr.bf16.mxu1 %v20792_v32 }
 0x28c   : > { %v2864_v33 = vsel %vm26447_vm7, %v2861_v63, %v2863_v45  ;;  %v2866_v44 = vsel %vm26447_vm7, %v2863_v45, %v2865_v5  ;;  %v20794_v63 = vld [vmem:[%s26243_s2 + $0x110] sm:$0xff]  }
 0x28d   : > { %17689 = vmatmul.mubr.bf16.gmra.mrb[36].mxu1 %v2848_v30 }
 0x28e   : > { %17692 = vmatprep.mubr.bf16.mxu1 %v23541_v24 }
 0x295   : > { %17693 = vmatmul.mubr.bf16.gmra.mrb[40].mxu1 %v2852_v40 }
 0x296   : > { %17696 = vmatprep.mubr.bf16.mxu1 %v2854_v1 }
 0x29d   : > { %17697 = vmatmul.mubr.bf16.gmra.mrb[44].mxu1 %v2856_v10 }
 0x29e   : > { %17700 = vmatprep.mubr.bf16.mxu1 %v2858_v12 }
 0x2a5   : > { %17701 = vmatmul.mubr.bf16.gmra.mrb[48].mxu1 %v2860_v17 }
 0x2a6   : > { %17704 = vmatprep.mubr.bf16.mxu1 %v2862_v39 }
 0x2ad   : > { %17705 = vmatmul.mubr.bf16.gmra.mrb[52].mxu1 %v2864_v33 }
 0x2ae   : > { %17708 = vmatprep.mubr.bf16.mxu1 %v2866_v44 }
 0x2b5   : > { %17709 = vmatmul.mubr.bf16.gmra.mrb[56].mxu1 %v2868_v61 }
 0x2b6   : > { %17728 = vmatprep.mubr.bf16.mxu1 %v3231_v19  ;;  %v20804_v19 = vld [vmem:[%s26243_s2 + $0x160] sm:$0xff]  }
 0x2bd   : > { %17729 = vmatmul.mubr.bf16.vlgmr.msra.gmra.mrb[20].mxu1 %v23483_v48  ;;  %v20799_v48 = vld [vmem:[%s26243_s2 + $0x138] sm:$0xff]  }
 0x2be   : > { %17769 = vmatpush3.bf16.msra.mxu1 %v20792_v32  ;;  %17732 = vmatprep.mubr.bf16.mxu1 %v23495_v13  ;;  %v20800_v13 = vld [vmem:[%s26243_s2 + $0x140] sm:$0xff]  }
 0x2bf   : > { %17770 = vmatprep.subr.bf16.mxu1 %v20793_v37 }
 0x2c2   : > { %17771 = vmatpush3.bf16.msra.mxu1 %v20793_v37  ;;  %v20797_v37 = vld [vmem:[%s26243_s2 + $0x128] sm:$0xff]  }
 0x2c3   : > { %17772 = vmatprep.subr.bf16.mxu1 %v20794_v63 }
 0x2c5   : > { %17733 = vmatmul.mubr.bf16.gmra.mrb[24].mxu1 %v23499_v35  ;;  %v23595_v35 = vld [vmem:[#allocation2 + $0xa0] sm:$0xff] }
 0x2c6   : > { %17736 = vmatprep.mubr.bf16.mxu1 %v23511_v25  ;;  %17773 = vmatpush3.bf16.msra.mxu1 %v20794_v63  ;;  %v3266_v25 = vrot.slane %v23595_v35, 5  ;;  %v3604_v63 = vrot.slane %v23328_v21, 6 }
 0x2c7   : > { %17774 = vmatprep.subr.bf16.mxu1 %v20795_v59 }
 0x2ca   : > { %17775 = vmatpush3.bf16.msra.mxu1 %v20795_v59  ;;  %v3606_v59 = vrot.slane %v23345_v47, 6 }
 0x2cb   : > { %17776 = vmatprep.subr.bf16.mxu1 %v20796_v7 }
 0x2cd   : > { %17737 = vmatmul.mubr.bf16.gmra.mrb[28].mxu1 %v23515_v55  ;;  %v3267_v55 = vsel %vm26447_vm7, %v2865_v5, %v3266_v25  ;;  %v20802_v5 = vld [vmem:[%s26243_s2 + $0x150] sm:$0xff]  }
 0x2ce   : > { %17740 = vmatprep.mubr.bf16.mxu1 %v23527_v58  ;;  %17777 = vmatpush3.bf16.msra.mxu1 %v20796_v7  ;;  %v3190_v58 = vld [vmem:[#allocation2 + $0xa8] sm:$0x1f] }
 0x2cf   : > { %17778 = vmatprep.subr.bf16.mxu1 %v20797_v37  ;;  %v3268_v32 = vrot.slane %v3190_v58, 5  ;;  %v20805_v7 = vld [vmem:[%s26243_s2 + $0x168] sm:$0xff]  }
 0x2d2   : > { %17779 = vmatpush3.bf16.msra.mxu1 %v20797_v37 }
 0x2d3   : > { %17780 = vmatprep.subr.bf16.mxu1 %v20798_v6 }
 0x2d5   : > { %17741 = vmatmul.mubr.bf16.gmra.mrb[32].mxu1 %v23531_v28  ;;  %v3571_v28 = vld [vmem:[#allocation2 + $0x8] sm:$0xc0] }
 0x2d6   : > { %17744 = vmatprep.mubr.bf16.mxu1 %v2848_v30  ;;  %17781 = vmatpush3.bf16.msra.mxu1 %v20798_v6  ;;  %v3593_v30 = vrot.slane %v3571_v28, 6  ;;  %v3607_v6 = vsel %vm26445_vm0, %v3604_v63, %v3606_v59 }
 0x2d7   : > { %17782 = vmatprep.subr.bf16.mxu1 %v20799_v48 }
 0x2da   : > { %17783 = vmatpush3.bf16.msra.mxu1 %v20799_v48  ;;  %v20806_v48 = vld [vmem:[%s26243_s2 + $0x170] sm:$0xff]  }
 0x2db   : > { %17824 = vmatprep.subr.bf16.mxu1 %v20800_v13 }
 0x2dd   : > { %17745 = vmatmul.mubr.bf16.gmra.mrb[36].mxu1 %v23541_v24  ;;  %v3594_v24 = vrot.slane %v23284_v3, 6 }
 0x2de   : > { %17748 = vmatprep.mubr.bf16.mxu1 %v2852_v40  ;;  %v3269_v40 = vsel %vm26447_vm7, %v3266_v25, %v3268_v32  ;;  %v3610_v25 = vrot.slane %v23356_v62, 6  ;;  %v20808_v32 = vld [vmem:[%s26243_s2 + $0x180] sm:$0xff]  }
 0x2e5   : > { %17749 = vmatmul.mubr.bf16.gmra.mrb[40].mxu1 %v2854_v1  ;;  %v3595_v1 = vsel %vm26445_vm0, %v3593_v30, %v3594_v24  ;;  %v3612_v30 = vrot.slane %v23358_v53, 6 }
 0x2e6   : > { %17752 = vmatprep.mubr.bf16.mxu1 %v2856_v10  ;;  %v3596_v10 = vrot.slane %v23292_v4, 6 }
 0x2ed   : > { %17753 = vmatmul.mubr.bf16.gmra.mrb[44].mxu1 %v2858_v12  ;;  %v3598_v12 = vrot.slane %v23306_v36, 6 }
 0x2ee   : > { %17756 = vmatprep.mubr.bf16.mxu1 %v2860_v17  ;;  %v20801_v17 = vld [vmem:[%s26243_s2 + $0x148] sm:$0xff]  }
 0x2ef   : > { %v3599_v45 = vsel %vm26445_vm0, %v3596_v10, %v3598_v12 }
 0x2f5   : > { %17757 = vmatmul.mubr.bf16.gmra.mrb[48].mxu1 %v2862_v39  ;;  %v3597_v39 = vsel %vm26445_vm0, %v3594_v24, %v3596_v10  ;;  %v3614_v24 = vrot.slane %v23366_v9, 6  ;;  %v3616_v10 = vrot.slane %v23368_v23, 6 }
 0x2f6   : > { %17760 = vmatprep.mubr.bf16.mxu1 %v2864_v33  ;;  %v3600_v33 = vrot.slane %v23313_v26, 6 }
 0x2f8   : > { %v3601_v46 = vsel %vm26445_vm0, %v3598_v12, %v3600_v33  ;;  %v3618_v12 = vrot.slane %v23378_v49, 6 }
 0x2fd   : > { %17761 = vmatmul.mubr.bf16.gmra.mrb[52].mxu1 %v2866_v44  ;;  %v3602_v44 = vrot.slane %v23325_v2, 6 }
 0x2fe   : > { %17764 = vmatprep.mubr.bf16.mxu1 %v3267_v55  ;;  %v20807_v55 = vld [vmem:[%s26243_s2 + $0x178] sm:$0xff]  }
 0x2ff   : > { %v3603_v61 = vsel %vm26445_vm0, %v3600_v33, %v3602_v44  ;;  %v3605_v37 = vsel %vm26445_vm0, %v3602_v44, %v3604_v63  ;;  %v3628_v63 = vrot.slane %v23399_v22, 6 }
 0x305   : > { %17765 = vmatmul.mubr.bf16.gmra.mrb[56].mxu1 %v3269_v40  ;;  %v3613_v40 = vsel %vm26445_vm0, %v3610_v25, %v3612_v30 }
 0x306   : > { %17784 = vmatprep.mubr.bf16.mxu1 %v3595_v1  ;;  %v3615_v1 = vsel %vm26445_vm0, %v3612_v30, %v3614_v24  ;;  %v3960_v30 = vrot.slane %v23292_v4, 7  ;;  %v3964_v4 = vrot.slane %v23313_v26, 7  ;;  %v20812_v26 = vld [vmem:[%s26243_s2 + $0x1a0] sm:$0xff]  }
 0x30d   : > { %17785 = vmatmul.mubr.bf16.vlgmr.msra.gmra.mrb[20].mxu1 %v3597_v39  ;;  %v3619_v39 = vsel %vm26445_vm0, %v3616_v10, %v3618_v12 }
 0x30e   : > { %17825 = vmatpush3.bf16.msra.mxu1 %v20800_v13  ;;  %17788 = vmatprep.mubr.bf16.mxu1 %v3599_v45  ;;  %v3608_v13 = vrot.slane %v23343_v38, 6  ;;  %v3620_v45 = vrot.slane %v23380_v29, 6 }
 0x30f   : > { %17826 = vmatprep.subr.bf16.mxu1 %v20801_v17 }
 0x310   : > { %v3609_v58 = vsel %vm26445_vm0, %v3606_v59, %v3608_v13  ;;  %v3611_v28 = vsel %vm26445_vm0, %v3608_v13, %v3610_v25  ;;  %v3621_v33 = vsel %vm26445_vm0, %v3618_v12, %v3620_v45  ;;  %v3630_v59 = vrot.slane %v23595_v35, 6  ;;  %v20811_v12 = vld [vmem:[%s26243_s2 + $0x198] sm:$0xff]  }
 0x312   : > { %17827 = vmatpush3.bf16.msra.mxu1 %v20801_v17  ;;  %v3617_v17 = vsel %vm26445_vm0, %v3614_v24, %v3616_v10  ;;  %v3962_v24 = vrot.slane %v23306_v36, 7  ;;  %v3966_v36 = vrot.slane %v23325_v2, 7  ;;  %v3968_v2 = vrot.slane %v23328_v21, 7  ;;  %v20814_v21 = vld [vmem:[%s26243_s2 + $0x1b0] sm:$0xff]  }
 0x313   : > { %17828 = vmatprep.subr.bf16.mxu1 %v20802_v5 }
 0x314   : > { %v3963_v10 = vsel %vm27147_vm14, %v3960_v30, %v3962_v24  ;;  %vm27149_vm14 = vmmov %vm27145_vm3 }
 0x315   : > { %17789 = vmatmul.mubr.bf16.gmra.mrb[24].mxu1 %v3601_v46  ;;  %v3626_v46 = vrot.slane %v23397_v31, 6 }
 0x316   : > { %17792 = vmatprep.mubr.bf16.mxu1 %v3603_v61  ;;  %17829 = vmatpush3.bf16.msra.mxu1 %v20802_v5  ;;  %v3622_v5 = vrot.slane %v23389_v42, 6 }
 0x317   : > { %17830 = vmatprep.subr.bf16.mxu1 %v20803_v51 }
 0x318   : > { %v3623_v44 = vsel %vm26445_vm0, %v3620_v45, %v3622_v5  ;;  %v20813_v45 = vld [vmem:[%s26243_s2 + $0x1a8] sm:$0xff]  }
 0x31a   : > { %17831 = vmatpush3.bf16.msra.mxu1 %v20803_v51  ;;  %v3624_v51 = vrot.slane %v23391_v54, 6 }
 0x31b   : > { %17832 = vmatprep.subr.bf16.mxu1 %v20804_v19 }
 0x31c   : > { %v3625_v61 = vsel %vm26445_vm0, %v3622_v5, %v3624_v51  ;;  %v3969_v5 = vsel %vm27145_vm3, %v3966_v36, %v3968_v2 }
 0x31d   : > { %17793 = vmatmul.mubr.bf16.gmra.mrb[28].mxu1 %v3605_v37  ;;  %v3631_v37 = vsel %vm26445_vm0, %v3628_v63, %v3630_v59 }
 0x31e   : > { %17796 = vmatprep.mubr.bf16.mxu1 %v3607_v6  ;;  %17833 = vmatpush3.bf16.msra.mxu1 %v20804_v19  ;;  %v3627_v19 = vsel %vm26445_vm0, %v3624_v51, %v3626_v46  ;;  %v3572_v6 = vld [vmem:[#allocation2 + $0xa8] sm:$0x3f]  ;;  %v20815_v51 = vld [vmem:[%s26243_s2 + $0x1b8] sm:$0xff]  }
 0x31f   : > { %17834 = vmatprep.subr.bf16.mxu1 %v20805_v7  ;;  %v3632_v13 = vrot.slane %v3572_v6, 6 }
 0x322   : > { %17835 = vmatpush3.bf16.msra.mxu1 %v20805_v7  ;;  %v3629_v7 = vsel %vm26445_vm0, %v3626_v46, %v3628_v63 }
 0x323   : > { %17836 = vmatprep.subr.bf16.mxu1 %v20806_v48 }
 0x325   : > { %17797 = vmatmul.mubr.bf16.gmra.mrb[32].mxu1 %v3609_v58  ;;  %v3633_v58 = vsel %vm26445_vm0, %v3630_v59, %v3632_v13  ;;  %vm27154_vm0 = vmmov %vm27145_vm3 }
 0x326   : > { %17800 = vmatprep.mubr.bf16.mxu1 %v3611_v28  ;;  %17837 = vmatpush3.bf16.msra.mxu1 %v20806_v48  ;;  %v3935_v48 = vld [vmem:[#allocation2 + $0x8] sm:$0x80]  ;;  %vm27155_vm1 = vmmov %vm27154_vm0 }
 0x327   : > { %17838 = vmatprep.subr.bf16.mxu1 %v20807_v55  ;;  %v3957_v25 = vrot.slane %v3935_v48, 7 }
 0x32a   : > { %17839 = vmatpush3.bf16.msra.mxu1 %v20807_v55  ;;  %v3958_v55 = vrot.slane %v23284_v3, 7  ;;  %v20810_v3 = vld [vmem:[%s26243_s2 + $0x190] sm:$0xff]  }
 0x32b   : > { %17880 = vmatprep.subr.bf16.mxu1 %v20808_v32 }
 0x32c   : > { %v3959_v28 = vsel %vm27145_vm3, %v3957_v25, %v3958_v55 }
 0x32d   : > { %17801 = vmatmul.mubr.bf16.gmra.mrb[36].mxu1 %v3613_v40  ;;  %v20809_v40 = vld [vmem:[%s26243_s2 + $0x188] sm:$0xff]  }
 0x32e   : > { %17804 = vmatprep.mubr.bf16.mxu1 %v3615_v1  ;;  %v3961_v1 = vsel %vm27146_vm12, %v3958_v55, %v3960_v30  ;;  %vm27148_vm12 = vmmov %vm27145_vm3 }
 0x335   : > { %17805 = vmatmul.mubr.bf16.gmra.mrb[40].mxu1 %v3617_v17  ;;  %v3965_v17 = vsel %vm27148_vm12, %v3962_v24, %v3964_v4  ;;  %vm27150_vm12 = vmmov %vm27145_vm3 }
 0x336   : > { %17808 = vmatprep.mubr.bf16.mxu1 %v3619_v39  ;;  %v3970_v39 = vrot.slane %v23345_v47, 7  ;;  %v3972_v47 = vrot.slane %v23343_v38, 7  ;;  %v20816_v38 = vld [vmem:[%s26243_s2 + $0x1c0] sm:$0xff]  }
 0x33d   : > { %17809 = vmatmul.mubr.bf16.gmra.mrb[44].mxu1 %v3621_v33  ;;  %v3971_v33 = vsel %vm27150_vm12, %v3968_v2, %v3970_v39  ;;  %vm27152_vm12 = vmmov %vm27145_vm3 }
 0x33e   : > { %17812 = vmatprep.mubr.bf16.mxu1 %v3623_v44  ;;  %v3974_v44 = vrot.slane %v23356_v62, 7  ;;  %v3976_v62 = vrot.slane %v23358_v53, 7  ;;  %v3984_v53 = vrot.slane %v23380_v29, 7  ;;  %v3992_v29 = vrot.slane %v23399_v22, 7 }
 0x340   : > { %v3977_v63 = vsel %vm27152_vm12, %v3974_v44, %v3976_v62  ;;  %vm27156_vm12 = vmmov %vm27154_vm0 }
 0x345   : > { %17813 = vmatmul.mubr.bf16.gmra.mrb[48].mxu1 %v3625_v61  ;;  %v3975_v61 = vsel %vm27145_vm3, %v3972_v47, %v3974_v44 }
 0x346   : > { %17816 = vmatprep.mubr.bf16.mxu1 %v3627_v19  ;;  %v3978_v19 = vrot.slane %v23366_v9, 7  ;;  %v3986_v9 = vrot.slane %v23389_v42, 7  ;;  %v23723_v42 = vrot.slane %v23595_v35, 7 }
 0x348   : > { %v3987_v25 = vsel %vm27156_vm12, %v3984_v53, %v3986_v9  ;;  %v3995_v30 = vsel %vm27154_vm0, %v3992_v29, %v23723_v42  ;;  %vm27160_vm12 = vmmov %vm27154_vm0 }
 0x34d   : > { %17817 = vmatmul.mubr.bf16.gmra.mrb[52].mxu1 %v3629_v7  ;;  %v3980_v7 = vrot.slane %v23368_v23, 7  ;;  %v3988_v23 = vrot.slane %v23391_v54, 7  ;;  %v3936_v54 = vld [vmem:[#allocation2 + $0xa8] sm:$0x7f] }
 0x34e   : > { %17820 = vmatprep.mubr.bf16.mxu1 %v3631_v37  ;;  %v3982_v37 = vrot.slane %v23378_v49, 7  ;;  %v3990_v49 = vrot.slane %v23397_v31, 7  ;;  %v23728_v31 = vld [vmem:[#allocation2 + $0x18] sm:$0xff]  ;;  %v3996_v24 = vrot.slane %v3936_v54, 7 }
 0x34f   : > { %v3981_v6 = vsel %vm27145_vm3, %v3978_v19, %v3980_v7 }
 0x350   : > { %v3983_v48 = vsel %vm27154_vm0, %v3980_v7, %v3982_v37  ;;  %v3985_v13 = vsel %vm27155_vm1, %v3982_v37, %v3984_v53  ;;  %vm27159_vm1 = vmmov %vm27154_vm0  ;;  %v3997_v22 = vsel %vm27160_vm12, %v23723_v42, %v3996_v24  ;;  %v23773_v37 = vld [vmem:[#allocation2 + $0x50] sm:$0xff] }
 0x351   : > { %vm27164_vm12 = vmmov %vm27154_vm0  ;;  %v4373_v53 = vrot.slane %v23773_v37, 7  ;;  %v23798_v24 = vld [vmem:[#allocation2 + $0x70] sm:$0xff] }
 0x355   : > { %17821 = vmatmul.mubr.bf16.gmra.mrb[56].mxu1 %v3633_v58 }
 0x356   : > { %17840 = vmatprep.mubr.bf16.mxu1 %v3959_v28  ;;  %v3993_v28 = vsel %vm27159_vm1, %v3990_v49, %v3992_v29  ;;  %vm27163_vm1 = vmmov %vm27154_vm0 }
 0x35d   : > { %17841 = vmatmul.mubr.bf16.vlgmr.msra.gmra.mrb[20].mxu1 %v3961_v1  ;;  %v4359_v1 = vrot.slane %v23728_v31, 7 }
 0x35e   : > { %17881 = vmatpush3.bf16.msra.mxu1 %v20808_v32  ;;  %17844 = vmatprep.mubr.bf16.mxu1 %v3963_v10  ;;  %v3967_v32 = vsel %vm27149_vm14, %v3964_v4, %v3966_v36  ;;  %vm27151_vm14 = vmmov %vm27145_vm3  ;;  %v23734_v4 = vld [vmem:[#allocation2 + $0x20] sm:$0xff]  ;;  %v23736_v36 = vld [vmem:[#allocation2 + $0x28] sm:$0xff] }
 0x35f   : > { %17882 = vmatprep.subr.bf16.mxu1 %v20809_v40  ;;  %v3973_v46 = vsel %vm27151_vm14, %v3970_v39, %v3972_v47  ;;  %vm27153_vm14 = vmmov %vm27145_vm3  ;;  %v23745_v39 = vld [vmem:[#allocation2 + $0x30] sm:$0xff]  ;;  %v20819_v47 = vld [vmem:[%s26243_s2 + $0x1d8] sm:$0xff]  }
 0x360   : > { %v3979_v59 = vsel %vm27153_vm14, %v3976_v62, %v3978_v19  ;;  %vm27157_vm14 = vmmov %vm27154_vm0 }
 0x361   : > { %v3989_v55 = vsel %vm27157_vm14, %v3986_v9, %v3988_v23  ;;  %vm27158_vm3 = vmmov %vm27154_vm0 }
 0x362   : > { %17883 = vmatpush3.bf16.msra.mxu1 %v20809_v40  ;;  %v3991_v58 = vsel %vm27158_vm3, %v3988_v23, %v3990_v49  ;;  %v4299_v40 = vld [vmem:[#allocation2 + $0x10] sm:$0x80]  ;;  %vm27161_vm14 = vmmov %vm27154_vm0  ;;  %v23787_v49 = vld [vmem:[#allocation2 + $0x60] sm:$0xff] }
 0x363   : > { %17884 = vmatprep.subr.bf16.mxu1 %v20810_v3  ;;  %v4358_v10 = vrot.slane %v4299_v40, 7  ;;  %vm27162_vm3 = vmmov %vm27154_vm0  ;;  %v4377_v29 = vrot.slane %v23787_v49, 7  ;;  %v23800_v40 = vld [vmem:[#allocation2 + $0x78] sm:$0xff] }
 0x365   : > { %17845 = vmatmul.mubr.bf16.gmra.mrb[24].mxu1 %v3965_v17  ;;  %v4363_v17 = vrot.slane %v23736_v36, 7 }
 0x366   : > { %17848 = vmatprep.mubr.bf16.mxu1 %v3967_v32  ;;  %17885 = vmatpush3.bf16.msra.mxu1 %v20810_v3  ;;  %v4360_v3 = vsel %vm27161_vm14, %v4358_v10, %v4359_v1  ;;  %v20817_v32 = vld [vmem:[%s26243_s2 + $0x1c8] sm:$0xff]   ;;  %vm27165_vm14 = vmmov %vm27154_vm0  ;;  %v4383_v10 = vrot.slane %v23800_v40, 7 }
 0x367   : > { %17886 = vmatprep.subr.bf16.mxu1 %v20811_v12 }
 0x36a   : > { %17887 = vmatpush3.bf16.msra.mxu1 %v20811_v12  ;;  %v4361_v12 = vrot.slane %v23734_v4, 7 }
 0x36b   : > { %17888 = vmatprep.subr.bf16.mxu1 %v20812_v26 }
 0x36c   : > { %v4364_v2 = vsel %vm27163_vm1, %v4361_v12, %v4363_v17  ;;  %vm27167_vm1 = vmmov %vm27154_vm0 }
 0x36d   : > { %17849 = vmatmul.mubr.bf16.gmra.mrb[28].mxu1 %v3969_v5  ;;  %v20818_v5 = vld [vmem:[%s26243_s2 + $0x1d0] sm:$0xff]  }
 0x36e   : > { %17852 = vmatprep.mubr.bf16.mxu1 %v3971_v33  ;;  %17889 = vmatpush3.bf16.msra.mxu1 %v20812_v26  ;;  %v4362_v26 = vsel %vm27162_vm3, %v4359_v1, %v4361_v12  ;;  %v4365_v33 = vrot.slane %v23745_v39, 7  ;;  %vm27166_vm3 = vmmov %vm27154_vm0  ;;  %v4381_v1 = vrot.slane %v23798_v24, 7  ;;  %v23806_v12 = vld [vmem:[#allocation2 + $0x80] sm:$0xff] }
 0x36f   : > { %17890 = vmatprep.subr.bf16.mxu1 %v20813_v45 }
 0x370   : > { %v4366_v44 = vsel %vm27154_vm0, %v4363_v17, %v4365_v33  ;;  %v23808_v17 = vld [vmem:[#allocation2 + $0x88] sm:$0xff] }
 0x372   : > { %17891 = vmatpush3.bf16.msra.mxu1 %v20813_v45  ;;  %v23747_v45 = vld [vmem:[#allocation2 + $0x38] sm:$0xff] }
 0x373   : > { %17892 = vmatprep.subr.bf16.mxu1 %v20814_v21 }
 0x375   : > { %17853 = vmatmul.mubr.bf16.gmra.mrb[32].mxu1 %v3973_v46  ;;  %v23759_v46 = vld [vmem:[#allocation2 + $0x40] sm:$0xff] }
 0x376   : > { %17856 = vmatprep.mubr.bf16.mxu1 %v3975_v61  ;;  %17893 = vmatpush3.bf16.msra.mxu1 %v20814_v21  ;;  %v4367_v21 = vrot.slane %v23747_v45, 7  ;;  %v23761_v61 = vld [vmem:[#allocation2 + $0x48] sm:$0xff]  ;;  %v4369_v62 = vrot.slane %v23759_v46, 7 }
 0x377   : > { %17894 = vmatprep.subr.bf16.mxu1 %v20815_v51  ;;  %v4371_v19 = vrot.slane %v23761_v61, 7 }
 0x379   : > { %v4372_v7 = vsel %vm27166_vm3, %v4369_v62, %v4371_v19  ;;  %vm27170_vm3 = vmmov %vm27154_vm0 }
 0x37a   : > { %17895 = vmatpush3.bf16.msra.mxu1 %v20815_v51  ;;  %v4368_v51 = vsel %vm27164_vm12, %v4365_v33, %v4367_v21  ;;  %vm27168_vm12 = vmmov %vm27154_vm0  ;;  %v23814_v33 = vld [vmem:[#allocation2 + $0x90] sm:$0xff] }
 0x37b   : > { %17936 = vmatprep.subr.bf16.mxu1 %v20816_v38 }
 0x37d   : > { %17857 = vmatmul.mubr.bf16.gmra.mrb[36].mxu1 %v3977_v63  ;;  %v20821_v63 = vld [vmem:[%s26243_s2 + $0x1e8] sm:$0xff]  }
 0x37e   : > { %17860 = vmatprep.mubr.bf16.mxu1 %v3979_v59  ;;  %v4370_v59 = vsel %vm27165_vm14, %v4367_v21, %v4369_v62  ;;  %vm27169_vm14 = vmmov %vm27154_vm0  ;;  %v23816_v21 = vld [vmem:[#allocation2 + $0x98] sm:$0xff]  ;;  %v23822_v62 = vld [vmem:[#allocation2 + $0xa8] sm:$0xff] }
 0x385   : > { %17861 = vmatmul.mubr.bf16.gmra.mrb[40].mxu1 %v3981_v6  ;;  %v23775_v6 = vld [vmem:[#allocation2 + $0x58] sm:$0xff] }
 0x386   : > { %17864 = vmatprep.mubr.bf16.mxu1 %v3983_v48  ;;  %v20822_v48 = vld [vmem:[%s26243_s2 + $0x1f0] sm:$0xff]   ;;  %v4375_v9 = vrot.slane %v23775_v6, 7 }
 0x388   : > { %v4376_v23 = vsel %vm27154_vm0, %v4373_v53, %v4375_v9 }
 0x38d   : > { %17865 = vmatmul.mubr.bf16.gmra.mrb[44].mxu1 %v3985_v13  ;;  %v20823_v13 = vld [vmem:[%s26243_s2 + $0x1f8] sm:$0xff]  }
 0x38e   : > { %17868 = vmatprep.mubr.bf16.mxu1 %v3987_v25  ;;  %v4374_v25 = vsel %vm27167_vm1, %v4371_v19, %v4373_v53  ;;  %vm27171_vm1 = vmmov %vm27154_vm0  ;;  %v4395_v19 = vrot.slane %v23822_v62, 7 }
 0x395   : > { %17869 = vmatmul.mubr.bf16.gmra.mrb[48].mxu1 %v3989_v55  ;;  %v23789_v55 = vld [vmem:[#allocation2 + $0x68] sm:$0xff] }
 0x396   : > { %17872 = vmatprep.mubr.bf16.mxu1 %v3991_v58  ;;  %v20824_v58 = vld [vmem:[%s26243_s2 + $0x200] sm:$0xff]  }
 0x39d   : > { %17873 = vmatmul.mubr.bf16.gmra.mrb[52].mxu1 %v3993_v28  ;;  %v4379_v28 = vrot.slane %v23789_v55, 7 }
 0x39e   : > { %17876 = vmatprep.mubr.bf16.mxu1 %v3995_v30  ;;  %v4378_v30 = vsel %vm27168_vm12, %v4375_v9, %v4377_v29  ;;  %vm27172_vm12 = vmmov %vm27154_vm0  ;;  %v20825_v9 = vld [vmem:[%s26243_s2 + $0x208] sm:$0xff]  }
 0x39f   : > { %v4380_v54 = vsel %vm27169_vm14, %v4377_v29, %v4379_v28  ;;  %vm27173_vm14 = vmmov %vm27154_vm0  ;;  %v20832_v29 = vld [vmem:[%s26243_s2 + $0x240] sm:$0xff]  }
 0x3a5   : > { %17877 = vmatmul.mubr.bf16.gmra.mrb[56].mxu1 %v3997_v22  ;;  %v4382_v22 = vsel %vm27170_vm3, %v4379_v28, %v4381_v1  ;;  %vm27174_vm3 = vmmov %vm27154_vm0  ;;  %v4999_v28 = vld [vmem:[#allocation2 + $0x18] sm:$0xfe] }
 0x3a6   : > { %17896 = vmatprep.mubr.bf16.mxu1 %v4360_v3  ;;  %v4384_v3 = vsel %vm27171_vm1, %v4381_v1, %v4383_v10  ;;  %vm27175_vm1 = vmmov %vm27154_vm0  ;;  %v23874_v1 = vld [vmem:[#allocation2 + $0xb0] sm:$0xff] }
 0x3ad   : > { %17897 = vmatmul.mubr.bf16.vlgmr.msra.gmra.mrb[20].mxu1 %v4362_v26  ;;  %v4387_v26 = vrot.slane %v23808_v17, 7 }
 0x3ae   : > { %17937 = vmatpush3.bf16.msra.mxu1 %v20816_v38  ;;  %17900 = vmatprep.mubr.bf16.mxu1 %v4364_v2  ;;  %v20820_v38 = vld [vmem:[%s26243_s2 + $0x1e0] sm:$0xff]  }
 0x3af   : > { %17938 = vmatprep.subr.bf16.mxu1 %v20817_v32 }
 0x3b2   : > { %17939 = vmatpush3.bf16.msra.mxu1 %v20817_v32  ;;  %v4385_v32 = vrot.slane %v23806_v12, 7 }
 0x3b3   : > { %17940 = vmatprep.subr.bf16.mxu1 %v20818_v5 }
 0x3b4   : > { %v4386_v2 = vsel %vm27154_vm0, %v4383_v10, %v4385_v32 }
 0x3b5   : > { %17901 = vmatmul.mubr.bf16.gmra.mrb[24].mxu1 %v4366_v44  ;;  %v4391_v44 = vrot.slane %v23816_v21, 7 }
 0x3b6   : > { %17904 = vmatprep.mubr.bf16.mxu1 %v4368_v51  ;;  %17941 = vmatpush3.bf16.msra.mxu1 %v20818_v5  ;;  %v4388_v5 = vsel %vm27172_vm12, %v4385_v32, %v4387_v26  ;;  %vm27176_vm12 = vmmov %vm27154_vm0  ;;  %v20833_v32 = vld [vmem:[%s26243_s2 + $0x248] sm:$0xff]  }
 0x3b7   : > { %17942 = vmatprep.subr.bf16.mxu1 %v20819_v47 }
 0x3ba   : > { %17943 = vmatpush3.bf16.msra.mxu1 %v20819_v47  ;;  %v4389_v47 = vrot.slane %v23814_v33, 7 }
 0x3bb   : > { %17944 = vmatprep.subr.bf16.mxu1 %v20820_v38 }
 0x3bc   : > { %v4390_v51 = vsel %vm27173_vm14, %v4387_v26, %v4389_v47  ;;  %vm27177_vm14 = vcmask 1046528  }
 0x3bd   : > { %17905 = vmatmul.mubr.bf16.gmra.mrb[28].mxu1 %v4370_v59  ;;  %v4396_v59 = vsel %vm27154_vm0, %v23723_v42, %v4395_v19 }
 0x3be   : > { %17908 = vmatprep.mubr.bf16.mxu1 %v4372_v7  ;;  %17945 = vmatpush3.bf16.msra.mxu1 %v20820_v38  ;;  %v4392_v38 = vsel %vm27174_vm3, %v4389_v47, %v4391_v44  ;;  %v4319_v7 = vld [vmem:[#allocation2 + $0xb0] sm:$0x7f]  ;;  %vm27178_vm3 = vmmov %vm27177_vm14  ;;  %v5067_v47 = vrot.slane %v23759_v46, 1 }
 0x3bf   : > { %17946 = vmatprep.subr.bf16.mxu1 %v20821_v63 }
 0x3c2   : > { %17947 = vmatpush3.bf16.msra.mxu1 %v20821_v63  ;;  %v4394_v63 = vsel %vm27175_vm1, %v4391_v44, %v23723_v42  ;;  %v20826_v42 = vld [vmem:[%s26243_s2 + $0x210] sm:$0xff]   ;;  %vm27179_vm1 = vmmov %vm27178_vm3  ;;  %v20835_v44 = vld [vmem:[%s26243_s2 + $0x258] sm:$0xff]  }
 0x3c3   : > { %17948 = vmatprep.subr.bf16.mxu1 %v20822_v48  ;;  %vm27180_vm0 = vmmov %vm27179_vm1 }
 0x3c5   : > { %17909 = vmatmul.mubr.bf16.gmra.mrb[32].mxu1 %v4374_v25  ;;  %v20829_v25 = vld [vmem:[%s26243_s2 + $0x228] sm:$0xff]  }
 0x3c6   : > { %17912 = vmatprep.mubr.bf16.mxu1 %v4376_v23  ;;  %17949 = vmatpush3.bf16.msra.mxu1 %v20822_v48  ;;  %v4397_v48 = vrot.slane %v4319_v7, 7  ;;  %v20830_v23 = vld [vmem:[%s26243_s2 + $0x230] sm:$0xff]   ;;  %v20837_v7 = vld [vmem:[%s26243_s2 + $0x268] sm:$0xff]  }
 0x3c7   : > { %17950 = vmatprep.subr.bf16.mxu1 %v20823_v13 }
 0x3c8   : > { %v4398_v53 = vsel %vm27176_vm12, %v4395_v19, %v4397_v48  ;;  %vm27181_vm12 = vmmov %vm27180_vm0  ;;  %v20836_v19 = vld [vmem:[%s26243_s2 + $0x260] sm:$0xff]  }
 0x3ca   : > { %17951 = vmatpush3.bf16.msra.mxu1 %v20823_v13  ;;  %v20828_v13 = vld [vmem:[%s26243_s2 + $0x220] sm:$0xff]  }
 0x3cb   : > { %17992 = vmatprep.subr.bf16.mxu1 %v20824_v58 }
 0x3cd   : > { %17913 = vmatmul.mubr.bf16.gmra.mrb[36].mxu1 %v4378_v30  ;;  %v5059_v30 = vrot.slane %v23734_v4, 1 }
 0x3ce   : > { %17916 = vmatprep.mubr.bf16.mxu1 %v4380_v54  ;;  %v5058_v54 = vrot.slane %v4999_v28, 1  ;;  %v5079_v28 = vrot.slane %v23798_v24, 1 }
 0x3d0   : > { %v5060_v10 = vsel %vm27177_vm14, %v5058_v54, %v5059_v30  ;;  %vm27182_vm14 = vmmov %vm27180_vm0 }
 0x3d5   : > { %17917 = vmatmul.mubr.bf16.gmra.mrb[40].mxu1 %v4382_v22  ;;  %v23879_v22 = vrot.slane %v23736_v36, 1 }
 0x3d6   : > { %17920 = vmatprep.mubr.bf16.mxu1 %v4384_v3  ;;  %v5063_v3 = vrot.slane %v23745_v39, 1 }
 0x3d8   : > { %v23889_v26 = vsel %vm27179_vm1, %v23879_v22, %v5063_v3  ;;  %vm27184_vm1 = vmmov %vm27180_vm0 }
 0x3dd   : > { %17921 = vmatmul.mubr.bf16.gmra.mrb[44].mxu1 %v4386_v2  ;;  %v20834_v2 = vld [vmem:[%s26243_s2 + $0x250] sm:$0xff]  }
 0x3de   : > { %17924 = vmatprep.mubr.bf16.mxu1 %v4388_v5  ;;  %v5065_v5 = vrot.slane %v23747_v45, 1 }
 0x3e5   : > { %17925 = vmatmul.mubr.bf16.gmra.mrb[48].mxu1 %v4390_v51  ;;  %v23901_v51 = vsel %vm27180_vm0, %v5063_v3, %v5065_v5  ;;  %v5083_v3 = vrot.slane %v23806_v12, 1 }
 0x3e6   : > { %17928 = vmatprep.mubr.bf16.mxu1 %v4392_v38  ;;  %v23905_v38 = vsel %vm27181_vm12, %v5065_v5, %v5067_v47  ;;  %vm27185_vm12 = vmmov %vm27180_vm0  ;;  %v5087_v5 = vrot.slane %v23814_v33, 1 }
 0x3ed   : > { %17929 = vmatmul.mubr.bf16.gmra.mrb[52].mxu1 %v4394_v63  ;;  %v5069_v63 = vrot.slane %v23761_v61, 1 }
 0x3ee   : > { %17932 = vmatprep.mubr.bf16.mxu1 %v4396_v59  ;;  %v5071_v59 = vrot.slane %v23773_v37, 1 }
 0x3ef   : > { %v23917_v48 = vsel %vm27182_vm14, %v5067_v47, %v5069_v63  ;;  %vm27186_vm14 = vmmov %vm27180_vm0 }
 0x3f5   : > { %17933 = vmatmul.mubr.bf16.gmra.mrb[56].mxu1 %v4398_v53 }
 0x3f6   : > { %17952 = vmatprep.mubr.bf16.mxu1 %v23728_v31  ;;  %v20827_v31 = vld [vmem:[%s26243_s2 + $0x218] sm:$0xff]  }
 0x3fd   : > { %17953 = vmatmul.mubr.bf16.vlgmr.msra.gmra.mrb[20].mxu1 %v23734_v4  ;;  %v5062_v4 = vsel %vm27178_vm3, %v5059_v30, %v23879_v22  ;;  %vm27183_vm3 = vmmov %vm27180_vm0 }
 0x3fe   : > { %17993 = vmatpush3.bf16.msra.mxu1 %v20824_v58  ;;  %17956 = vmatprep.mubr.bf16.mxu1 %v23736_v36  ;;  %v20831_v58 = vld [vmem:[%s26243_s2 + $0x238] sm:$0xff]   ;;  %v23921_v53 = vsel %vm27183_vm3, %v5069_v63, %v5071_v59  ;;  %vm27187_vm3 = vmmov %vm27180_vm0  ;;  %v5091_v63 = vrot.slane %v23595_v35, 1 }
 0x3ff   : > { %17994 = vmatprep.subr.bf16.mxu1 %v20825_v9 }
 0x402   : > { %17995 = vmatpush3.bf16.msra.mxu1 %v20825_v9  ;;  %v20838_v9 = vld [vmem:[%s26243_s2 + $0x270] sm:$0xff]  }
 0x403   : > { %17996 = vmatprep.subr.bf16.mxu1 %v20826_v42 }
 0x405   : > { %17957 = vmatmul.mubr.bf16.gmra.mrb[24].mxu1 %v23745_v39 }
 0x406   : > { %17960 = vmatprep.mubr.bf16.mxu1 %v23747_v45  ;;  %17997 = vmatpush3.bf16.msra.mxu1 %v20826_v42  ;;  %v5073_v42 = vrot.slane %v23775_v6, 1 }
 0x407   : > { %17998 = vmatprep.subr.bf16.mxu1 %v20827_v31 }
 0x40a   : > { %17999 = vmatpush3.bf16.msra.mxu1 %v20827_v31  ;;  %v5075_v31 = vrot.slane %v23787_v49, 1 }
 0x40b   : > { %18000 = vmatprep.subr.bf16.mxu1 %v20828_v13 }
 0x40d   : > { %17961 = vmatmul.mubr.bf16.gmra.mrb[28].mxu1 %v23759_v46 }
 0x40e   : > { %17964 = vmatprep.mubr.bf16.mxu1 %v23761_v61  ;;  %18001 = vmatpush3.bf16.msra.mxu1 %v20828_v13  ;;  %v20839_v13 = vld [vmem:[%s26243_s2 + $0x278] sm:$0xff]  }
 0x40f   : > { %18002 = vmatprep.subr.bf16.mxu1 %v20829_v25 }
 0x412   : > { %18003 = vmatpush3.bf16.msra.mxu1 %v20829_v25  ;;  %v23933_v25 = vsel %vm27184_vm1, %v5071_v59, %v5073_v42  ;;  %vm27188_vm1 = vmmov %vm27180_vm0 }
 0x413   : > { %18004 = vmatprep.subr.bf16.mxu1 %v20830_v23 }
 0x415   : > { %17965 = vmatmul.mubr.bf16.gmra.mrb[32].mxu1 %v23773_v37 }
 0x416   : > { %17968 = vmatprep.mubr.bf16.mxu1 %v23775_v6  ;;  %18005 = vmatpush3.bf16.msra.mxu1 %v20830_v23  ;;  %v23937_v23 = vsel %vm27180_vm0, %v5073_v42, %v5075_v31  ;;  %v5095_v42 = vrot.slane %v23874_v1, 1 }
 0x417   : > { %18006 = vmatprep.subr.bf16.mxu1 %v20831_v58 }
 0x41a   : > { %18007 = vmatpush3.bf16.msra.mxu1 %v20831_v58  ;;  %v20840_v58 = vld [vmem:[%s26243_s2 + $0x280] sm:$0xff]  }
 0x41b   : > { %18048 = vmatprep.subr.bf16.mxu1 %v20832_v29 }
 0x41d   : > { %17969 = vmatmul.mubr.bf16.gmra.mrb[36].mxu1 %v23787_v49 }
 0x41e   : > { %17972 = vmatprep.mubr.bf16.mxu1 %v23789_v55 }
 0x425   : > { %17973 = vmatmul.mubr.bf16.gmra.mrb[40].mxu1 %v23798_v24 }
 0x426   : > { %17976 = vmatprep.mubr.bf16.mxu1 %v23800_v40 }
 0x42d   : > { %17977 = vmatmul.mubr.bf16.gmra.mrb[44].mxu1 %v23806_v12 }
 0x42e   : > { %17980 = vmatprep.mubr.bf16.mxu1 %v23808_v17 }
 0x435   : > { %17981 = vmatmul.mubr.bf16.gmra.mrb[48].mxu1 %v23814_v33 }
 0x436   : > { %17984 = vmatprep.mubr.bf16.mxu1 %v23816_v21 }
 0x43d   : > { %17985 = vmatmul.mubr.bf16.gmra.mrb[52].mxu1 %v23595_v35 }
 0x43e   : > { %17988 = vmatprep.mubr.bf16.mxu1 %v23822_v62 }
 0x445   : > { %17989 = vmatmul.mubr.bf16.gmra.mrb[56].mxu1 %v23874_v1 }
 0x446   : > { %18008 = vmatprep.mubr.bf16.mxu1 %v5060_v10  ;;  %v5081_v10 = vrot.slane %v23800_v40, 1 }
 0x44d   : > { %18009 = vmatmul.mubr.bf16.vlgmr.msra.gmra.mrb[20].mxu1 %v5062_v4  ;;  %v5084_v4 = vsel %vm27188_vm1, %v5081_v10, %v5083_v3  ;;  %vm27192_vm1 = vmmov %vm27180_vm0 }
 0x44e   : > { %18049 = vmatpush3.bf16.msra.mxu1 %v20832_v29  ;;  %18012 = vmatprep.mubr.bf16.mxu1 %v23889_v26  ;;  %v5077_v29 = vrot.slane %v23789_v55, 1 }
 0x44f   : > { %18050 = vmatprep.subr.bf16.mxu1 %v20833_v32 }
 0x450   : > { %v5078_v30 = vsel %vm27185_vm12, %v5075_v31, %v5077_v29  ;;  %v23947_v54 = vsel %vm27186_vm14, %v5077_v29, %v5079_v28  ;;  %vm27189_vm12 = vmmov %vm27180_vm0  ;;  %v5019_v29 = vld [vmem:[#allocation2 + $0xb8] sm:$0x1] }
 0x451   : > { %vm27190_vm14 = vmmov %vm27180_vm0 }
 0x452   : > { %18051 = vmatpush3.bf16.msra.mxu1 %v20833_v32  ;;  %v5082_v32 = vsel %vm27187_vm3, %v5079_v28, %v5081_v10  ;;  %vm27191_vm3 = vmmov %vm27180_vm0  ;;  %v5097_v28 = vrot.slane %v5019_v29, 1  ;;  %v5400_v10 = vld [vmem:[#allocation2 + $0x20] sm:$0xfe]  ;;  %v5826_v29 = vrot.slane %v23745_v39, 2 }
 0x453   : > { %18052 = vmatprep.subr.bf16.mxu1 %v20834_v2  ;;  %v5459_v35 = vrot.slane %v5400_v10, 1 }
 0x455   : > { %18013 = vmatmul.mubr.bf16.gmra.mrb[24].mxu1 %v23901_v51 }
 0x456   : > { %18016 = vmatprep.mubr.bf16.mxu1 %v23905_v38  ;;  %18053 = vmatpush3.bf16.msra.mxu1 %v20834_v2  ;;  %v5085_v2 = vrot.slane %v23808_v17, 1 }
 0x457   : > { %18054 = vmatprep.subr.bf16.mxu1 %v20835_v44 }
 0x458   : > { %v5086_v47 = vsel %vm27180_vm0, %v5083_v3, %v5085_v2 }
 0x45a   : > { %18055 = vmatpush3.bf16.msra.mxu1 %v20835_v44  ;;  %v5088_v44 = vsel %vm27189_vm12, %v5085_v2, %v5087_v5  ;;  %vm27193_vm12 = vmmov %vm27180_vm0 }
 0x45b   : > { %18056 = vmatprep.subr.bf16.mxu1 %v20836_v19  ;;  %v5098_v3 = vsel %vm27193_vm12, %v5095_v42, %v5097_v28  ;;  %vm27197_vm12 = vmmov %vm27180_vm0  ;;  %v5828_v28 = vrot.slane %v23747_v45, 2 }
 0x45d   : > { %18017 = vmatmul.mubr.bf16.gmra.mrb[28].mxu1 %v23917_v48 }
 0x45e   : > { %18020 = vmatprep.mubr.bf16.mxu1 %v23921_v53  ;;  %18057 = vmatpush3.bf16.msra.mxu1 %v20836_v19  ;;  %v5089_v19 = vrot.slane %v23816_v21, 1 }
 0x45f   : > { %18058 = vmatprep.subr.bf16.mxu1 %v20837_v7 }
 0x460   : > { %v5090_v59 = vsel %vm27190_vm14, %v5087_v5, %v5089_v19  ;;  %vm27194_vm14 = vmmov %vm27180_vm0  ;;  %v20841_v5 = vld [vmem:[%s26243_s2 + $0x288] sm:$0xff]  }
 0x461   : > { %v5461_v2 = vsel %vm27194_vm14, %v5459_v35, %v23879_v22  ;;  %v20843_v22 = vld [vmem:[%s26243_s2 + $0x298] sm:$0xff]   ;;  %vm5822_vm14 = vcmask 1045504   ;;  %v20850_v35 = vld [vmem:[%s26243_s2 + $0x2d0] sm:$0xff]  }
 0x462   : > { %18059 = vmatpush3.bf16.msra.mxu1 %v20837_v7  ;;  %v5092_v7 = vsel %vm27191_vm3, %v5089_v19, %v5091_v63  ;;  %vm27195_vm3 = vmmov %vm27180_vm0  ;;  %v5829_v10 = vsel %vm5822_vm14, %v5826_v29, %v5828_v28 }
 0x463   : > { %18060 = vmatprep.subr.bf16.mxu1 %v20838_v9 }
 0x465   : > { %18021 = vmatmul.mubr.bf16.gmra.mrb[32].mxu1 %v23933_v25 }
 0x466   : > { %18024 = vmatprep.mubr.bf16.mxu1 %v23937_v23  ;;  %18061 = vmatpush3.bf16.msra.mxu1 %v20838_v9  ;;  %v5093_v9 = vrot.slane %v23822_v62, 1 }
 0x467   : > { %18062 = vmatprep.subr.bf16.mxu1 %v20839_v13 }
 0x468   : > { %v5094_v31 = vsel %vm27192_vm1, %v5091_v63, %v5093_v9  ;;  %v20842_v63 = vld [vmem:[%s26243_s2 + $0x290] sm:$0xff]   ;;  %vm27196_vm1 = vmmov %vm27180_vm0 }
 0x46a   : > { %18063 = vmatpush3.bf16.msra.mxu1 %v20839_v13  ;;  %v5096_v13 = vsel %vm27180_vm0, %v5093_v9, %v5095_v42 }
 0x46b   : > { %18104 = vmatprep.subr.bf16.mxu1 %v20840_v58 }
 0x46d   : > { %18025 = vmatmul.mubr.bf16.gmra.mrb[36].mxu1 %v5078_v30 }
 0x46e   : > { %18028 = vmatprep.mubr.bf16.mxu1 %v23947_v54 }
 0x475   : > { %18029 = vmatmul.mubr.bf16.gmra.mrb[40].mxu1 %v5082_v32 }
 0x476   : > { %18032 = vmatprep.mubr.bf16.mxu1 %v5084_v4 }
 0x47d   : > { %18033 = vmatmul.mubr.bf16.gmra.mrb[44].mxu1 %v5086_v47 }
 0x47e   : > { %18036 = vmatprep.mubr.bf16.mxu1 %v5088_v44 }
 0x485   : > { %18037 = vmatmul.mubr.bf16.gmra.mrb[48].mxu1 %v5090_v59 }
 0x486   : > { %18040 = vmatprep.mubr.bf16.mxu1 %v5092_v7  ;;  %v24006_v7 = vld [vmem:[#allocation2] sm:$0xff] }
 0x48d   : > { %18041 = vmatmul.mubr.bf16.gmra.mrb[52].mxu1 %v5094_v31  ;;  %v5496_v31 = vrot.slane %v24006_v7, 1 }
 0x48e   : > { %18044 = vmatprep.mubr.bf16.mxu1 %v5096_v13 }
 0x495   : > { %18045 = vmatmul.mubr.bf16.gmra.mrb[56].mxu1 %v5098_v3  ;;  %v5830_v3 = vrot.slane %v23759_v46, 2 }
 0x496   : > { %18064 = vmatprep.mubr.bf16.mxu1 %v5461_v2  ;;  %v5832_v2 = vrot.slane %v23761_v61, 2 }
 0x49d   : > { %18065 = vmatmul.mubr.bf16.vlgmr.msra.gmra.mrb[20].mxu1 %v23889_v26  ;;  %v20844_v26 = vld [vmem:[%s26243_s2 + $0x2a0] sm:$0xff]  }
 0x49e   : > { %18105 = vmatpush3.bf16.msra.mxu1 %v20840_v58  ;;  %18068 = vmatprep.mubr.bf16.mxu1 %v23901_v51  ;;  %v20845_v51 = vld [vmem:[%s26243_s2 + $0x2a8] sm:$0xff]  }
 0x49f   : > { %18106 = vmatprep.subr.bf16.mxu1 %v20841_v5 }
 0x4a2   : > { %18107 = vmatpush3.bf16.msra.mxu1 %v20841_v5  ;;  %v20851_v5 = vld [vmem:[%s26243_s2 + $0x2d8] sm:$0xff]  }
 0x4a3   : > { %18108 = vmatprep.subr.bf16.mxu1 %v20842_v63 }
 0x4a5   : > { %18069 = vmatmul.mubr.bf16.gmra.mrb[24].mxu1 %v23905_v38  ;;  %v20846_v38 = vld [vmem:[%s26243_s2 + $0x2b0] sm:$0xff]  }
 0x4a6   : > { %18072 = vmatprep.mubr.bf16.mxu1 %v23917_v48  ;;  %18109 = vmatpush3.bf16.msra.mxu1 %v20842_v63  ;;  %v20847_v48 = vld [vmem:[%s26243_s2 + $0x2b8] sm:$0xff]   ;;  %v5831_v63 = vsel %vm5822_vm14, %v5828_v28, %v5830_v3  ;;  %v5848_v28 = vrot.slane %v23808_v17, 2 }
 0x4a7   : > { %18110 = vmatprep.subr.bf16.mxu1 %v20843_v22 }
 0x4aa   : > { %18111 = vmatpush3.bf16.msra.mxu1 %v20843_v22  ;;  %v5833_v22 = vsel %vm5822_vm14, %v5830_v3, %v5832_v2 }
 0x4ab   : > { %18112 = vmatprep.subr.bf16.mxu1 %v20844_v26 }
 0x4ad   : > { %18073 = vmatmul.mubr.bf16.gmra.mrb[28].mxu1 %v23921_v53  ;;  %v20848_v53 = vld [vmem:[%s26243_s2 + $0x2c0] sm:$0xff]  }
 0x4ae   : > { %18076 = vmatprep.mubr.bf16.mxu1 %v23933_v25  ;;  %18113 = vmatpush3.bf16.msra.mxu1 %v20844_v26  ;;  %v24001_v25 = vld [vmem:[#allocation2 + $0xa0] sm:$0xff] }
 0x4af   : > { %18114 = vmatprep.subr.bf16.mxu1 %v20845_v51  ;;  %v20852_v26 = vld [vmem:[%s26243_s2 + $0x2e0] sm:$0xff]  }
 0x4b2   : > { %18115 = vmatpush3.bf16.msra.mxu1 %v20845_v51  ;;  %v5834_v51 = vrot.slane %v23773_v37, 2 }
 0x4b3   : > { %18116 = vmatprep.subr.bf16.mxu1 %v20846_v38 }
 0x4b5   : > { %18077 = vmatmul.mubr.bf16.gmra.mrb[32].mxu1 %v23937_v23  ;;  %v5490_v23 = vrot.slane %v24001_v25, 1 }
 0x4b6   : > { %18080 = vmatprep.mubr.bf16.mxu1 %v5078_v30  ;;  %18117 = vmatpush3.bf16.msra.mxu1 %v20846_v38  ;;  %v5836_v38 = vrot.slane %v23775_v6, 2 }
 0x4b7   : > { %18118 = vmatprep.subr.bf16.mxu1 %v20847_v48  ;;  %v5491_v58 = vsel %vm27195_vm3, %v5089_v19, %v5490_v23  ;;  %v5493_v30 = vsel %vm27196_vm1, %v5490_v23, %v5093_v9  ;;  %vm27198_vm3 = vnez %v26737_v50  ;;  %vm27199_vm1 = vnez %v26752_v20 }
 0x4b8   : > { %v5837_v23 = vsel %vm5822_vm14, %v5834_v51, %v5836_v38 }
 0x4ba   : > { %18119 = vmatpush3.bf16.msra.mxu1 %v20847_v48  ;;  %v20853_v48 = vld [vmem:[%s26243_s2 + $0x2e8] sm:$0xff]  }
 0x4bb   : > { %18160 = vmatprep.subr.bf16.mxu1 %v20848_v53 }
 0x4bd   : > { %18081 = vmatmul.mubr.bf16.gmra.mrb[36].mxu1 %v23947_v54  ;;  %v5420_v54 = vld [vmem:[#allocation2 + $0xc0] sm:$0x1] }
 0x4be   : > { %18084 = vmatprep.mubr.bf16.mxu1 %v5082_v32  ;;  %v5497_v32 = vsel %vm27180_vm0, %v5095_v42, %v5496_v31  ;;  %v20849_v42 = vld [vmem:[%s26243_s2 + $0x2c8] sm:$0xff]  }
 0x4c5   : > { %18085 = vmatmul.mubr.bf16.gmra.mrb[40].mxu1 %v5084_v4  ;;  %v5498_v4 = vrot.slane %v5420_v54, 1  ;;  %v20855_v54 = vld [vmem:[%s26243_s2 + $0x2f8] sm:$0xff]  }
 0x4c6   : > { %18088 = vmatprep.mubr.bf16.mxu1 %v5086_v47  ;;  %v5801_v47 = vld [vmem:[#allocation2 + $0x20] sm:$0xfc] }
 0x4c7   : > { %v5823_v19 = vrot.slane %v5801_v47, 2  ;;  %v20856_v47 = vld [vmem:[%s26243_s2 + $0x300] sm:$0xff]  }
 0x4cd   : > { %18089 = vmatmul.mubr.bf16.gmra.mrb[44].mxu1 %v5088_v44  ;;  %v5824_v44 = vrot.slane %v23736_v36, 2 }
 0x4ce   : > { %18092 = vmatprep.mubr.bf16.mxu1 %v5090_v59  ;;  %v5499_v59 = vsel %vm27197_vm12, %v5496_v31, %v5498_v4  ;;  %v5840_v31 = vrot.slane %v23789_v55, 2 }
 0x4cf   : > { %v5825_v9 = vsel %vm5822_vm14, %v5823_v19, %v5824_v44 }
 0x4d5   : > { %18093 = vmatmul.mubr.bf16.gmra.mrb[48].mxu1 %v5491_v58  ;;  %v20854_v58 = vld [vmem:[%s26243_s2 + $0x2f0] sm:$0xff]  }
 0x4d6   : > { %18096 = vmatprep.mubr.bf16.mxu1 %v5493_v30  ;;  %v5838_v30 = vrot.slane %v23787_v49, 2 }
 0x4d8   : > { %v5841_v4 = vsel %vm5822_vm14, %v5838_v30, %v5840_v31 }
 0x4dd   : > { %18097 = vmatmul.mubr.bf16.gmra.mrb[52].mxu1 %v5096_v13  ;;  %v5827_v13 = vsel %vm5822_vm14, %v5824_v44, %v5826_v29  ;;  %v5842_v44 = vrot.slane %v23798_v24, 2  ;;  %v5846_v29 = vrot.slane %v23806_v12, 2 }
 0x4de   : > { %18100 = vmatprep.mubr.bf16.mxu1 %v5497_v32  ;;  %v5839_v32 = vsel %vm5822_vm14, %v5836_v38, %v5838_v30  ;;  %v5860_v38 = vrot.slane %v24006_v7, 2  ;;  %v6165_v30 = vld [vmem:[#allocation2 + $0x20] sm:$0xf8] }
 0x4df   : > { %v5843_v19 = vsel %vm5822_vm14, %v5840_v31, %v5842_v44  ;;  %v6187_v31 = vrot.slane %v23736_v36, 3 }
 0x4e5   : > { %18101 = vmatmul.mubr.bf16.gmra.mrb[56].mxu1 %v5499_v59  ;;  %v5844_v59 = vrot.slane %v23800_v40, 2 }
 0x4e6   : > { %18120 = vmatprep.mubr.bf16.mxu1 %v5825_v9 }
 0x4e7   : > { %v5845_v9 = vsel %vm5822_vm14, %v5842_v44, %v5844_v59  ;;  %v6189_v44 = vrot.slane %v23745_v39, 3  ;;  %v6193_v39 = vrot.slane %v23759_v46, 3  ;;  %v20860_v46 = vld [vmem:[%s26243_s2 + $0x320] sm:$0xff]  }
 0x4ed   : > { %18121 = vmatmul.mubr.bf16.vlgmr.msra.gmra.mrb[20].mxu1 %v5827_v13  ;;  %v5849_v13 = vsel %vm5822_vm14, %v5846_v29, %v5848_v28 }
 0x4ee   : > { %18161 = vmatpush3.bf16.msra.mxu1 %v20848_v53  ;;  %18124 = vmatprep.mubr.bf16.mxu1 %v5829_v10  ;;  %v5835_v53 = vsel %vm5822_vm14, %v5832_v2, %v5834_v51  ;;  %v5850_v10 = vrot.slane %v23814_v33, 2  ;;  %v5858_v51 = vrot.slane %v23874_v1, 2 }
 0x4ef   : > { %18162 = vmatprep.subr.bf16.mxu1 %v20849_v42 }
 0x4f0   : > { %v5851_v3 = vsel %vm5822_vm14, %v5848_v28, %v5850_v10  ;;  %v20859_v28 = vld [vmem:[%s26243_s2 + $0x318] sm:$0xff]  }
 0x4f2   : > { %18163 = vmatpush3.bf16.msra.mxu1 %v20849_v42  ;;  %v5847_v42 = vsel %vm5822_vm14, %v5844_v59, %v5846_v29  ;;  %v6191_v59 = vrot.slane %v23747_v45, 3  ;;  %v20858_v29 = vld [vmem:[%s26243_s2 + $0x310] sm:$0xff]   ;;  %v6195_v45 = vrot.slane %v23761_v61, 3  ;;  %v6197_v61 = vrot.slane %v23773_v37, 3 }
 0x4f3   : > { %18164 = vmatprep.subr.bf16.mxu1 %v20850_v35  ;;  %v20862_v37 = vld [vmem:[%s26243_s2 + $0x330] sm:$0xff]  }
 0x4f4   : > { %v6192_v36 = vsel %vm2503_vm10, %v6189_v44, %v6191_v59 }
 0x4f5   : > { %18125 = vmatmul.mubr.bf16.gmra.mrb[24].mxu1 %v5831_v63  ;;  %v5856_v63 = vrot.slane %v23822_v62, 2 }
 0x4f6   : > { %18128 = vmatprep.mubr.bf16.mxu1 %v5833_v22  ;;  %18165 = vmatpush3.bf16.msra.mxu1 %v20850_v35  ;;  %v5852_v35 = vrot.slane %v23816_v21, 2 }
 0x4f7   : > { %18166 = vmatprep.subr.bf16.mxu1 %v20851_v5 }
 0x4f8   : > { %v5853_v2 = vsel %vm5822_vm14, %v5850_v10, %v5852_v35  ;;  %v20861_v10 = vld [vmem:[%s26243_s2 + $0x328] sm:$0xff]  }
 0x4fa   : > { %18167 = vmatpush3.bf16.msra.mxu1 %v20851_v5  ;;  %v5854_v5 = vrot.slane %v24001_v25, 2 }
 0x4fb   : > { %18168 = vmatprep.subr.bf16.mxu1 %v20852_v26 }
 0x4fc   : > { %v5855_v22 = vsel %vm5822_vm14, %v5852_v35, %v5854_v5  ;;  %v6198_v35 = vsel %vm2503_vm10, %v6195_v45, %v6197_v61 }
 0x4fd   : > { %18129 = vmatmul.mubr.bf16.gmra.mrb[28].mxu1 %v5835_v53  ;;  %v5859_v53 = vsel %vm5822_vm14, %v5856_v63, %v5858_v51 }
 0x4fe   : > { %18132 = vmatprep.mubr.bf16.mxu1 %v5837_v23  ;;  %18169 = vmatpush3.bf16.msra.mxu1 %v20852_v26  ;;  %v5857_v26 = vsel %vm5822_vm14, %v5854_v5, %v5856_v63  ;;  %v5861_v23 = vsel %vm5822_vm14, %v5858_v51, %v5860_v38  ;;  %v20863_v5 = vld [vmem:[%s26243_s2 + $0x338] sm:$0xff]  }
 0x4ff   : > { %18170 = vmatprep.subr.bf16.mxu1 %v20853_v48 }
 0x502   : > { %18171 = vmatpush3.bf16.msra.mxu1 %v20853_v48  ;;  %v5802_v48 = vld [vmem:[#allocation2 + $0xc0] sm:$0x3] }
 0x503   : > { %18172 = vmatprep.subr.bf16.mxu1 %v20854_v58 }
 0x505   : > { %18133 = vmatmul.mubr.bf16.gmra.mrb[32].mxu1 %v5839_v32  ;;  %v6186_v32 = vrot.slane %v6165_v30, 3 }
 0x506   : > { %18136 = vmatprep.mubr.bf16.mxu1 %v5841_v4  ;;  %18173 = vmatpush3.bf16.msra.mxu1 %v20854_v58  ;;  %v5862_v58 = vrot.slane %v5802_v48, 2  ;;  %v6209_v48 = vrot.slane %v23806_v12, 3  ;;  %v24129_v12 = vrot.slane %v24001_v25, 3 }
 0x507   : > { %18174 = vmatprep.subr.bf16.mxu1 %v20855_v54  ;;  %v6188_v4 = vsel %vm2503_vm10, %v6186_v32, %v6187_v31  ;;  %v24138_v32 = vrot.slane %v24006_v7, 3 }
 0x50a   : > { %18175 = vmatpush3.bf16.msra.mxu1 %v20855_v54  ;;  %v5863_v54 = vsel %vm5822_vm14, %v5860_v38, %v5862_v58 }
 0x50b   : > { %18216 = vmatprep.subr.bf16.mxu1 %v20856_v47 }
 0x50d   : > { %18137 = vmatmul.mubr.bf16.gmra.mrb[36].mxu1 %v5843_v19  ;;  %v20857_v19 = vld [vmem:[%s26243_s2 + $0x308] sm:$0xff]  }
 0x50e   : > { %18140 = vmatprep.mubr.bf16.mxu1 %v5845_v9  ;;  %v6190_v9 = vsel %vm2503_vm10, %v6187_v31, %v6189_v44 }
 0x515   : > { %18141 = vmatmul.mubr.bf16.gmra.mrb[40].mxu1 %v5847_v42  ;;  %v6194_v42 = vsel %vm2503_vm10, %v6191_v59, %v6193_v39 }
 0x516   : > { %18144 = vmatprep.mubr.bf16.mxu1 %v5849_v13  ;;  %v6199_v13 = vrot.slane %v23775_v6, 3  ;;  %v6201_v6 = vrot.slane %v23787_v49, 3  ;;  %v20864_v49 = vld [vmem:[%s26243_s2 + $0x340] sm:$0xff]  }
 0x518   : > { %v6202_v63 = vsel %vm2503_vm10, %v6199_v13, %v6201_v6 }
 0x51d   : > { %18145 = vmatmul.mubr.bf16.gmra.mrb[44].mxu1 %v5851_v3  ;;  %v6200_v3 = vsel %vm2503_vm10, %v6197_v61, %v6199_v13 }
 0x51e   : > { %18148 = vmatprep.mubr.bf16.mxu1 %v5853_v2  ;;  %v6203_v2 = vrot.slane %v23789_v55, 3  ;;  %v6205_v55 = vrot.slane %v23798_v24, 3  ;;  %v6213_v24 = vrot.slane %v23814_v33, 3 }
 0x520   : > { %v6206_v51 = vsel %vm2503_vm10, %v6203_v2, %v6205_v55 }
 0x525   : > { %18149 = vmatmul.mubr.bf16.gmra.mrb[48].mxu1 %v5855_v22  ;;  %v6204_v22 = vsel %vm2503_vm10, %v6201_v6, %v6203_v2  ;;  %v20867_v2 = vld [vmem:[%s26243_s2 + $0x358] sm:$0xff]  }
 0x526   : > { %18152 = vmatprep.mubr.bf16.mxu1 %v5857_v26  ;;  %v6207_v26 = vrot.slane %v23800_v40, 3  ;;  %v6215_v40 = vrot.slane %v23816_v21, 3  ;;  %v6221_v21 = vrot.slane %v23874_v1, 3 }
 0x528   : > { %v6208_v38 = vsel %vm2503_vm10, %v6205_v55, %v6207_v26  ;;  %v6216_v31 = vsel %vm2503_vm10, %v6213_v24, %v6215_v40  ;;  %v20868_v55 = vld [vmem:[%s26243_s2 + $0x360] sm:$0xff]  }
 0x52d   : > { %18153 = vmatmul.mubr.bf16.gmra.mrb[52].mxu1 %v5859_v53  ;;  %v6211_v53 = vrot.slane %v23808_v17, 3  ;;  %v6219_v17 = vrot.slane %v23822_v62, 3  ;;  %v6224_v62 = vsel %vm2503_vm10, %v6221_v21, %v24138_v32 }
 0x52e   : > { %18156 = vmatprep.mubr.bf16.mxu1 %v5861_v23  ;;  %v6210_v23 = vsel %vm2503_vm10, %v6207_v26, %v6209_v48 }
 0x52f   : > { %v6212_v58 = vsel %vm2503_vm10, %v6209_v48, %v6211_v53  ;;  %v6214_v30 = vsel %vm2503_vm10, %v6211_v53, %v6213_v24  ;;  %v6220_v33 = vsel %vm2503_vm10, %v24129_v12, %v6219_v17  ;;  %v6222_v44 = vsel %vm2503_vm10, %v6219_v17, %v6221_v21  ;;  %v20870_v24 = vld [vmem:[%s26243_s2 + $0x370] sm:$0xff]   ;;  %v24204_v21 = vld [vmem:[#allocation2 + $0x80] sm:$0xff] }
 0x535   : > { %18157 = vmatmul.mubr.bf16.gmra.mrb[56].mxu1 %v5863_v54  ;;  %v6218_v54 = vsel %vm2503_vm10, %v6215_v40, %v24129_v12 }
 0x536   : > { %18176 = vmatprep.mubr.bf16.mxu1 %v6188_v4  ;;  %v6166_v4 = vld [vmem:[#allocation2 + $0xc0] sm:$0x7] }
 0x537   : > { %v6225_v59 = vrot.slane %v6166_v4, 3  ;;  %v20872_v4 = vld [vmem:[%s26243_s2 + $0x380] sm:$0xff]  }
 0x539   : > { %v6226_v1 = vsel %vm2503_vm10, %v24138_v32, %v6225_v59 }
 0x53d   : > { %18177 = vmatmul.mubr.bf16.vlgmr.msra.gmra.mrb[20].mxu1 %v6190_v9  ;;  %v6528_v9 = vld [vmem:[#allocation2 + $0x28] sm:$0xf8] }
 0x53e   : > { %18217 = vmatpush3.bf16.msra.mxu1 %v20856_v47  ;;  %18180 = vmatprep.mubr.bf16.mxu1 %v6192_v36  ;;  %v6196_v47 = vsel %vm2503_vm10, %v6193_v39, %v6195_v45  ;;  %v24149_v45 = vld [vmem:[#allocation2 + $0x38] sm:$0xff] }
 0x53f   : > { %18218 = vmatprep.subr.bf16.mxu1 %v20857_v19 }
 0x542   : > { %18219 = vmatpush3.bf16.msra.mxu1 %v20857_v19  ;;  %v24143_v19 = vld [vmem:[#allocation2 + $0x30] sm:$0xff] }
 0x543   : > { %18220 = vmatprep.subr.bf16.mxu1 %v20858_v29  ;;  %v6588_v36 = vrot.slane %v24143_v19, 3 }
 0x545   : > { %18181 = vmatmul.mubr.bf16.gmra.mrb[24].mxu1 %v6194_v42  ;;  %v6590_v42 = vrot.slane %v24149_v45, 3 }
 0x546   : > { %18184 = vmatprep.mubr.bf16.mxu1 %v6196_v47  ;;  %18221 = vmatpush3.bf16.msra.mxu1 %v20858_v29  ;;  %v6587_v29 = vrot.slane %v6528_v9, 3 }
 0x547   : > { %18222 = vmatprep.subr.bf16.mxu1 %v20859_v28  ;;  %v6591_v61 = vsel %vm2503_vm10, %v6588_v36, %v6590_v42 }
 0x548   : > { %v6589_v39 = vsel %vm2503_vm10, %v6587_v29, %v6588_v36  ;;  %v24213_v36 = vld [vmem:[#allocation2 + $0x88] sm:$0xff] }
 0x549   : > { %v6610_v29 = vrot.slane %v24213_v36, 3 }
 0x54a   : > { %18223 = vmatpush3.bf16.msra.mxu1 %v20859_v28  ;;  %v24151_v28 = vld [vmem:[#allocation2 + $0x40] sm:$0xff] }
 0x54b   : > { %18224 = vmatprep.subr.bf16.mxu1 %v20860_v46  ;;  %v6592_v47 = vrot.slane %v24151_v28, 3 }
 0x54d   : > { %18185 = vmatmul.mubr.bf16.gmra.mrb[28].mxu1 %v6198_v35  ;;  %v6593_v13 = vsel %vm2503_vm10, %v6590_v42, %v6592_v47  ;;  %v24162_v35 = vld [vmem:[#allocation2 + $0x50] sm:$0xff] }
 0x54e   : > { %18188 = vmatprep.mubr.bf16.mxu1 %v6200_v3  ;;  %18225 = vmatpush3.bf16.msra.mxu1 %v20860_v46  ;;  %v20865_v46 = vld [vmem:[%s26243_s2 + $0x348] sm:$0xff]   ;;  %v20866_v3 = vld [vmem:[%s26243_s2 + $0x350] sm:$0xff]   ;;  %v6596_v6 = vrot.slane %v24162_v35, 3 }
 0x54f   : > { %18226 = vmatprep.subr.bf16.mxu1 %v20861_v10 }
 0x552   : > { %18227 = vmatpush3.bf16.msra.mxu1 %v20861_v10  ;;  %v24160_v10 = vld [vmem:[#allocation2 + $0x48] sm:$0xff] }
 0x553   : > { %18228 = vmatprep.subr.bf16.mxu1 %v20862_v37 }
 0x555   : > { %18189 = vmatmul.mubr.bf16.gmra.mrb[32].mxu1 %v6202_v63 }
 0x556   : > { %18192 = vmatprep.mubr.bf16.mxu1 %v6204_v22  ;;  %18229 = vmatpush3.bf16.msra.mxu1 %v20862_v37  ;;  %v6594_v37 = vrot.slane %v24160_v10, 3  ;;  %v24174_v22 = vld [vmem:[#allocation2 + $0x58] sm:$0xff] }
 0x557   : > { %18230 = vmatprep.subr.bf16.mxu1 %v20863_v5  ;;  %v6598_v26 = vrot.slane %v24174_v22, 3 }
 0x558   : > { %v6597_v63 = vsel %vm2503_vm10, %v6594_v37, %v6596_v6 }
 0x559   : > { %v6599_v48 = vsel %vm2503_vm10, %v6596_v6, %v6598_v26  ;;  %v24229_v6 = vld [vmem:[#allocation2 + $0xb0] sm:$0xff] }
 0x55a   : > { %18231 = vmatpush3.bf16.msra.mxu1 %v20863_v5  ;;  %v6595_v5 = vsel %vm2503_vm10, %v6592_v47, %v6594_v37  ;;  %v24227_v37 = vld [vmem:[#allocation2 + $0xa8] sm:$0xff] }
 0x55b   : > { %18272 = vmatprep.subr.bf16.mxu1 %v20864_v49 }
 0x55d   : > { %18193 = vmatmul.mubr.bf16.gmra.mrb[36].mxu1 %v6206_v51 }
 0x55e   : > { %18196 = vmatprep.mubr.bf16.mxu1 %v6208_v38  ;;  %v20869_v38 = vld [vmem:[%s26243_s2 + $0x368] sm:$0xff]  }
 0x565   : > { %18197 = vmatmul.mubr.bf16.gmra.mrb[40].mxu1 %v6210_v23  ;;  %v24188_v23 = vld [vmem:[#allocation2 + $0x68] sm:$0xff] }
 0x566   : > { %18200 = vmatprep.mubr.bf16.mxu1 %v6212_v58  ;;  %v24190_v58 = vld [vmem:[#allocation2 + $0x70] sm:$0xff]  ;;  %v6602_v40 = vrot.slane %v24188_v23, 3 }
 0x56d   : > { %18201 = vmatmul.mubr.bf16.gmra.mrb[44].mxu1 %v6214_v30  ;;  %v6604_v30 = vrot.slane %v24190_v58, 3 }
 0x56e   : > { %18204 = vmatprep.mubr.bf16.mxu1 %v6216_v31  ;;  %v20871_v31 = vld [vmem:[%s26243_s2 + $0x378] sm:$0xff]  }
 0x575   : > { %18205 = vmatmul.mubr.bf16.gmra.mrb[48].mxu1 %v6218_v54  ;;  %v6605_v54 = vsel %vm2503_vm10, %v6602_v40, %v6604_v30 }
 0x576   : > { %18208 = vmatprep.mubr.bf16.mxu1 %v6220_v33  ;;  %v24202_v33 = vld [vmem:[#allocation2 + $0x78] sm:$0xff] }
 0x57d   : > { %18209 = vmatmul.mubr.bf16.gmra.mrb[52].mxu1 %v6222_v44  ;;  %v6606_v44 = vrot.slane %v24202_v33, 3 }
 0x57e   : > { %18212 = vmatprep.mubr.bf16.mxu1 %v6224_v62  ;;  %v6608_v62 = vrot.slane %v24204_v21, 3 }
 0x57f   : > { %v6607_v59 = vsel %vm2503_vm10, %v6604_v30, %v6606_v44  ;;  %v6953_v30 = vrot.slane %v24149_v45, 4 }
 0x580   : > { %v6609_v9 = vsel %vm2503_vm10, %v6606_v44, %v6608_v62  ;;  %v6611_v42 = vsel %vm2503_vm10, %v6608_v62, %v6610_v29  ;;  %v6957_v62 = vrot.slane %v24160_v10, 4 }
 0x585   : > { %18213 = vmatmul.mubr.bf16.gmra.mrb[56].mxu1 %v6226_v1  ;;  %v24215_v1 = vld [vmem:[#allocation2 + $0x90] sm:$0xff] }
 0x586   : > { %18232 = vmatprep.mubr.bf16.mxu1 %v6589_v39  ;;  %v6612_v39 = vrot.slane %v24215_v1, 3 }
 0x588   : > { %v6613_v47 = vsel %vm2503_vm10, %v6610_v29, %v6612_v39 }
 0x58d   : > { %18233 = vmatmul.mubr.bf16.vlgmr.msra.gmra.mrb[20].mxu1 %v6591_v61 }
 0x58e   : > { %18273 = vmatpush3.bf16.msra.mxu1 %v20864_v49  ;;  %18236 = vmatprep.mubr.bf16.mxu1 %v6593_v13  ;;  %v24176_v49 = vld [vmem:[#allocation2 + $0x60] sm:$0xff] }
 0x58f   : > { %18274 = vmatprep.subr.bf16.mxu1 %v20865_v46  ;;  %v6600_v51 = vrot.slane %v24176_v49, 3 }
 0x591   : > { %v6601_v53 = vsel %vm2503_vm10, %v6598_v26, %v6600_v51  ;;  %v6603_v17 = vsel %vm2503_vm10, %v6600_v51, %v6602_v40  ;;  %v6548_v26 = vld [vmem:[#allocation2 + $0xc8] sm:$0x7] }
 0x592   : > { %18275 = vmatpush3.bf16.msra.mxu1 %v20865_v46  ;;  %v24221_v46 = vld [vmem:[#allocation2 + $0x98] sm:$0xff] }
 0x593   : > { %18276 = vmatprep.subr.bf16.mxu1 %v20866_v3  ;;  %v6614_v61 = vrot.slane %v24221_v46, 3 }
 0x595   : > { %18237 = vmatmul.mubr.bf16.gmra.mrb[24].mxu1 %v6595_v5  ;;  %v6615_v13 = vsel %vm2503_vm10, %v6612_v39, %v6614_v61  ;;  %v6620_v5 = vrot.slane %v24229_v6, 3  ;;  %v20876_v39 = vld [vmem:[%s26243_s2 + $0x3a0] sm:$0xff]  }
 0x596   : > { %18240 = vmatprep.mubr.bf16.mxu1 %v6597_v63  ;;  %18277 = vmatpush3.bf16.msra.mxu1 %v20866_v3  ;;  %v6617_v3 = vsel %vm2503_vm10, %v6614_v61, %v24129_v12  ;;  %v20877_v61 = vld [vmem:[%s26243_s2 + $0x3a8] sm:$0xff]  }
 0x597   : > { %18278 = vmatprep.subr.bf16.mxu1 %v20867_v2  ;;  %v6623_v51 = vsel %vm2503_vm10, %v6620_v5, %v24138_v32 }
 0x59a   : > { %18279 = vmatpush3.bf16.msra.mxu1 %v20867_v2  ;;  %v6618_v2 = vrot.slane %v24227_v37, 3 }
 0x59b   : > { %18280 = vmatprep.subr.bf16.mxu1 %v20868_v55 }
 0x59c   : > { %v6619_v63 = vsel %vm2503_vm10, %v24129_v12, %v6618_v2 }
 0x59d   : > { %18241 = vmatmul.mubr.bf16.gmra.mrb[28].mxu1 %v6599_v48  ;;  %v6929_v48 = vld [vmem:[#allocation2 + $0x28] sm:$0xf0] }
 0x59e   : > { %18244 = vmatprep.mubr.bf16.mxu1 %v6601_v53  ;;  %18281 = vmatpush3.bf16.msra.mxu1 %v20868_v55  ;;  %v6621_v55 = vsel %vm2503_vm10, %v6618_v2, %v6620_v5  ;;  %v6951_v53 = vrot.slane %v24143_v19, 4  ;;  %v6950_v40 = vrot.slane %v6929_v48, 4  ;;  %v20878_v2 = vld [vmem:[%s26243_s2 + $0x3b0] sm:$0xff]   ;;  %v6965_v5 = vrot.slane %v24188_v23, 4 }
 0x59f   : > { %18282 = vmatprep.subr.bf16.mxu1 %v20869_v38  ;;  %v6971_v48 = vrot.slane %v24204_v21, 4 }
 0x5a0   : > { %v6952_v12 = vsel %vm26448_vm11, %v6950_v40, %v6951_v53  ;;  %v6973_v40 = vrot.slane %v24213_v36, 4 }
 0x5a2   : > { %18283 = vmatpush3.bf16.msra.mxu1 %v20869_v38  ;;  %v6626_v38 = vrot.slane %v6548_v26, 3 }
 0x5a3   : > { %18284 = vmatprep.subr.bf16.mxu1 %v20870_v24 }
 0x5a5   : > { %18245 = vmatmul.mubr.bf16.gmra.mrb[32].mxu1 %v6603_v17  ;;  %v20873_v17 = vld [vmem:[%s26243_s2 + $0x388] sm:$0xff]  }
 0x5a6   : > { %18248 = vmatprep.mubr.bf16.mxu1 %v6605_v54  ;;  %18285 = vmatpush3.bf16.msra.mxu1 %v20870_v24  ;;  %v6627_v24 = vsel %vm2503_vm10, %v24138_v32, %v6626_v38  ;;  %v6954_v54 = vsel %vm26448_vm11, %v6951_v53, %v6953_v30  ;;  %v6969_v38 = vrot.slane %v24202_v33, 4 }
 0x5a7   : > { %18286 = vmatprep.subr.bf16.mxu1 %v20871_v31 }
 0x5aa   : > { %18287 = vmatpush3.bf16.msra.mxu1 %v20871_v31  ;;  %v6955_v31 = vrot.slane %v24151_v28, 4 }
 0x5ab   : > { %18328 = vmatprep.subr.bf16.mxu1 %v20872_v4 }
 0x5ac   : > { %v6956_v44 = vsel %vm26448_vm11, %v6953_v30, %v6955_v31  ;;  %v6958_v29 = vsel %vm26448_vm11, %v6955_v31, %v6957_v62  ;;  %v6974_v30 = vsel %vm26448_vm11, %v6971_v48, %v6973_v40 }
 0x5ad   : > { %18249 = vmatmul.mubr.bf16.gmra.mrb[36].mxu1 %v6607_v59  ;;  %v6959_v59 = vrot.slane %v24162_v35, 4 }
 0x5ae   : > { %18252 = vmatprep.mubr.bf16.mxu1 %v6609_v9  ;;  %v20875_v9 = vld [vmem:[%s26243_s2 + $0x398] sm:$0xff]  }
 0x5b5   : > { %18253 = vmatmul.mubr.bf16.gmra.mrb[40].mxu1 %v6611_v42  ;;  %v6961_v42 = vrot.slane %v24174_v22, 4 }
 0x5b6   : > { %18256 = vmatprep.mubr.bf16.mxu1 %v6613_v47  ;;  %v6963_v47 = vrot.slane %v24176_v49, 4 }
 0x5b8   : > { %v6966_v26 = vsel %vm26448_vm11, %v6963_v47, %v6965_v5 }
 0x5bd   : > { %18257 = vmatmul.mubr.bf16.gmra.mrb[44].mxu1 %v6615_v13  ;;  %v6962_v13 = vsel %vm26448_vm11, %v6959_v59, %v6961_v42 }
 0x5be   : > { %18260 = vmatprep.mubr.bf16.mxu1 %v6617_v3  ;;  %v6964_v3 = vsel %vm26448_vm11, %v6961_v42, %v6963_v47 }
 0x5c5   : > { %18261 = vmatmul.mubr.bf16.gmra.mrb[48].mxu1 %v6619_v63  ;;  %v6967_v63 = vrot.slane %v24190_v58, 4 }
 0x5c6   : > { %18264 = vmatprep.mubr.bf16.mxu1 %v6621_v55  ;;  %v20879_v55 = vld [vmem:[%s26243_s2 + $0x3b8] sm:$0xff]  }
 0x5c7   : > { %v6970_v53 = vsel %vm26448_vm11, %v6967_v63, %v6969_v38 }
 0x5cd   : > { %18265 = vmatmul.mubr.bf16.gmra.mrb[52].mxu1 %v6623_v51  ;;  %v6968_v51 = vsel %vm26448_vm11, %v6965_v5, %v6967_v63  ;;  %v7316_v63 = vrot.slane %v24149_v45, 5  ;;  %v7324_v45 = vrot.slane %v24174_v22, 5  ;;  %v7332_v22 = vrot.slane %v24202_v33, 5 }
 0x5ce   : > { %18268 = vmatprep.mubr.bf16.mxu1 %v24138_v32  ;;  %v20874_v32 = vld [vmem:[%s26243_s2 + $0x390] sm:$0xff]   ;;  %v7340_v33 = vrot.slane %v24221_v46, 5 }
 0x5d5   : > { %18269 = vmatmul.mubr.bf16.gmra.mrb[56].mxu1 %v6627_v24  ;;  %v6972_v24 = vsel %vm26448_vm11, %v6969_v38, %v6971_v48  ;;  %v7320_v38 = vrot.slane %v24160_v10, 5  ;;  %v7328_v10 = vrot.slane %v24188_v23, 5  ;;  %v7336_v23 = vrot.slane %v24213_v36, 5 }
 0x5d6   : > { %18288 = vmatprep.mubr.bf16.mxu1 %v6952_v12  ;;  %v6975_v12 = vrot.slane %v24215_v1, 4  ;;  %v7344_v36 = vrot.slane %v24227_v37, 5 }
 0x5d8   : > { %v6976_v31 = vsel %vm26448_vm11, %v6973_v40, %v6975_v12 }
 0x5dd   : > { %18289 = vmatmul.mubr.bf16.vlgmr.msra.gmra.mrb[20].mxu1 %v6954_v54  ;;  %v6979_v54 = vrot.slane %v24001_v25, 4 }
 0x5de   : > { %18329 = vmatpush3.bf16.msra.mxu1 %v20872_v4  ;;  %18292 = vmatprep.mubr.bf16.mxu1 %v6956_v44  ;;  %v6960_v4 = vsel %vm26448_vm11, %v6957_v62, %v6959_v59  ;;  %v6981_v62 = vrot.slane %v24227_v37, 4  ;;  %v6983_v59 = vrot.slane %v24229_v6, 4  ;;  %v20880_v37 = vld [vmem:[%s26244_s3] sm:$0xff]  }
 0x5df   : > { %18330 = vmatprep.subr.bf16.mxu1 %v20873_v17  ;;  %18384 = vmatprep.subr.bf16.mxu0 %v20880_v37 }
 0x5e0   : > { %18385 = vmatpush3.bf16.msra.mxu0 %v20880_v37 }
 0x5e2   : > { %18331 = vmatpush3.bf16.msra.mxu1 %v20873_v17  ;;  %v6977_v17 = vrot.slane %v24221_v46, 4  ;;  %v7348_v46 = vrot.slane %v24006_v7, 5 }
 0x5e3   : > { %18332 = vmatprep.subr.bf16.mxu1 %v20874_v32 }
 0x5e4   : > { %v6978_v44 = vsel %vm26448_vm11, %v6975_v12, %v6977_v17 }
 0x5e5   : > { %18293 = vmatmul.mubr.bf16.gmra.mrb[24].mxu1 %v6958_v29  ;;  %v6984_v29 = vsel %vm26448_vm11, %v6981_v62, %v6983_v59 }
 0x5e6   : > { %18296 = vmatprep.mubr.bf16.mxu1 %v6960_v4  ;;  %18333 = vmatpush3.bf16.msra.mxu1 %v20874_v32  ;;  %v6980_v32 = vsel %vm26448_vm11, %v6977_v17, %v6979_v54  ;;  %v6985_v4 = vrot.slane %v24006_v7, 4  ;;  %v20882_v7 = vld [vmem:[%s26244_s3 + $0x10] sm:$0xff]  }
 0x5e7   : > { %18334 = vmatprep.subr.bf16.mxu1 %v20875_v9 }
 0x5e8   : > { %v6986_v42 = vsel %vm26448_vm11, %v6983_v59, %v6985_v4 }
 0x5ea   : > { %18335 = vmatpush3.bf16.msra.mxu1 %v20875_v9  ;;  %v6982_v9 = vsel %vm26448_vm11, %v6979_v54, %v6981_v62 }
 0x5eb   : > { %18336 = vmatprep.subr.bf16.mxu1 %v20876_v39 }
 0x5ed   : > { %18297 = vmatmul.mubr.bf16.gmra.mrb[28].mxu1 %v6962_v13  ;;  %v7314_v13 = vrot.slane %v24143_v19, 5  ;;  %v7322_v19 = vrot.slane %v24162_v35, 5  ;;  %v7330_v35 = vrot.slane %v24190_v58, 5  ;;  %v7338_v58 = vrot.slane %v24215_v1, 5 }
 0x5ee   : > { %18300 = vmatprep.mubr.bf16.mxu1 %v6964_v3  ;;  %18337 = vmatpush3.bf16.msra.mxu1 %v20876_v39  ;;  %v6930_v39 = vld [vmem:[#allocation2 + $0xc8] sm:$0xf]  ;;  %v7346_v1 = vrot.slane %v24229_v6, 5 }
 0x5ef   : > { %18338 = vmatprep.subr.bf16.mxu1 %v20877_v61  ;;  %v6989_v47 = vrot.slane %v6930_v39, 4  ;;  %v20881_v6 = vld [vmem:[%s26244_s3 + $0x8] sm:$0xff]  }
 0x5f0   : > { %18386 = vmatprep.subr.bf16.mxu0 %v20881_v6 }
 0x5f1   : > { %v6990_v3 = vsel %vm26448_vm11, %v6985_v4, %v6989_v47  ;;  %18387 = vmatpush3.bf16.msra.mxu0 %v20881_v6  ;;  %v20884_v47 = vld [vmem:[%s26244_s3 + $0x20] sm:$0xff]  }
 0x5f2   : > { %18339 = vmatpush3.bf16.msra.mxu1 %v20877_v61  ;;  %v7292_v61 = vld [vmem:[#allocation2 + $0x28] sm:$0xe0]  ;;  %18388 = vmatprep.subr.bf16.mxu0 %v20882_v7 }
 0x5f3   : > { %18340 = vmatprep.subr.bf16.mxu1 %v20878_v2 }
 0x5f5   : > { %18301 = vmatmul.mubr.bf16.gmra.mrb[32].mxu1 %v6966_v26  ;;  %v7317_v26 = vsel %vm26447_vm7, %v7314_v13, %v7316_v63  ;;  %18389 = vmatpush3.bf16.msra.mxu0 %v20882_v7 }
 0x5f6   : > { %18304 = vmatprep.mubr.bf16.mxu1 %v6968_v51  ;;  %18341 = vmatpush3.bf16.msra.mxu1 %v20878_v2  ;;  %v7313_v2 = vrot.slane %v7292_v61, 5  ;;  %v20885_v61 = vld [vmem:[%s26244_s3 + $0x28] sm:$0xff]  }
 0x5f7   : > { %18342 = vmatprep.subr.bf16.mxu1 %v20879_v55 }
 0x5f8   : > { %v7315_v5 = vsel %vm26447_vm7, %v7313_v2, %v7314_v13  ;;  %v24357_v13 = vld [vmem:[%s26247_s6] ss:$0 sm:$0xff] }
 0x5f9   : > { %v24362_v2 = vld [vmem:[%s26248_s7] ss:$0 sm:$0xff] }
 0x5fa   : > { %18343 = vmatpush3.bf16.msra.mxu1 %v20879_v55  ;;  %v7318_v55 = vrot.slane %v24151_v28, 5  ;;  %v7326_v28 = vrot.slane %v24176_v49, 5  ;;  %v7334_v49 = vrot.slane %v24204_v21, 5  ;;  %v7342_v21 = vrot.slane %v24001_v25, 5 }
 0x5fb   : > { %v7349_v25 = vsel %vm26447_vm7, %v7346_v1, %v7348_v46 }
 0x5fc   : > { %v7319_v51 = vsel %vm26447_vm7, %v7316_v63, %v7318_v55  ;;  %v7321_v48 = vsel %vm26447_vm7, %v7318_v55, %v7320_v38  ;;  %v7327_v40 = vsel %vm26447_vm7, %v7324_v45, %v7326_v28  ;;  %v7329_v12 = vsel %vm26447_vm7, %v7326_v28, %v7328_v10 }
 0x5fd   : > { %18305 = vmatmul.mubr.bf16.gmra.mrb[36].mxu1 %v6970_v53  ;;  %v7323_v53 = vsel %vm26447_vm7, %v7320_v38, %v7322_v19  ;;  %v7335_v17 = vsel %vm26447_vm7, %v7332_v22, %v7334_v49  ;;  %v7337_v54 = vsel %vm26447_vm7, %v7334_v49, %v7336_v23  ;;  %v7343_v62 = vsel %vm26447_vm7, %v7340_v33, %v7342_v21  ;;  %v20886_v49 = vld [vmem:[%s26244_s3 + $0x30] sm:$0xff]  }
 0x5fe   : > { %18308 = vmatprep.mubr.bf16.mxu1 %v6972_v24  ;;  %v7325_v24 = vsel %vm26447_vm7, %v7322_v19, %v7324_v45  ;;  %v7345_v59 = vsel %vm26447_vm7, %v7342_v21, %v7344_v36  ;;  %v27202_v21 = vld [vmem:[#allocation6_spill] sm:$0xff] }
 0x5ff   : > { %vm27203_vm12 = vnez %v27202_v21 }
 0x605   : > { %18309 = vmatmul.mubr.bf16.gmra.mrb[40].mxu1 %v6974_v30  ;;  %v7331_v30 = vsel %vm26447_vm7, %v7328_v10, %v7330_v35 }
 0x606   : > { %18312 = vmatprep.mubr.bf16.mxu1 %v6976_v31  ;;  %v7333_v31 = vsel %vm26447_vm7, %v7330_v35, %v7332_v22 }
 0x60d   : > { %18313 = vmatmul.mubr.bf16.gmra.mrb[44].mxu1 %v6978_v44  ;;  %v7339_v44 = vsel %vm26447_vm7, %v7336_v23, %v7338_v58 }
 0x60e   : > { %18316 = vmatprep.mubr.bf16.mxu1 %v6980_v32  ;;  %v7341_v32 = vsel %vm26447_vm7, %v7338_v58, %v7340_v33  ;;  %v27200_v58 = vld [vmem:[#allocation4_spill] sm:$0xff] }
 0x60f   : > { %vm27201_vm0 = vnez %v27200_v58 }
 0x615   : > { %18317 = vmatmul.mubr.bf16.gmra.mrb[48].mxu1 %v6982_v9  ;;  %v7347_v9 = vsel %vm26447_vm7, %v7344_v36, %v7346_v1 }
 0x616   : > { %18320 = vmatprep.mubr.bf16.mxu1 %v6984_v29  ;;  %v7293_v29 = vld [vmem:[#allocation2 + $0xc8] sm:$0x1f] }
 0x61d   : > { %18321 = vmatmul.mubr.bf16.gmra.mrb[52].mxu1 %v6986_v42  ;;  %v20883_v42 = vld [vmem:[%s26244_s3 + $0x18] sm:$0xff]  }
 0x61e   : > { %18324 = vmatprep.mubr.bf16.mxu1 %v6985_v4  ;;  %v7352_v4 = vrot.slane %v7293_v29, 5  ;;  %18390 = vmatprep.subr.bf16.mxu0 %v20883_v42 }
 0x61f   : > { %18391 = vmatpush3.bf16.msra.mxu0 %v20883_v42 }
 0x620   : > { %v7353_v39 = vsel %vm26447_vm7, %v7348_v46, %v7352_v4  ;;  %18392 = vmatprep.subr.bf16.mxu0 %v20884_v47 }
 0x623   : > { %18393 = vmatpush3.bf16.msra.mxu0 %v20884_v47 }
 0x624   : > { %18394 = vmatprep.subr.bf16.mxu0 %v20885_v61 }
 0x625   : > { %18325 = vmatmul.mubr.bf16.gmra.mrb[56].mxu1 %v6990_v3 }
 0x626   : > { %18344 = vmatprep.mubr.bf16.mxu1 %v7315_v5 }
 0x627   : > { %18395 = vmatpush3.bf16.msra.mxu0 %v20885_v61 }
 0x628   : > { %18396 = vmatprep.subr.bf16.mxu0 %v20886_v49 }
 0x62b   : > { %18397 = vmatpush3.bf16.msra.mxu0 %v20886_v49 }
 0x62d   : > { %18345 = vmatmul.mubr.bf16.vlgmr.msra.gmra.mrb[20].mxu1 %v7317_v26 }
 0x62e   : > { %18348 = vmatprep.mubr.bf16.mxu1 %v7319_v51 }
 0x635   : > { %18349 = vmatmul.mubr.bf16.gmra.mrb[24].mxu1 %v7321_v48 }
 0x636   : > { %18352 = vmatprep.mubr.bf16.mxu1 %v7323_v53 }
 0x63d   : > { %18353 = vmatmul.mubr.bf16.gmra.mrb[28].mxu1 %v7325_v24 }
 0x63e   : > { %18356 = vmatprep.mubr.bf16.mxu1 %v7327_v40 }
 0x645   : > { %18357 = vmatmul.mubr.bf16.gmra.mrb[32].mxu1 %v7329_v12 }
 0x646   : > { %18360 = vmatprep.mubr.bf16.mxu1 %v7331_v30 }
 0x64d   : > { %18361 = vmatmul.mubr.bf16.gmra.mrb[36].mxu1 %v7333_v31  ;;  %v20887_v31 = vld [vmem:[%s26244_s3 + $0x38] sm:$0xff]  }
 0x64e   : > { %18364 = vmatprep.mubr.bf16.mxu1 %v7335_v17  ;;  %18398 = vmatprep.subr.bf16.mxu0 %v20887_v31 }
 0x64f   : > { %18399 = vmatpush3.bf16.msra.mxu0 %v20887_v31 }
 0x655   : > { %18365 = vmatmul.mubr.bf16.gmra.mrb[40].mxu1 %v7337_v54 }
 0x656   : > { %18368 = vmatprep.mubr.bf16.mxu1 %v7339_v44 }
 0x65d   : > { %18369 = vmatmul.mubr.bf16.gmra.mrb[44].mxu1 %v7341_v32 }
 0x65e   : > { %18372 = vmatprep.mubr.bf16.mxu1 %v7343_v62 }
 0x665   : > { %18373 = vmatmul.mubr.bf16.gmra.mrb[48].mxu1 %v7345_v59 }
 0x666   : > { %18376 = vmatprep.mubr.bf16.mxu1 %v7347_v9 }
 0x66d   : > { %18377 = vmatmul.mubr.bf16.gmra.mrb[52].mxu1 %v7349_v25 }
 0x66e   : > { %18380 = vmatprep.mubr.bf16.mxu1 %v7348_v46 }
 0x675   : > { %18381 = vmatmul.mubr.bf16.gmra.mrb[56].mxu1 %v7353_v39 }
 0x700   : > { %v18346_v3 = vpop.f32.mrb[20].mxu1 }
 0x701   : > { %v7664_v5 = vmul.f32 %v18346_v3, %v24357_v13  ;;  %v7456_v63 = vpop.f32.mrb[21].mxu1 }
 0x702   : > { %v7662_v55 = vmul.f32 %v24357_v13, %v7456_v63  ;;  %v18347_v26 = vpop.f32.mrb[22].mxu1 }
 0x703   : > { %v7711_v51 = vadd.f32 %v24362_v2, %v7664_v5  ;;  %v7665_v38 = vmul.f32 %v18347_v26, %v24357_v13  ;;  %v7459_v19 = vpop.f32.mrb[23].mxu1 }
 0x704   : > { %v7709_v48 = vadd.f32 %v24362_v2, %v7662_v55  ;;  %v7663_v53 = vmul.f32 %v24357_v13, %v7459_v19  ;;  %v27210_v55 = vld [vmem:[#allocation11_spill] sm:$0xff]  ;;  %v27212_v19 = vld [vmem:[#allocation12_spill] sm:$0xff] }
 0x705   : > { %v7751_v45 = vmax.f32 %v7711_v51, 0.0  ;;  %v7712_v28 = vadd.f32 %v24362_v2, %v7665_v38 }
 0x706   : > { %v7749_v24 = vmax.f32 %v7709_v48, 0.0  ;;  %v7710_v40 = vadd.f32 %v24362_v2, %v7663_v53 }
 0x707   : > { %v7791_v10 = vsel %vm27198_vm3, %v7751_v45, 0.0  ;;  %v7752_v35 = vmax.f32 %v7712_v28, 0.0  ;;  %vm27204_vm3 = vcmask 523264  }
 0x708   : > { %v7789_v12 = vsel %vm27199_vm1, %v7749_v24, 0.0  ;;  %v7750_v30 = vmax.f32 %v7710_v40, 0.0  ;;  %v18350_v22 = vpop.f32.mrb[24].mxu1  ;;  %v7912_v17 = vrot.slane %v7791_v10, 7  ;;  %vm27205_vm1 = vcmask 1040384   ;;  %v24407_v24 = vld [vmem:[%s26244_s3 + $0x40] sm:$0xff]  }
 0x709   : > { %v7909_v23 = vrot.slane %v7789_v12, 7  ;;  %v7792_v50 = vsel %vm27201_vm0, %v7752_v35, 0.0  ;;  %v7668_v54 = vmul.f32 %v18350_v22, %v24357_v13  ;;  %v7472_v44 = vpop.f32.mrb[25].mxu1  ;;  %vm27206_vm0 = vmmov %vm27205_vm1  ;;  %18420 = vmatprep.subr.bf16.mxu0 %v24407_v24 }
 0x70a   : > { %v7830_v20 = vpack.c.bf16 %v7792_v50, %v7791_v10  ;;  %v7914_v33 = vrot.slane %v7792_v50, 7  ;;  %v7790_v32 = vsel %vm27203_vm12, %v7750_v30, 0.0  ;;  %v7666_v62 = vmul.f32 %v24357_v13, %v7472_v44  ;;  %v18351_v36 = vpop.f32.mrb[26].mxu1  ;;  %vm27207_vm12 = vmmov %vm27204_vm3  ;;  %v27214_v10 = vld [vmem:[#allocation13_spill] sm:$0xff] }
 0x70b   : > { %v7829_v1 = vpack.c.bf16 %v7790_v32, %v7789_v12  ;;  %v7910_v59 = vrot.slane %v7790_v32, 7  ;;  %v7715_v9 = vadd.f32 %v24362_v2, %v7668_v54  ;;  %v7669_v46 = vmul.f32 %v18351_v36, %v24357_v13  ;;  %v7475_v29 = vpop.f32.mrb[27].mxu1  ;;  %vm27208_vm7 = vmmov %vm27206_vm0 }
 0x70c   : > { %7850 = vst.msk [vmem:[#allocation2 + $0x20] sm:$0xff] %vm27204_vm3, %v7830_v20  ;;  %v7713_v25 = vadd.f32 %v24362_v2, %v7666_v62  ;;  %v7667_v4 = vmul.f32 %v24357_v13, %v7475_v29  ;;  %v8028_v39 = vsel %vm27205_vm1, 0.0, %v7909_v23  ;;  %v7915_v37 = vsel %vm27206_vm0, %v7912_v17, %v7914_v33  ;;  %vm27209_vm11 = vmmov %vm27206_vm0 }
 0x70d   : > { %7849 = vst.msk [vmem:[#allocation2 + $0x18] sm:$0xff] %vm27207_vm12, %v7829_v1  ;;  %v7755_v6 = vmax.f32 %v7715_v9, 0.0  ;;  %v7716_v7 = vadd.f32 %v24362_v2, %v7669_v46  ;;  %v7911_v42 = vsel %vm27208_vm7, %v7909_v23, %v7910_v59  ;;  %v7913_v47 = vsel %vm27209_vm11, %v7910_v59, %v7912_v17  ;;  %v27216_v17 = vld [vmem:[#allocation14_spill] sm:$0xff]  ;;  %vm27218_vm0 = vmmov %vm27207_vm12  ;;  %v24428_v9 = vld [vmem:[#allocation2] sm:$0xf8] }
 0x70e   : > { %v7753_v61 = vmax.f32 %v7713_v25, 0.0  ;;  %v7714_v3 = vadd.f32 %v24362_v2, %v7667_v4  ;;  %v8029_v5 = vpack.c.bf16 %v7911_v42, %v8028_v39  ;;  %v8030_v63 = vpack.c.bf16 %v7915_v37, %v7913_v47 }
 0x70f   : > { %vm27211_vm3 = vnez %v27210_v55  ;;  %v7756_v51 = vmax.f32 %v7716_v7, 0.0  ;;  %vm27213_vm1 = vnez %v27212_v19  ;;  %vm27215_vm11 = vnez %v27214_v10 }
 0x710   : > { %v7795_v26 = vsel %vm27211_vm3, %v7755_v6, 0.0  ;;  %v7793_v48 = vsel %vm27213_vm1, %v7753_v61, 0.0  ;;  %v7754_v53 = vmax.f32 %v7714_v3, 0.0  ;;  %v18354_v45 = vpop.f32.mrb[28].mxu1  ;;  %v8069_v28 = vrot.slane %v8029_v5, 1  ;;  %vm27221_vm1 = vmmov %vm27218_vm0 }
 0x711   : > { %v7920_v38 = vrot.slane %v7795_v26, 7  ;;  %v7916_v40 = vrot.slane %v7793_v48, 7  ;;  %v24411_v35 = vsel %vm27215_vm11, %v7756_v51, 0.0  ;;  %v7672_v12 = vmul.f32 %v18354_v45, %v24357_v13  ;;  %v7488_v30 = vpop.f32.mrb[29].mxu1 }
 0x712   : > { %v8070_v22 = vrot.slane %v8030_v63, 1  ;;  %v7832_v49 = vpack.c.bf16 %v24411_v35, %v7795_v26  ;;  %v7922_v31 = vrot.slane %v24411_v35, 7  ;;  %vm27217_vm7 = vnez %v27216_v17  ;;  %8108 = vrot.lane.b32.xlu1 %v8069_v28, %s21145_s15  ;;  %v18355_v50 = vpop.f32.mrb[30].mxu1  ;;  %v27227_v63 = vld [vmem:[#allocation16_spill] sm:$0xff] }
 0x713   : > { %v7794_v23 = vsel %vm27217_vm7, %v7754_v53, 0.0  ;;  %v7670_v58 = vmul.f32 %v24357_v13, %v7488_v30  ;;  %v7719_v20 = vadd.f32 %v24362_v2, %v7672_v12  ;;  %v7673_v21 = vmul.f32 %v18355_v50, %v24357_v13  ;;  %v7491_v32 = vpop.f32.mrb[31].mxu1  ;;  %v27229_v53 = vld [vmem:[#allocation17_spill] sm:$0xff]  ;;  %v27231_v12 = vld [vmem:[#allocation28_spill] sm:$0xff] }
 0x714   : > { %v7831_v54 = vpack.c.bf16 %v7794_v23, %v7793_v48  ;;  %v7918_v44 = vrot.slane %v7794_v23, 7  ;;  %7852 = vst.msk [vmem:[#allocation2 + $0x30] sm:$0xff] %vm27218_vm0, %v7832_v49  ;;  %vm27219_vm12 = vcmask 1046528   ;;  %v7671_v1 = vmul.f32 %v24357_v13, %v7491_v32 }
 0x715   : > { %v7717_v62 = vadd.f32 %v24362_v2, %v7670_v58  ;;  %v8071_v36 = vsel %vm27219_vm12, %v8069_v28, %v8070_v22  ;;  %vm27220_vm3 = vcmask 1040384   ;;  %v7759_v46 = vmax.f32 %v7719_v20, 0.0 }
 0x716   : > { %v7917_v59 = vsel %vm27220_vm3, %v7914_v33, %v7916_v40  ;;  %7851 = vst.msk [vmem:[#allocation2 + $0x28] sm:$0xff] %vm27221_vm1, %v7831_v54  ;;  %v7720_v29 = vadd.f32 %v24362_v2, %v7673_v21  ;;  %8110 = vrot.lane.b32.xlu0 %v8071_v36, %s21145_s15  ;;  %vm27222_vm11 = vmmov %vm27220_vm3  ;;  %v7718_v37 = vadd.f32 %v24362_v2, %v7671_v1  ;;  %v27225_v33 = vld [vmem:[#allocation15_spill] sm:$0xff]  ;;  %v8238_v3 = vrot.slane %v24428_v9, 3 }
 0x717   : > { %v7919_v25 = vsel %vm27222_vm11, %v7916_v40, %v7918_v44  ;;  %vm27223_vm7 = vmmov %vm27220_vm3  ;;  %v7757_v39 = vmax.f32 %v7717_v62, 0.0  ;;  %vm27226_vm12 = vnez %v27225_v33  ;;  %vm27230_vm1 = vnez %v27229_v53 }
 0x718   : > { %v7921_v4 = vsel %vm27223_vm7, %v7918_v44, %v7920_v38  ;;  %vm27224_vm0 = vmmov %vm27220_vm3  ;;  %v8031_v7 = vpack.c.bf16 %v7919_v25, %v7917_v59  ;;  %v7799_v42 = vsel %vm27226_vm12, %v7759_v46, 0.0  ;;  %v7760_v47 = vmax.f32 %v7720_v29, 0.0  ;;  %v18358_v51 = vpop.f32.mrb[32].mxu1 }
 0x719   : > { %v7923_v6 = vsel %vm27224_vm0, %v7920_v38, %v7922_v31  ;;  %v7928_v5 = vrot.slane %v7799_v42, 7  ;;  %vm27228_vm3 = vnez %v27227_v63  ;;  %v7758_v26 = vmax.f32 %v7718_v37, 0.0  ;;  %v7504_v28 = vpop.f32.mrb[33].mxu1 }
 0x71a   : > { %v8032_v61 = vpack.c.bf16 %v7923_v6, %v7921_v4  ;;  %v7797_v55 = vsel %vm27228_vm3, %v7757_v39, 0.0  ;;  %v8072_v19 = vrot.slane %v8031_v7, 1  ;;  %v24444_v45 = vsel %vm27230_vm1, %v7760_v47, 0.0  ;;  %v18359_v17 = vpop.f32.mrb[34].mxu1  ;;  %v27242_v47 = vld [vmem:[#allocation70_spill] sm:$0xff] }
 0x71b   : > { %v7924_v48 = vrot.slane %v7797_v55, 7  ;;  %v7676_v38 = vmul.f32 %v18358_v51, %v24357_v13  ;;  %v7834_v10 = vpack.c.bf16 %v24444_v45, %v7799_v42  ;;  %v7930_v35 = vrot.slane %v24444_v45, 7  ;;  %v7507_v44 = vpop.f32.mrb[35].mxu1 }
 0x71c   : > { %v8074_v40 = vrot.slane %v8032_v61, 1  ;;  %vm27232_vm11 = vnez %v27231_v12  ;;  %v7674_v49 = vmul.f32 %v24357_v13, %v7504_v28  ;;  %v7677_v54 = vmul.f32 %v18359_v17, %v24357_v13 }
 0x71d   : > { %v7798_v30 = vsel %vm27232_vm11, %v7758_v26, 0.0  ;;  %v7723_v50 = vadd.f32 %v24362_v2, %v7676_v38  ;;  %vm27233_vm7 = vcmask 523264   ;;  %vm27234_vm0 = vcmask 1046528  }
 0x71e   : > { %v7833_v23 = vpack.c.bf16 %v7798_v30, %v7797_v55  ;;  %v7926_v58 = vrot.slane %v7798_v30, 7  ;;  %7854 = vst.msk [vmem:[#allocation2 + $0x40] sm:$0xff] %vm27233_vm7, %v7834_v10  ;;  %v7721_v20 = vadd.f32 %v24362_v2, %v7674_v49  ;;  %v8075_v21 = vsel %vm27234_vm0, %v8072_v19, %v8074_v40  ;;  %vm27235_vm12 = vmmov %vm27234_vm0  ;;  %v24472_v55 = vld [vmem:[#allocation2] sm:$0xff]  ;;  %v27246_v10 = vld [vmem:[#allocation72_spill] sm:$0xff] }
 0x71f   : > { %v8073_v32 = vsel %vm27235_vm12, %v8070_v22, %v8072_v19  ;;  %v7675_v62 = vmul.f32 %v24357_v13, %v7507_v44  ;;  %vm27236_vm3 = vmmov %vm27233_vm7  ;;  %v7763_v36 = vmax.f32 %v7723_v50, 0.0  ;;  %v7724_v1 = vadd.f32 %v24362_v2, %v7677_v54  ;;  %8114 = vrot.lane.b32.xlu0 %v8075_v21, %s21145_s15  ;;  %v27244_v19 = vld [vmem:[#allocation32_spill] sm:$0xff] }
 0x720   : > { %7853 = vst.msk [vmem:[#allocation2 + $0x38] sm:$0xff] %vm27236_vm3, %v7833_v23  ;;  %8112 = vrot.lane.b32.xlu1 %v8073_v32, %s21145_s15  ;;  %vm27237_vm1 = vcmask 1040384   ;;  %v7761_v29 = vmax.f32 %v7721_v20, 0.0  ;;  %vm27243_vm12 = vnez %v27242_v47  ;;  %v18362_v63 = vpop.f32.mrb[36].mxu1  ;;  %v8239_v26 = vrot.slane %v24472_v55, 3 }
 0x721   : > { %v7925_v59 = vsel %vm27237_vm1, %v7922_v31, %v7924_v48  ;;  %vm27238_vm11 = vmmov %vm27237_vm1  ;;  %v7722_v25 = vadd.f32 %v24362_v2, %v7675_v62  ;;  %v7803_v37 = vsel %vm22614_vm13, %v7763_v36, 0.0  ;;  %v7764_v6 = vmax.f32 %v7724_v1, 0.0  ;;  %v7520_v53 = vpop.f32.mrb[37].mxu1 }
 0x722   : > { %v7927_v46 = vsel %vm27238_vm11, %v7924_v48, %v7926_v58  ;;  %vm27239_vm7 = vmmov %vm27237_vm1  ;;  %v7936_v42 = vrot.slane %v7803_v37, 7  ;;  %v7801_v61 = vsel %vm27243_vm12, %v7761_v29, 0.0  ;;  %vm27245_vm3 = vnez %v27244_v19  ;;  %v18363_v49 = vpop.f32.mrb[38].mxu1 }
 0x723   : > { %v7929_v22 = vsel %vm27239_vm7, %v7926_v58, %v7928_v5  ;;  %vm27240_vm0 = vmmov %vm27237_vm1  ;;  %v8033_v7 = vpack.c.bf16 %v7927_v46, %v7925_v59  ;;  %v7762_v31 = vmax.f32 %v7722_v25, 0.0  ;;  %v7932_v51 = vrot.slane %v7801_v61, 7  ;;  %v7523_v54 = vpop.f32.mrb[39].mxu1 }
 0x724   : > { %v7931_v4 = vsel %vm27240_vm0, %v7928_v5, %v7930_v35  ;;  %v24477_v5 = vsel %vm27245_vm3, %v7764_v6, 0.0  ;;  %v7680_v48 = vmul.f32 %v18362_v63, %v24357_v13  ;;  %vm27247_vm13 = vnez %v27246_v10  ;;  %vm27251_vm12 = vmmov %vm27240_vm0 }
 0x725   : > { %v8034_v33 = vpack.c.bf16 %v7931_v4, %v7929_v22  ;;  %v8076_v45 = vrot.slane %v8033_v7, 1  ;;  %v7836_v38 = vpack.c.bf16 %v24477_v5, %v7803_v37  ;;  %v7938_v28 = vrot.slane %v24477_v5, 7 }
 0x726   : > { %v7802_v12 = vsel %vm27247_vm13, %v7762_v31, 0.0  ;;  %v7678_v30 = vmul.f32 %v24357_v13, %v7520_v53  ;;  %v7727_v58 = vadd.f32 %v24362_v2, %v7680_v48  ;;  %v7681_v50 = vmul.f32 %v18363_v49, %v24357_v13  ;;  %vm27253_vm13 = vmmov %vm27240_vm0 }
 0x727   : > { %v7835_v17 = vpack.c.bf16 %v7802_v12, %v7801_v61  ;;  %v7934_v23 = vrot.slane %v7802_v12, 7  ;;  %vm27248_vm1 = vcmask 523264   ;;  %v8078_v20 = vrot.slane %v8034_v33, 1 }
 0x728   : > { %7856 = vst.msk [vmem:[#allocation2 + $0x50] sm:$0xff] %vm27248_vm1, %v7836_v38  ;;  %v7725_v44 = vadd.f32 %v24362_v2, %v7678_v30  ;;  %vm27249_vm11 = vcmask 1046528   ;;  %v7679_v32 = vmul.f32 %v24357_v13, %v7523_v54  ;;  %vm27250_vm7 = vmmov %vm27248_vm1  ;;  %v7767_v62 = vmax.f32 %v7727_v58, 0.0  ;;  %v18366_v33 = vpop.f32.mrb[40].mxu1 }
 0x729   : > { %v8077_v21 = vsel %vm27249_vm11, %v8074_v40, %v8076_v45  ;;  %7855 = vst.msk [vmem:[#allocation2 + $0x48] sm:$0xff] %vm27250_vm7, %v7835_v17  ;;  %v7728_v36 = vadd.f32 %v24362_v2, %v7681_v50  ;;  %v7933_v1 = vsel %vm27240_vm0, %v7930_v35, %v7932_v51  ;;  %v7935_v59 = vsel %vm27251_vm12, %v7932_v51, %v7934_v23  ;;  %vm27252_vm3 = vmmov %vm27249_vm11  ;;  %v7536_v63 = vpop.f32.mrb[41].mxu1 }
 0x72a   : > { %8116 = vrot.lane.b32.xlu1 %v8077_v21, %s21145_s15  ;;  %v7765_v46 = vmax.f32 %v7725_v44, 0.0  ;;  %v8079_v29 = vsel %vm27252_vm3, %v8076_v45, %v8078_v20  ;;  %v7726_v25 = vadd.f32 %v24362_v2, %v7679_v32  ;;  %v7937_v40 = vsel %vm27253_vm13, %v7934_v23, %v7936_v42  ;;  %vm27255_vm11 = vmmov %vm27240_vm0  ;;  %v18367_v48 = vpop.f32.mrb[42].mxu1  ;;  %v27265_v32 = vld [vmem:[#allocation3_spill] sm:$0xff] }
 0x72b   : > { %vm27254_vm1 = vnez %v26922_v34  ;;  %v7768_v4 = vmax.f32 %v7728_v36, 0.0  ;;  %8118 = vrot.lane.b32.xlu0 %v8079_v29, %s21145_s15  ;;  %v7939_v39 = vsel %vm27255_vm11, %v7936_v42, %v7938_v28  ;;  %v8035_v37 = vpack.c.bf16 %v7935_v59, %v7933_v1  ;;  %v7539_v10 = vpop.f32.mrb[43].mxu1 }
 0x72c   : > { %v7807_v22 = vsel %vm27254_vm1, %v7767_v62, 0.0  ;;  %vm27256_vm7 = vnez %v26930_v11  ;;  %v7766_v7 = vmax.f32 %v7726_v25, 0.0  ;;  %v8036_v47 = vpack.c.bf16 %v7939_v39, %v7937_v40  ;;  %v27270_v39 = vld [vmem:[#allocation23_spill] sm:$0xff] }
 0x72d   : > { %v7944_v6 = vrot.slane %v7807_v22, 7  ;;  %v7805_v35 = vsel %vm27256_vm7, %v7765_v46, 0.0  ;;  %vm27257_vm0 = vnez %v26938_v56  ;;  %v7684_v34 = vmul.f32 %v18366_v33, %v24357_v13  ;;  %vm27262_vm7 = vmmov %vm27255_vm11 }
 0x72e   : > { %v7940_v61 = vrot.slane %v7805_v35, 7  ;;  %v24507_v31 = vsel %vm27257_vm0, %v7768_v4, 0.0  ;;  %v8080_v51 = vrot.slane %v8035_v37, 1  ;;  %vm27258_vm12 = vnez %v26950_v43 }
 0x72f   : > { %v7838_v19 = vpack.c.bf16 %v24507_v31, %v7807_v22  ;;  %v7946_v42 = vrot.slane %v24507_v31, 7  ;;  %v7806_v11 = vsel %vm27258_vm12, %v7766_v7, 0.0  ;;  %v7682_v5 = vmul.f32 %v24357_v13, %v7536_v63  ;;  %vm27264_vm12 = vmmov %vm27262_vm7 }
 0x730   : > { %v7837_v53 = vpack.c.bf16 %v7806_v11, %v7805_v35  ;;  %v7942_v45 = vrot.slane %v7806_v11, 7  ;;  %v7731_v56 = vadd.f32 %v24362_v2, %v7684_v34  ;;  %v7685_v38 = vmul.f32 %v18367_v48, %v24357_v13  ;;  %v18370_v40 = vpop.f32.mrb[44].mxu1 }
 0x731   : > { %vm27259_vm3 = vcmask 523264   ;;  %v7729_v12 = vadd.f32 %v24362_v2, %v7682_v5  ;;  %v8082_v30 = vrot.slane %v8036_v47, 1  ;;  %vm27260_vm13 = vcmask 1046528   ;;  %v7552_v7 = vpop.f32.mrb[45].mxu1 }
 0x732   : > { %7858 = vst.msk [vmem:[#allocation2 + $0x60] sm:$0xff] %vm27259_vm3, %v7838_v19  ;;  %v8081_v49 = vsel %vm27260_vm13, %v8078_v20, %v8080_v51  ;;  %v7683_v43 = vmul.f32 %v24357_v13, %v7539_v10  ;;  %vm27261_vm1 = vmmov %vm27259_vm3  ;;  %v7771_v17 = vmax.f32 %v7731_v56, 0.0  ;;  %v7732_v23 = vadd.f32 %v24362_v2, %v7685_v38  ;;  %v18371_v63 = vpop.f32.mrb[46].mxu1 }
 0x733   : > { %7857 = vst.msk [vmem:[#allocation2 + $0x58] sm:$0xff] %vm27261_vm1, %v7837_v53  ;;  %8120 = vrot.lane.b32.xlu1 %v8081_v49, %s21145_s15  ;;  %v7941_v58 = vsel %vm27255_vm11, %v7938_v28, %v7940_v61  ;;  %v7943_v50 = vsel %vm27262_vm7, %v7940_v61, %v7942_v45  ;;  %v7769_v54 = vmax.f32 %v7729_v12, 0.0  ;;  %vm27263_vm0 = vmmov %vm27260_vm13  ;;  %v7945_v20 = vsel %vm27264_vm12, %v7942_v45, %v7944_v6  ;;  %v27268_v28 = vld [vmem:[#allocation5_spill] sm:$0xff]  ;;  %v27272_v61 = vld [vmem:[#allocation30_spill] sm:$0xff]  ;;  %v7555_v48 = vpop.f32.mrb[47].mxu1 }
 0x734   : > { %v8083_v44 = vsel %vm27263_vm0, %v8080_v51, %v8082_v30  ;;  %v7730_v21 = vadd.f32 %v24362_v2, %v7683_v43  ;;  %vm27266_vm3 = vnez %v27265_v32  ;;  %v7772_v36 = vmax.f32 %v7732_v23, 0.0  ;;  %vm27267_vm13 = vmmov %vm27262_vm7 }
 0x735   : > { %v7811_v62 = vsel %vm27266_vm3, %v7771_v17, 0.0  ;;  %8122 = vrot.lane.b32.xlu0 %v8083_v44, %s21145_s15  ;;  %v7947_v1 = vsel %vm27267_vm13, %v7944_v6, %v7946_v42  ;;  %v8037_v59 = vpack.c.bf16 %v7943_v50, %v7941_v58  ;;  %vm27269_vm1 = vnez %v27268_v28 }
 0x736   : > { %v7952_v46 = vrot.slane %v7811_v62, 7  ;;  %v7809_v29 = vsel %vm27269_vm1, %v7769_v54, 0.0  ;;  %v7770_v25 = vmax.f32 %v7730_v21, 0.0  ;;  %v8038_v22 = vpack.c.bf16 %v7947_v1, %v7945_v20  ;;  %vm27277_vm1 = vmmov %vm27267_vm13 }
 0x737   : > { %v7948_v4 = vrot.slane %v7809_v29, 7  ;;  %vm27271_vm11 = vnez %v27270_v39  ;;  %v7688_v35 = vmul.f32 %v18370_v40, %v24357_v13  ;;  %v8084_v33 = vrot.slane %v8037_v59, 1 }
 0x738   : > { %v24537_v37 = vsel %vm27271_vm11, %v7772_v36, 0.0  ;;  %vm27273_vm7 = vnez %v27272_v61  ;;  %v7686_v34 = vmul.f32 %v24357_v13, %v7552_v7  ;;  %v7689_v5 = vmul.f32 %v18371_v63, %v24357_v13 }
 0x739   : > { %v7840_v47 = vpack.c.bf16 %v24537_v37, %v7811_v62  ;;  %v7954_v6 = vrot.slane %v24537_v37, 7  ;;  %v7810_v31 = vsel %vm27273_vm7, %v7770_v25, 0.0  ;;  %v7735_v11 = vadd.f32 %v24362_v2, %v7688_v35  ;;  %vm27279_vm7 = vmmov %vm27277_vm1  ;;  %v18374_v62 = vpop.f32.mrb[48].mxu1 }
 0x73a   : > { %v7839_v51 = vpack.c.bf16 %v7810_v31, %v7809_v29  ;;  %v7950_v19 = vrot.slane %v7810_v31, 7  ;;  %vm27274_vm0 = vcmask 523264   ;;  %v7733_v53 = vadd.f32 %v24362_v2, %v7686_v34  ;;  %v7568_v28 = vpop.f32.mrb[49].mxu1 }
 0x73b   : > { %7860 = vst.msk [vmem:[#allocation2 + $0x70] sm:$0xff] %vm27274_vm0, %v7840_v47  ;;  %v8086_v45 = vrot.slane %v8038_v22, 1  ;;  %vm27275_vm12 = vcmask 1046528   ;;  %v7687_v38 = vmul.f32 %v24357_v13, %v7555_v48  ;;  %vm27276_vm3 = vmmov %vm27274_vm0  ;;  %v7775_v10 = vmax.f32 %v7735_v11, 0.0  ;;  %v18375_v22 = vpop.f32.mrb[50].mxu1 }
 0x73c   : > { %v8085_v56 = vsel %vm27275_vm12, %v8082_v30, %v8084_v33  ;;  %7859 = vst.msk [vmem:[#allocation2 + $0x68] sm:$0xff] %vm27276_vm3, %v7839_v51  ;;  %v7736_v12 = vadd.f32 %v24362_v2, %v7689_v5  ;;  %v7949_v49 = vsel %vm27267_vm13, %v7946_v42, %v7948_v4  ;;  %v7951_v43 = vsel %vm27277_vm1, %v7948_v4, %v7950_v19  ;;  %vm27278_vm11 = vmmov %vm27275_vm12  ;;  %v7571_v35 = vpop.f32.mrb[51].mxu1 }
 0x73d   : > { %8124 = vrot.lane.b32.xlu1 %v8085_v56, %s21145_s15  ;;  %v7773_v17 = vmax.f32 %v7733_v53, 0.0  ;;  %v8087_v23 = vsel %vm27278_vm11, %v8084_v33, %v8086_v45  ;;  %v7734_v58 = vadd.f32 %v24362_v2, %v7687_v38  ;;  %v7953_v30 = vsel %vm27279_vm7, %v7950_v19, %v7952_v46  ;;  %vm27281_vm12 = vmmov %vm27277_vm1 }
 0x73e   : > { %vm27280_vm0 = vnez %v26955_v8  ;;  %v7776_v54 = vmax.f32 %v7736_v12, 0.0  ;;  %8126 = vrot.lane.b32.xlu0 %v8087_v23, %s21145_s15  ;;  %v7955_v44 = vsel %vm27281_vm12, %v7952_v46, %v7954_v6  ;;  %v8039_v21 = vpack.c.bf16 %v7951_v43, %v7949_v49  ;;  %vm27284_vm13 = vmmov %vm27278_vm11 }
 0x73f   : > { %v7815_v50 = vsel %vm27280_vm0, %v7775_v10, 0.0  ;;  %v7813_v42 = vsel %vm22809_vm8, %v7773_v17, 0.0  ;;  %v7774_v32 = vmax.f32 %v7734_v58, 0.0  ;;  %v8040_v36 = vpack.c.bf16 %v7955_v44, %v7953_v30  ;;  %vm27286_vm11 = vmmov %vm27277_vm1  ;;  %v27292_v17 = vld [vmem:[#allocation39_spill] sm:$0xff] }
 0x740   : > { %v7960_v20 = vrot.slane %v7815_v50, 7  ;;  %v7956_v1 = vrot.slane %v7813_v42, 7  ;;  %vm27282_vm3 = vnez %v26974_v16  ;;  %v7692_v8 = vmul.f32 %v18374_v62, %v24357_v13  ;;  %vm27287_vm7 = vmmov %vm27284_vm13  ;;  %v18378_v12 = vpop.f32.mrb[52].mxu1  ;;  %v27294_v44 = vld [vmem:[#allocation75_spill] sm:$0xff] }
 0x741   : > { %v24567_v59 = vsel %vm27282_vm3, %v7776_v54, 0.0  ;;  %v8088_v29 = vrot.slane %v8039_v21, 1  ;;  %v7814_v18 = vsel %vm22851_vm6, %v7774_v32, 0.0  ;;  %v7690_v40 = vmul.f32 %v24357_v13, %v7568_v28  ;;  %vm27288_vm0 = vmmov %vm27277_vm1  ;;  %v7584_v58 = vpop.f32.mrb[53].mxu1 }
 0x742   : > { %v7842_v25 = vpack.c.bf16 %v24567_v59, %v7815_v50  ;;  %v7962_v46 = vrot.slane %v24567_v59, 7  ;;  %v7841_v4 = vpack.c.bf16 %v7814_v18, %v7813_v42  ;;  %v7958_v39 = vrot.slane %v7814_v18, 7  ;;  %vm27290_vm3 = vmmov %vm27288_vm0 }
 0x743   : > { %v7739_v16 = vadd.f32 %v24362_v2, %v7692_v8  ;;  %v7693_v37 = vmul.f32 %v18375_v22, %v24357_v13  ;;  %vm27283_vm8 = vcmask 523264   ;;  %v7737_v7 = vadd.f32 %v24362_v2, %v7690_v40 }
 0x744   : > { %7862 = vst.msk [vmem:[#allocation2 + $0x80] sm:$0xff] %vm27283_vm8, %v7842_v25  ;;  %v8090_v33 = vrot.slane %v8040_v36, 1  ;;  %v8089_v47 = vsel %vm27284_vm13, %v8086_v45, %v8088_v29  ;;  %v7691_v52 = vmul.f32 %v24357_v13, %v7571_v35  ;;  %vm27285_vm6 = vmmov %vm27283_vm8  ;;  %v7957_v34 = vsel %vm27277_vm1, %v7954_v6, %v7956_v1 }
 0x745   : > { %7861 = vst.msk [vmem:[#allocation2 + $0x78] sm:$0xff] %vm27285_vm6, %v7841_v4  ;;  %v7779_v61 = vmax.f32 %v7739_v16, 0.0  ;;  %v7740_v31 = vadd.f32 %v24362_v2, %v7693_v37  ;;  %8128 = vrot.lane.b32.xlu1 %v8089_v47, %s21145_s15  ;;  %v7959_v63 = vsel %vm27286_vm11, %v7956_v1, %v7958_v39  ;;  %v7777_v51 = vmax.f32 %v7737_v7, 0.0  ;;  %vm27297_vm11 = vmmov %vm27287_vm7 }
 0x746   : > { %v8091_v19 = vsel %vm27287_vm7, %v8088_v29, %v8090_v33  ;;  %v7738_v11 = vadd.f32 %v24362_v2, %v7691_v52  ;;  %v7961_v5 = vsel %vm27288_vm0, %v7958_v39, %v7960_v20  ;;  %vm27289_vm12 = vnez %v26989_v27 }
 0x747   : > { %v7819_v48 = vsel %vm27289_vm12, %v7779_v61, 0.0  ;;  %v7780_v53 = vmax.f32 %v7740_v31, 0.0  ;;  %8130 = vrot.lane.b32.xlu0 %v8091_v19, %s21145_s15  ;;  %v7963_v45 = vsel %vm27290_vm3, %v7960_v20, %v7962_v46  ;;  %v8041_v56 = vpack.c.bf16 %v7959_v63, %v7957_v34  ;;  %v18379_v20 = vpop.f32.mrb[54].mxu1  ;;  %vm27299_vm12 = vmmov %vm27288_vm0 }
 0x748   : > { %v7968_v38 = vrot.slane %v7819_v48, 7  ;;  %vm27291_vm8 = vnez %v26995_v14  ;;  %v7778_v10 = vmax.f32 %v7738_v11, 0.0  ;;  %v8042_v49 = vpack.c.bf16 %v7963_v45, %v7961_v5  ;;  %v7587_v1 = vpop.f32.mrb[55].mxu1  ;;  %vm27300_vm3 = vmmov %vm27297_vm11 }
 0x749   : > { %v7817_v6 = vsel %vm27291_vm8, %v7777_v51, 0.0  ;;  %vm27293_vm13 = vnez %v27292_v17  ;;  %v7696_v27 = vmul.f32 %v18378_v12, %v24357_v13  ;;  %v8092_v30 = vrot.slane %v8041_v56, 1  ;;  %vm27301_vm8 = vmmov %vm27288_vm0  ;;  %v18382_v31 = vpop.f32.mrb[56].mxu1 }
 0x74a   : > { %v7964_v43 = vrot.slane %v7817_v6, 7  ;;  %v24597_v23 = vsel %vm27293_vm13, %v7780_v53, 0.0  ;;  %vm27295_vm6 = vnez %v27294_v44  ;;  %v7694_v21 = vmul.f32 %v24357_v13, %v7584_v58  ;;  %vm27302_vm13 = vmmov %vm27288_vm0  ;;  %v7600_v19 = vpop.f32.mrb[57].mxu1 }
 0x74b   : > { %v7844_v50 = vpack.c.bf16 %v24597_v23, %v7819_v48  ;;  %v7970_v54 = vrot.slane %v24597_v23, 7  ;;  %v7818_v14 = vsel %vm27295_vm6, %v7778_v10, 0.0  ;;  %v7743_v62 = vadd.f32 %v24362_v2, %v7696_v27  ;;  %v18383_v60 = vpop.f32.mrb[58].mxu1  ;;  %vm27307_vm6 = vmmov %vm27288_vm0 }
 0x74c   : > { %v7843_v42 = vpack.c.bf16 %v7818_v14, %v7817_v6  ;;  %v7966_v32 = vrot.slane %v7818_v14, 7  ;;  %v7697_v36 = vmul.f32 %v18379_v20, %v24357_v13  ;;  %vm27296_vm1 = vcmask 523264   ;;  %v7603_v41 = vpop.f32.mrb[59].mxu1 }
 0x74d   : > { %7864 = vst.msk [vmem:[#allocation2 + $0x90] sm:$0xff] %vm27296_vm1, %v7844_v50  ;;  %v7741_v59 = vadd.f32 %v24362_v2, %v7694_v21  ;;  %v8094_v8 = vrot.slane %v8042_v49, 1  ;;  %v8093_v28 = vsel %vm27297_vm11, %v8090_v33, %v8092_v30  ;;  %v7695_v29 = vmul.f32 %v24357_v13, %v7587_v1  ;;  %vm27298_vm7 = vmmov %vm27296_vm1 }
 0x74e   : > { %7863 = vst.msk [vmem:[#allocation2 + $0x88] sm:$0xff] %vm27298_vm7, %v7843_v42  ;;  %v7783_v25 = vmax.f32 %v7743_v62, 0.0  ;;  %v7744_v18 = vadd.f32 %v24362_v2, %v7697_v36  ;;  %8132 = vrot.lane.b32.xlu1 %v8093_v28, %s21145_s15  ;;  %v7965_v40 = vsel %vm27288_vm0, %v7962_v46, %v7964_v43  ;;  %v7967_v22 = vsel %vm27299_vm12, %v7964_v43, %v7966_v32  ;;  %vm27309_vm11 = vmmov %vm27288_vm0 }
 0x74f   : > { %v7781_v4 = vmax.f32 %v7741_v59, 0.0  ;;  %v8095_v39 = vsel %vm27300_vm3, %v8092_v30, %v8094_v8  ;;  %v7742_v16 = vadd.f32 %v24362_v2, %v7695_v29  ;;  %v7969_v37 = vsel %vm27301_vm8, %v7966_v32, %v7968_v38  ;;  %vm27310_vm7 = vmmov %vm27288_vm0 }
 0x750   : > { %v7823_v35 = vsel %vm22973_vm4, %v7783_v25, 0.0  ;;  %v7784_v7 = vmax.f32 %v7744_v18, 0.0  ;;  %8134 = vrot.lane.b32.xlu0 %v8095_v39, %s21145_s15  ;;  %v7971_v33 = vsel %vm27302_vm13, %v7968_v38, %v7970_v54  ;;  %v8043_v47 = vpack.c.bf16 %v7967_v22, %v7965_v40  ;;  %vm27304_vm4 = vmmov %vm27300_vm3  ;;  %v27315_v18 = vld [vmem:[#allocation50_spill] sm:$0xff] }
 0x751   : > { %v7976_v52 = vrot.slane %v7823_v35, 7  ;;  %v7821_v46 = vsel %vm22982_vm9, %v7781_v4, 0.0  ;;  %v7782_v61 = vmax.f32 %v7742_v16, 0.0  ;;  %v8044_v34 = vpack.c.bf16 %v7971_v33, %v7969_v37  ;;  %vm27305_vm9 = vmmov %vm27296_vm1 }
 0x752   : > { %v7972_v63 = vrot.slane %v7821_v46, 7  ;;  %v7824_v51 = vsel %vm22991_vm2, %v7784_v7, 0.0  ;;  %v7700_v0 = vmul.f32 %v18382_v31, %v24357_v13  ;;  %v8096_v11 = vrot.slane %v8043_v47, 1  ;;  %vm27303_vm2 = vmmov %vm27296_vm1 }
 0x753   : > { %v7846_v5 = vpack.c.bf16 %v7824_v51, %v7823_v35  ;;  %v7978_v48 = vrot.slane %v7824_v51, 7  ;;  %v7822_v53 = vsel %vm23000_vm15, %v7782_v61, 0.0  ;;  %v7698_v45 = vmul.f32 %v24357_v13, %v7600_v19  ;;  %vm27306_vm15 = vmmov %vm27288_vm0  ;;  %v20889_v19 = vld [vmem:[%s26244_s3 + $0x48] sm:$0xff]  }
 0x754   : > { %v7845_v56 = vpack.c.bf16 %v7822_v53, %v7821_v46  ;;  %v7974_v38 = vrot.slane %v7822_v53, 7  ;;  %v7747_v6 = vadd.f32 %v24362_v2, %v7700_v0  ;;  %v7701_v10 = vmul.f32 %v18383_v60, %v24357_v13  ;;  %vm27308_vm1 = vmmov %vm27300_vm3 }
 0x755   : > { %7866 = vst.msk [vmem:[#allocation2 + $0xa0] sm:$0xff] %vm27303_vm2, %v7846_v5  ;;  %v7745_v12 = vadd.f32 %v24362_v2, %v7698_v45  ;;  %v8098_v49 = vrot.slane %v8044_v34, 1  ;;  %v8097_v43 = vsel %vm27304_vm4, %v8094_v8, %v8096_v11  ;;  %v7699_v15 = vmul.f32 %v24357_v13, %v7603_v41  ;;  %v27313_v8 = vld [vmem:[#allocation44_spill] sm:$0xff]  ;;  %vm27317_vm3 = vmmov %vm27308_vm1 }
 0x756   : > { %7865 = vst.msk [vmem:[#allocation2 + $0x98] sm:$0xff] %vm27305_vm9, %v7845_v56  ;;  %v7787_v17 = vmax.f32 %v7747_v6, 0.0  ;;  %v7748_v23 = vadd.f32 %v24362_v2, %v7701_v10  ;;  %8136 = vrot.lane.b32.xlu1 %v8097_v43, %s21145_s15  ;;  %v7973_v27 = vsel %vm27306_vm15, %v7970_v54, %v7972_v63  ;;  %v7975_v58 = vsel %vm27307_vm6, %v7972_v63, %v7974_v38  ;;  %v27311_v54 = vld [vmem:[#allocation40_spill] sm:$0xff]  ;;  %vm27318_vm8 = vmmov %vm27307_vm6  ;;  %v20890_v56 = vld [vmem:[%s26244_s3 + $0x50] sm:$0xff]  }
 0x757   : > { %v7785_v30 = vmax.f32 %v7745_v12, 0.0  ;;  %v8099_v50 = vsel %vm27308_vm1, %v8096_v11, %v8098_v49  ;;  %v7746_v44 = vadd.f32 %v24362_v2, %v7699_v15  ;;  %v7977_v14 = vsel %vm27309_vm11, %v7974_v38, %v7976_v52  ;;  %vm27319_vm13 = vmmov %vm27303_vm2  ;;  %v20892_v15 = vld [vmem:[%s26244_s3 + $0x60] sm:$0xff]  }
 0x758   : > { %v7827_v13 = vsel %vm23064_vm5, %v7787_v17, 0.0  ;;  %v7788_v21 = vmax.f32 %v7748_v23, 0.0  ;;  %8138 = vrot.lane.b32.xlu0 %v8099_v50, %s21145_s15  ;;  %v7979_v20 = vsel %vm27310_vm7, %v7976_v52, %v7978_v48  ;;  %v8045_v42 = vpack.c.bf16 %v7975_v58, %v7973_v27  ;;  %vm27320_vm2 = vmmov %vm27308_vm1  ;;  %v20893_v17 = vld [vmem:[%s26244_s3 + $0x68] sm:$0xff]  }
 0x759   : > { %v7984_v32 = vrot.slane %v7827_v13, 7  ;;  %vm27312_vm0 = vnez %v27311_v54  ;;  %v7786_v36 = vmax.f32 %v7746_v44, 0.0  ;;  %v8046_v1 = vpack.c.bf16 %v7979_v20, %v7977_v14  ;;  %vm27321_vm4 = vmmov %vm27307_vm6  ;;  %v20894_v20 = vld [vmem:[%s26244_s3 + $0x70] sm:$0xff]  }
 0x75a   : > { %v7825_v62 = vsel %vm27312_vm0, %v7785_v30, 0.0  ;;  %vm27314_vm12 = vnez %v27313_v8  ;;  %v8100_v28 = vrot.slane %v8045_v42, 1  ;;  %v8240_v57 = vsel %vm2503_vm10, %v8238_v3, %v8239_v26  ;;  %vm27322_vm15 = vmmov %vm27321_vm4 }
 0x75b   : > { %v7980_v59 = vrot.slane %v7825_v62, 7  ;;  %v7828_v2 = vsel %vm27314_vm12, %v7788_v21, 0.0  ;;  %vm27316_vm5 = vnez %v27315_v18  ;;  %v8102_v22 = vrot.slane %v8046_v1, 1  ;;  %18400 = vmatprep.mubr.bf16.mxu0 %v8240_v57  ;;  %vm27323_vm6 = vmmov %vm27321_vm4 }
 0x75c   : > { %v7848_v29 = vpack.c.bf16 %v7828_v2, %v7827_v13  ;;  %v7986_v25 = vrot.slane %v7828_v2, 7  ;;  %v7826_v40 = vsel %vm27316_vm5, %v7786_v36, 0.0  ;;  %v8101_v16 = vsel %vm27317_vm3, %v8098_v49, %v8100_v28  ;;  %vm27324_vm11 = vmmov %vm27308_vm1  ;;  %v20895_v36 = vld [vmem:[%s26244_s3 + $0x78] sm:$0xff]  }
 0x75d   : > { %v7847_v4 = vpack.c.bf16 %v7826_v40, %v7825_v62  ;;  %v7982_v39 = vrot.slane %v7826_v40, 7  ;;  %v7981_v37 = vsel %vm27318_vm8, %v7978_v48, %v7980_v59  ;;  %v8103_v35 = vsel %vm27320_vm2, %v8100_v28, %v8102_v22  ;;  %8140 = vrot.lane.b32.xlu1 %v8101_v16, %s21145_s15 }
 0x75e   : > { %7868 = vst.msk [vmem:[#allocation2 + $0xb0] sm:$0xff] %vm27319_vm13, %v7848_v29  ;;  %v7987_v9 = vsel %vm27321_vm4, %v7984_v32, %v7986_v25  ;;  %8142 = vrot.lane.b32.xlu0 %v8103_v35, %s21145_s15  ;;  %vm27325_vm7 = vcmask 1048071   ;;  %vm27326_vm0 = vcmask 1048064  }
 0x75f   : > { %7867 = vst.msk [vmem:[#allocation2 + $0xa8] sm:$0xff] %vm27305_vm9, %v7847_v4  ;;  %v7983_v3 = vsel %vm27322_vm15, %v7980_v59, %v7982_v39  ;;  %v7985_v7 = vsel %vm27323_vm6, %v7982_v39, %v7984_v32  ;;  %vm27327_vm12 = vmmov %vm27326_vm0  ;;  %v8450_v4 = vld [vmem:[#allocation2] sm:$0xf0]  ;;  %vm27336_vm6 = vcmask 1043456  }
 0x760   : > { %v8047_v33 = vpack.c.bf16 %v7983_v3, %v7981_v37  ;;  %v8048_v47 = vpack.c.bf16 %v7987_v9, %v7985_v7  ;;  %vm27328_vm5 = vmmov %vm27326_vm0  ;;  %v20896_v39 = vld [vmem:[%s26244_s3 + $0x80] sm:$0xff]  }
 0x761   : > { %vm27329_vm3 = vmmov %vm27326_vm0 }
 0x762   : > { %v8104_v52 = vrot.slane %v8047_v33, 1  ;;  %v8106_v46 = vrot.slane %v8048_v47, 1  ;;  %vm27330_vm8 = vmmov %vm27326_vm0  ;;  %v8471_v33 = vrot.slane %v8450_v4, 4  ;;  %v20900_v4 = vld [vmem:[%s26244_s3 + $0xa0] sm:$0xff]  }
 0x763   : > { %vm27331_vm13 = vmmov %vm27326_vm0 }
 0x764   : > { %v8107_v61 = vsel %vm27308_vm1, %v8104_v52, %v8106_v46  ;;  %v8105_v31 = vsel %vm27324_vm11, %v8102_v22, %v8104_v52  ;;  %vm27332_vm2 = vmmov %vm27326_vm0 }
 0x765   : > { %8146 = vrot.lane.b32.xlu0 %v8107_v61, %s21145_s15  ;;  %8144 = vrot.lane.b32.xlu1 %v8105_v31, %s21145_s15  ;;  %vm27333_vm4 = vmmov %vm27326_vm0 }
 0x766   : > { %vm27334_vm9 = vmmov %vm27326_vm0 }
 0x767   : > { %vm27335_vm15 = vmmov %vm27326_vm0 }
 0x768   : > { %vm27337_vm1 = vmmov %vm27326_vm0 }
 0x769   : > { %8148 = vrot.lane.b32.xlu1 %v8106_v46, %s21145_s15  ;;  %vm27338_vm11 = vmmov %vm27326_vm0 }
 0x784   : > { %v8109_v34 = vpop.permute.xlu1 %8108 }
 0x785   : > { %8171 = vst.msk [vmem:[#allocation2 + $0x10] sm:$0x80] %vm27325_vm7, %v8109_v34  ;;  %v8472_v34 = vrot.slane %v24472_v55, 4  ;;  %vm27339_vm7 = vmmov %vm27326_vm0 }
 0x788   : > { %v8111_v63 = vpop.permute.xlu0 %8110 }
 0x789   : > { %8172 = vst.msk [vmem:[#allocation2 + $0x18] sm:$0xff] %vm27326_vm0, %v8111_v63  ;;  %vm27340_vm0 = vmmov %vm27336_vm6 }
 0x78c   : > { %v24677_v51 = vld [vmem:[#allocation2 + $0x10] sm:$0xff] }
 0x78d   : > { %v8241_v0 = vrot.slane %v24677_v51, 3 }
 0x78f   : > { %v8242_v48 = vsel %vm2503_vm10, %v8239_v26, %v8241_v0  ;;  %v20891_v26 = vld [vmem:[%s26244_s3 + $0x58] sm:$0xff]  }
 0x790   : > { %v24686_v53 = vld [vmem:[#allocation2 + $0x18] sm:$0xff]  ;;  %18401 = vmatmul.mubr.bf16.vlgmr.msra.gmra.mrb[20].mxu0 %v8242_v48 }
 0x791   : > { %v8115_v11 = vpop.permute.xlu0 %8114  ;;  %v8243_v45 = vrot.slane %v24686_v53, 3  ;;  %18421 = vmatpush3.bf16.msra.mxu0 %v24407_v24 }
 0x792   : > { %v8113_v5 = vpop.permute.xlu1 %8112  ;;  %8174 = vst.msk [vmem:[#allocation2 + $0x28] sm:$0xff] %vm27327_vm12, %v8115_v11  ;;  %18422 = vmatprep.subr.bf16.mxu0 %v20889_v19  ;;  %vm27341_vm12 = vmmov %vm27340_vm0 }
 0x793   : > { %8173 = vst.msk [vmem:[#allocation2 + $0x20] sm:$0xff] %vm27328_vm5, %v8113_v5  ;;  %v8244_v60 = vsel %vm2503_vm10, %v8241_v0, %v8243_v45  ;;  %v8473_v5 = vsel %vm27336_vm6, %v8471_v33, %v8472_v34  ;;  %vm27342_vm5 = vmmov %vm27340_vm0  ;;  %vm27350_vm6 = vcmask 1042432  }
 0x794   : > { %18404 = vmatprep.mubr.bf16.mxu0 %v8244_v60 }
 0x795   : > { %18423 = vmatpush3.bf16.msra.mxu0 %v20889_v19 }
 0x796   : > { %18424 = vmatprep.subr.bf16.mxu0 %v20890_v56 }
 0x799   : > { %v24701_v10 = vld [vmem:[#allocation2 + $0x28] sm:$0xff]  ;;  %18425 = vmatpush3.bf16.msra.mxu0 %v20890_v56  ;;  %v8476_v56 = vrot.slane %v24686_v53, 4 }
 0x79a   : > { %v24699_v6 = vld [vmem:[#allocation2 + $0x20] sm:$0xff]  ;;  %v8247_v41 = vrot.slane %v24701_v10, 3  ;;  %18426 = vmatprep.subr.bf16.mxu0 %v20891_v26  ;;  %v24723_v14 = vld [vmem:[#allocation2 + $0x28] sm:$0xff] }
 0x79b   : > { %v8245_v24 = vrot.slane %v24699_v6, 3  ;;  %v26457_v62 = vrot.slane %v24723_v14, 2  ;;  %v26454_v7 = vrot.slane %v24723_v14, 3 }
 0x79c   : > { %v8117_v38 = vpop.permute.xlu1 %8116 }
 0x79d   : > { %8175 = vst.msk [vmem:[#allocation2 + $0x30] sm:$0xff] %vm27329_vm3, %v8117_v38  ;;  %v8119_v12 = vpop.permute.xlu0 %8118  ;;  %v8246_v49 = vsel %vm2503_vm10, %v8243_v45, %v8245_v24  ;;  %v8248_v43 = vsel %vm2503_vm10, %v8245_v24, %v8247_v41  ;;  %18427 = vmatpush3.bf16.msra.mxu0 %v20891_v26  ;;  %v8474_v45 = vrot.slane %v24677_v51, 4  ;;  %vm27343_vm3 = vmmov %vm27340_vm0 }
 0x79e   : > { %8176 = vst.msk [vmem:[#allocation2 + $0x38] sm:$0xff] %vm27330_vm8, %v8119_v12  ;;  %18405 = vmatmul.mubr.bf16.gmra.mrb[24].mxu0 %v8246_v49  ;;  %18428 = vmatprep.subr.bf16.mxu0 %v20892_v15  ;;  %vm27344_vm8 = vmmov %vm27337_vm1 }
 0x79f   : > { %18408 = vmatprep.mubr.bf16.mxu0 %v8248_v43  ;;  %v8475_v43 = vsel %vm27340_vm0, %v8472_v34, %v8474_v45 }
 0x7a1   : > { %18429 = vmatpush3.bf16.msra.mxu0 %v20892_v15  ;;  %v8477_v15 = vsel %vm27341_vm12, %v8474_v45, %v8476_v56  ;;  %vm27355_vm12 = vmmov %vm27343_vm3 }
 0x7a2   : > { %18430 = vmatprep.subr.bf16.mxu0 %v20893_v17 }
 0x7a4   : > { %v24715_v27 = vld [vmem:[#allocation2 + $0x30] sm:$0xff] }
 0x7a5   : > { %v8121_v23 = vpop.permute.xlu1 %8120  ;;  %v24717_v58 = vld [vmem:[#allocation2 + $0x30] sm:$0xff]  ;;  %v8249_v30 = vrot.slane %v24715_v27, 3  ;;  %v24721_v44 = vld [vmem:[#allocation2 + $0x38] sm:$0xff]  ;;  %18431 = vmatpush3.bf16.msra.mxu0 %v20893_v17  ;;  %v8482_v33 = vrot.slane %v24715_v27, 4 }
 0x7a6   : > { %8177 = vst.msk [vmem:[#allocation2 + $0x40] sm:$0xff] %vm27331_vm13, %v8121_v23  ;;  %v8251_v21 = vrot.slane %v24721_v44, 3  ;;  %v10609_v42 = vrot.slane %v24717_v58, 2  ;;  %v24732_v32 = vld [vmem:[#allocation2 + $0x38] sm:$0xff]  ;;  %18432 = vmatprep.subr.bf16.mxu0 %v20894_v20  ;;  %v24764_v37 = vrot.slane %v24717_v58, 3  ;;  %v26453_v17 = vrot.slane %v24717_v58, 4  ;;  %vm27345_vm13 = vmmov %vm27340_vm0 }
 0x7a7   : > { %v8123_v50 = vpop.permute.xlu0 %8122  ;;  %v8250_v13 = vsel %vm2503_vm10, %v8247_v41, %v8249_v30  ;;  %v10611_v59 = vrot.slane %v24732_v32, 2  ;;  %v10844_v9 = vrot.slane %v24732_v32, 3  ;;  %v20897_v41 = vld [vmem:[%s26244_s3 + $0x88] sm:$0xff]   ;;  %v20898_v23 = vld [vmem:[%s26244_s3 + $0x90] sm:$0xff]  }
 0x7a8   : > { %8178 = vst.msk [vmem:[#allocation2 + $0x48] sm:$0xff] %vm27332_vm2, %v8123_v50  ;;  %18409 = vmatmul.mubr.bf16.gmra.mrb[28].mxu0 %v8250_v13  ;;  %v8252_v54 = vsel %vm2503_vm10, %v8249_v30, %v8251_v21  ;;  %v24742_v1 = vsel %vm5822_vm14, %v26457_v62, %v10609_v42  ;;  %v24779_v46 = vsel %vm2503_vm10, %v26454_v7, %v24764_v37  ;;  %v11326_v30 = vrot.slane %v24732_v32, 4  ;;  %vm27346_vm2 = vmmov %vm27337_vm1  ;;  %v20909_v7 = vld [vmem:[%s26244_s3 + $0xe8] sm:$0xff]  }
 0x7a9   : > { %18412 = vmatprep.mubr.bf16.mxu0 %v8252_v54  ;;  %18433 = vmatpush3.bf16.msra.mxu0 %v20894_v20  ;;  %v24754_v18 = vsel %vm5822_vm14, %v10609_v42, %v10611_v59  ;;  %v24784_v63 = vsel %vm2503_vm10, %v24764_v37, %v10844_v9  ;;  %v8478_v13 = vrot.slane %v24699_v6, 4  ;;  %v8480_v42 = vrot.slane %v24701_v10, 4 }
 0x7aa   : > { %18434 = vmatprep.subr.bf16.mxu0 %v20895_v36  ;;  %v24827_v54 = vsel %vm27342_vm5, %v26453_v17, %v11326_v30  ;;  %vm27356_vm5 = vmmov %vm27343_vm3 }
 0x7ad   : > { %v24745_v2 = vld [vmem:[#allocation2 + $0x40] sm:$0xff]  ;;  %18435 = vmatpush3.bf16.msra.mxu0 %v20895_v36 }
 0x7ae   : > { %v24747_v28 = vld [vmem:[#allocation2 + $0x40] sm:$0xff]  ;;  %v8253_v57 = vrot.slane %v24745_v2, 3  ;;  %18456 = vmatprep.subr.bf16.mxu0 %v20896_v39 }
 0x7af   : > { %v8125_v8 = vpop.permute.xlu1 %8124  ;;  %v24751_v25 = vld [vmem:[#allocation2 + $0x48] sm:$0xff]  ;;  %v10613_v16 = vrot.slane %v24747_v28, 2  ;;  %v10846_v26 = vrot.slane %v24747_v28, 3  ;;  %v11328_v50 = vrot.slane %v24747_v28, 4 }
 0x7b0   : > { %8179 = vst.msk [vmem:[#allocation2 + $0x50] sm:$0xff] %vm27333_vm4, %v8125_v8  ;;  %v8127_v29 = vpop.permute.xlu0 %8126  ;;  %v8254_v40 = vsel %vm2503_vm10, %v8251_v21, %v8253_v57  ;;  %v8255_v22 = vrot.slane %v24751_v25, 3  ;;  %v24766_v35 = vld [vmem:[#allocation2 + $0x48] sm:$0xff]  ;;  %vm27347_vm4 = vmmov %vm27340_vm0 }
 0x7b1   : > { %8180 = vst.msk [vmem:[#allocation2 + $0x58] sm:$0xff] %vm27334_vm9, %v8127_v29  ;;  %18413 = vmatmul.mubr.bf16.gmra.mrb[32].mxu0 %v8254_v40  ;;  %v24772_v47 = vsel %vm5822_vm14, %v10611_v59, %v10613_v16  ;;  %v26455_v52 = vrot.slane %v24766_v35, 2  ;;  %v24799_v38 = vrot.slane %v24766_v35, 3  ;;  %v24806_v12 = vsel %vm2503_vm10, %v10844_v9, %v10846_v26  ;;  %vm27348_vm9 = vmmov %vm27340_vm0 }
 0x7b2   : > { %v8256_v3 = vsel %vm2503_vm10, %v8253_v57, %v8255_v22  ;;  %v26452_v21 = vrot.slane %v24766_v35, 4  ;;  %v24830_v36 = vsel %vm27343_vm3, %v11326_v30, %v11328_v50  ;;  %v20899_v57 = vld [vmem:[%s26244_s3 + $0x98] sm:$0xff]   ;;  %v8479_v29 = vsel %vm27347_vm4, %v8476_v56, %v8478_v13 }
 0x7b3   : > { %18416 = vmatprep.mubr.bf16.mxu0 %v8256_v3  ;;  %v24790_v19 = vsel %vm5822_vm14, %v10613_v16, %v26455_v52  ;;  %v24810_v49 = vsel %vm2503_vm10, %v10846_v26, %v24799_v38  ;;  %v8481_v40 = vsel %vm27348_vm9, %v8478_v13, %v8480_v42  ;;  %v11559_v16 = vrot.slane %v24732_v32, 5  ;;  %v20901_v26 = vld [vmem:[%s26244_s3 + $0xa8] sm:$0xff]   ;;  %v20902_v13 = vld [vmem:[%s26244_s3 + $0xb0] sm:$0xff]  }
 0x7b4   : > { %v24836_v59 = vsel %vm27345_vm13, %v11328_v50, %v26452_v21  ;;  %v11561_v9 = vrot.slane %v24747_v28, 5  ;;  %v11563_v34 = vrot.slane %v24766_v35, 5  ;;  %vm27359_vm13 = vmmov %vm27346_vm2 }
 0x7b7   : > { %v8129_v61 = vpop.permute.xlu1 %8128  ;;  %v8210_v31 = vld [vmem:[#allocation2 + $0x50] sm:$0x7] }
 0x7b8   : > { %8181 = vst.msk [vmem:[#allocation2 + $0x60] sm:$0xff] %vm27335_vm15, %v8129_v61  ;;  %v8257_v0 = vrot.slane %v8210_v31, 3  ;;  %vm27349_vm15 = vmmov %vm27337_vm1 }
 0x7b9   : > { %v8131_v11 = vpop.permute.xlu0 %8130 }
 0x7ba   : > { %8182 = vst.msk [vmem:[#allocation2 + $0x68] sm:$0xff] %vm27337_vm1, %v8131_v11  ;;  %v8258_v48 = vsel %vm2503_vm10, %v8255_v22, %v8257_v0  ;;  %v24844_v22 = vld [vmem:[#allocation2 + $0x50] sm:$0xff]  ;;  %vm27351_vm1 = vmmov %vm27350_vm6 }
 0x7bb   : > { %18417 = vmatmul.mubr.bf16.gmra.mrb[36].mxu0 %v8258_v48  ;;  %v26450_v0 = vrot.slane %v24844_v22, 5  ;;  %v24865_v45 = vsel %vm27351_vm1, %v11559_v16, %v11561_v9  ;;  %vm27354_vm0 = vmmov %vm27351_vm1 }
 0x7bc   : > { %18436 = vmatprep.mubr.bf16.mxu0 %v8473_v5  ;;  %v8484_v5 = vrot.slane %v24721_v44, 4  ;;  %vm27357_vm3 = vmmov %vm27354_vm0 }
 0x7bd   : > { %v24874_v56 = vsel %vm27354_vm0, %v11563_v34, %v26450_v0  ;;  %v8717_v0 = vrot.slane %v24721_v44, 5 }
 0x7c0   : > { %v8133_v60 = vpop.permute.xlu1 %8132 }
 0x7c1   : > { %8183 = vst.msk [vmem:[#allocation2 + $0x70] sm:$0xff] %vm27338_vm11, %v8133_v60  ;;  %v24853_v61 = vld [vmem:[#allocation2 + $0x68] sm:$0xff]  ;;  %vm27352_vm11 = vmmov %vm27346_vm2 }
 0x7c2   : > { %v8135_v24 = vpop.permute.xlu0 %8134 }
 0x7c3   : > { %8184 = vst.msk [vmem:[#allocation2 + $0x78] sm:$0xff] %vm27339_vm7, %v8135_v24  ;;  %18437 = vmatmul.mubr.bf16.vlgmr.msra.gmra.mrb[20].mxu0 %v8475_v43  ;;  %vm27353_vm7 = vmmov %vm27351_vm1  ;;  %v24880_v24 = vrot.slane %v24853_v61, 5  ;;  %v8483_v43 = vsel %vm27355_vm12, %v8480_v42, %v8482_v33  ;;  %v8488_v42 = vrot.slane %v24751_v25, 4 }
 0x7c4   : > { %18457 = vmatpush3.bf16.msra.mxu0 %v20896_v39  ;;  %18440 = vmatprep.mubr.bf16.mxu0 %v8477_v15  ;;  %v26451_v39 = vrot.slane %v24717_v58, 5  ;;  %v24869_v60 = vsel %vm27353_vm7, %v11561_v9, %v11563_v34  ;;  %v8485_v15 = vsel %vm27356_vm5, %v8482_v33, %v8484_v5  ;;  %vm27367_vm1 = vmmov %vm27354_vm0 }
 0x7c5   : > { %18458 = vmatprep.subr.bf16.mxu0 %v20897_v41  ;;  %vm27369_vm7 = vmmov %vm27354_vm0 }
 0x7c6   : > { %v24862_v48 = vsel %vm27350_vm6, %v26451_v39, %v11559_v16  ;;  %v8683_v16 = vld [vmem:[#allocation2] sm:$0xe0]  ;;  %vm27365_vm6 = vmmov %vm27354_vm0 }
 0x7c7   : > { %v8704_v34 = vrot.slane %v8683_v16, 5  ;;  %v20907_v16 = vld [vmem:[%s26244_s3 + $0xd8] sm:$0xff]   ;;  %vm27370_vm12 = vmmov %vm27354_vm0 }
 0x7c8   : > { %v8137_v20 = vpop.permute.xlu1 %8136  ;;  %18459 = vmatpush3.bf16.msra.mxu0 %v20897_v41  ;;  %v11060_v31 = vld [vmem:[#allocation2 + $0x70] sm:$0xff]  ;;  %vm27372_vm5 = vmmov %vm27354_vm0 }
 0x7c9   : > { %8185 = vst.msk [vmem:[#allocation2 + $0x80] sm:$0xff] %vm27344_vm8, %v8137_v20  ;;  %18460 = vmatprep.subr.bf16.mxu0 %v20898_v23  ;;  %v24882_v41 = vrot.slane %v11060_v31, 5  ;;  %vm27358_vm8 = vmmov %vm27346_vm2  ;;  %v8486_v20 = vrot.slane %v24745_v2, 4 }
 0x7ca   : > { %v8139_v8 = vpop.permute.xlu0 %8138 }
 0x7cb   : > { %8186 = vst.msk [vmem:[#allocation2 + $0x88] sm:$0xff] %vm27346_vm2, %v8139_v8  ;;  %18441 = vmatmul.mubr.bf16.gmra.mrb[24].mxu0 %v8479_v29  ;;  %v24898_v8 = vld [vmem:[#allocation2 + $0x58] sm:$0xff]  ;;  %vm27360_vm2 = vmmov %vm27347_vm4  ;;  %vm27361_vm4 = vcmask 1047040  }
 0x7cc   : > { %18444 = vmatprep.mubr.bf16.mxu0 %v8481_v40  ;;  %18461 = vmatpush3.bf16.msra.mxu0 %v20898_v23  ;;  %v24889_v23 = vsel %vm27357_vm3, %v24880_v24, %v24882_v41  ;;  %v20903_v40 = vld [vmem:[%s26244_s3 + $0xb8] sm:$0xff]   ;;  %vm27362_vm9 = vmmov %vm27360_vm2  ;;  %v26449_v33 = vrot.slane %v24898_v8, 5 }
 0x7cd   : > { %18462 = vmatprep.subr.bf16.mxu0 %v20899_v57  ;;  %v8489_v9 = vsel %vm27362_vm9, %v8486_v20, %v8488_v42  ;;  %vm27377_vm3 = vmmov %vm27354_vm0 }
 0x7ce   : > { %vm27389_vm9 = vmmov %vm27360_vm2 }
 0x7cf   : > { %v8141_v3 = vpop.permute.xlu1 %8140 }
 0x7d0   : > { %v8143_v11 = vpop.permute.xlu0 %8142  ;;  %8187 = vst.msk [vmem:[#allocation2 + $0x90] sm:$0xff] %vm27349_vm15, %v8141_v3  ;;  %18463 = vmatpush3.bf16.msra.mxu0 %v20899_v57  ;;  %v11798_v57 = vld [vmem:[#allocation2 + $0x60] sm:$0xff]  ;;  %v8451_v3 = vld [vmem:[#allocation2 + $0x50] sm:$0xf]  ;;  %vm27364_vm15 = vmmov %vm27354_vm0 }
 0x7d1   : > { %8188 = vst.msk [vmem:[#allocation2 + $0x98] sm:$0xff] %vm27352_vm11, %v8143_v11  ;;  %18464 = vmatprep.subr.bf16.mxu0 %v20900_v4  ;;  %v24907_v31 = vrot.slane %v11798_v57, 5  ;;  %v20904_v11 = vld [vmem:[%s26244_s3 + $0xc0] sm:$0xff]   ;;  %vm27368_vm11 = vmmov %vm27360_vm2  ;;  %v20905_v57 = vld [vmem:[%s26244_s3 + $0xc8] sm:$0xff]  }
 0x7d3   : > { %18445 = vmatmul.mubr.bf16.gmra.mrb[28].mxu0 %v8483_v43  ;;  %27363 = vst [vmem:[#allocation60_spill] sm:$0xff] %v24907_v31  ;;  %v8490_v43 = vrot.slane %v8451_v3, 4  ;;  %v24951_v3 = vld [vmem:[#allocation2 + $0x78] sm:$0xff] }
 0x7d4   : > { %18448 = vmatprep.mubr.bf16.mxu0 %v8485_v15  ;;  %18465 = vmatpush3.bf16.msra.mxu0 %v20900_v4  ;;  %v8487_v4 = vsel %vm27360_vm2, %v8484_v5, %v8486_v20  ;;  %v24916_v5 = vsel %vm27364_vm15, %v26449_v33, %v24907_v31  ;;  %v8705_v15 = vrot.slane %v24472_v55, 5  ;;  %v8709_v20 = vrot.slane %v24686_v53, 5  ;;  %27371 = vst [vmem:[#allocation62_spill] sm:$0xff] %v24951_v3  ;;  %vm27391_vm15 = vmmov %vm27354_vm0 }
 0x7d5   : > { %18466 = vmatprep.subr.bf16.mxu0 %v20901_v26 }
 0x7d7   : > { %v8147_v30 = vpop.permute.xlu0 %8146  ;;  %v8145_v50 = vpop.permute.xlu1 %8144 }
 0x7d8   : > { %8190 = vst.msk [vmem:[#allocation2 + $0xa8] sm:$0xff] %vm27358_vm8, %v8147_v30  ;;  %18467 = vmatpush3.bf16.msra.mxu0 %v20901_v26  ;;  %v24921_v26 = vsel %vm27365_vm6, %v24907_v31, %v24880_v24  ;;  %v8706_v30 = vsel %vm27367_vm1, %v8704_v34, %v8705_v15  ;;  %v24953_v34 = vld [vmem:[#allocation2 + $0x80] sm:$0xff]  ;;  %vm27379_vm8 = vmmov %vm27354_vm0  ;;  %v8916_v31 = vld [vmem:[#allocation2 + $0x8] sm:$0xe0] }
 0x7d9   : > { %8189 = vst.msk [vmem:[#allocation2 + $0xa0] sm:$0xff] %vm27359_vm13, %v8145_v50  ;;  %18468 = vmatprep.subr.bf16.mxu0 %v20902_v13  ;;  %27366 = vst [vmem:[#allocation65_spill] sm:$0xff] %v24921_v26  ;;  %v8491_v50 = vsel %vm27368_vm11, %v8488_v42, %v8490_v43  ;;  %v20906_v42 = vld [vmem:[%s26244_s3 + $0xd0] sm:$0xff]   ;;  %v26472_v26 = vrot.slane %v24953_v34, 5 }
 0x7da   : > { %vm27385_vm13 = vmmov %vm27354_vm0 }
 0x7db   : > { %v8149_v29 = vpop.permute.xlu1 %8148  ;;  %18449 = vmatmul.mubr.bf16.gmra.mrb[32].mxu0 %v8487_v4  ;;  %v8713_v4 = vrot.slane %v24701_v10, 5  ;;  %vm27392_vm6 = vmmov %vm27354_vm0 }
 0x7dc   : > { %8191 = vst.msk [vmem:[#allocation2 + $0xb0] sm:$0x7f] %vm27361_vm4, %v8149_v29  ;;  %18452 = vmatprep.mubr.bf16.mxu0 %v8489_v9  ;;  %18469 = vmatpush3.bf16.msra.mxu0 %v20902_v13  ;;  %v24927_v13 = vrot.slane %v24677_v51, 5  ;;  %vm27387_vm4 = vmmov %vm27360_vm2 }
 0x7dd   : > { %18470 = vmatprep.subr.bf16.mxu0 %v20903_v40  ;;  %vm27393_vm1 = vmmov %vm27354_vm0 }
 0x7de   : > { %v8708_v55 = vsel %vm27369_vm7, %v8705_v15, %v24927_v13  ;;  %v24937_v29 = vsel %vm27354_vm0, %v24927_v13, %v8709_v20  ;;  %v24961_v15 = vld [vmem:[#allocation2 + $0x90] sm:$0xff]  ;;  %vm27394_vm11 = vmmov %vm27354_vm0 }
 0x7df   : > { %v14199_v33 = vrot.slane %v24961_v15, 2  ;;  %vm27395_vm7 = vmmov %vm27354_vm0 }
 0x7e0   : > { %18471 = vmatpush3.bf16.msra.mxu0 %v20903_v40  ;;  %v8711_v40 = vrot.slane %v24699_v6, 5 }
 0x7e1   : > { %18492 = vmatprep.subr.bf16.mxu0 %v20904_v11 }
 0x7e2   : > { %v24949_v9 = vsel %vm27370_vm12, %v8709_v20, %v8711_v40  ;;  %v24959_v43 = vsel %vm27372_vm5, %v8711_v40, %v8713_v4  ;;  %v26456_v20 = vrot.slane %v24951_v3, 2  ;;  %v8715_v40 = vrot.slane %v24715_v27, 5  ;;  %vm27396_vm12 = vmmov %vm27354_vm0 }
 0x7e3   : > { %18453 = vmatmul.mubr.bf16.gmra.mrb[36].mxu0 %v8491_v50  ;;  %v20908_v50 = vld [vmem:[%s26244_s3 + $0xe0] sm:$0xff]   ;;  %vm27397_vm5 = vmmov %vm27354_vm0 }
 0x7e4   : > { %18472 = vmatprep.mubr.bf16.mxu0 %v8706_v30  ;;  %v24964_v30 = vld [vmem:[#allocation2 + $0x98] sm:$0xff] }
 0x7e5   : > { %v26458_v21 = vrot.slane %v24964_v30, 2 }
 0x7e7   : > { %v24993_v52 = vsel %vm5822_vm14, %v14199_v33, %v26458_v21 }
 0x7e8   : > { %27376 = vst [vmem:[#allocation8_spill] sm:$0xff] %v24993_v52 }
 0x7eb   : > { %18473 = vmatmul.mubr.bf16.vlgmr.msra.gmra.mrb[20].mxu0 %v8708_v55 }
 0x7ec   : > { %18493 = vmatpush3.bf16.msra.mxu0 %v20904_v11  ;;  %18476 = vmatprep.mubr.bf16.mxu0 %v24937_v29  ;;  %v24955_v11 = vld [vmem:[#allocation2 + $0x88] sm:$0xff] }
 0x7ed   : > { %18494 = vmatprep.subr.bf16.mxu0 %v20905_v57  ;;  %v14197_v55 = vrot.slane %v24955_v11, 2  ;;  %v14429_v62 = vrot.slane %v24955_v11, 3 }
 0x7ef   : > { %v24985_v17 = vsel %vm5822_vm14, %v14197_v55, %v14199_v33  ;;  %v25009_v33 = vrot.slane %v24964_v30, 3 }
 0x7f0   : > { %18495 = vmatpush3.bf16.msra.mxu0 %v20905_v57  ;;  %v14195_v57 = vrot.slane %v24953_v34, 2  ;;  %27375 = vst [vmem:[#allocation7_spill] sm:$0xff] %v24985_v17  ;;  %v14431_v17 = vrot.slane %v24961_v15, 3 }
 0x7f1   : > { %18496 = vmatprep.subr.bf16.mxu0 %v20906_v42  ;;  %27380 = vst [vmem:[#allocation64_spill] sm:$0xff] %v25009_v33 }
 0x7f2   : > { %v24981_v39 = vsel %vm5822_vm14, %v14195_v57, %v14197_v55  ;;  %v25004_v55 = vsel %vm27379_vm8, %v8715_v40, %v8717_v0  ;;  %v25026_v52 = vsel %vm2503_vm10, %v14429_v62, %v14431_v17  ;;  %vm27399_vm8 = vcmask 1041408  }
 0x7f3   : > { %18477 = vmatmul.mubr.bf16.gmra.mrb[24].mxu0 %v24949_v9  ;;  %27374 = vst [vmem:[#allocation90_spill] sm:$0xff] %v24981_v39  ;;  %27383 = vst [vmem:[#allocation66_spill] sm:$0xff] %v25026_v52  ;;  %v8719_v39 = vrot.slane %v24745_v2, 5 }
 0x7f4   : > { %18480 = vmatprep.mubr.bf16.mxu0 %v24959_v43  ;;  %18497 = vmatpush3.bf16.msra.mxu0 %v20906_v42  ;;  %v24978_v42 = vsel %vm5822_vm14, %v26456_v20, %v14195_v57  ;;  %v24996_v20 = vsel %vm27377_vm3, %v8713_v4, %v8715_v40  ;;  %v26459_v57 = vrot.slane %v24951_v3, 3  ;;  %v20910_v40 = vld [vmem:[%s26244_s3 + $0xf0] sm:$0xff]   ;;  %vm27398_vm3 = vmmov %vm27354_vm0 }
 0x7f5   : > { %18498 = vmatprep.subr.bf16.mxu0 %v20907_v16  ;;  %27373 = vst [vmem:[#allocation74_spill] sm:$0xff] %v24978_v42  ;;  %v14909_v42 = vrot.slane %v24955_v11, 4 }
 0x7f8   : > { %18499 = vmatpush3.bf16.msra.mxu0 %v20907_v16  ;;  %v25000_v16 = vrot.slane %v24953_v34, 3 }
 0x7f9   : > { %18500 = vmatprep.subr.bf16.mxu0 %v20908_v50 }
 0x7fa   : > { %27378 = vst [vmem:[#allocation9_spill] sm:$0xff] %v25000_v16  ;;  %v25016_v4 = vsel %vm2503_vm10, %v26459_v57, %v25000_v16  ;;  %v25023_v21 = vsel %vm2503_vm10, %v25000_v16, %v14429_v62  ;;  %v25034_v57 = vrot.slane %v24751_v25, 5  ;;  %v14911_v16 = vrot.slane %v24961_v15, 4  ;;  %v20911_v62 = vld [vmem:[%s26244_s3 + $0xf8] sm:$0xff]  }
 0x7fb   : > { %18481 = vmatmul.mubr.bf16.gmra.mrb[28].mxu0 %v24996_v20  ;;  %27381 = vst [vmem:[#allocation18_spill] sm:$0xff] %v25016_v4  ;;  %27382 = vst [vmem:[#allocation10_spill] sm:$0xff] %v25023_v21  ;;  %v26470_v4 = vrot.slane %v24953_v34, 4  ;;  %v26471_v21 = vrot.slane %v24964_v30, 4 }
 0x7fc   : > { %18484 = vmatprep.mubr.bf16.mxu0 %v25004_v55  ;;  %18501 = vmatpush3.bf16.msra.mxu0 %v20908_v50  ;;  %v25030_v50 = vsel %vm2503_vm10, %v14431_v17, %v25009_v33  ;;  %v8720_v17 = vsel %vm27385_vm13, %v8717_v0, %v8719_v39  ;;  %v25044_v33 = vld [vmem:[#allocation2 + $0xa0] sm:$0xff]  ;;  %v8722_v3 = vsel %vm27391_vm15, %v8719_v39, %v25034_v57  ;;  %v8684_v0 = vld [vmem:[#allocation2 + $0x50] sm:$0x1f]  ;;  %vm27400_vm13 = vmmov %vm27399_vm8 }
 0x7fd   : > { %18502 = vmatprep.subr.bf16.mxu0 %v20909_v7  ;;  %27384 = vst [vmem:[#allocation67_spill] sm:$0xff] %v25030_v50  ;;  %v25049_v50 = vsel %vm27360_vm2, %v26470_v4, %v14909_v42  ;;  %v25057_v52 = vsel %vm27389_vm9, %v14911_v16, %v26471_v21  ;;  %v15141_v4 = vrot.slane %v24955_v11, 5  ;;  %v15145_v21 = vrot.slane %v24964_v30, 5  ;;  %vm27401_vm2 = vmmov %vm27399_vm8 }
 0x7fe   : > { %27386 = vst [vmem:[#allocation22_spill] sm:$0xff] %v25049_v50  ;;  %27390 = vst [vmem:[#allocation68_spill] sm:$0xff] %v25057_v52  ;;  %v15147_v52 = vrot.slane %v25044_v33, 5  ;;  %v8723_v39 = vrot.slane %v8684_v0, 5  ;;  %v8955_v11 = vrot.slane %v8916_v31, 5  ;;  %v20913_v31 = vld [vmem:[%s26244_s3 + $0x108] sm:$0xff]  }
 0x7ff   : > { %vm27403_vm9 = vmmov %vm27401_vm2 }
 0x800   : > { %18503 = vmatpush3.bf16.msra.mxu0 %v20909_v7  ;;  %v25052_v7 = vsel %vm27387_vm4, %v14909_v42, %v14911_v16  ;;  %v15143_v42 = vrot.slane %v24961_v15, 5  ;;  %v20912_v16 = vld [vmem:[%s26244_s3 + $0x100] sm:$0xff]   ;;  %v25083_v50 = vsel %vm27395_vm7, %v15145_v21, %v15147_v52  ;;  %v8724_v0 = vsel %vm27354_vm0, %v25034_v57, %v8723_v39  ;;  %vm27402_vm4 = vmmov %vm27401_vm2 }
 0x801   : > { %18504 = vmatprep.subr.bf16.mxu0 %v20910_v40  ;;  %27388 = vst [vmem:[#allocation19_spill] sm:$0xff] %v25052_v7  ;;  %vm27404_vm15 = vmmov %vm27401_vm2  ;;  %vm27409_vm0 = vcmask 1040384  }
 0x802   : > { %v25075_v7 = vsel %vm27393_vm1, %v15141_v4, %v15143_v42  ;;  %v25078_v15 = vsel %vm27394_vm11, %v15143_v42, %v15145_v21  ;;  %v20914_v21 = vld [vmem:[%s26244_s3 + $0x110] sm:$0xff]   ;;  %v20920_v42 = vld [vmem:[%s26244_s3 + $0x140] sm:$0xff]   ;;  %vm27406_vm1 = vmmov %vm27401_vm2 }
 0x803   : > { %18485 = vmatmul.mubr.bf16.gmra.mrb[32].mxu0 %v8720_v17  ;;  %vm27407_vm11 = vmmov %vm27406_vm1 }
 0x804   : > { %18488 = vmatprep.mubr.bf16.mxu0 %v8722_v3  ;;  %18505 = vmatpush3.bf16.msra.mxu0 %v20910_v40  ;;  %v25072_v40 = vsel %vm27392_vm6, %v26472_v26, %v15141_v4  ;;  %v8957_v26 = vsel %vm27396_vm12, %v8955_v11, %v24927_v13  ;;  %v20916_v13 = vld [vmem:[%s26244_s3 + $0x120] sm:$0xff]   ;;  %v20919_v4 = vld [vmem:[%s26244_s3 + $0x138] sm:$0xff]   ;;  %v9189_v11 = vrot.slane %v24677_v51, 6  ;;  %vm27405_vm6 = vmmov %vm27401_vm2 }
 0x805   : > { %18506 = vmatprep.subr.bf16.mxu0 %v20911_v62  ;;  %vm27408_vm7 = vmmov %vm27406_vm1 }
 0x806   : > { %vm27410_vm12 = vmmov %vm27409_vm0 }
 0x808   : > { %18507 = vmatpush3.bf16.msra.mxu0 %v20911_v62  ;;  %v8926_v62 = vld [vmem:[#allocation2 + $0x58] sm:$0x1f] }
 0x809   : > { %18528 = vmatprep.subr.bf16.mxu0 %v20912_v16 }
 0x80b   : > { %18489 = vmatmul.mubr.bf16.gmra.mrb[36].mxu0 %v8724_v0  ;;  %v9191_v0 = vrot.slane %v24686_v53, 6 }
 0x80c   : > { %18508 = vmatprep.mubr.bf16.mxu0 %v8957_v26  ;;  %v20915_v26 = vld [vmem:[%s26244_s3 + $0x118] sm:$0xff]  }
 0x813   : > { %18509 = vmatmul.mubr.bf16.vlgmr.msra.gmra.mrb[20].mxu0 %v24937_v29  ;;  %v20917_v29 = vld [vmem:[%s26244_s3 + $0x128] sm:$0xff]  }
 0x814   : > { %18529 = vmatpush3.bf16.msra.mxu0 %v20912_v16  ;;  %18512 = vmatprep.mubr.bf16.mxu0 %v24949_v9  ;;  %v25109_v9 = vld [vmem:[#allocation2 + $0x50] sm:$0xff]  ;;  %v8974_v16 = vrot.slane %v8926_v62, 5 }
 0x815   : > { %18530 = vmatprep.subr.bf16.mxu0 %v20913_v31 }
 0x818   : > { %18531 = vmatpush3.bf16.msra.mxu0 %v20913_v31  ;;  %v9193_v31 = vrot.slane %v24699_v6, 6 }
 0x819   : > { %18532 = vmatprep.subr.bf16.mxu0 %v20914_v21 }
 0x81b   : > { %18513 = vmatmul.mubr.bf16.gmra.mrb[24].mxu0 %v24959_v43  ;;  %v20918_v43 = vld [vmem:[%s26244_s3 + $0x130] sm:$0xff]  }
 0x81c   : > { %18516 = vmatprep.mubr.bf16.mxu0 %v24996_v20  ;;  %18533 = vmatpush3.bf16.msra.mxu0 %v20914_v21  ;;  %v8972_v20 = vrot.slane %v25109_v9, 5  ;;  %v20921_v21 = vld [vmem:[%s26244_s3 + $0x148] sm:$0xff]  }
 0x81d   : > { %18534 = vmatprep.subr.bf16.mxu0 %v20915_v26 }
 0x820   : > { %18535 = vmatpush3.bf16.msra.mxu0 %v20915_v26  ;;  %v9192_v26 = vsel %vm27400_vm13, %v9189_v11, %v9191_v0  ;;  %vm27414_vm13 = vmmov %vm27409_vm0 }
 0x821   : > { %18536 = vmatprep.subr.bf16.mxu0 %v20916_v13 }
 0x823   : > { %18517 = vmatmul.mubr.bf16.gmra.mrb[28].mxu0 %v25004_v55  ;;  %v8973_v55 = vsel %vm27397_vm5, %v25034_v57, %v8972_v20  ;;  %vm27411_vm5 = vmmov %vm27409_vm0 }
 0x824   : > { %18520 = vmatprep.mubr.bf16.mxu0 %v8720_v17  ;;  %18537 = vmatpush3.bf16.msra.mxu0 %v20916_v13  ;;  %v9167_v17 = vld [vmem:[#allocation2 + $0x8] sm:$0xc0]  ;;  %v9194_v13 = vsel %vm27401_vm2, %v9191_v0, %v9193_v31  ;;  %v9203_v0 = vrot.slane %v24751_v25, 6  ;;  %vm27415_vm2 = vmmov %vm27409_vm0 }
 0x825   : > { %18538 = vmatprep.subr.bf16.mxu0 %v20917_v29  ;;  %v9188_v39 = vrot.slane %v9167_v17, 6  ;;  %v20924_v17 = vld [vmem:[%s26244_s3 + $0x160] sm:$0xff]  }
 0x827   : > { %v9190_v57 = vsel %vm27399_vm8, %v9188_v39, %v9189_v11  ;;  %v20925_v39 = vld [vmem:[%s26244_s3 + $0x168] sm:$0xff]   ;;  %vm27413_vm8 = vmmov %vm27409_vm0 }
 0x828   : > { %18539 = vmatpush3.bf16.msra.mxu0 %v20917_v29  ;;  %v20922_v29 = vld [vmem:[%s26244_s3 + $0x150] sm:$0xff]  }
 0x829   : > { %18540 = vmatprep.subr.bf16.mxu0 %v20918_v43 }
 0x82b   : > { %18521 = vmatmul.mubr.bf16.gmra.mrb[32].mxu0 %v8722_v3  ;;  %v8975_v3 = vsel %vm27398_vm3, %v8972_v20, %v8974_v16  ;;  %v9197_v20 = vrot.slane %v24715_v27, 6  ;;  %v9201_v16 = vrot.slane %v24745_v2, 6  ;;  %vm27412_vm3 = vmmov %vm27409_vm0 }
 0x82c   : > { %18524 = vmatprep.mubr.bf16.mxu0 %v8973_v55  ;;  %18541 = vmatpush3.bf16.msra.mxu0 %v20918_v43  ;;  %v9195_v43 = vrot.slane %v24701_v10, 6 }
 0x82d   : > { %18542 = vmatprep.subr.bf16.mxu0 %v20919_v4 }
 0x82e   : > { %v9196_v55 = vsel %vm27402_vm4, %v9193_v31, %v9195_v43  ;;  %v9198_v62 = vsel %vm27403_vm9, %v9195_v43, %v9197_v20  ;;  %v9205_v31 = vrot.slane %v25109_v9, 6  ;;  %v9400_v43 = vld [vmem:[#allocation2 + $0x8] sm:$0x80]  ;;  %vm27416_vm4 = vmmov %vm27409_vm0 }
 0x82f   : > { %vm27417_vm9 = vmmov %vm27409_vm0 }
 0x830   : > { %18543 = vmatpush3.bf16.msra.mxu0 %v20919_v4  ;;  %v20923_v4 = vld [vmem:[%s26244_s3 + $0x158] sm:$0xff]  }
 0x831   : > { %18564 = vmatprep.subr.bf16.mxu0 %v20920_v42 }
 0x833   : > { %18525 = vmatmul.mubr.bf16.gmra.mrb[36].mxu0 %v8975_v3 }
 0x834   : > { %18544 = vmatprep.mubr.bf16.mxu0 %v9190_v57  ;;  %v20926_v57 = vld [vmem:[%s26244_s3 + $0x170] sm:$0xff]  }
 0x83b   : > { %18545 = vmatmul.mubr.bf16.vlgmr.msra.gmra.mrb[20].mxu0 %v9192_v26  ;;  %v9204_v26 = vsel %vm27406_vm1, %v9201_v16, %v9203_v0  ;;  %vm27420_vm1 = vmmov %vm27409_vm0 }
 0x83c   : > { %18565 = vmatpush3.bf16.msra.mxu0 %v20920_v42  ;;  %18548 = vmatprep.mubr.bf16.mxu0 %v9194_v13  ;;  %v9199_v42 = vrot.slane %v24721_v44, 6  ;;  %v9206_v13 = vsel %vm27407_vm11, %v9203_v0, %v9205_v31  ;;  %v9428_v0 = vrot.slane %v24701_v10, 7  ;;  %vm27421_vm11 = vmmov %vm27409_vm0 }
 0x83d   : > { %18566 = vmatprep.subr.bf16.mxu0 %v20921_v21 }
 0x83e   : > { %v9200_v11 = vsel %vm27404_vm15, %v9197_v20, %v9199_v42  ;;  %v9202_v3 = vsel %vm27405_vm6, %v9199_v42, %v9201_v16  ;;  %v20928_v20 = vld [vmem:[%s26244_s3 + $0x180] sm:$0xff]   ;;  %v9424_v16 = vrot.slane %v24686_v53, 7  ;;  %vm27418_vm15 = vmmov %vm27409_vm0 }
 0x83f   : > { %vm27419_vm6 = vmmov %vm27409_vm0 }
 0x840   : > { %18567 = vmatpush3.bf16.msra.mxu0 %v20921_v21  ;;  %v20927_v21 = vld [vmem:[%s26244_s3 + $0x178] sm:$0xff]  }
 0x841   : > { %18568 = vmatprep.subr.bf16.mxu0 %v20922_v29 }
 0x843   : > { %18549 = vmatmul.mubr.bf16.gmra.mrb[24].mxu0 %v9196_v55  ;;  %v9421_v55 = vrot.slane %v9400_v43, 7  ;;  %v9432_v43 = vrot.slane %v24721_v44, 7 }
 0x844   : > { %18552 = vmatprep.mubr.bf16.mxu0 %v9198_v62  ;;  %18569 = vmatpush3.bf16.msra.mxu0 %v20922_v29  ;;  %v9168_v29 = vld [vmem:[#allocation2 + $0x58] sm:$0x3f]  ;;  %v9422_v62 = vrot.slane %v24677_v51, 7 }
 0x845   : > { %18570 = vmatprep.subr.bf16.mxu0 %v20923_v4 }
 0x846   : > { %v9423_v42 = vsel %vm27409_vm0, %v9421_v55, %v9422_v62 }
 0x848   : > { %18571 = vmatpush3.bf16.msra.mxu0 %v20923_v4  ;;  %v9207_v4 = vrot.slane %v9168_v29, 6  ;;  %v20932_v29 = vld [vmem:[%s26244_s3 + $0x1a0] sm:$0xff]  }
 0x849   : > { %18572 = vmatprep.subr.bf16.mxu0 %v20924_v17 }
 0x84b   : > { %18553 = vmatmul.mubr.bf16.gmra.mrb[28].mxu0 %v9200_v11  ;;  %v20929_v11 = vld [vmem:[%s26244_s3 + $0x188] sm:$0xff]  }
 0x84c   : > { %18556 = vmatprep.mubr.bf16.mxu0 %v9202_v3  ;;  %18573 = vmatpush3.bf16.msra.mxu0 %v20924_v17  ;;  %v9208_v17 = vsel %vm27408_vm7, %v9205_v31, %v9207_v4  ;;  %v9425_v3 = vsel %vm27410_vm12, %v9422_v62, %v9424_v16  ;;  %v9430_v31 = vrot.slane %v24715_v27, 7  ;;  %v20933_v4 = vld [vmem:[%s26244_s3 + $0x1a8] sm:$0xff]   ;;  %vm27422_vm7 = vcmask 1046528  }
 0x84d   : > { %18574 = vmatprep.subr.bf16.mxu0 %v20925_v39  ;;  %vm27423_vm0 = vmmov %vm27422_vm7 }
 0x84e   : > { %v9433_v55 = vsel %vm27414_vm13, %v9430_v31, %v9432_v43  ;;  %vm27424_vm12 = vmmov %vm27423_vm0 }
 0x84f   : > { %vm27428_vm13 = vmmov %vm27423_vm0 }
 0x850   : > { %18575 = vmatpush3.bf16.msra.mxu0 %v20925_v39  ;;  %v9426_v39 = vrot.slane %v24699_v6, 7 }
 0x851   : > { %18576 = vmatprep.subr.bf16.mxu0 %v20926_v57 }
 0x852   : > { %v9427_v51 = vsel %vm27411_vm5, %v9424_v16, %v9426_v39  ;;  %vm27425_vm5 = vmmov %vm27423_vm0 }
 0x853   : > { %18557 = vmatmul.mubr.bf16.gmra.mrb[32].mxu0 %v9204_v26  ;;  %v9429_v26 = vsel %vm27412_vm3, %v9426_v39, %v9428_v0  ;;  %v9438_v39 = vrot.slane %v25109_v9, 7  ;;  %vm27426_vm3 = vmmov %vm27423_vm0 }
 0x854   : > { %18560 = vmatprep.mubr.bf16.mxu0 %v9206_v13  ;;  %18577 = vmatpush3.bf16.msra.mxu0 %v20926_v57  ;;  %v20930_v57 = vld [vmem:[%s26244_s3 + $0x190] sm:$0xff]   ;;  %v9431_v13 = vsel %vm27413_vm8, %v9428_v0, %v9430_v31  ;;  %v9401_v0 = vld [vmem:[#allocation2 + $0x58] sm:$0x7f]  ;;  %vm27427_vm8 = vmmov %vm27423_vm0 }
 0x855   : > { %18578 = vmatprep.subr.bf16.mxu0 %v20927_v21  ;;  %v9633_v31 = vld [vmem:[#allocation2 + $0x10] sm:$0x80] }
 0x858   : > { %18579 = vmatpush3.bf16.msra.mxu0 %v20927_v21  ;;  %v20931_v21 = vld [vmem:[%s26244_s3 + $0x198] sm:$0xff]  }
 0x859   : > { %18600 = vmatprep.subr.bf16.mxu0 %v20928_v20 }
 0x85b   : > { %18561 = vmatmul.mubr.bf16.gmra.mrb[36].mxu0 %v9208_v17  ;;  %v20934_v17 = vld [vmem:[%s26244_s3 + $0x1b0] sm:$0xff]  }
 0x85c   : > { %18580 = vmatprep.mubr.bf16.mxu0 %v9423_v42  ;;  %v9436_v42 = vrot.slane %v24751_v25, 7 }
 0x863   : > { %18581 = vmatmul.mubr.bf16.vlgmr.msra.gmra.mrb[20].mxu0 %v9425_v3 }
 0x864   : > { %18601 = vmatpush3.bf16.msra.mxu0 %v20928_v20  ;;  %18584 = vmatprep.mubr.bf16.mxu0 %v9427_v51  ;;  %v9434_v20 = vrot.slane %v24745_v2, 7 }
 0x865   : > { %18602 = vmatprep.subr.bf16.mxu0 %v20929_v11 }
 0x866   : > { %v9435_v62 = vsel %vm27415_vm2, %v9432_v43, %v9434_v20  ;;  %v9437_v3 = vsel %vm27416_vm4, %v9434_v20, %v9436_v42  ;;  %v9672_v43 = vrot.slane %v9633_v31, 7  ;;  %v20944_v31 = vld [vmem:[%s26244_s3 + $0x200] sm:$0xff]   ;;  %vm27429_vm2 = vmmov %vm27423_vm0 }
 0x867   : > { %vm27430_vm4 = vmmov %vm27423_vm0 }
 0x868   : > { %18603 = vmatpush3.bf16.msra.mxu0 %v20929_v11  ;;  %v20935_v11 = vld [vmem:[%s26244_s3 + $0x1b8] sm:$0xff]   ;;  %v9674_v20 = vsel %vm27419_vm6, %v9672_v43, %v9424_v16  ;;  %v20940_v16 = vld [vmem:[%s26244_s3 + $0x1e0] sm:$0xff]   ;;  %vm27433_vm6 = vmmov %vm27423_vm0 }
 0x869   : > { %18604 = vmatprep.subr.bf16.mxu0 %v20930_v57  ;;  %v10083_v43 = vld [vmem:[#allocation2 + $0x18] sm:$0xfe] }
 0x86b   : > { %18585 = vmatmul.mubr.bf16.gmra.mrb[24].mxu0 %v9429_v26 }
 0x86c   : > { %18588 = vmatprep.mubr.bf16.mxu0 %v9431_v13  ;;  %18605 = vmatpush3.bf16.msra.mxu0 %v20930_v57  ;;  %v9439_v57 = vsel %vm27417_vm9, %v9436_v42, %v9438_v39  ;;  %v20938_v42 = vld [vmem:[%s26244_s3 + $0x1d0] sm:$0xff]   ;;  %vm27431_vm9 = vmmov %vm27423_vm0 }
 0x86d   : > { %18606 = vmatprep.subr.bf16.mxu0 %v20931_v21 }
 0x870   : > { %18607 = vmatpush3.bf16.msra.mxu0 %v20931_v21  ;;  %v20936_v21 = vld [vmem:[%s26244_s3 + $0x1c0] sm:$0xff]  }
 0x871   : > { %18608 = vmatprep.subr.bf16.mxu0 %v20932_v29 }
 0x873   : > { %18589 = vmatmul.mubr.bf16.gmra.mrb[28].mxu0 %v9433_v55 }
 0x874   : > { %18592 = vmatprep.mubr.bf16.mxu0 %v9435_v62  ;;  %18609 = vmatpush3.bf16.msra.mxu0 %v20932_v29  ;;  %v9440_v29 = vrot.slane %v9401_v0, 7  ;;  %v20943_v0 = vld [vmem:[%s26244_s3 + $0x1f8] sm:$0xff]  }
 0x875   : > { %18610 = vmatprep.subr.bf16.mxu0 %v20933_v4 }
 0x878   : > { %18611 = vmatpush3.bf16.msra.mxu0 %v20933_v4  ;;  %v9441_v4 = vsel %vm27418_vm15, %v9438_v39, %v9440_v29  ;;  %vm27432_vm15 = vmmov %vm27423_vm0 }
 0x879   : > { %18612 = vmatprep.subr.bf16.mxu0 %v20934_v17 }
 0x87b   : > { %18593 = vmatmul.mubr.bf16.gmra.mrb[32].mxu0 %v9437_v3 }
 0x87c   : > { %18596 = vmatprep.mubr.bf16.mxu0 %v9439_v57  ;;  %18613 = vmatpush3.bf16.msra.mxu0 %v20934_v17  ;;  %v20937_v17 = vld [vmem:[%s26244_s3 + $0x1c8] sm:$0xff]  }
 0x87d   : > { %18614 = vmatprep.subr.bf16.mxu0 %v20935_v11 }
 0x880   : > { %18615 = vmatpush3.bf16.msra.mxu0 %v20935_v11  ;;  %v20939_v11 = vld [vmem:[%s26244_s3 + $0x1d8] sm:$0xff]  }
 0x881   : > { %18636 = vmatprep.subr.bf16.mxu0 %v20936_v21 }
 0x883   : > { %18597 = vmatmul.mubr.bf16.gmra.mrb[36].mxu0 %v9441_v4 }
 0x884   : > { %18616 = vmatprep.mubr.bf16.mxu0 %v9674_v20  ;;  %v10122_v20 = vrot.slane %v10083_v43, 1 }
 0x88b   : > { %18617 = vmatmul.mubr.bf16.vlgmr.msra.gmra.mrb[20].mxu0 %v9427_v51  ;;  %v20941_v51 = vld [vmem:[%s26244_s3 + $0x1e8] sm:$0xff]  }
 0x88c   : > { %18637 = vmatpush3.bf16.msra.mxu0 %v20936_v21  ;;  %18620 = vmatprep.mubr.bf16.mxu0 %v9429_v26  ;;  %v25226_v26 = vld [vmem:[#allocation2 + $0x58] sm:$0xff] }
 0x88d   : > { %18638 = vmatprep.subr.bf16.mxu0 %v20937_v17 }
 0x890   : > { %18639 = vmatpush3.bf16.msra.mxu0 %v20937_v17  ;;  %v25273_v17 = vld [vmem:[#allocation2 + $0x60] sm:$0xff] }
 0x891   : > { %18640 = vmatprep.subr.bf16.mxu0 %v20938_v42 }
 0x893   : > { %18621 = vmatmul.mubr.bf16.gmra.mrb[24].mxu0 %v9431_v13  ;;  %v20942_v13 = vld [vmem:[%s26244_s3 + $0x1f0] sm:$0xff]  }
 0x894   : > { %18624 = vmatprep.mubr.bf16.mxu0 %v9433_v55  ;;  %18641 = vmatpush3.bf16.msra.mxu0 %v20938_v42  ;;  %v9689_v55 = vrot.slane %v25226_v26, 7 }
 0x895   : > { %18642 = vmatprep.subr.bf16.mxu0 %v20939_v11 }
 0x898   : > { %18643 = vmatpush3.bf16.msra.mxu0 %v20939_v11  ;;  %v10125_v11 = vrot.slane %v24723_v14, 1 }
 0x899   : > { %18644 = vmatprep.subr.bf16.mxu0 %v20940_v16 }
 0x89b   : > { %18625 = vmatmul.mubr.bf16.gmra.mrb[28].mxu0 %v9435_v62  ;;  %v9690_v62 = vsel %vm27420_vm1, %v9438_v39, %v9689_v55  ;;  %v20945_v39 = vld [vmem:[%s26244_s3 + $0x208] sm:$0xff]   ;;  %vm27434_vm1 = vmmov %vm27423_vm0 }
 0x89c   : > { %18628 = vmatprep.mubr.bf16.mxu0 %v9437_v3  ;;  %18645 = vmatpush3.bf16.msra.mxu0 %v20940_v16  ;;  %v9643_v3 = vld [vmem:[#allocation2 + $0x60] sm:$0x7f]  ;;  %v10127_v16 = vrot.slane %v24717_v58, 1 }
 0x89d   : > { %18646 = vmatprep.subr.bf16.mxu0 %v20941_v51  ;;  %v9691_v21 = vrot.slane %v9643_v3, 7  ;;  %v10131_v3 = vrot.slane %v24747_v28, 1  ;;  %v10133_v28 = vrot.slane %v24766_v35, 1 }
 0x89f   : > { %v9692_v29 = vsel %vm27421_vm11, %v9689_v55, %v9691_v21  ;;  %v10128_v55 = vsel %vm27424_vm12, %v10125_v11, %v10127_v16  ;;  %vm27439_vm11 = vcmask 1043456  }
 0x8a0   : > { %18647 = vmatpush3.bf16.msra.mxu0 %v20941_v51  ;;  %v20953_v51 = vld [vmem:[%s26244_s3 + $0x248] sm:$0xff]  }
 0x8a1   : > { %18648 = vmatprep.subr.bf16.mxu0 %v20942_v13 }
 0x8a3   : > { %18629 = vmatmul.mubr.bf16.gmra.mrb[32].mxu0 %v9439_v57  ;;  %v20946_v57 = vld [vmem:[%s26244_s3 + $0x210] sm:$0xff]  }
 0x8a4   : > { %18632 = vmatprep.mubr.bf16.mxu0 %v9690_v62  ;;  %18649 = vmatpush3.bf16.msra.mxu0 %v20942_v13  ;;  %v10129_v62 = vrot.slane %v24732_v32, 1  ;;  %v20956_v32 = vld [vmem:[%s26244_s3 + $0x260] sm:$0xff]  }
 0x8a5   : > { %18650 = vmatprep.subr.bf16.mxu0 %v20943_v0 }
 0x8a6   : > { %v10130_v21 = vsel %vm27425_vm5, %v10127_v16, %v10129_v62 }
 0x8a8   : > { %18651 = vmatpush3.bf16.msra.mxu0 %v20943_v0  ;;  %v20954_v0 = vld [vmem:[%s26244_s3 + $0x250] sm:$0xff]  }
 0x8a9   : > { %18672 = vmatprep.subr.bf16.mxu0 %v20944_v31 }
 0x8ab   : > { %18633 = vmatmul.mubr.bf16.gmra.mrb[36].mxu0 %v9692_v29  ;;  %v10132_v29 = vsel %vm27426_vm3, %v10129_v62, %v10131_v3  ;;  %v20961_v62 = vld [vmem:[%s26244_s3 + $0x288] sm:$0xff]  }
 0x8ac   : > { %18652 = vmatprep.mubr.bf16.mxu0 %v24686_v53  ;;  %v20947_v53 = vld [vmem:[%s26244_s3 + $0x218] sm:$0xff]  }
 0x8b3   : > { %18653 = vmatmul.mubr.bf16.vlgmr.msra.gmra.mrb[20].mxu0 %v24699_v6  ;;  %v20948_v6 = vld [vmem:[%s26244_s3 + $0x220] sm:$0xff]  }
 0x8b4   : > { %18673 = vmatpush3.bf16.msra.mxu0 %v20944_v31  ;;  %18656 = vmatprep.mubr.bf16.mxu0 %v24701_v10  ;;  %v20949_v10 = vld [vmem:[%s26244_s3 + $0x228] sm:$0xff]   ;;  %v20955_v31 = vld [vmem:[%s26244_s3 + $0x258] sm:$0xff]  }
 0x8b5   : > { %18674 = vmatprep.subr.bf16.mxu0 %v20945_v39 }
 0x8b8   : > { %18675 = vmatpush3.bf16.msra.mxu0 %v20945_v39  ;;  %v10135_v39 = vrot.slane %v25109_v9, 1 }
 0x8b9   : > { %18676 = vmatprep.subr.bf16.mxu0 %v20946_v57 }
 0x8bb   : > { %18657 = vmatmul.mubr.bf16.gmra.mrb[24].mxu0 %v24715_v27  ;;  %v20950_v27 = vld [vmem:[%s26244_s3 + $0x230] sm:$0xff]  }
 0x8bc   : > { %18660 = vmatprep.mubr.bf16.mxu0 %v24721_v44  ;;  %18677 = vmatpush3.bf16.msra.mxu0 %v20946_v57  ;;  %v20951_v44 = vld [vmem:[%s26244_s3 + $0x238] sm:$0xff]   ;;  %v20957_v57 = vld [vmem:[%s26244_s3 + $0x268] sm:$0xff]  }
 0x8bd   : > { %18678 = vmatprep.subr.bf16.mxu0 %v20947_v53 }
 0x8c0   : > { %18679 = vmatpush3.bf16.msra.mxu0 %v20947_v53  ;;  %v10134_v53 = vsel %vm27427_vm8, %v10131_v3, %v10133_v28  ;;  %v20962_v3 = vld [vmem:[%s26244_s3 + $0x290] sm:$0xff]  }
 0x8c1   : > { %18680 = vmatprep.subr.bf16.mxu0 %v20948_v6 }
 0x8c3   : > { %18661 = vmatmul.mubr.bf16.gmra.mrb[28].mxu0 %v24745_v2  ;;  %v10084_v2 = vld [vmem:[#allocation2 + $0x20] sm:$0xff] }
 0x8c4   : > { %18664 = vmatprep.mubr.bf16.mxu0 %v24751_v25  ;;  %18681 = vmatpush3.bf16.msra.mxu0 %v20948_v6  ;;  %v20952_v25 = vld [vmem:[%s26244_s3 + $0x240] sm:$0xff]   ;;  %v10123_v4 = vrot.slane %v10084_v2, 1  ;;  %v10136_v6 = vsel %vm27428_vm13, %v10133_v28, %v10135_v39  ;;  %v20959_v2 = vld [vmem:[%s26244_s3 + $0x278] sm:$0xff]   ;;  %vm27448_vm13 = vcmask 1042432  }
 0x8c5   : > { %18682 = vmatprep.subr.bf16.mxu0 %v20949_v10 }
 0x8c6   : > { %v10124_v42 = vsel %vm27422_vm7, %v10122_v20, %v10123_v4  ;;  %v10126_v13 = vsel %vm27423_vm0, %v10123_v4, %v10125_v11  ;;  %v10093_v4 = vld [vmem:[#allocation2 + $0x68] sm:$0x1]  ;;  %v10334_v20 = vld [vmem:[#allocation2 + $0x20] sm:$0xfe]  ;;  %vm27441_vm7 = vmmov %vm27439_vm11 }
 0x8c7   : > { %v10141_v16 = vrot.slane %v10093_v4, 1  ;;  %v10619_v4 = vrot.slane %v25226_v26, 2  ;;  %vm27442_vm0 = vmmov %vm27441_vm7 }
 0x8c8   : > { %18683 = vmatpush3.bf16.msra.mxu0 %v20949_v10  ;;  %v20958_v10 = vld [vmem:[%s26244_s3 + $0x270] sm:$0xff]   ;;  %vm27443_vm12 = vmmov %vm27442_vm0 }
 0x8c9   : > { %18684 = vmatprep.subr.bf16.mxu0 %v20950_v27  ;;  %vm27444_vm5 = vmmov %vm27442_vm0 }
 0x8ca   : > { %vm27445_vm3 = vmmov %vm27442_vm0 }
 0x8cb   : > { %18665 = vmatmul.mubr.bf16.gmra.mrb[32].mxu0 %v25109_v9  ;;  %vm27446_vm8 = vmmov %vm27442_vm0 }
 0x8cc   : > { %18668 = vmatprep.mubr.bf16.mxu0 %v25226_v26  ;;  %18685 = vmatpush3.bf16.msra.mxu0 %v20950_v27  ;;  %v10137_v27 = vrot.slane %v25226_v26, 1 }
 0x8cd   : > { %18686 = vmatprep.subr.bf16.mxu0 %v20951_v44 }
 0x8d0   : > { %18687 = vmatpush3.bf16.msra.mxu0 %v20951_v44  ;;  %v10139_v44 = vrot.slane %v25273_v17, 1 }
 0x8d1   : > { %18708 = vmatprep.subr.bf16.mxu0 %v20952_v25 }
 0x8d2   : > { %v10140_v43 = vsel %vm27430_vm4, %v10137_v27, %v10139_v44 }
 0x8d3   : > { %18669 = vmatmul.mubr.bf16.gmra.mrb[36].mxu0 %v25273_v17 }
 0x8d4   : > { %18688 = vmatprep.mubr.bf16.mxu0 %v10124_v42  ;;  %v20960_v42 = vld [vmem:[%s26244_s3 + $0x280] sm:$0xff]  }
 0x8db   : > { %18689 = vmatmul.mubr.bf16.vlgmr.msra.gmra.mrb[20].mxu0 %v10126_v13  ;;  %v10142_v13 = vsel %vm27431_vm9, %v10139_v44, %v10141_v16  ;;  %v20974_v16 = vld [vmem:[%s26244_s3 + $0x2f0] sm:$0xff]  }
 0x8dc   : > { %18709 = vmatpush3.bf16.msra.mxu0 %v20952_v25  ;;  %18692 = vmatprep.mubr.bf16.mxu0 %v10128_v55  ;;  %v10138_v25 = vsel %vm27429_vm2, %v10135_v39, %v10137_v27  ;;  %v10344_v39 = vld [vmem:[#allocation2 + $0x70] sm:$0x1]  ;;  %v27435_v27 = vrot.slane %v24723_v14, 2  ;;  %vm27450_vm2 = vmmov %vm27448_vm13 }
 0x8dd   : > { %18710 = vmatprep.subr.bf16.mxu0 %v20953_v51  ;;  %vm27451_vm4 = vmmov %vm27450_vm2 }
 0x8de   : > { %vm27452_vm9 = vmmov %vm27450_vm2 }
 0x8e0   : > { %18711 = vmatpush3.bf16.msra.mxu0 %v20953_v51  ;;  %v10373_v51 = vrot.slane %v10334_v20, 1  ;;  %v20973_v20 = vld [vmem:[%s26244_s3 + $0x2e8] sm:$0xff]  }
 0x8e1   : > { %18712 = vmatprep.subr.bf16.mxu0 %v20954_v0 }
 0x8e3   : > { %18693 = vmatmul.mubr.bf16.gmra.mrb[24].mxu0 %v10130_v21 }
 0x8e4   : > { %18696 = vmatprep.mubr.bf16.mxu0 %v10132_v29  ;;  %18713 = vmatpush3.bf16.msra.mxu0 %v20954_v0  ;;  %v10375_v0 = vsel %vm27432_vm15, %v10373_v51, %v10125_v11  ;;  %v20964_v11 = vld [vmem:[%s26244_s3 + $0x2a0] sm:$0xff]   ;;  %v10621_v51 = vrot.slane %v25273_v17, 2  ;;  %vm27453_vm15 = vmmov %vm27450_vm2 }
 0x8e5   : > { %18714 = vmatprep.subr.bf16.mxu0 %v20955_v31 }
 0x8e8   : > { %18715 = vmatpush3.bf16.msra.mxu0 %v20955_v31  ;;  %v20963_v31 = vld [vmem:[%s26244_s3 + $0x298] sm:$0xff]  }
 0x8e9   : > { %18716 = vmatprep.subr.bf16.mxu0 %v20956_v32 }
 0x8eb   : > { %18697 = vmatmul.mubr.bf16.gmra.mrb[28].mxu0 %v10134_v53 }
 0x8ec   : > { %18700 = vmatprep.mubr.bf16.mxu0 %v10136_v6  ;;  %18717 = vmatpush3.bf16.msra.mxu0 %v20956_v32  ;;  %v20967_v32 = vld [vmem:[%s26244_s3 + $0x2b8] sm:$0xff]  }
 0x8ed   : > { %18718 = vmatprep.subr.bf16.mxu0 %v20957_v57 }
 0x8f0   : > { %18719 = vmatpush3.bf16.msra.mxu0 %v20957_v57  ;;  %v10585_v57 = vld [vmem:[#allocation2 + $0x20] sm:$0xfc] }
 0x8f1   : > { %18720 = vmatprep.subr.bf16.mxu0 %v20958_v10 }
 0x8f3   : > { %18701 = vmatmul.mubr.bf16.gmra.mrb[32].mxu0 %v10138_v25 }
 0x8f4   : > { %18704 = vmatprep.mubr.bf16.mxu0 %v10140_v43  ;;  %18721 = vmatpush3.bf16.msra.mxu0 %v20958_v10 }
 0x8f5   : > { %18722 = vmatprep.subr.bf16.mxu0 %v20959_v2 }
 0x8f8   : > { %18723 = vmatpush3.bf16.msra.mxu0 %v20959_v2  ;;  %v20969_v2 = vld [vmem:[%s26244_s3 + $0x2c8] sm:$0xff]  }
 0x8f9   : > { %18744 = vmatprep.subr.bf16.mxu0 %v20960_v42 }
 0x8fb   : > { %18705 = vmatmul.mubr.bf16.gmra.mrb[36].mxu0 %v10142_v13  ;;  %v25378_v13 = vld [vmem:[#allocation2 + $0x68] sm:$0xff] }
 0x8fc   : > { %18724 = vmatprep.mubr.bf16.mxu0 %v10375_v0  ;;  %v10623_v0 = vrot.slane %v25378_v13, 2 }
 0x903   : > { %18725 = vmatmul.mubr.bf16.vlgmr.msra.gmra.mrb[20].mxu0 %v10128_v55  ;;  %v20965_v55 = vld [vmem:[%s26244_s3 + $0x2a8] sm:$0xff]  }
 0x904   : > { %18745 = vmatpush3.bf16.msra.mxu0 %v20960_v42  ;;  %18728 = vmatprep.mubr.bf16.mxu0 %v10130_v21  ;;  %v20966_v21 = vld [vmem:[%s26244_s3 + $0x2b0] sm:$0xff]  }
 0x905   : > { %18746 = vmatprep.subr.bf16.mxu0 %v20961_v62 }
 0x908   : > { %18747 = vmatpush3.bf16.msra.mxu0 %v20961_v62  ;;  %v20975_v62 = vld [vmem:[%s26244_s3 + $0x2f8] sm:$0xff]  }
 0x909   : > { %18748 = vmatprep.subr.bf16.mxu0 %v20962_v3 }
 0x90b   : > { %18729 = vmatmul.mubr.bf16.gmra.mrb[24].mxu0 %v10132_v29  ;;  %v10390_v29 = vrot.slane %v24853_v61, 1  ;;  %v10606_v61 = vrot.slane %v10585_v57, 2 }
 0x90c   : > { %18732 = vmatprep.mubr.bf16.mxu0 %v10134_v53  ;;  %18749 = vmatpush3.bf16.msra.mxu0 %v20962_v3  ;;  %v20968_v53 = vld [vmem:[%s26244_s3 + $0x2c0] sm:$0xff]   ;;  %v10622_v3 = vsel %vm5822_vm14, %v10619_v4, %v10621_v51 }
 0x90d   : > { %18750 = vmatprep.subr.bf16.mxu0 %v20963_v31  ;;  %v10391_v28 = vsel %vm27433_vm6, %v10139_v44, %v10390_v29  ;;  %v10608_v44 = vsel %vm5822_vm14, %v10606_v61, %v27435_v27  ;;  %v10850_v61 = vrot.slane %v25109_v9, 3  ;;  %v20981_v27 = vld [vmem:[%s26244_s3 + $0x328] sm:$0xff]   ;;  %vm27454_vm6 = vmmov %vm27442_vm0 }
 0x910   : > { %18751 = vmatpush3.bf16.msra.mxu0 %v20963_v31  ;;  %v10624_v31 = vsel %vm5822_vm14, %v10621_v51, %v10623_v0 }
 0x911   : > { %18752 = vmatprep.subr.bf16.mxu0 %v20964_v11 }
 0x913   : > { %18733 = vmatmul.mubr.bf16.gmra.mrb[28].mxu0 %v10136_v6  ;;  %v10392_v6 = vrot.slane %v10344_v39, 1  ;;  %v27437_v39 = vrot.slane %v24723_v14, 3  ;;  %v20979_v14 = vld [vmem:[%s26244_s3 + $0x318] sm:$0xff]  }
 0x914   : > { %18736 = vmatprep.mubr.bf16.mxu0 %v10138_v25  ;;  %18753 = vmatpush3.bf16.msra.mxu0 %v20964_v11  ;;  %v20970_v25 = vld [vmem:[%s26244_s3 + $0x2d0] sm:$0xff]  }
 0x915   : > { %18754 = vmatprep.subr.bf16.mxu0 %v20965_v55  ;;  %v10393_v10 = vsel %vm27434_vm1, %v10390_v29, %v10392_v6  ;;  %v10586_v11 = vld [vmem:[#allocation2 + $0x70] sm:$0x3]  ;;  %vm27455_vm1 = vmmov %vm27442_vm0 }
 0x916   : > { %v10625_v29 = vrot.slane %v10586_v11, 2  ;;  %v20978_v6 = vld [vmem:[%s26244_s3 + $0x310] sm:$0xff]  }
 0x918   : > { %18755 = vmatpush3.bf16.msra.mxu0 %v20965_v55  ;;  %v10818_v55 = vld [vmem:[#allocation2 + $0x20] sm:$0xf8] }
 0x919   : > { %18756 = vmatprep.subr.bf16.mxu0 %v20966_v21 }
 0x91b   : > { %18737 = vmatmul.mubr.bf16.gmra.mrb[32].mxu0 %v10140_v43  ;;  %v20971_v43 = vld [vmem:[%s26244_s3 + $0x2d8] sm:$0xff]  }
 0x91c   : > { %18740 = vmatprep.mubr.bf16.mxu0 %v10391_v28  ;;  %18757 = vmatpush3.bf16.msra.mxu0 %v20966_v21  ;;  %v20976_v21 = vld [vmem:[%s26244_s3 + $0x300] sm:$0xff]   ;;  %v10626_v28 = vsel %vm5822_vm14, %v10623_v0, %v10625_v29 }
 0x91d   : > { %18758 = vmatprep.subr.bf16.mxu0 %v20967_v32 }
 0x920   : > { %18759 = vmatpush3.bf16.msra.mxu0 %v20967_v32  ;;  %v10839_v32 = vrot.slane %v10818_v55, 3  ;;  %v20989_v55 = vld [vmem:[%s26244_s3 + $0x368] sm:$0xff]  }
 0x921   : > { %18780 = vmatprep.subr.bf16.mxu0 %v20968_v53 }
 0x922   : > { %v10841_v57 = vsel %vm2503_vm10, %v10839_v32, %v27437_v39  ;;  %v20991_v32 = vld [vmem:[%s26244_s3 + $0x378] sm:$0xff]  }
 0x923   : > { %18741 = vmatmul.mubr.bf16.gmra.mrb[36].mxu0 %v10393_v10  ;;  %v10852_v10 = vrot.slane %v25226_v26, 3  ;;  %v11061_v39 = vld [vmem:[#allocation2 + $0x78] sm:$0x7] }
 0x924   : > { %18760 = vmatprep.mubr.bf16.mxu0 %v10608_v44  ;;  %v10851_v44 = vsel %vm2503_vm10, %v24799_v38, %v10850_v61 }
 0x92b   : > { %18761 = vmatmul.mubr.bf16.vlgmr.msra.gmra.mrb[20].mxu0 %v24742_v1  ;;  %v20972_v1 = vld [vmem:[%s26244_s3 + $0x2e0] sm:$0xff]  }
 0x92c   : > { %18781 = vmatpush3.bf16.msra.mxu0 %v20968_v53  ;;  %18764 = vmatprep.mubr.bf16.mxu0 %v24754_v18  ;;  %v10617_v18 = vrot.slane %v25109_v9, 2  ;;  %v20977_v53 = vld [vmem:[%s26244_s3 + $0x308] sm:$0xff]   ;;  %v20982_v9 = vld [vmem:[%s26244_s3 + $0x330] sm:$0xff]  }
 0x92d   : > { %18782 = vmatprep.subr.bf16.mxu0 %v20969_v2 }
 0x92e   : > { %v10620_v42 = vsel %vm5822_vm14, %v10617_v18, %v10619_v4 }
 0x930   : > { %18783 = vmatpush3.bf16.msra.mxu0 %v20969_v2  ;;  %v10853_v2 = vsel %vm2503_vm10, %v10850_v61, %v10852_v10  ;;  %v27438_v61 = vrot.slane %v24717_v58, 4 }
 0x931   : > { %18784 = vmatprep.subr.bf16.mxu0 %v20970_v25 }
 0x933   : > { %18765 = vmatmul.mubr.bf16.gmra.mrb[24].mxu0 %v24772_v47  ;;  %v27436_v47 = vrot.slane %v24766_v35, 2 }
 0x934   : > { %18768 = vmatprep.mubr.bf16.mxu0 %v24790_v19  ;;  %18785 = vmatpush3.bf16.msra.mxu0 %v20970_v25  ;;  %v10854_v25 = vrot.slane %v25273_v17, 3 }
 0x935   : > { %18786 = vmatprep.subr.bf16.mxu0 %v20971_v43  ;;  %v10618_v19 = vsel %vm5822_vm14, %v27436_v47, %v10617_v18  ;;  %v20984_v47 = vld [vmem:[%s26244_s3 + $0x340] sm:$0xff]  }
 0x936   : > { %v10855_v18 = vsel %vm2503_vm10, %v10852_v10, %v10854_v25 }
 0x938   : > { %18787 = vmatpush3.bf16.msra.mxu0 %v20971_v43  ;;  %v25422_v43 = vrot.slane %v25378_v13, 3 }
 0x939   : > { %18788 = vmatprep.subr.bf16.mxu0 %v20972_v1 }
 0x93a   : > { %v10857_v4 = vsel %vm2503_vm10, %v10854_v25, %v25422_v43 }
 0x93b   : > { %18769 = vmatmul.mubr.bf16.gmra.mrb[28].mxu0 %v10618_v19 }
 0x93c   : > { %18772 = vmatprep.mubr.bf16.mxu0 %v10620_v42  ;;  %18789 = vmatpush3.bf16.msra.mxu0 %v20972_v1  ;;  %v20983_v1 = vld [vmem:[%s26244_s3 + $0x338] sm:$0xff]   ;;  %v11051_v42 = vld [vmem:[#allocation2 + $0x28] sm:$0xf8] }
 0x93d   : > { %18790 = vmatprep.subr.bf16.mxu0 %v20973_v20 }
 0x940   : > { %18791 = vmatpush3.bf16.msra.mxu0 %v20973_v20  ;;  %v10819_v20 = vld [vmem:[#allocation2 + $0x70] sm:$0x7] }
 0x941   : > { %18792 = vmatprep.subr.bf16.mxu0 %v20974_v16  ;;  %v10858_v19 = vrot.slane %v10819_v20, 3  ;;  %v20998_v20 = vld [vmem:[%s26244_s3 + $0x3b0] sm:$0xff]  }
 0x943   : > { %18773 = vmatmul.mubr.bf16.gmra.mrb[32].mxu0 %v10622_v3  ;;  %v10859_v51 = vsel %vm2503_vm10, %v25422_v43, %v10858_v19  ;;  %v20986_v3 = vld [vmem:[%s26244_s3 + $0x350] sm:$0xff]  }
 0x944   : > { %18776 = vmatprep.mubr.bf16.mxu0 %v10624_v31  ;;  %18793 = vmatpush3.bf16.msra.mxu0 %v20974_v16  ;;  %v11090_v16 = vrot.slane %v11051_v42, 3  ;;  %v25445_v31 = vld [vmem:[#allocation2 + $0x50] sm:$0xff]  ;;  %v20999_v42 = vld [vmem:[%s26244_s3 + $0x3b8] sm:$0xff]  }
 0x945   : > { %18794 = vmatprep.subr.bf16.mxu0 %v20975_v62  ;;  %v11099_v11 = vrot.slane %v25445_v31, 3 }
 0x946   : > { %v11092_v0 = vsel %vm2503_vm10, %v11090_v16, %v24764_v37  ;;  %v20987_v37 = vld [vmem:[%s26244_s3 + $0x358] sm:$0xff]  }
 0x948   : > { %18795 = vmatpush3.bf16.msra.mxu0 %v20975_v62  ;;  %v20985_v62 = vld [vmem:[%s26244_s3 + $0x348] sm:$0xff]  }
 0x949   : > { %18816 = vmatprep.subr.bf16.mxu0 %v20976_v21 }
 0x94b   : > { %18777 = vmatmul.mubr.bf16.gmra.mrb[36].mxu0 %v10626_v28 }
 0x94c   : > { %18796 = vmatprep.mubr.bf16.mxu0 %v10841_v57  ;;  %v20992_v57 = vld [vmem:[%s26244_s3 + $0x380] sm:$0xff]  }
 0x953   : > { %18797 = vmatmul.mubr.bf16.vlgmr.msra.gmra.mrb[20].mxu0 %v24779_v46  ;;  %v20980_v46 = vld [vmem:[%s26244_s3 + $0x320] sm:$0xff]  }
 0x954   : > { %18817 = vmatpush3.bf16.msra.mxu0 %v20976_v21  ;;  %18800 = vmatprep.mubr.bf16.mxu0 %v24784_v63  ;;  %v11102_v21 = vsel %vm2503_vm10, %v11099_v11, %v10852_v10 }
 0x955   : > { %18818 = vmatprep.subr.bf16.mxu0 %v20977_v53 }
 0x958   : > { %18819 = vmatpush3.bf16.msra.mxu0 %v20977_v53  ;;  %v11109_v53 = vrot.slane %v11061_v39, 3  ;;  %v11536_v39 = vld [vmem:[#allocation2 + $0x78] sm:$0x1f] }
 0x959   : > { %18820 = vmatprep.subr.bf16.mxu0 %v20978_v6 }
 0x95b   : > { %18801 = vmatmul.mubr.bf16.gmra.mrb[24].mxu0 %v24806_v12 }
 0x95c   : > { %18804 = vmatprep.mubr.bf16.mxu0 %v24810_v49  ;;  %18821 = vmatpush3.bf16.msra.mxu0 %v20978_v6  ;;  %v11302_v6 = vld [vmem:[#allocation2 + $0x28] sm:$0xf0] }
 0x95d   : > { %18822 = vmatprep.subr.bf16.mxu0 %v20979_v14 }
 0x960   : > { %18823 = vmatpush3.bf16.msra.mxu0 %v20979_v14  ;;  %v11323_v14 = vrot.slane %v11302_v6, 4  ;;  %v11575_v6 = vrot.slane %v11536_v39, 5 }
 0x961   : > { %18824 = vmatprep.subr.bf16.mxu0 %v20980_v46 }
 0x962   : > { %v11325_v10 = vsel %vm27439_vm11, %v11323_v14, %v27438_v61  ;;  %vm27456_vm11 = vmmov %vm27442_vm0 }
 0x963   : > { %18805 = vmatmul.mubr.bf16.gmra.mrb[28].mxu0 %v10851_v44  ;;  %v20994_v44 = vld [vmem:[%s26244_s3 + $0x390] sm:$0xff]  }
 0x964   : > { %18808 = vmatprep.mubr.bf16.mxu0 %v10853_v2  ;;  %18825 = vmatpush3.bf16.msra.mxu0 %v20980_v46  ;;  %v11332_v2 = vrot.slane %v25445_v31, 4 }
 0x965   : > { %18826 = vmatprep.subr.bf16.mxu0 %v20981_v27 }
 0x968   : > { %18827 = vmatpush3.bf16.msra.mxu0 %v20981_v27  ;;  %v20993_v27 = vld [vmem:[%s26244_s3 + $0x388] sm:$0xff]  }
 0x969   : > { %18828 = vmatprep.subr.bf16.mxu0 %v20982_v9 }
 0x96b   : > { %18809 = vmatmul.mubr.bf16.gmra.mrb[32].mxu0 %v10855_v18 }
 0x96c   : > { %18812 = vmatprep.mubr.bf16.mxu0 %v10857_v4  ;;  %18829 = vmatpush3.bf16.msra.mxu0 %v20982_v9  ;;  %v20995_v9 = vld [vmem:[%s26244_s3 + $0x398] sm:$0xff]  }
 0x96d   : > { %18830 = vmatprep.subr.bf16.mxu0 %v20983_v1 }
 0x970   : > { %18831 = vmatpush3.bf16.msra.mxu0 %v20983_v1  ;;  %v11334_v1 = vrot.slane %v25226_v26, 4 }
 0x971   : > { %18852 = vmatprep.subr.bf16.mxu0 %v20984_v47 }
 0x973   : > { %18813 = vmatmul.mubr.bf16.gmra.mrb[36].mxu0 %v10859_v51 }
 0x974   : > { %18832 = vmatprep.mubr.bf16.mxu0 %v11092_v0  ;;  %v21000_v0 = vld [vmem:[%s26244_s3] sm:$0xff]  }
 0x97b   : > { %18833 = vmatmul.mubr.bf16.vlgmr.msra.gmra.mrb[20].mxu0 %v24784_v63  ;;  %v11100_v63 = vsel %vm2503_vm10, %v24799_v38, %v11099_v11  ;;  %v20990_v38 = vld [vmem:[%s26244_s3 + $0x370] sm:$0xff]  }
 0x97c   : > { %18853 = vmatpush3.bf16.msra.mxu0 %v20984_v47  ;;  %18836 = vmatprep.mubr.bf16.mxu0 %v24806_v12  ;;  %v20988_v12 = vld [vmem:[%s26244_s3 + $0x360] sm:$0xff]   ;;  %v25516_v47 = vrot.slane %v25378_v13, 4  ;;  %v11303_v13 = vld [vmem:[#allocation2 + $0x78] sm:$0xf] }
 0x97d   : > { %18854 = vmatprep.subr.bf16.mxu0 %v20985_v62 }
 0x980   : > { %18855 = vmatpush3.bf16.msra.mxu0 %v20985_v62  ;;  %v11342_v62 = vrot.slane %v11303_v13, 4  ;;  %v25618_v13 = vld [vmem:[#allocation2 + $0x90] sm:$0xff] }
 0x981   : > { %18856 = vmatprep.subr.bf16.mxu0 %v20986_v3 }
 0x983   : > { %18837 = vmatmul.mubr.bf16.gmra.mrb[24].mxu0 %v24810_v49  ;;  %v25464_v49 = vld [vmem:[#allocation2 + $0x70] sm:$0xff] }
 0x984   : > { %18840 = vmatprep.mubr.bf16.mxu0 %v11100_v63  ;;  %18857 = vmatpush3.bf16.msra.mxu0 %v20986_v3  ;;  %v25467_v29 = vrot.slane %v25464_v49, 3  ;;  %v25519_v19 = vrot.slane %v25464_v49, 4  ;;  %v11535_v3 = vld [vmem:[#allocation2 + $0x28] sm:$0xe0] }
 0x985   : > { %18858 = vmatprep.subr.bf16.mxu0 %v20987_v37  ;;  %v11556_v31 = vrot.slane %v11535_v3, 5  ;;  %v11849_v3 = vrot.slane %v25618_v13, 3 }
 0x986   : > { %v25475_v28 = vsel %vm2503_vm10, %v25422_v43, %v25467_v29  ;;  %v11110_v46 = vsel %vm2503_vm10, %v25467_v29, %v11109_v53  ;;  %v25529_v51 = vsel %vm27445_vm3, %v25516_v47, %v25519_v19  ;;  %v11343_v11 = vsel %vm27446_vm8, %v25519_v19, %v11342_v62  ;;  %v21008_v53 = vld [vmem:[%s26244_s3 + $0x40] sm:$0xff]   ;;  %v21014_v62 = vld [vmem:[%s26244_s3 + $0x70] sm:$0xff]   ;;  %vm27460_vm3 = vmmov %vm27442_vm0 }
 0x987   : > { %vm27461_vm8 = vmmov %vm27442_vm0 }
 0x988   : > { %18859 = vmatpush3.bf16.msra.mxu0 %v20987_v37  ;;  %v27447_v37 = vrot.slane %v24717_v58, 5  ;;  %v21003_v58 = vld [vmem:[%s26244_s3 + $0x18] sm:$0xff]  }
 0x989   : > { %18860 = vmatprep.subr.bf16.mxu0 %v20988_v12 }
 0x98a   : > { %v11558_v63 = vsel %vm27448_vm13, %v11556_v31, %v27447_v37  ;;  %vm27463_vm13 = vmmov %vm27450_vm2 }
 0x98b   : > { %18841 = vmatmul.mubr.bf16.gmra.mrb[28].mxu0 %v11102_v21  ;;  %v11569_v21 = vrot.slane %v25273_v17, 5 }
 0x98c   : > { %18844 = vmatprep.mubr.bf16.mxu0 %v10855_v18  ;;  %18861 = vmatpush3.bf16.msra.mxu0 %v20988_v12  ;;  %v11336_v18 = vrot.slane %v25273_v17, 4  ;;  %v21001_v12 = vld [vmem:[%s26244_s3 + $0x8] sm:$0xff]   ;;  %v21007_v17 = vld [vmem:[%s26244_s3 + $0x38] sm:$0xff]  }
 0x98d   : > { %18862 = vmatprep.subr.bf16.mxu0 %v20989_v55 }
 0x98e   : > { %v11339_v16 = vsel %vm27444_vm5, %v11336_v18, %v25516_v47  ;;  %vm27459_vm5 = vmmov %vm27442_vm0 }
 0x990   : > { %18863 = vmatpush3.bf16.msra.mxu0 %v20989_v55  ;;  %v21002_v55 = vld [vmem:[%s26244_s3 + $0x10] sm:$0xff]  }
 0x991   : > { %18864 = vmatprep.subr.bf16.mxu0 %v20990_v38 }
 0x993   : > { %18845 = vmatmul.mubr.bf16.gmra.mrb[32].mxu0 %v10857_v4  ;;  %v11337_v4 = vsel %vm27443_vm12, %v11334_v1, %v11336_v18  ;;  %v21011_v18 = vld [vmem:[%s26244_s3 + $0x58] sm:$0xff]   ;;  %vm27458_vm12 = vmmov %vm27442_vm0 }
 0x994   : > { %18848 = vmatprep.mubr.bf16.mxu0 %v25475_v28  ;;  %18865 = vmatpush3.bf16.msra.mxu0 %v20990_v38  ;;  %v21005_v38 = vld [vmem:[%s26244_s3 + $0x28] sm:$0xff]  }
 0x995   : > { %18866 = vmatprep.subr.bf16.mxu0 %v20991_v32 }
 0x998   : > { %18867 = vmatpush3.bf16.msra.mxu0 %v20991_v32 }
 0x999   : > { %18888 = vmatprep.subr.bf16.mxu0 %v20992_v57 }
 0x99b   : > { %18849 = vmatmul.mubr.bf16.gmra.mrb[36].mxu0 %v11110_v46  ;;  %v25577_v46 = vld [vmem:[#allocation2 + $0x58] sm:$0xff] }
 0x99c   : > { %18868 = vmatprep.mubr.bf16.mxu0 %v11325_v10  ;;  %v11835_v61 = vrot.slane %v25577_v46, 3 }
 0x9a3   : > { %18869 = vmatmul.mubr.bf16.vlgmr.msra.gmra.mrb[20].mxu0 %v24827_v54  ;;  %v27440_v54 = vrot.slane %v24766_v35, 4  ;;  %v11335_v35 = vsel %vm27442_vm0, %v11332_v2, %v11334_v1 }
 0x9a4   : > { %18889 = vmatpush3.bf16.msra.mxu0 %v20992_v57  ;;  %18872 = vmatprep.mubr.bf16.mxu0 %v24830_v36  ;;  %v20996_v36 = vld [vmem:[%s26244_s3 + $0x3a0] sm:$0xff]   ;;  %v11796_v57 = vld [vmem:[#allocation2 + $0x50] sm:$0xf8] }
 0x9a5   : > { %18890 = vmatprep.subr.bf16.mxu0 %v20993_v27  ;;  %v11333_v25 = vsel %vm27441_vm7, %v27440_v54, %v11332_v2  ;;  %v11834_v14 = vrot.slane %v11796_v57, 3  ;;  %v21009_v2 = vld [vmem:[%s26244_s3 + $0x48] sm:$0xff]   ;;  %v21019_v57 = vld [vmem:[%s26244_s3 + $0x98] sm:$0xff]   ;;  %vm27457_vm7 = vmmov %vm27442_vm0 }
 0x9a7   : > { %v11836_v10 = vsel %vm2503_vm10, %v11834_v14, %v11835_v61 }
 0x9a8   : > { %18891 = vmatpush3.bf16.msra.mxu0 %v20993_v27  ;;  %v25583_v27 = vld [vmem:[#allocation2 + $0x60] sm:$0xff] }
 0x9a9   : > { %18892 = vmatprep.subr.bf16.mxu0 %v20994_v44 }
 0x9ab   : > { %18873 = vmatmul.mubr.bf16.gmra.mrb[24].mxu0 %v24836_v59  ;;  %v20997_v59 = vld [vmem:[%s26244_s3 + $0x3a8] sm:$0xff]  }
 0x9ac   : > { %18876 = vmatprep.mubr.bf16.mxu0 %v11333_v25  ;;  %18893 = vmatpush3.bf16.msra.mxu0 %v20994_v44  ;;  %v11837_v44 = vrot.slane %v25583_v27, 3  ;;  %v25592_v25 = vld [vmem:[#allocation2 + $0x78] sm:$0xff] }
 0x9ad   : > { %18894 = vmatprep.subr.bf16.mxu0 %v20995_v9  ;;  %v11843_v1 = vrot.slane %v25592_v25, 3  ;;  %v12075_v39 = vrot.slane %v25592_v25, 4 }
 0x9ae   : > { %v11840_v54 = vsel %vm2503_vm10, %v11837_v44, %v25422_v43 }
 0x9af   : > { %v11844_v43 = vsel %vm2503_vm10, %v25467_v29, %v11843_v1  ;;  %v21013_v29 = vld [vmem:[%s26244_s3 + $0x68] sm:$0xff]  }
 0x9b0   : > { %18895 = vmatpush3.bf16.msra.mxu0 %v20995_v9  ;;  %v11838_v9 = vsel %vm2503_vm10, %v11835_v61, %v11837_v44  ;;  %v21022_v61 = vld [vmem:[%s26244_s3 + $0xb0] sm:$0xff]   ;;  %v21023_v44 = vld [vmem:[%s26244_s3 + $0xb8] sm:$0xff]  }
 0x9b1   : > { %18896 = vmatprep.subr.bf16.mxu0 %v20996_v36 }
 0x9b3   : > { %18877 = vmatmul.mubr.bf16.gmra.mrb[28].mxu0 %v11335_v35  ;;  %v25606_v35 = vld [vmem:[#allocation2 + $0x88] sm:$0xff] }
 0x9b4   : > { %18880 = vmatprep.mubr.bf16.mxu0 %v11337_v4  ;;  %18897 = vmatpush3.bf16.msra.mxu0 %v20996_v36  ;;  %v21010_v36 = vld [vmem:[%s26244_s3 + $0x50] sm:$0xff]   ;;  %v21012_v4 = vld [vmem:[%s26244_s3 + $0x60] sm:$0xff]   ;;  %v12079_v14 = vrot.slane %v25606_v35, 4 }
 0x9b5   : > { %18898 = vmatprep.subr.bf16.mxu0 %v20997_v59 }
 0x9b8   : > { %18899 = vmatpush3.bf16.msra.mxu0 %v20997_v59  ;;  %v25604_v59 = vld [vmem:[#allocation2 + $0x80] sm:$0xff] }
 0x9b9   : > { %18900 = vmatprep.subr.bf16.mxu0 %v20998_v20 }
 0x9bb   : > { %18881 = vmatmul.mubr.bf16.gmra.mrb[32].mxu0 %v11339_v16 }
 0x9bc   : > { %18884 = vmatprep.mubr.bf16.mxu0 %v25529_v51  ;;  %18901 = vmatpush3.bf16.msra.mxu0 %v20998_v20  ;;  %v11845_v20 = vrot.slane %v25604_v59, 3 }
 0x9bd   : > { %18902 = vmatprep.subr.bf16.mxu0 %v20999_v42 }
 0x9c0   : > { %18903 = vmatpush3.bf16.msra.mxu0 %v20999_v42  ;;  %v11847_v42 = vrot.slane %v25606_v35, 3 }
 0x9c1   : > { %18924 = vmatprep.subr.bf16.mxu0 %v21000_v0 }
 0x9c2   : > { %v11848_v16 = vsel %vm2503_vm10, %v11845_v20, %v11847_v42  ;;  %v11850_v37 = vsel %vm2503_vm10, %v11847_v42, %v11849_v3 }
 0x9c3   : > { %18885 = vmatmul.mubr.bf16.gmra.mrb[36].mxu0 %v11343_v11  ;;  %v21015_v11 = vld [vmem:[%s26244_s3 + $0x78] sm:$0xff]  }
 0x9c4   : > { %18904 = vmatprep.mubr.bf16.mxu0 %v11558_v63 }
 0x9cb   : > { %18905 = vmatmul.mubr.bf16.vlgmr.msra.gmra.mrb[20].mxu0 %v24862_v48  ;;  %v21004_v48 = vld [vmem:[%s26244_s3 + $0x20] sm:$0xff]  }
 0x9cc   : > { %18925 = vmatpush3.bf16.msra.mxu0 %v21000_v0  ;;  %18908 = vmatprep.mubr.bf16.mxu0 %v24865_v45  ;;  %v11567_v45 = vrot.slane %v25226_v26, 5  ;;  %v21006_v26 = vld [vmem:[%s26244_s3 + $0x30] sm:$0xff]   ;;  %v25620_v0 = vld [vmem:[#allocation2 + $0x98] sm:$0xff] }
 0x9cd   : > { %18926 = vmatprep.subr.bf16.mxu0 %v21001_v12  ;;  %v11851_v31 = vrot.slane %v25620_v0, 3 }
 0x9ce   : > { %v11570_v32 = vsel %vm27451_vm4, %v11567_v45, %v11569_v21  ;;  %vm27465_vm4 = vmmov %vm27450_vm2 }
 0x9cf   : > { %v11852_v63 = vsel %vm2503_vm10, %v11849_v3, %v11851_v31  ;;  %v21028_v3 = vld [vmem:[%s26244_s3 + $0xe0] sm:$0xff]  }
 0x9d0   : > { %18927 = vmatpush3.bf16.msra.mxu0 %v21001_v12  ;;  %v11806_v12 = vld [vmem:[#allocation2 + $0xa0] sm:$0x7] }
 0x9d1   : > { %18928 = vmatprep.subr.bf16.mxu0 %v21002_v55 }
 0x9d3   : > { %18909 = vmatmul.mubr.bf16.gmra.mrb[24].mxu0 %v24869_v60  ;;  %v27449_v60 = vrot.slane %v24844_v22, 5  ;;  %v11572_v22 = vsel %vm27452_vm9, %v11569_v21, %v24880_v24  ;;  %v11576_v24 = vsel %vm27453_vm15, %v24882_v41, %v11575_v6  ;;  %v12067_v21 = vrot.slane %v25577_v46, 4  ;;  %vm27466_vm9 = vmmov %vm27450_vm2 }
 0x9d4   : > { %18912 = vmatprep.mubr.bf16.mxu0 %v24874_v56  ;;  %18929 = vmatpush3.bf16.msra.mxu0 %v21002_v55  ;;  %v12046_v55 = vld [vmem:[#allocation2 + $0x50] sm:$0xf0]  ;;  %v12077_v6 = vrot.slane %v25604_v59, 4  ;;  %vm27467_vm15 = vmmov %vm27450_vm2 }
 0x9d5   : > { %18930 = vmatprep.subr.bf16.mxu0 %v21003_v58  ;;  %v11568_v56 = vsel %vm27450_vm2, %v27449_v60, %v11567_v45  ;;  %v12066_v45 = vrot.slane %v12046_v55, 4  ;;  %v12313_v55 = vrot.slane %v25618_v13, 5 }
 0x9d6   : > { %v12078_v46 = vsel %vm27442_vm0, %v12075_v39, %v12077_v6 }
 0x9d7   : > { %v12068_v60 = vsel %vm27454_vm6, %v12066_v45, %v12067_v21  ;;  %vm27468_vm6 = vmmov %vm27450_vm2 }
 0x9d8   : > { %18931 = vmatpush3.bf16.msra.mxu0 %v21003_v58  ;;  %v21016_v58 = vld [vmem:[%s26244_s3 + $0x80] sm:$0xff]  }
 0x9d9   : > { %18932 = vmatprep.subr.bf16.mxu0 %v21004_v48 }
 0x9db   : > { %18913 = vmatmul.mubr.bf16.gmra.mrb[28].mxu0 %v11568_v56  ;;  %v12069_v56 = vrot.slane %v25583_v27, 4 }
 0x9dc   : > { %18916 = vmatprep.mubr.bf16.mxu0 %v11570_v32  ;;  %18933 = vmatpush3.bf16.msra.mxu0 %v21004_v48  ;;  %v11853_v48 = vrot.slane %v11806_v12, 3  ;;  %v21017_v32 = vld [vmem:[%s26244_s3 + $0x88] sm:$0xff]   ;;  %v21030_v12 = vld [vmem:[%s26244_s3 + $0xf0] sm:$0xff]  }
 0x9dd   : > { %18934 = vmatprep.subr.bf16.mxu0 %v21005_v38 }
 0x9e0   : > { %18935 = vmatpush3.bf16.msra.mxu0 %v21005_v38  ;;  %v11854_v38 = vsel %vm2503_vm10, %v11851_v31, %v11853_v48  ;;  %v12309_v31 = vrot.slane %v25604_v59, 5  ;;  %v21031_v48 = vld [vmem:[%s26244_s3 + $0xf8] sm:$0xff]  }
 0x9e1   : > { %18936 = vmatprep.subr.bf16.mxu0 %v21006_v26 }
 0x9e3   : > { %18917 = vmatmul.mubr.bf16.gmra.mrb[32].mxu0 %v11572_v22  ;;  %v21018_v22 = vld [vmem:[%s26244_s3 + $0x90] sm:$0xff]  }
 0x9e4   : > { %18920 = vmatprep.mubr.bf16.mxu0 %v24889_v23  ;;  %18937 = vmatpush3.bf16.msra.mxu0 %v21006_v26  ;;  %v12070_v26 = vsel %vm27455_vm1, %v12067_v21, %v12069_v56  ;;  %vm27469_vm1 = vmmov %vm27450_vm2 }
 0x9e5   : > { %18938 = vmatprep.subr.bf16.mxu0 %v21007_v17  ;;  %vm27473_vm0 = vmmov %vm27469_vm1 }
 0x9e8   : > { %18939 = vmatpush3.bf16.msra.mxu0 %v21007_v17  ;;  %v12072_v17 = vsel %vm27456_vm11, %v12069_v56, %v25516_v47  ;;  %v12076_v47 = vsel %vm27457_vm7, %v25519_v19, %v12075_v39  ;;  %v12080_v19 = vsel %vm27458_vm12, %v12077_v6, %v12079_v14  ;;  %vm27471_vm11 = vmmov %vm27469_vm1 }
 0x9e9   : > { %18960 = vmatprep.subr.bf16.mxu0 %v21008_v53  ;;  %vm27472_vm7 = vmmov %vm27469_vm1 }
 0x9ea   : > { %vm27474_vm12 = vmmov %vm27473_vm0 }
 0x9eb   : > { %18921 = vmatmul.mubr.bf16.gmra.mrb[36].mxu0 %v11576_v24  ;;  %v12081_v24 = vrot.slane %v25618_v13, 4 }
 0x9ec   : > { %18940 = vmatprep.mubr.bf16.mxu0 %v11836_v10  ;;  %v12083_v10 = vrot.slane %v25620_v0, 4 }
 0x9f3   : > { %18941 = vmatmul.mubr.bf16.vlgmr.msra.gmra.mrb[40].mxu0 %v11838_v9  ;;  %v12084_v9 = vsel %vm27460_vm3, %v12081_v24, %v12083_v10  ;;  %vm27476_vm3 = vcmask 1041408  }
 0x9f4   : > { %18961 = vmatpush3.bf16.msra.mxu0 %v21008_v53  ;;  %18944 = vmatprep.mubr.bf16.mxu0 %v11840_v54  ;;  %v21020_v53 = vld [vmem:[%s26244_s3 + $0xa0] sm:$0xff]  }
 0x9f5   : > { %18962 = vmatprep.subr.bf16.mxu0 %v21009_v2  ;;  %v12047_v54 = vld [vmem:[#allocation2 + $0xa0] sm:$0xf] }
 0x9f8   : > { %18963 = vmatpush3.bf16.msra.mxu0 %v21009_v2  ;;  %v12082_v2 = vsel %vm27459_vm5, %v12079_v14, %v12081_v24  ;;  %v21038_v24 = vld [vmem:[%s26244_s3 + $0x130] sm:$0xff]   ;;  %vm27475_vm5 = vmmov %vm27473_vm0 }
 0x9f9   : > { %18964 = vmatprep.subr.bf16.mxu0 %v21010_v36 }
 0x9fb   : > { %18945 = vmatmul.mubr.bf16.gmra.mrb[44].mxu0 %v25475_v28  ;;  %v11846_v28 = vsel %vm2503_vm10, %v11843_v1, %v11845_v20  ;;  %v21024_v1 = vld [vmem:[%s26244_s3 + $0xc0] sm:$0xff]   ;;  %v27462_v20 = vrot.slane %v24898_v8, 5  ;;  %v21027_v8 = vld [vmem:[%s26244_s3 + $0xd8] sm:$0xff]  }
 0x9fc   : > { %18948 = vmatprep.mubr.bf16.mxu0 %v11844_v43  ;;  %18965 = vmatpush3.bf16.msra.mxu0 %v21010_v36  ;;  %v12278_v36 = vld [vmem:[#allocation2 + $0x50] sm:$0xe0] }
 0x9fd   : > { %18966 = vmatprep.subr.bf16.mxu0 %v21011_v18  ;;  %v12298_v43 = vrot.slane %v12278_v36, 5 }
 0x9ff   : > { %v12300_v42 = vsel %vm27463_vm13, %v12298_v43, %v27462_v20  ;;  %vm27478_vm13 = vmmov %vm27476_vm3 }
 0xa00   : > { %18967 = vmatpush3.bf16.msra.mxu0 %v21011_v18  ;;  %v12085_v18 = vrot.slane %v12047_v54, 4  ;;  %v21040_v54 = vld [vmem:[%s26244_s3 + $0x140] sm:$0xff]  }
 0xa01   : > { %18968 = vmatprep.subr.bf16.mxu0 %v21012_v4 }
 0xa03   : > { %18949 = vmatmul.mubr.bf16.gmra.mrb[48].mxu0 %v11846_v28  ;;  %v27464_v28 = vld [vmem:[#allocation65_spill] sm:$0xff] }
 0xa04   : > { %18952 = vmatprep.mubr.bf16.mxu0 %v11848_v16  ;;  %18969 = vmatpush3.bf16.msra.mxu0 %v21012_v4  ;;  %v12086_v4 = vsel %vm27461_vm8, %v12083_v10, %v12085_v18  ;;  %v21026_v16 = vld [vmem:[%s26244_s3 + $0xd0] sm:$0xff]   ;;  %v12781_v18 = vrot.slane %v25583_v27, 6  ;;  %vm27477_vm8 = vmmov %vm27476_vm3 }
 0xa05   : > { %18970 = vmatprep.subr.bf16.mxu0 %v21013_v29 }
 0xa08   : > { %18971 = vmatpush3.bf16.msra.mxu0 %v21013_v29  ;;  %v21025_v29 = vld [vmem:[%s26244_s3 + $0xc8] sm:$0xff]  }
 0xa09   : > { %18972 = vmatprep.subr.bf16.mxu0 %v21014_v62 }
 0xa0b   : > { %18953 = vmatmul.mubr.bf16.gmra.mrb[52].mxu0 %v11850_v37 }
 0xa0c   : > { %18956 = vmatprep.mubr.bf16.mxu0 %v11852_v63  ;;  %18973 = vmatpush3.bf16.msra.mxu0 %v21014_v62  ;;  %v12307_v62 = vrot.slane %v25592_v25, 5 }
 0xa0d   : > { %18974 = vmatprep.subr.bf16.mxu0 %v21015_v11 }
 0xa0e   : > { %v12310_v37 = vsel %vm27465_vm4, %v12307_v62, %v12309_v31 }
 0xa10   : > { %18975 = vmatpush3.bf16.msra.mxu0 %v21015_v11  ;;  %v12311_v11 = vrot.slane %v25606_v35, 5 }
 0xa11   : > { %18996 = vmatprep.subr.bf16.mxu0 %v21016_v58 }
 0xa12   : > { %v12312_v63 = vsel %vm27466_vm9, %v12309_v31, %v12311_v11  ;;  %v12314_v45 = vsel %vm27467_vm15, %v12311_v11, %v12313_v55  ;;  %v21043_v31 = vld [vmem:[%s26244_s3 + $0x158] sm:$0xff]  }
 0xa13   : > { %18957 = vmatmul.mubr.bf16.gmra.mrb[56].mxu0 %v11854_v38  ;;  %v12279_v38 = vld [vmem:[#allocation2 + $0xa0] sm:$0x1f] }
 0xa14   : > { %18976 = vmatprep.mubr.bf16.mxu0 %v12068_v60  ;;  %v21032_v60 = vld [vmem:[%s26244_s3 + $0x100] sm:$0xff]   ;;  %v12317_v56 = vrot.slane %v12279_v38, 5 }
 0xa1b   : > { %18977 = vmatmul.mubr.bf16.vlgmr.msra.gmra.mrb[40].mxu0 %v12070_v26 }
 0xa1c   : > { %18997 = vmatpush3.bf16.msra.mxu0 %v21016_v58  ;;  %18980 = vmatprep.mubr.bf16.mxu0 %v12072_v17  ;;  %v12315_v58 = vrot.slane %v25620_v0, 5 }
 0xa1d   : > { %18998 = vmatprep.subr.bf16.mxu0 %v21017_v32 }
 0xa1e   : > { %v12316_v21 = vsel %vm27468_vm6, %v12313_v55, %v12315_v58  ;;  %v12318_v17 = vsel %vm27469_vm1, %v12315_v58, %v12317_v56  ;;  %v12791_v55 = vrot.slane %v25606_v35, 6 }
 0xa20   : > { %18999 = vmatpush3.bf16.msra.mxu0 %v21017_v32  ;;  %v12510_v32 = vld [vmem:[#allocation2 + $0x58] sm:$0xe0] }
 0xa21   : > { %19000 = vmatprep.subr.bf16.mxu0 %v21018_v22  ;;  %v12548_v26 = vrot.slane %v12510_v32, 5  ;;  %v21045_v32 = vld [vmem:[%s26244_s3 + $0x168] sm:$0xff]  }
 0xa23   : > { %18981 = vmatmul.mubr.bf16.gmra.mrb[44].mxu0 %v25529_v51  ;;  %v21021_v51 = vld [vmem:[%s26244_s3 + $0xa8] sm:$0xff]  }
 0xa24   : > { %18984 = vmatprep.mubr.bf16.mxu0 %v12076_v47  ;;  %19001 = vmatpush3.bf16.msra.mxu0 %v21018_v22  ;;  %v27470_v22 = vld [vmem:[#allocation60_spill] sm:$0xff] }
 0xa25   : > { %19002 = vmatprep.subr.bf16.mxu0 %v21019_v57  ;;  %v12550_v39 = vsel %vm27471_vm11, %v12548_v26, %v27470_v22 }
 0xa28   : > { %19003 = vmatpush3.bf16.msra.mxu0 %v21019_v57  ;;  %v25723_v57 = vld [vmem:[#allocation2 + $0x68] sm:$0xff] }
 0xa29   : > { %19004 = vmatprep.subr.bf16.mxu0 %v21020_v53  ;;  %v12551_v47 = vrot.slane %v25723_v57, 5 }
 0xa2b   : > { %18985 = vmatmul.mubr.bf16.gmra.mrb[48].mxu0 %v12078_v46  ;;  %v12552_v6 = vsel %vm27472_vm7, %v27470_v22, %v12551_v47  ;;  %v12554_v14 = vsel %vm27473_vm0, %v12551_v47, %v24882_v41  ;;  %v21035_v46 = vld [vmem:[%s26244_s3 + $0x118] sm:$0xff]   ;;  %vm27486_vm7 = vcmask 1040384  }
 0xa2c   : > { %18988 = vmatprep.mubr.bf16.mxu0 %v12080_v19  ;;  %19005 = vmatpush3.bf16.msra.mxu0 %v21020_v53  ;;  %v21033_v53 = vld [vmem:[%s26244_s3 + $0x108] sm:$0xff]   ;;  %vm27487_vm0 = vmmov %vm27486_vm7 }
 0xa2d   : > { %19006 = vmatprep.subr.bf16.mxu0 %v21021_v51  ;;  %v21037_v19 = vld [vmem:[%s26244_s3 + $0x128] sm:$0xff]  }
 0xa30   : > { %19007 = vmatpush3.bf16.msra.mxu0 %v21021_v51  ;;  %v21034_v51 = vld [vmem:[%s26244_s3 + $0x110] sm:$0xff]  }
 0xa31   : > { %19008 = vmatprep.subr.bf16.mxu0 %v21022_v61 }
 0xa33   : > { %18989 = vmatmul.mubr.bf16.gmra.mrb[52].mxu0 %v12082_v2 }
 0xa34   : > { %18992 = vmatprep.mubr.bf16.mxu0 %v12084_v9  ;;  %19009 = vmatpush3.bf16.msra.mxu0 %v21022_v61  ;;  %v25745_v61 = vld [vmem:[#allocation2 + $0xa0] sm:$0xff]  ;;  %v12520_v9 = vld [vmem:[#allocation2 + $0xa8] sm:$0x1f] }
 0xa35   : > { %19010 = vmatprep.subr.bf16.mxu0 %v21023_v44  ;;  %v12565_v10 = vrot.slane %v25745_v61, 5  ;;  %v12567_v36 = vrot.slane %v12520_v9, 5 }
 0xa37   : > { %v12566_v2 = vsel %vm27474_vm12, %v12315_v58, %v12565_v10  ;;  %vm27488_vm12 = vmmov %vm27487_vm0 }
 0xa38   : > { %19011 = vmatpush3.bf16.msra.mxu0 %v21023_v44  ;;  %v21039_v44 = vld [vmem:[%s26244_s3 + $0x138] sm:$0xff]  }
 0xa39   : > { %19032 = vmatprep.subr.bf16.mxu0 %v21024_v1 }
 0xa3b   : > { %18993 = vmatmul.mubr.bf16.gmra.mrb[56].mxu0 %v12086_v4  ;;  %v12568_v4 = vsel %vm27475_vm5, %v12565_v10, %v12567_v36  ;;  %v21047_v10 = vld [vmem:[%s26244_s3 + $0x178] sm:$0xff]   ;;  %v21048_v36 = vld [vmem:[%s26244_s3 + $0x180] sm:$0xff]   ;;  %vm27489_vm5 = vmmov %vm27487_vm0 }
 0xa3c   : > { %19012 = vmatprep.mubr.bf16.mxu0 %v12300_v42  ;;  %v12783_v42 = vrot.slane %v25723_v57, 6 }
 0xa43   : > { %19013 = vmatmul.mubr.bf16.vlgmr.msra.gmra.mrb[40].mxu0 %v24916_v5  ;;  %v12308_v5 = vsel %vm27450_vm2, %v24882_v41, %v12307_v62  ;;  %v21036_v41 = vld [vmem:[%s26244_s3 + $0x120] sm:$0xff]   ;;  %vm27479_vm2 = vmmov %vm27476_vm3 }
 0xa44   : > { %19033 = vmatpush3.bf16.msra.mxu0 %v21024_v1  ;;  %19016 = vmatprep.mubr.bf16.mxu0 %v27464_v28  ;;  %v12760_v1 = vld [vmem:[#allocation2 + $0x58] sm:$0xc0]  ;;  %v21041_v28 = vld [vmem:[%s26244_s3 + $0x148] sm:$0xff]   ;;  %vm27480_vm4 = vmmov %vm27479_vm2 }
 0xa45   : > { %19034 = vmatprep.subr.bf16.mxu0 %v21025_v29  ;;  %v12780_v43 = vrot.slane %v12760_v1, 6  ;;  %vm27481_vm9 = vmmov %vm27479_vm2 }
 0xa46   : > { %vm27482_vm15 = vmmov %vm27479_vm2 }
 0xa47   : > { %v12782_v20 = vsel %vm27476_vm3, %v12780_v43, %v12781_v18  ;;  %vm27483_vm6 = vmmov %vm27479_vm2  ;;  %v12992_v43 = vld [vmem:[#allocation2 + $0x58] sm:$0x80] }
 0xa48   : > { %19035 = vmatpush3.bf16.msra.mxu0 %v21025_v29  ;;  %v12785_v29 = vrot.slane %v25464_v49, 6  ;;  %vm27484_vm1 = vmmov %vm27479_vm2 }
 0xa49   : > { %19036 = vmatprep.subr.bf16.mxu0 %v21026_v16  ;;  %vm27485_vm11 = vmmov %vm27484_vm1 }
 0xa4a   : > { %v12786_v62 = vsel %vm27478_vm13, %v12783_v42, %v12785_v29  ;;  %vm27490_vm3 = vmmov %vm27487_vm0 }
 0xa4b   : > { %19017 = vmatmul.mubr.bf16.gmra.mrb[44].mxu0 %v24889_v23  ;;  %v21029_v23 = vld [vmem:[%s26244_s3 + $0xe8] sm:$0xff]   ;;  %vm27492_vm13 = vmmov %vm27487_vm0 }
 0xa4c   : > { %19020 = vmatprep.mubr.bf16.mxu0 %v12308_v5  ;;  %19037 = vmatpush3.bf16.msra.mxu0 %v21026_v16  ;;  %v12784_v16 = vsel %vm27477_vm8, %v12781_v18, %v12783_v42  ;;  %v13013_v42 = vrot.slane %v25583_v27, 7  ;;  %vm27491_vm8 = vmmov %vm27487_vm0 }
 0xa4d   : > { %19038 = vmatprep.subr.bf16.mxu0 %v21027_v8 }
 0xa50   : > { %19039 = vmatpush3.bf16.msra.mxu0 %v21027_v8  ;;  %v21042_v8 = vld [vmem:[%s26244_s3 + $0x150] sm:$0xff]  }
 0xa51   : > { %19040 = vmatprep.subr.bf16.mxu0 %v21028_v3 }
 0xa53   : > { %19021 = vmatmul.mubr.bf16.gmra.mrb[48].mxu0 %v12310_v37 }
 0xa54   : > { %19024 = vmatprep.mubr.bf16.mxu0 %v12312_v63  ;;  %19041 = vmatpush3.bf16.msra.mxu0 %v21028_v3  ;;  %v12789_v3 = vrot.slane %v25604_v59, 6 }
 0xa55   : > { %19042 = vmatprep.subr.bf16.mxu0 %v21029_v23 }
 0xa58   : > { %19043 = vmatpush3.bf16.msra.mxu0 %v21029_v23 }
 0xa59   : > { %19044 = vmatprep.subr.bf16.mxu0 %v21030_v12 }
 0xa5b   : > { %19025 = vmatmul.mubr.bf16.gmra.mrb[52].mxu0 %v12314_v45 }
 0xa5c   : > { %19028 = vmatprep.mubr.bf16.mxu0 %v12316_v21  ;;  %19045 = vmatpush3.bf16.msra.mxu0 %v21030_v12 }
 0xa5d   : > { %19046 = vmatprep.subr.bf16.mxu0 %v21031_v48 }
 0xa60   : > { %19047 = vmatpush3.bf16.msra.mxu0 %v21031_v48 }
 0xa61   : > { %19068 = vmatprep.subr.bf16.mxu0 %v21032_v60 }
 0xa63   : > { %19029 = vmatmul.mubr.bf16.gmra.mrb[56].mxu0 %v12318_v17  ;;  %v12792_v17 = vsel %vm27481_vm9, %v12789_v3, %v12791_v55  ;;  %vm27495_vm9 = vmmov %vm27487_vm0 }
 0xa64   : > { %19048 = vmatprep.mubr.bf16.mxu0 %v12550_v39  ;;  %v21046_v39 = vld [vmem:[%s26244_s3 + $0x170] sm:$0xff]  }
 0xa6b   : > { %19049 = vmatmul.mubr.bf16.vlgmr.msra.gmra.mrb[40].mxu0 %v12552_v6 }
 0xa6c   : > { %19069 = vmatpush3.bf16.msra.mxu0 %v21032_v60  ;;  %19052 = vmatprep.mubr.bf16.mxu0 %v12554_v14 }
 0xa6d   : > { %19070 = vmatprep.subr.bf16.mxu0 %v21033_v53 }
 0xa70   : > { %19071 = vmatpush3.bf16.msra.mxu0 %v21033_v53  ;;  %v12795_v53 = vrot.slane %v25620_v0, 6 }
 0xa71   : > { %19072 = vmatprep.subr.bf16.mxu0 %v21034_v51 }
 0xa73   : > { %19053 = vmatmul.mubr.bf16.gmra.mrb[44].mxu0 %v12308_v5  ;;  %v12787_v5 = vrot.slane %v25592_v25, 6 }
 0xa74   : > { %19056 = vmatprep.mubr.bf16.mxu0 %v12310_v37  ;;  %19073 = vmatpush3.bf16.msra.mxu0 %v21034_v51  ;;  %v25782_v37 = vld [vmem:[%s26249_s8] ss:$0 sm:$0xff]  ;;  %v12797_v51 = vrot.slane %v25745_v61, 6 }
 0xa75   : > { %19074 = vmatprep.subr.bf16.mxu0 %v21035_v46  ;;  %v12788_v11 = vsel %vm27479_vm2, %v12785_v29, %v12787_v5  ;;  %v12790_v23 = vsel %vm27480_vm4, %v12787_v5, %v12789_v3  ;;  %vm27493_vm2 = vmmov %vm27487_vm0 }
 0xa76   : > { %v12798_v9 = vsel %vm27484_vm1, %v12795_v53, %v12797_v51  ;;  %vm27494_vm4 = vmmov %vm27487_vm0 }
 0xa77   : > { %vm27498_vm1 = vmmov %vm27487_vm0 }
 0xa78   : > { %19075 = vmatpush3.bf16.msra.mxu0 %v21035_v46 }
 0xa79   : > { %19076 = vmatprep.subr.bf16.mxu0 %v21036_v41 }
 0xa7b   : > { %19057 = vmatmul.mubr.bf16.gmra.mrb[48].mxu0 %v12312_v63  ;;  %v21044_v63 = vld [vmem:[%s26244_s3 + $0x160] sm:$0xff]  }
 0xa7c   : > { %19060 = vmatprep.mubr.bf16.mxu0 %v12314_v45  ;;  %19077 = vmatpush3.bf16.msra.mxu0 %v21036_v41  ;;  %v12793_v45 = vrot.slane %v25618_v13, 6 }
 0xa7d   : > { %19078 = vmatprep.subr.bf16.mxu0 %v21037_v19 }
 0xa7e   : > { %v12794_v22 = vsel %vm27482_vm15, %v12791_v55, %v12793_v45  ;;  %vm27496_vm15 = vmmov %vm27487_vm0 }
 0xa80   : > { %19079 = vmatpush3.bf16.msra.mxu0 %v21037_v19 }
 0xa81   : > { %19080 = vmatprep.subr.bf16.mxu0 %v21038_v24 }
 0xa83   : > { %19061 = vmatmul.mubr.bf16.gmra.mrb[52].mxu0 %v12316_v21 }
 0xa84   : > { %19064 = vmatprep.mubr.bf16.mxu0 %v12566_v2  ;;  %19081 = vmatpush3.bf16.msra.mxu0 %v21038_v24  ;;  %v12796_v2 = vsel %vm27483_vm6, %v12793_v45, %v12795_v53  ;;  %vm27497_vm6 = vmmov %vm27487_vm0 }
 0xa85   : > { %19082 = vmatprep.subr.bf16.mxu0 %v21039_v44 }
 0xa88   : > { %19083 = vmatpush3.bf16.msra.mxu0 %v21039_v44 }
 0xa89   : > { %19104 = vmatprep.subr.bf16.mxu0 %v21040_v54 }
 0xa8b   : > { %19065 = vmatmul.mubr.bf16.gmra.mrb[56].mxu0 %v12568_v4 }
 0xa8c   : > { %19084 = vmatprep.mubr.bf16.mxu0 %v12782_v20 }
 0xa93   : > { %19085 = vmatmul.mubr.bf16.vlgmr.msra.gmra.mrb[40].mxu0 %v12784_v16 }
 0xa94   : > { %19105 = vmatpush3.bf16.msra.mxu0 %v21040_v54  ;;  %19088 = vmatprep.mubr.bf16.mxu0 %v12786_v62  ;;  %v12761_v54 = vld [vmem:[#allocation2 + $0xa8] sm:$0x3f] }
 0xa95   : > { %19106 = vmatprep.subr.bf16.mxu0 %v21041_v28  ;;  %v12799_v18 = vrot.slane %v12761_v54, 6  ;;  %v21054_v54 = vld [vmem:[%s26244_s3 + $0x1b0] sm:$0xff]  }
 0xa97   : > { %v12800_v3 = vsel %vm27485_vm11, %v12797_v51, %v12799_v18  ;;  %v21051_v51 = vld [vmem:[%s26244_s3 + $0x198] sm:$0xff]   ;;  %vm27499_vm11 = vmmov %vm27487_vm0 }
 0xa98   : > { %19107 = vmatpush3.bf16.msra.mxu0 %v21041_v28  ;;  %v21055_v18 = vld [vmem:[%s26244_s3 + $0x1b8] sm:$0xff]  }
 0xa99   : > { %19108 = vmatprep.subr.bf16.mxu0 %v21042_v8 }
 0xa9b   : > { %19089 = vmatmul.mubr.bf16.gmra.mrb[44].mxu0 %v12788_v11  ;;  %v25840_v11 = vrot.slane %v25723_v57, 7 }
 0xa9c   : > { %19092 = vmatprep.mubr.bf16.mxu0 %v12790_v23  ;;  %19109 = vmatpush3.bf16.msra.mxu0 %v21042_v8  ;;  %v13012_v8 = vrot.slane %v12992_v43, 7 }
 0xa9d   : > { %19110 = vmatprep.subr.bf16.mxu0 %v21043_v31 }
 0xa9e   : > { %v18906_v12 = vpop.f32.mrb[20].mxu0  ;;  %v13014_v27 = vsel %vm27486_vm7, %v13012_v8, %v13013_v42  ;;  %vm27500_vm7 = vmmov %vm27487_vm0 }
 0xa9f   : > { %v19480_v58 = vadd.f32 %v18906_v12, %v25782_v37  ;;  %v11669_v48 = vpop.f32.mrb[21].mxu0  ;;  %v13017_v12 = vrot.slane %v25464_v49, 7 }
 0xaa0   : > { %v19481_v21 = vadd.f32 %v25782_v37, %v11669_v48  ;;  %v18907_v38 = vpop.f32.mrb[22].mxu0  ;;  %19111 = vmatpush3.bf16.msra.mxu0 %v21043_v31 }
 0xaa1   : > { %11770 = vst [vmem:[%s25790_s22 + $0x10] sm:$0xff] %v19480_v58  ;;  %v19482_v60 = vadd.f32 %v18907_v38, %v25782_v37  ;;  %v11672_v56 = vpop.f32.mrb[23].mxu0  ;;  %19112 = vmatprep.subr.bf16.mxu0 %v21044_v63  ;;  %v13018_v49 = vsel %vm27488_vm12, %v25840_v11, %v13017_v12 }
 0xaa2   : > { %11768 = vst [vmem:[%s25790_s22] sm:$0xff] %v19481_v21  ;;  %v19483_v26 = vadd.f32 %v25782_v37, %v11672_v56  ;;  %v21049_v21 = vld [vmem:[%s26244_s3 + $0x188] sm:$0xff]   ;;  %v21050_v56 = vld [vmem:[%s26244_s3 + $0x190] sm:$0xff]  }
 0xaa3   : > { %11771 = vst [vmem:[%s25790_s22 + $0x18] sm:$0xff] %v19482_v60  ;;  %19093 = vmatmul.mubr.bf16.gmra.mrb[48].mxu0 %v12792_v17  ;;  %v13016_v60 = vsel %vm27487_vm0, %v13013_v42, %v25840_v11  ;;  %v13224_v42 = vld [vmem:[#allocation2 + $0x60] sm:$0x80]  ;;  %vm27501_vm0 = vcmask 1046528  }
 0xaa4   : > { %11769 = vst [vmem:[%s25790_s22 + $0x8] sm:$0xff] %v19483_v26  ;;  %19096 = vmatprep.mubr.bf16.mxu0 %v12794_v22  ;;  %19113 = vmatpush3.bf16.msra.mxu0 %v21044_v63  ;;  %v25862_v26 = vrot.slane %v25592_v25, 7  ;;  %vm27502_vm12 = vmmov %vm27501_vm0 }
 0xaa5   : > { %19114 = vmatprep.subr.bf16.mxu0 %v21045_v32 }
 0xaa6   : > { %v18910_v47 = vpop.f32.mrb[24].mxu0 }
 0xaa7   : > { %v19484_v6 = vadd.f32 %v18910_v47, %v25782_v37  ;;  %v11685_v14 = vpop.f32.mrb[25].mxu0 }
 0xaa8   : > { %v19485_v46 = vadd.f32 %v25782_v37, %v11685_v14  ;;  %v18911_v41 = vpop.f32.mrb[26].mxu0  ;;  %19115 = vmatpush3.bf16.msra.mxu0 %v21045_v32 }
 0xaa9   : > { %11774 = vst [vmem:[%s25790_s22 + $0x30] sm:$0xff] %v19484_v6  ;;  %v19486_v19 = vadd.f32 %v18911_v41, %v25782_v37  ;;  %v11688_v24 = vpop.f32.mrb[27].mxu0  ;;  %19116 = vmatprep.subr.bf16.mxu0 %v21046_v39  ;;  %v13020_v41 = vsel %vm27489_vm5, %v13017_v12, %v25862_v26  ;;  %v21059_v12 = vld [vmem:[%s26244_s3 + $0x1d8] sm:$0xff]   ;;  %vm27503_vm5 = vmmov %vm27501_vm0 }
 0xaaa   : > { %11772 = vst [vmem:[%s25790_s22 + $0x20] sm:$0xff] %v19485_v46  ;;  %v19487_v44 = vadd.f32 %v25782_v37, %v11688_v24  ;;  %v21052_v24 = vld [vmem:[%s26244_s3 + $0x1a0] sm:$0xff]  }
 0xaab   : > { %11775 = vst [vmem:[%s25790_s22 + $0x38] sm:$0xff] %v19486_v19  ;;  %19097 = vmatmul.mubr.bf16.gmra.mrb[52].mxu0 %v12796_v2 }
 0xaac   : > { %11773 = vst [vmem:[%s25790_s22 + $0x28] sm:$0xff] %v19487_v44  ;;  %19100 = vmatprep.mubr.bf16.mxu0 %v12798_v9  ;;  %19117 = vmatpush3.bf16.msra.mxu0 %v21046_v39  ;;  %v13021_v39 = vrot.slane %v25604_v59, 7  ;;  %v21053_v44 = vld [vmem:[%s26244_s3 + $0x1a8] sm:$0xff]  }
 0xaad   : > { %19118 = vmatprep.subr.bf16.mxu0 %v21047_v10 }
 0xaae   : > { %v18914_v1 = vpop.f32.mrb[28].mxu0  ;;  %v13022_v19 = vsel %vm27490_vm3, %v25862_v26, %v13021_v39  ;;  %vm27504_vm3 = vmmov %vm27501_vm0 }
 0xaaf   : > { %v19488_v4 = vadd.f32 %v18914_v1, %v25782_v37  ;;  %v11701_v20 = vpop.f32.mrb[29].mxu0  ;;  %v13029_v1 = vrot.slane %v25745_v61, 7 }
 0xab0   : > { %v19489_v29 = vadd.f32 %v25782_v37, %v11701_v20  ;;  %v18915_v28 = vpop.f32.mrb[30].mxu0  ;;  %19119 = vmatpush3.bf16.msra.mxu0 %v21047_v10  ;;  %v13023_v10 = vrot.slane %v25606_v35, 7  ;;  %v12993_v20 = vld [vmem:[#allocation2 + $0xa8] sm:$0x7f] }
 0xab1   : > { %11778 = vst [vmem:[%s25790_s22 + $0x50] sm:$0xff] %v19488_v4  ;;  %v19490_v16 = vadd.f32 %v18915_v28, %v25782_v37  ;;  %v11704_v62 = vpop.f32.mrb[31].mxu0  ;;  %19140 = vmatprep.subr.bf16.mxu0 %v21048_v36  ;;  %v13031_v28 = vrot.slane %v12993_v20, 7 }
 0xab2   : > { %11776 = vst [vmem:[%s25790_s22 + $0x40] sm:$0xff] %v19489_v29  ;;  %v19491_v5 = vadd.f32 %v25782_v37, %v11704_v62  ;;  %v13024_v2 = vsel %vm27491_vm8, %v13021_v39, %v13023_v10  ;;  %v21056_v29 = vld [vmem:[%s26244_s3 + $0x1c0] sm:$0xff]   ;;  %vm27505_vm8 = vmmov %vm27501_vm0 }
 0xab3   : > { %11779 = vst [vmem:[%s25790_s22 + $0x58] sm:$0xff] %v19490_v16  ;;  %19101 = vmatmul.mubr.bf16.gmra.mrb[56].mxu0 %v12800_v3  ;;  %v13262_v16 = vrot.slane %v13224_v42, 7  ;;  %v13032_v62 = vsel %vm27495_vm9, %v13029_v1, %v13031_v28  ;;  %v13723_v42 = vrot.slane %v25745_v61, 1  ;;  %vm27509_vm9 = vmmov %vm27501_vm0 }
 0xab4   : > { %11777 = vst [vmem:[%s25790_s22 + $0x48] sm:$0xff] %v19491_v5  ;;  %19120 = vmatprep.mubr.bf16.mxu0 %v13014_v27  ;;  %v25906_v5 = vld [vmem:[#allocation2 + $0x70] sm:$0xff]  ;;  %v21057_v27 = vld [vmem:[%s26244_s3 + $0x1c8] sm:$0xff]  }
 0xab5   : > { %v13264_v8 = vsel %vm27496_vm15, %v13262_v16, %v25840_v11  ;;  %v13265_v3 = vrot.slane %v25906_v5, 7  ;;  %v13711_v39 = vrot.slane %v25906_v5, 1  ;;  %vm27510_vm15 = vmmov %vm27501_vm0 }
 0xab6   : > { %v18918_v31 = vpop.f32.mrb[32].mxu0 }
 0xab7   : > { %v19492_v23 = vadd.f32 %v18918_v31, %v25782_v37  ;;  %v11717_v63 = vpop.f32.mrb[33].mxu0  ;;  %v13266_v31 = vsel %vm27497_vm6, %v25840_v11, %v13265_v3  ;;  %v21060_v11 = vld [vmem:[%s26244_s3 + $0x1e0] sm:$0xff]   ;;  %vm27511_vm6 = vmmov %vm27501_vm0 }
 0xab8   : > { %v19493_v55 = vadd.f32 %v25782_v37, %v11717_v63  ;;  %v18919_v58 = vpop.f32.mrb[34].mxu0  ;;  %v21058_v63 = vld [vmem:[%s26244_s3 + $0x1d0] sm:$0xff]  }
 0xab9   : > { %11782 = vst [vmem:[%s25790_s22 + $0x70] sm:$0xff] %v19492_v23  ;;  %v19494_v48 = vadd.f32 %v18919_v58, %v25782_v37  ;;  %v11720_v45 = vpop.f32.mrb[35].mxu0  ;;  %v13268_v23 = vsel %vm27498_vm1, %v13265_v3, %v25862_v26  ;;  %v25928_v58 = vld [vmem:[#allocation2 + $0xa8] sm:$0xff]  ;;  %v21079_v3 = vld [vmem:[%s26244_s3 + $0x278] sm:$0xff]   ;;  %vm27512_vm1 = vmmov %vm27501_vm0 }
 0xaba   : > { %11780 = vst [vmem:[%s25790_s22 + $0x60] sm:$0xff] %v19493_v55  ;;  %v19495_v38 = vadd.f32 %v25782_v37, %v11720_v45  ;;  %v21061_v55 = vld [vmem:[%s26244_s3 + $0x1e8] sm:$0xff]   ;;  %v13279_v45 = vrot.slane %v25928_v58, 7 }
 0xabb   : > { %11783 = vst [vmem:[%s25790_s22 + $0x78] sm:$0xff] %v19494_v48  ;;  %19121 = vmatmul.mubr.bf16.vlgmr.msra.gmra.mrb[40].mxu0 %v13016_v60  ;;  %v21062_v48 = vld [vmem:[%s26244_s3 + $0x1f0] sm:$0xff]   ;;  %v21065_v26 = vld [vmem:[%s26244_s3 + $0x208] sm:$0xff]  }
 0xabc   : > { %11781 = vst [vmem:[%s25790_s22 + $0x68] sm:$0xff] %v19495_v38  ;;  %19141 = vmatpush3.bf16.msra.mxu0 %v21048_v36  ;;  %19124 = vmatprep.mubr.bf16.mxu0 %v13018_v49  ;;  %v13027_v36 = vrot.slane %v25620_v0, 7  ;;  %v13280_v38 = vsel %vm27499_vm11, %v13029_v1, %v13279_v45  ;;  %v13234_v60 = vld [vmem:[#allocation2 + $0xb0] sm:$0x7f]  ;;  %v21064_v49 = vld [vmem:[%s26244_s3 + $0x200] sm:$0xff]   ;;  %vm27513_vm11 = vmmov %vm27501_vm0 }
 0xabd   : > { %19142 = vmatprep.subr.bf16.mxu0 %v21049_v21 }
 0xabe   : > { %v18922_v32 = vpop.f32.mrb[36].mxu0  ;;  %v13030_v4 = vsel %vm27494_vm4, %v13027_v36, %v13029_v1  ;;  %vm27508_vm4 = vmmov %vm27501_vm0 }
 0xabf   : > { %v19496_v17 = vadd.f32 %v18922_v32, %v25782_v37  ;;  %v11733_v22 = vpop.f32.mrb[37].mxu0 }
 0xac0   : > { %v19497_v47 = vadd.f32 %v25782_v37, %v11733_v22  ;;  %v18923_v53 = vpop.f32.mrb[38].mxu0  ;;  %19143 = vmatpush3.bf16.msra.mxu0 %v21049_v21  ;;  %v21063_v21 = vld [vmem:[%s26244_s3 + $0x1f8] sm:$0xff]   ;;  %v21069_v22 = vld [vmem:[%s26244_s3 + $0x228] sm:$0xff]  }
 0xac1   : > { %11786 = vst [vmem:[%s25790_s22 + $0x90] sm:$0xff] %v19496_v17  ;;  %v19498_v6 = vadd.f32 %v18923_v53, %v25782_v37  ;;  %v11736_v14 = vpop.f32.mrb[39].mxu0  ;;  %19144 = vmatprep.subr.bf16.mxu0 %v21050_v56  ;;  %v21066_v17 = vld [vmem:[%s26244_s3 + $0x210] sm:$0xff]  }
 0xac2   : > { %11784 = vst [vmem:[%s25790_s22 + $0x80] sm:$0xff] %v19497_v47  ;;  %v19499_v46 = vadd.f32 %v25782_v37, %v11736_v14  ;;  %v13025_v37 = vrot.slane %v25618_v13, 7  ;;  %v25976_v53 = vld [vmem:[#allocation2 + $0xb0] sm:$0xff]  ;;  %v21129_v14 = vld [vmem:[#allocation2 + $0x78] sm:$0xff] }
 0xac3   : > { %11787 = vst [vmem:[%s25790_s22 + $0x98] sm:$0xff] %v19498_v6  ;;  %19125 = vmatmul.mubr.bf16.gmra.mrb[44].mxu0 %v13020_v41 }
 0xac4   : > { %11785 = vst [vmem:[%s25790_s22 + $0x88] sm:$0xff] %v19499_v46  ;;  %19128 = vmatprep.mubr.bf16.mxu0 %v13022_v19  ;;  %19145 = vmatpush3.bf16.msra.mxu0 %v21050_v56  ;;  %v13026_v9 = vsel %vm27492_vm13, %v13023_v10, %v13025_v37  ;;  %v13028_v43 = vsel %vm27493_vm2, %v13025_v37, %v13027_v36  ;;  %v13281_v56 = vrot.slane %v13234_v60, 7  ;;  %v21130_v46 = vld [vmem:[#allocation2 + $0x80] sm:$0xff]  ;;  %v21074_v37 = vld [vmem:[%s26244_s3 + $0x250] sm:$0xff]   ;;  %v21075_v36 = vld [vmem:[%s26244_s3 + $0x258] sm:$0xff]  }
 0xac5   : > { %19146 = vmatprep.subr.bf16.mxu0 %v21051_v51  ;;  %v13715_v41 = vrot.slane %v21130_v46, 1  ;;  %vm27506_vm13 = vmmov %vm27501_vm0  ;;  %v21083_v60 = vld [vmem:[%s26244_s3 + $0x298] sm:$0xff]   ;;  %v27516_v46 = vld [vmem:[#allocation74_spill] sm:$0xff] }
 0xac6   : > { %v13282_v32 = vsel %vm27500_vm7, %v13279_v45, %v13281_v56  ;;  %vm27507_vm2 = vmmov %vm27501_vm0  ;;  %v21085_v56 = vld [vmem:[%s26244_s3 + $0x2a8] sm:$0xff]  }
 0xac8   : > { %19147 = vmatpush3.bf16.msra.mxu0 %v21051_v51  ;;  %v13713_v51 = vrot.slane %v21129_v14, 1 }
 0xac9   : > { %19148 = vmatprep.subr.bf16.mxu0 %v21052_v24 }
 0xaca   : > { %v13716_v10 = vsel %vm27503_vm5, %v13713_v51, %v13715_v41 }
 0xacb   : > { %19129 = vmatmul.mubr.bf16.gmra.mrb[48].mxu0 %v13024_v2 }
 0xacc   : > { %19132 = vmatprep.mubr.bf16.mxu0 %v13026_v9  ;;  %19149 = vmatpush3.bf16.msra.mxu0 %v21052_v24  ;;  %v13714_v24 = vsel %vm27502_vm12, %v13711_v39, %v13713_v51 }
 0xacd   : > { %19150 = vmatprep.subr.bf16.mxu0 %v21053_v44 }
 0xad0   : > { %19151 = vmatpush3.bf16.msra.mxu0 %v21053_v44  ;;  %v21131_v44 = vld [vmem:[#allocation2 + $0x88] sm:$0xff] }
 0xad1   : > { %19152 = vmatprep.subr.bf16.mxu0 %v21054_v54 }
 0xad3   : > { %19133 = vmatmul.mubr.bf16.gmra.mrb[52].mxu0 %v13028_v43 }
 0xad4   : > { %19136 = vmatprep.mubr.bf16.mxu0 %v13030_v4  ;;  %19153 = vmatpush3.bf16.msra.mxu0 %v21054_v54 }
 0xad5   : > { %19154 = vmatprep.subr.bf16.mxu0 %v21055_v18 }
 0xad8   : > { %19155 = vmatpush3.bf16.msra.mxu0 %v21055_v18 }
 0xad9   : > { %19176 = vmatprep.subr.bf16.mxu0 %v21056_v29 }
 0xadb   : > { %19137 = vmatmul.mubr.bf16.gmra.mrb[56].mxu0 %v13032_v62  ;;  %v21078_v62 = vld [vmem:[%s26244_s3 + $0x270] sm:$0xff]  }
 0xadc   : > { %19156 = vmatprep.mubr.bf16.mxu0 %v13264_v8  ;;  %v13725_v8 = vrot.slane %v25928_v58, 1 }
 0xae3   : > { %19157 = vmatmul.mubr.bf16.vlgmr.msra.gmra.mrb[40].mxu0 %v13266_v31 }
 0xae4   : > { %19177 = vmatpush3.bf16.msra.mxu0 %v21056_v29  ;;  %19160 = vmatprep.mubr.bf16.mxu0 %v13268_v23  ;;  %v21077_v29 = vld [vmem:[%s26244_s3 + $0x268] sm:$0xff]   ;;  %v13682_v23 = vld [vmem:[#allocation2 + $0xb8] sm:$0x1] }
 0xae5   : > { %19178 = vmatprep.subr.bf16.mxu0 %v21057_v27 }
 0xae8   : > { %19179 = vmatpush3.bf16.msra.mxu0 %v21057_v27  ;;  %v13726_v27 = vsel %vm27508_vm4, %v13723_v42, %v13725_v8 }
 0xae9   : > { %19180 = vmatprep.subr.bf16.mxu0 %v21058_v63 }
 0xaeb   : > { %19161 = vmatmul.mubr.bf16.gmra.mrb[44].mxu0 %v13022_v19  ;;  %v21073_v19 = vld [vmem:[%s26244_s3 + $0x248] sm:$0xff]  }
 0xaec   : > { %19164 = vmatprep.mubr.bf16.mxu0 %v13024_v2  ;;  %19181 = vmatpush3.bf16.msra.mxu0 %v21058_v63  ;;  %v13717_v2 = vrot.slane %v21131_v44, 1  ;;  %v13922_v63 = vld [vmem:[#allocation2 + $0x70] sm:$0xfe]  ;;  %v21092_v44 = vld [vmem:[%s26244_s3 + $0x2e0] sm:$0xff]  }
 0xaed   : > { %19182 = vmatprep.subr.bf16.mxu0 %v21059_v12 }
 0xaee   : > { %v13718_v1 = vsel %vm27504_vm3, %v13715_v41, %v13717_v2  ;;  %v27517_v41 = vld [vmem:[#allocation90_spill] sm:$0xff]  ;;  %vm27540_vm3 = vcmask 1042432  }
 0xaf0   : > { %19183 = vmatpush3.bf16.msra.mxu0 %v21059_v12  ;;  %v21080_v12 = vld [vmem:[%s26244_s3 + $0x280] sm:$0xff]  }
 0xaf1   : > { %19184 = vmatprep.subr.bf16.mxu0 %v21060_v11 }
 0xaf3   : > { %19165 = vmatmul.mubr.bf16.gmra.mrb[48].mxu0 %v13026_v9  ;;  %v21132_v9 = vld [vmem:[#allocation2 + $0x90] sm:$0xff] }
 0xaf4   : > { %19168 = vmatprep.mubr.bf16.mxu0 %v13028_v43  ;;  %19185 = vmatpush3.bf16.msra.mxu0 %v21060_v11  ;;  %v13719_v54 = vrot.slane %v21132_v9, 1  ;;  %v21076_v43 = vld [vmem:[%s26244_s3 + $0x260] sm:$0xff]   ;;  %v13729_v11 = vrot.slane %v13682_v23, 1  ;;  %v14205_v9 = vrot.slane %v25928_v58, 2 }
 0xaf5   : > { %19186 = vmatprep.subr.bf16.mxu0 %v21061_v55 }
 0xaf6   : > { %v13720_v18 = vsel %vm27505_vm8, %v13717_v2, %v13719_v54  ;;  %v14203_v2 = vrot.slane %v25745_v61, 2  ;;  %vm27541_vm8 = vmmov %vm27540_vm3 }
 0xaf8   : > { %19187 = vmatpush3.bf16.msra.mxu0 %v21061_v55  ;;  %v13960_v55 = vrot.slane %v13922_v63, 1  ;;  %v21097_v63 = vld [vmem:[%s26244_s3 + $0x308] sm:$0xff]  }
 0xaf9   : > { %19188 = vmatprep.subr.bf16.mxu0 %v21062_v48 }
 0xafa   : > { %v13962_v45 = vsel %vm27511_vm6, %v13960_v55, %v13713_v51  ;;  %v21089_v51 = vld [vmem:[%s26244_s3 + $0x2c8] sm:$0xff]   ;;  %v21098_v55 = vld [vmem:[%s26244_s3 + $0x310] sm:$0xff]  }
 0xafb   : > { %19169 = vmatmul.mubr.bf16.gmra.mrb[52].mxu0 %v13030_v4  ;;  %v21133_v4 = vld [vmem:[#allocation2 + $0x98] sm:$0xff] }
 0xafc   : > { %19172 = vmatprep.mubr.bf16.mxu0 %v13280_v38  ;;  %19189 = vmatpush3.bf16.msra.mxu0 %v21062_v48  ;;  %v13721_v20 = vrot.slane %v21133_v4, 1  ;;  %v21082_v38 = vld [vmem:[%s26244_s3 + $0x290] sm:$0xff]   ;;  %v14207_v4 = vrot.slane %v25976_v53, 2 }
 0xafd   : > { %19190 = vmatprep.subr.bf16.mxu0 %v21063_v21 }
 0xafe   : > { %v13722_v28 = vsel %vm27506_vm13, %v13719_v54, %v13721_v20  ;;  %v13724_v16 = vsel %vm27507_vm2, %v13721_v20, %v13723_v42  ;;  %v21093_v54 = vld [vmem:[%s26244_s3 + $0x2e8] sm:$0xff]   ;;  %v14173_v42 = vld [vmem:[#allocation2 + $0xc0] sm:$0x3]  ;;  %vm27542_vm13 = vmmov %vm27540_vm3 }
 0xaff   : > { %vm27543_vm2 = vmmov %vm27540_vm3 }
 0xb00   : > { %19191 = vmatpush3.bf16.msra.mxu0 %v21063_v21  ;;  %v21081_v21 = vld [vmem:[%s26244_s3 + $0x288] sm:$0xff]   ;;  %vm27544_vm4 = vmmov %vm27543_vm2 }
 0xb01   : > { %19212 = vmatprep.subr.bf16.mxu0 %v21064_v49 }
 0xb03   : > { %19173 = vmatmul.mubr.bf16.gmra.mrb[56].mxu0 %v13282_v32  ;;  %v21086_v32 = vld [vmem:[%s26244_s3 + $0x2b0] sm:$0xff]  }
 0xb04   : > { %19192 = vmatprep.mubr.bf16.mxu0 %v25723_v57  ;;  %v21067_v57 = vld [vmem:[%s26244_s3 + $0x218] sm:$0xff]  }
 0xb0b   : > { %19193 = vmatmul.mubr.bf16.vlgmr.msra.gmra.mrb[40].mxu0 %v25906_v5  ;;  %v13727_v5 = vrot.slane %v25976_v53, 1 }
 0xb0c   : > { %19213 = vmatpush3.bf16.msra.mxu0 %v21064_v49  ;;  %19196 = vmatprep.mubr.bf16.mxu0 %v25592_v25  ;;  %v21068_v25 = vld [vmem:[%s26244_s3 + $0x220] sm:$0xff]  }
 0xb0d   : > { %19214 = vmatprep.subr.bf16.mxu0 %v21065_v26  ;;  %v13728_v31 = vsel %vm27509_vm9, %v13725_v8, %v13727_v5  ;;  %v13730_v48 = vsel %vm27510_vm15, %v13727_v5, %v13729_v11  ;;  %v21084_v49 = vld [vmem:[%s26244_s3 + $0x2a0] sm:$0xff]   ;;  %v14404_v8 = vld [vmem:[#allocation2 + $0x70] sm:$0xf8]  ;;  %v27523_v11 = vld [vmem:[#allocation10_spill] sm:$0xff] }
 0xb10   : > { %19215 = vmatpush3.bf16.msra.mxu0 %v21065_v26  ;;  %v26035_v26 = vld [vmem:[#allocation2] sm:$0xff] }
 0xb11   : > { %19216 = vmatprep.subr.bf16.mxu0 %v21066_v17  ;;  %v14209_v20 = vrot.slane %v26035_v26, 2 }
 0xb13   : > { %19197 = vmatmul.mubr.bf16.gmra.mrb[44].mxu0 %v25604_v59  ;;  %v21070_v59 = vld [vmem:[%s26244_s3 + $0x230] sm:$0xff]  }
 0xb14   : > { %19200 = vmatprep.mubr.bf16.mxu0 %v25606_v35  ;;  %19217 = vmatpush3.bf16.msra.mxu0 %v21066_v17  ;;  %v21071_v35 = vld [vmem:[%s26244_s3 + $0x238] sm:$0xff]   ;;  %v13977_v17 = vrot.slane %v26035_v26, 1 }
 0xb15   : > { %19218 = vmatprep.subr.bf16.mxu0 %v21067_v57 }
 0xb18   : > { %19219 = vmatpush3.bf16.msra.mxu0 %v21067_v57  ;;  %v13932_v57 = vld [vmem:[#allocation2 + $0xc0] sm:$0x1] }
 0xb19   : > { %19220 = vmatprep.subr.bf16.mxu0 %v21068_v25 }
 0xb1b   : > { %19201 = vmatmul.mubr.bf16.gmra.mrb[48].mxu0 %v25618_v13  ;;  %v21072_v13 = vld [vmem:[%s26244_s3 + $0x240] sm:$0xff]  }
 0xb1c   : > { %19204 = vmatprep.mubr.bf16.mxu0 %v25620_v0  ;;  %19221 = vmatpush3.bf16.msra.mxu0 %v21068_v25  ;;  %v13672_v0 = vld [vmem:[#allocation2 + $0x68] sm:$0xfe]  ;;  %v21087_v25 = vld [vmem:[%s26244_s3 + $0x2b8] sm:$0xff]  }
 0xb1d   : > { %19222 = vmatprep.subr.bf16.mxu0 %v21069_v22  ;;  %v13710_v47 = vrot.slane %v13672_v0, 1 }
 0xb1f   : > { %v13712_v6 = vsel %vm27501_vm0, %v13710_v47, %v13711_v39  ;;  %v27514_v47 = vld [vmem:[#allocation62_spill] sm:$0xff] }
 0xb20   : > { %19223 = vmatpush3.bf16.msra.mxu0 %v21069_v22  ;;  %v13978_v22 = vsel %vm27512_vm1, %v13727_v5, %v13977_v17  ;;  %v21096_v5 = vld [vmem:[%s26244_s3 + $0x300] sm:$0xff]  }
 0xb21   : > { %19224 = vmatprep.subr.bf16.mxu0 %v21070_v59 }
 0xb23   : > { %19205 = vmatmul.mubr.bf16.gmra.mrb[52].mxu0 %v25745_v61 }
 0xb24   : > { %19208 = vmatprep.mubr.bf16.mxu0 %v25928_v58  ;;  %19225 = vmatpush3.bf16.msra.mxu0 %v21070_v59  ;;  %v13979_v59 = vrot.slane %v13932_v57, 1 }
 0xb25   : > { %19226 = vmatprep.subr.bf16.mxu0 %v21071_v35 }
 0xb26   : > { %v13980_v39 = vsel %vm27513_vm11, %v13977_v17, %v13979_v59  ;;  %v14405_v59 = vld [vmem:[#allocation2 + $0xc0] sm:$0x7] }
 0xb28   : > { %19227 = vmatpush3.bf16.msra.mxu0 %v21071_v35  ;;  %v14172_v35 = vld [vmem:[#allocation2 + $0x70] sm:$0xfc] }
 0xb29   : > { %19248 = vmatprep.subr.bf16.mxu0 %v21072_v13  ;;  %v14192_v0 = vrot.slane %v14172_v35, 2  ;;  %v21103_v35 = vld [vmem:[%s26244_s3 + $0x338] sm:$0xff]  }
 0xb2b   : > { %19209 = vmatmul.mubr.bf16.gmra.mrb[56].mxu0 %v25976_v53 }
 0xb2c   : > { %19228 = vmatprep.mubr.bf16.mxu0 %v13712_v6  ;;  %v27515_v6 = vrot.slane %v27514_v47, 2 }
 0xb2e   : > { %v14194_v14 = vsel %vm5822_vm14, %v14192_v0, %v27515_v6  ;;  %v14636_v6 = vld [vmem:[#allocation2 + $0x78] sm:$0xf8] }
 0xb33   : > { %19229 = vmatmul.mubr.bf16.vlgmr.msra.gmra.mrb[40].mxu0 %v13714_v24  ;;  %v21091_v24 = vld [vmem:[%s26244_s3 + $0x2d8] sm:$0xff]  }
 0xb34   : > { %19249 = vmatpush3.bf16.msra.mxu0 %v21072_v13  ;;  %19232 = vmatprep.mubr.bf16.mxu0 %v13716_v10  ;;  %v21088_v13 = vld [vmem:[%s26244_s3 + $0x2c0] sm:$0xff]  }
 0xb35   : > { %19250 = vmatprep.subr.bf16.mxu0 %v21073_v19 }
 0xb38   : > { %19251 = vmatpush3.bf16.msra.mxu0 %v21073_v19  ;;  %v21090_v19 = vld [vmem:[%s26244_s3 + $0x2d0] sm:$0xff]  }
 0xb39   : > { %19252 = vmatprep.subr.bf16.mxu0 %v21074_v37 }
 0xb3b   : > { %19233 = vmatmul.mubr.bf16.gmra.mrb[44].mxu0 %v13718_v1 }
 0xb3c   : > { %19236 = vmatprep.mubr.bf16.mxu0 %v13720_v18  ;;  %19253 = vmatpush3.bf16.msra.mxu0 %v21074_v37  ;;  %v27519_v37 = vld [vmem:[#allocation8_spill] sm:$0xff] }
 0xb3d   : > { %19254 = vmatprep.subr.bf16.mxu0 %v21075_v36 }
 0xb40   : > { %19255 = vmatpush3.bf16.msra.mxu0 %v21075_v36  ;;  %v27520_v36 = vrot.slane %v24964_v30, 2 }
 0xb41   : > { %19256 = vmatprep.subr.bf16.mxu0 %v21076_v43 }
 0xb43   : > { %19237 = vmatmul.mubr.bf16.gmra.mrb[48].mxu0 %v13722_v28 }
 0xb44   : > { %19240 = vmatprep.mubr.bf16.mxu0 %v13724_v16  ;;  %19257 = vmatpush3.bf16.msra.mxu0 %v21076_v43  ;;  %v21094_v43 = vld [vmem:[%s26244_s3 + $0x2f0] sm:$0xff]  }
 0xb45   : > { %19258 = vmatprep.subr.bf16.mxu0 %v21077_v29 }
 0xb48   : > { %19259 = vmatpush3.bf16.msra.mxu0 %v21077_v29  ;;  %v21095_v29 = vld [vmem:[%s26244_s3 + $0x2f8] sm:$0xff]  }
 0xb49   : > { %19260 = vmatprep.subr.bf16.mxu0 %v21078_v62 }
 0xb4b   : > { %19241 = vmatmul.mubr.bf16.gmra.mrb[52].mxu0 %v13726_v27 }
 0xb4c   : > { %19244 = vmatprep.mubr.bf16.mxu0 %v13728_v31  ;;  %19261 = vmatpush3.bf16.msra.mxu0 %v21078_v62  ;;  %v14211_v62 = vrot.slane %v14173_v42, 2  ;;  %v14886_v42 = vld [vmem:[#allocation2 + $0x78] sm:$0xf0] }
 0xb4d   : > { %19262 = vmatprep.subr.bf16.mxu0 %v21079_v3 }
 0xb50   : > { %19263 = vmatpush3.bf16.msra.mxu0 %v21079_v3  ;;  %v14424_v3 = vrot.slane %v14404_v8, 3  ;;  %v21113_v8 = vld [vmem:[%s26244_s3 + $0x388] sm:$0xff]  }
 0xb51   : > { %19284 = vmatprep.subr.bf16.mxu0 %v21080_v12 }
 0xb53   : > { %19245 = vmatmul.mubr.bf16.gmra.mrb[56].mxu0 %v13730_v48  ;;  %v21099_v48 = vld [vmem:[%s26244_s3 + $0x318] sm:$0xff]  }
 0xb54   : > { %19264 = vmatprep.mubr.bf16.mxu0 %v13962_v45  ;;  %v27524_v45 = vld [vmem:[#allocation66_spill] sm:$0xff] }
 0xb5b   : > { %19265 = vmatmul.mubr.bf16.vlgmr.msra.gmra.mrb[40].mxu0 %v13716_v10  ;;  %v27518_v10 = vld [vmem:[#allocation7_spill] sm:$0xff] }
 0xb5c   : > { %19285 = vmatpush3.bf16.msra.mxu0 %v21080_v12  ;;  %19268 = vmatprep.mubr.bf16.mxu0 %v13718_v1  ;;  %v14204_v1 = vsel %vm5822_vm14, %v27520_v36, %v14203_v2  ;;  %v27522_v12 = vld [vmem:[#allocation18_spill] sm:$0xff] }
 0xb5d   : > { %19286 = vmatprep.subr.bf16.mxu0 %v21081_v21 }
 0xb60   : > { %19287 = vmatpush3.bf16.msra.mxu0 %v21081_v21  ;;  %v27525_v21 = vld [vmem:[#allocation67_spill] sm:$0xff] }
 0xb61   : > { %19288 = vmatprep.subr.bf16.mxu0 %v21082_v38 }
 0xb63   : > { %19269 = vmatmul.mubr.bf16.gmra.mrb[44].mxu0 %v13720_v18  ;;  %v14206_v18 = vsel %vm5822_vm14, %v14203_v2, %v14205_v9 }
 0xb64   : > { %19272 = vmatprep.mubr.bf16.mxu0 %v13722_v28  ;;  %19289 = vmatpush3.bf16.msra.mxu0 %v21082_v38  ;;  %v14208_v28 = vsel %vm5822_vm14, %v14205_v9, %v14207_v4  ;;  %v21100_v38 = vld [vmem:[%s26244_s3 + $0x320] sm:$0xff]  }
 0xb65   : > { %19290 = vmatprep.subr.bf16.mxu0 %v21083_v60  ;;  %v21108_v9 = vld [vmem:[%s26244_s3 + $0x360] sm:$0xff]  }
 0xb68   : > { %19291 = vmatpush3.bf16.msra.mxu0 %v21083_v60  ;;  %v14435_v60 = vrot.slane %v25745_v61, 3  ;;  %v21102_v61 = vld [vmem:[%s26244_s3 + $0x330] sm:$0xff]  }
 0xb69   : > { %19292 = vmatprep.subr.bf16.mxu0 %v21084_v49 }
 0xb6b   : > { %19273 = vmatmul.mubr.bf16.gmra.mrb[48].mxu0 %v13724_v16  ;;  %v14210_v16 = vsel %vm5822_vm14, %v14207_v4, %v14209_v20 }
 0xb6c   : > { %19276 = vmatprep.mubr.bf16.mxu0 %v13726_v27  ;;  %19293 = vmatpush3.bf16.msra.mxu0 %v21084_v49  ;;  %v14212_v27 = vsel %vm5822_vm14, %v14209_v20, %v14211_v62  ;;  %v14437_v49 = vrot.slane %v25928_v58, 3  ;;  %v21112_v20 = vld [vmem:[%s26244_s3 + $0x380] sm:$0xff]   ;;  %vm27529_vm14 = vcmask 1043456  }
 0xb6d   : > { %19294 = vmatprep.subr.bf16.mxu0 %v21085_v56 }
 0xb6e   : > { %v14438_v57 = vsel %vm2503_vm10, %v14435_v60, %v14437_v49 }
 0xb70   : > { %19295 = vmatpush3.bf16.msra.mxu0 %v21085_v56  ;;  %v21101_v56 = vld [vmem:[%s26244_s3 + $0x328] sm:$0xff]  }
 0xb71   : > { %19296 = vmatprep.subr.bf16.mxu0 %v21086_v32 }
 0xb73   : > { %19277 = vmatmul.mubr.bf16.gmra.mrb[52].mxu0 %v13728_v31  ;;  %v27521_v31 = vrot.slane %v27514_v47, 3  ;;  %v21104_v47 = vld [vmem:[%s26244_s3 + $0x340] sm:$0xff]  }
 0xb74   : > { %19280 = vmatprep.mubr.bf16.mxu0 %v13978_v22  ;;  %19297 = vmatpush3.bf16.msra.mxu0 %v21086_v32  ;;  %v27526_v32 = vld [vmem:[#allocation64_spill] sm:$0xff]  ;;  %v14441_v22 = vrot.slane %v26035_v26, 3 }
 0xb75   : > { %19298 = vmatprep.subr.bf16.mxu0 %v21087_v25  ;;  %v14426_v23 = vsel %vm2503_vm10, %v14424_v3, %v27521_v31  ;;  %v14436_v17 = vsel %vm2503_vm10, %v27526_v32, %v14435_v60  ;;  %v27531_v3 = vld [vmem:[#allocation19_spill] sm:$0xff] }
 0xb76   : > { %v21118_v60 = vld [vmem:[%s26244_s3 + $0x3b0] sm:$0xff]  }
 0xb78   : > { %19299 = vmatpush3.bf16.msra.mxu0 %v21087_v25  ;;  %v14439_v25 = vrot.slane %v25976_v53, 3 }
 0xb79   : > { %19320 = vmatprep.subr.bf16.mxu0 %v21088_v13 }
 0xb7a   : > { %v14442_v0 = vsel %vm2503_vm10, %v14439_v25, %v14441_v22 }
 0xb7b   : > { %19281 = vmatmul.mubr.bf16.gmra.mrb[56].mxu0 %v13980_v39  ;;  %v14443_v39 = vrot.slane %v14405_v59, 3  ;;  %v27539_v59 = vrot.slane %v24953_v34, 5 }
 0xb7c   : > { %19300 = vmatprep.mubr.bf16.mxu0 %v14194_v14 }
 0xb7d   : > { %v14444_v14 = vsel %vm2503_vm10, %v14441_v22, %v14443_v39 }
 0xb83   : > { %19301 = vmatmul.mubr.bf16.vlgmr.msra.gmra.mrb[40].mxu0 %v27516_v46  ;;  %v27527_v46 = vld [vmem:[#allocation9_spill] sm:$0xff] }
 0xb84   : > { %19321 = vmatpush3.bf16.msra.mxu0 %v21088_v13  ;;  %19304 = vmatprep.mubr.bf16.mxu0 %v27517_v41  ;;  %v14440_v13 = vsel %vm2503_vm10, %v14437_v49, %v14439_v25 }
 0xb85   : > { %19322 = vmatprep.subr.bf16.mxu0 %v21089_v51 }
 0xb88   : > { %19323 = vmatpush3.bf16.msra.mxu0 %v21089_v51  ;;  %v14674_v51 = vrot.slane %v14636_v6, 3 }
 0xb89   : > { %19324 = vmatprep.subr.bf16.mxu0 %v21090_v19 }
 0xb8a   : > { %v14676_v41 = vsel %vm2503_vm10, %v14674_v51, %v27527_v46 }
 0xb8b   : > { %19305 = vmatmul.mubr.bf16.gmra.mrb[44].mxu0 %v27518_v10  ;;  %v21135_v10 = vld [vmem:[#allocation2 + $0xa0] sm:$0xff] }
 0xb8c   : > { %19308 = vmatprep.mubr.bf16.mxu0 %v27519_v37  ;;  %19325 = vmatpush3.bf16.msra.mxu0 %v21090_v19  ;;  %v21105_v19 = vld [vmem:[%s26244_s3 + $0x348] sm:$0xff]   ;;  %v14683_v37 = vrot.slane %v21135_v10, 3  ;;  %v14915_v31 = vrot.slane %v21135_v10, 4 }
 0xb8d   : > { %19326 = vmatprep.subr.bf16.mxu0 %v21091_v24 }
 0xb8e   : > { %v14684_v2 = vsel %vm2503_vm10, %v27526_v32, %v14683_v37  ;;  %v14686_v36 = vsel %vm2503_vm10, %v14683_v37, %v14437_v49  ;;  %v14921_v49 = vrot.slane %v26035_v26, 4  ;;  %v21119_v32 = vld [vmem:[%s26244_s3 + $0x3b8] sm:$0xff]  }
 0xb90   : > { %19327 = vmatpush3.bf16.msra.mxu0 %v21091_v24  ;;  %v21106_v24 = vld [vmem:[%s26244_s3 + $0x350] sm:$0xff]  }
 0xb91   : > { %19328 = vmatprep.subr.bf16.mxu0 %v21092_v44 }
 0xb93   : > { %19309 = vmatmul.mubr.bf16.gmra.mrb[48].mxu0 %v14204_v1  ;;  %v21110_v1 = vld [vmem:[%s26244_s3 + $0x370] sm:$0xff]  }
 0xb94   : > { %19312 = vmatprep.mubr.bf16.mxu0 %v14206_v18  ;;  %19329 = vmatpush3.bf16.msra.mxu0 %v21092_v44  ;;  %v21107_v44 = vld [vmem:[%s26244_s3 + $0x358] sm:$0xff]   ;;  %v14646_v18 = vld [vmem:[#allocation2 + $0xc8] sm:$0x7] }
 0xb95   : > { %19330 = vmatprep.subr.bf16.mxu0 %v21093_v54  ;;  %v14693_v4 = vrot.slane %v14646_v18, 3 }
 0xb98   : > { %19331 = vmatpush3.bf16.msra.mxu0 %v21093_v54  ;;  %v21109_v54 = vld [vmem:[%s26244_s3 + $0x368] sm:$0xff]  }
 0xb99   : > { %19332 = vmatprep.subr.bf16.mxu0 %v21094_v43 }
 0xb9b   : > { %19313 = vmatmul.mubr.bf16.gmra.mrb[52].mxu0 %v14208_v28  ;;  %v14906_v28 = vrot.slane %v14886_v42, 4 }
 0xb9c   : > { %19316 = vmatprep.mubr.bf16.mxu0 %v14210_v16  ;;  %19333 = vmatpush3.bf16.msra.mxu0 %v21094_v43  ;;  %v21111_v43 = vld [vmem:[%s26244_s3 + $0x378] sm:$0xff]   ;;  %v27528_v16 = vrot.slane %v24953_v34, 4 }
 0xb9d   : > { %19334 = vmatprep.subr.bf16.mxu0 %v21095_v29 }
 0xb9e   : > { %v14908_v62 = vsel %vm27529_vm14, %v14906_v28, %v27528_v16 }
 0xba0   : > { %19335 = vmatpush3.bf16.msra.mxu0 %v21095_v29  ;;  %v14694_v29 = vsel %vm2503_vm10, %v14441_v22, %v14693_v4  ;;  %vm27534_vm10 = vmmov %vm27529_vm14 }
 0xba1   : > { %19356 = vmatprep.subr.bf16.mxu0 %v21096_v5  ;;  %vm27535_vm7 = vmmov %vm27534_vm10 }
 0xba2   : > { %vm27536_vm0 = vmmov %vm27535_vm7 }
 0xba3   : > { %19317 = vmatmul.mubr.bf16.gmra.mrb[56].mxu0 %v14212_v27  ;;  %v21114_v27 = vld [vmem:[%s26244_s3 + $0x390] sm:$0xff]   ;;  %vm27537_vm12 = vmmov %vm27536_vm0 }
 0xba4   : > { %19336 = vmatprep.mubr.bf16.mxu0 %v14426_v23  ;;  %v21115_v23 = vld [vmem:[%s26244_s3 + $0x398] sm:$0xff]   ;;  %vm27538_vm5 = vmmov %vm27536_vm0 }
 0xbab   : > { %19337 = vmatmul.mubr.bf16.vlgmr.msra.gmra.mrb[40].mxu0 %v27522_v12  ;;  %v27533_v12 = vrot.slane %v24964_v30, 4 }
 0xbac   : > { %19357 = vmatpush3.bf16.msra.mxu0 %v21096_v5  ;;  %19340 = vmatprep.mubr.bf16.mxu0 %v27523_v11  ;;  %v27530_v5 = vld [vmem:[#allocation22_spill] sm:$0xff] }
 0xbad   : > { %19358 = vmatprep.subr.bf16.mxu0 %v21097_v63 }
 0xbb0   : > { %19359 = vmatpush3.bf16.msra.mxu0 %v21097_v63  ;;  %v27532_v63 = vld [vmem:[#allocation68_spill] sm:$0xff] }
 0xbb1   : > { %19360 = vmatprep.subr.bf16.mxu0 %v21098_v55 }
 0xbb3   : > { %19341 = vmatmul.mubr.bf16.gmra.mrb[44].mxu0 %v27524_v45 }
 0xbb4   : > { %19344 = vmatprep.mubr.bf16.mxu0 %v27525_v21  ;;  %19361 = vmatpush3.bf16.msra.mxu0 %v21098_v55  ;;  %v21116_v55 = vld [vmem:[%s26244_s3 + $0x3a0] sm:$0xff]  }
 0xbb5   : > { %19362 = vmatprep.subr.bf16.mxu0 %v21099_v48 }
 0xbb8   : > { %19363 = vmatpush3.bf16.msra.mxu0 %v21099_v48  ;;  %v14917_v48 = vrot.slane %v25928_v58, 4 }
 0xbb9   : > { %19364 = vmatprep.subr.bf16.mxu0 %v21100_v38 }
 0xbba   : > { %v14918_v30 = vsel %vm27535_vm7, %v14915_v31, %v14917_v48 }
 0xbbb   : > { %19345 = vmatmul.mubr.bf16.gmra.mrb[48].mxu0 %v14436_v17 }
 0xbbc   : > { %19348 = vmatprep.mubr.bf16.mxu0 %v14438_v57  ;;  %19365 = vmatpush3.bf16.msra.mxu0 %v21100_v38 }
 0xbbd   : > { %19366 = vmatprep.subr.bf16.mxu0 %v21101_v56 }
 0xbc0   : > { %19367 = vmatpush3.bf16.msra.mxu0 %v21101_v56  ;;  %v14887_v56 = vld [vmem:[#allocation2 + $0xc8] sm:$0xf] }
 0xbc1   : > { %19368 = vmatprep.subr.bf16.mxu0 %v21102_v61  ;;  %v14925_v57 = vrot.slane %v14887_v56, 4 }
 0xbc3   : > { %19349 = vmatmul.mubr.bf16.gmra.mrb[52].mxu0 %v14440_v13  ;;  %v14926_v25 = vsel %vm27538_vm5, %v14921_v49, %v14925_v57 }
 0xbc4   : > { %19352 = vmatprep.mubr.bf16.mxu0 %v14442_v0  ;;  %19369 = vmatpush3.bf16.msra.mxu0 %v21102_v61  ;;  %v15118_v61 = vld [vmem:[#allocation2 + $0x78] sm:$0xe0] }
 0xbc5   : > { %19370 = vmatprep.subr.bf16.mxu0 %v21103_v35 }
 0xbc8   : > { %19371 = vmatpush3.bf16.msra.mxu0 %v21103_v35 }
 0xbc9   : > { %19392 = vmatprep.subr.bf16.mxu0 %v21104_v47 }
 0xbcb   : > { %19353 = vmatmul.mubr.bf16.gmra.mrb[56].mxu0 %v14444_v14 }
 0xbcc   : > { %19372 = vmatprep.mubr.bf16.mxu0 %v14676_v41 }
 0xbd3   : > { %19373 = vmatmul.mubr.bf16.vlgmr.msra.gmra.mrb[40].mxu0 %v27523_v11  ;;  %v14916_v11 = vsel %vm27534_vm10, %v27533_v12, %v14915_v31 }
 0xbd4   : > { %19393 = vmatpush3.bf16.msra.mxu0 %v21104_v47  ;;  %19376 = vmatprep.mubr.bf16.mxu0 %v27524_v45  ;;  %v14919_v45 = vrot.slane %v25976_v53, 4 }
 0xbd5   : > { %19394 = vmatprep.subr.bf16.mxu0 %v21105_v19 }
 0xbd6   : > { %v14920_v38 = vsel %vm27536_vm0, %v14917_v48, %v14919_v45  ;;  %v14922_v17 = vsel %vm27537_vm12, %v14919_v45, %v14921_v49 }
 0xbd8   : > { %19395 = vmatpush3.bf16.msra.mxu0 %v21105_v19 }
 0xbd9   : > { %19396 = vmatprep.subr.bf16.mxu0 %v21106_v24 }
 0xbdb   : > { %19377 = vmatmul.mubr.bf16.gmra.mrb[44].mxu0 %v27525_v21  ;;  %v21117_v21 = vld [vmem:[%s26244_s3 + $0x3a8] sm:$0xff]  }
 0xbdc   : > { %19380 = vmatprep.mubr.bf16.mxu0 %v14684_v2  ;;  %19397 = vmatpush3.bf16.msra.mxu0 %v21106_v24 }
 0xbdd   : > { %19398 = vmatprep.subr.bf16.mxu0 %v21107_v44 }
 0xbe0   : > { %19399 = vmatpush3.bf16.msra.mxu0 %v21107_v44 }
 0xbe1   : > { %19400 = vmatprep.subr.bf16.mxu0 %v21108_v9 }
 0xbe3   : > { %19381 = vmatmul.mubr.bf16.gmra.mrb[48].mxu0 %v14686_v36 }
 0xbe4   : > { %19384 = vmatprep.mubr.bf16.mxu0 %v14440_v13  ;;  %19401 = vmatpush3.bf16.msra.mxu0 %v21108_v9  ;;  %v15149_v13 = vrot.slane %v25928_v58, 5 }
 0xbe5   : > { %19402 = vmatprep.subr.bf16.mxu0 %v21109_v54 }
 0xbe6   : > { %v15150_v39 = vsel %vm27541_vm8, %v15147_v52, %v15149_v13  ;;  %v16153_v52 = vld [vmem:[%s26249_s8] ss:$0 sm:$0xff] }
 0xbe8   : > { %19403 = vmatpush3.bf16.msra.mxu0 %v21109_v54 }
 0xbe9   : > { %19404 = vmatprep.subr.bf16.mxu0 %v21110_v1 }
 0xbeb   : > { %19385 = vmatmul.mubr.bf16.gmra.mrb[52].mxu0 %v14442_v0  ;;  %v15151_v0 = vrot.slane %v25976_v53, 5 }
 0xbec   : > { %19405 = vmatpush3.bf16.msra.mxu0 %v21110_v1  ;;  %19388 = vmatprep.mubr.bf16.mxu0 %v14441_v22  ;;  %v15138_v22 = vrot.slane %v15118_v61, 5 }
 0xbed   : > { %19406 = vmatprep.subr.bf16.mxu0 %v21111_v43  ;;  %v15152_v34 = vsel %vm27542_vm13, %v15149_v13, %v15151_v0 }
 0xbee   : > { %v15140_v35 = vsel %vm27540_vm3, %v15138_v22, %v27539_v59 }
 0xbf0   : > { %19407 = vmatpush3.bf16.msra.mxu0 %v21111_v43 }
 0xbf1   : > { %19428 = vmatprep.subr.bf16.mxu0 %v21112_v20 }
 0xbf3   : > { %19389 = vmatmul.mubr.bf16.gmra.mrb[56].mxu0 %v14694_v29 }
 0xbf4   : > { %19408 = vmatprep.mubr.bf16.mxu0 %v14908_v62 }
 0xbfb   : > { %19409 = vmatmul.mubr.bf16.vlgmr.msra.gmra.mrb[40].mxu0 %v27530_v5 }
 0xbfc   : > { %19429 = vmatpush3.bf16.msra.mxu0 %v21112_v20  ;;  %19412 = vmatprep.mubr.bf16.mxu0 %v27531_v3 }
 0xbfd   : > { %19430 = vmatprep.subr.bf16.mxu0 %v21113_v8 }
 0xc00   : > { %19431 = vmatpush3.bf16.msra.mxu0 %v21113_v8 }
 0xc01   : > { %19432 = vmatprep.subr.bf16.mxu0 %v21114_v27 }
 0xc03   : > { %19413 = vmatmul.mubr.bf16.gmra.mrb[44].mxu0 %v27532_v63 }
 0xc04   : > { %19416 = vmatprep.mubr.bf16.mxu0 %v14916_v11  ;;  %19433 = vmatpush3.bf16.msra.mxu0 %v21114_v27 }
 0xc05   : > { %19434 = vmatprep.subr.bf16.mxu0 %v21115_v23 }
 0xc08   : > { %19435 = vmatpush3.bf16.msra.mxu0 %v21115_v23 }
 0xc09   : > { %19436 = vmatprep.subr.bf16.mxu0 %v21116_v55 }
 0xc0b   : > { %19417 = vmatmul.mubr.bf16.gmra.mrb[48].mxu0 %v14918_v30 }
 0xc0c   : > { %19420 = vmatprep.mubr.bf16.mxu0 %v14920_v38  ;;  %19437 = vmatpush3.bf16.msra.mxu0 %v21116_v55 }
 0xc0d   : > { %19438 = vmatprep.subr.bf16.mxu0 %v21117_v21 }
 0xc10   : > { %19439 = vmatpush3.bf16.msra.mxu0 %v21117_v21 }
 0xc11   : > { %19440 = vmatprep.subr.bf16.mxu0 %v21118_v60 }
 0xc13   : > { %19421 = vmatmul.mubr.bf16.gmra.mrb[52].mxu0 %v14922_v17 }
 0xc14   : > { %19441 = vmatpush3.bf16.msra.mxu0 %v21118_v60  ;;  %19424 = vmatprep.mubr.bf16.mxu0 %v14921_v49 }
 0xc15   : > { %19442 = vmatprep.subr.bf16.mxu0 %v21119_v32 }
 0xc18   : > { %19443 = vmatpush3.bf16.msra.mxu0 %v21119_v32 }
 0xc1b   : > { %19425 = vmatmul.mubr.bf16.gmra.mrb[56].mxu0 %v14926_v25 }
 0xc1c   : > { %19444 = vmatprep.mubr.bf16.mxu0 %v15140_v35 }
 0xc23   : > { %19445 = vmatmul.mubr.bf16.vlgmr.msra.gmra.mrb[40].mxu0 %v25072_v40  ;;  %v15153_v40 = vrot.slane %v26035_v26, 5 }
 0xc24   : > { %19448 = vmatprep.mubr.bf16.mxu0 %v25075_v7  ;;  %v15119_v7 = vld [vmem:[#allocation2 + $0xc8] sm:$0x1f] }
 0xc2b   : > { %19449 = vmatmul.mubr.bf16.gmra.mrb[44].mxu0 %v25078_v15  ;;  %v15154_v15 = vsel %vm27543_vm2, %v15151_v0, %v15153_v40 }
 0xc2c   : > { %19452 = vmatprep.mubr.bf16.mxu0 %v25083_v50  ;;  %v15157_v50 = vrot.slane %v15119_v7, 5 }
 0xc2e   : > { %v15158_v33 = vsel %vm27544_vm4, %v15153_v40, %v15157_v50 }
 0xc33   : > { %19453 = vmatmul.mubr.bf16.gmra.mrb[48].mxu0 %v15150_v39 }
 0xc34   : > { %19456 = vmatprep.mubr.bf16.mxu0 %v15152_v34 }
 0xc3b   : > { %19457 = vmatmul.mubr.bf16.gmra.mrb[52].mxu0 %v15154_v15 }
 0xc3c   : > { %19460 = vmatprep.mubr.bf16.mxu0 %v15153_v40 }
 0xc43   : > { %19461 = vmatmul.mubr.bf16.gmra.mrb[56].mxu0 %v15158_v33 }
 0xcf6   : > { %v19446_v58 = vpop.f32.mrb[40].mxu0 }
 0xcf7   : > { %v19500_v53 = vadd.f32 %v19446_v58, %v16153_v52  ;;  %v15251_v26 = vpop.f32.mrb[41].mxu0 }
 0xcf8   : > { %v19501_v47 = vadd.f32 %v16153_v52, %v15251_v26  ;;  %v19447_v6 = vpop.f32.mrb[42].mxu0 }
 0xcf9   : > { %15352 = vst [vmem:[%s25790_s22 + $0xb0] sm:$0xff] %v19500_v53  ;;  %v19502_v14 = vadd.f32 %v19447_v6, %v16153_v52  ;;  %v15254_v51 = vpop.f32.mrb[43].mxu0 }
 0xcfa   : > { %15350 = vst [vmem:[%s25790_s22 + $0xa0] sm:$0xff] %v19501_v47  ;;  %v19503_v46 = vadd.f32 %v16153_v52, %v15254_v51 }
 0xcfb   : > { %15353 = vst [vmem:[%s25790_s22 + $0xb8] sm:$0xff] %v19502_v14 }
 0xcfc   : > { %15351 = vst [vmem:[%s25790_s22 + $0xa8] sm:$0xff] %v19503_v46 }
 0xcfe   : > { %v19450_v41 = vpop.f32.mrb[44].mxu0 }
 0xcff   : > { %v19504_v19 = vadd.f32 %v19450_v41, %v16153_v52  ;;  %v15267_v24 = vpop.f32.mrb[45].mxu0 }
 0xd00   : > { %v19505_v10 = vadd.f32 %v16153_v52, %v15267_v24  ;;  %v19451_v37 = vpop.f32.mrb[46].mxu0 }
 0xd01   : > { %15356 = vst [vmem:[%s25790_s22 + $0xd0] sm:$0xff] %v19504_v19  ;;  %v19506_v44 = vadd.f32 %v19451_v37, %v16153_v52  ;;  %v15270_v2 = vpop.f32.mrb[47].mxu0 }
 0xd02   : > { %15354 = vst [vmem:[%s25790_s22 + $0xc0] sm:$0xff] %v19505_v10  ;;  %v19507_v9 = vadd.f32 %v16153_v52, %v15270_v2 }
 0xd03   : > { %15357 = vst [vmem:[%s25790_s22 + $0xd8] sm:$0xff] %v19506_v44 }
 0xd04   : > { %15355 = vst [vmem:[%s25790_s22 + $0xc8] sm:$0xff] %v19507_v9 }
 0xd06   : > { %v19454_v54 = vpop.f32.mrb[48].mxu0 }
 0xd07   : > { %v19508_v36 = vadd.f32 %v19454_v54, %v16153_v52  ;;  %v15283_v1 = vpop.f32.mrb[49].mxu0 }
 0xd08   : > { %v19509_v18 = vadd.f32 %v16153_v52, %v15283_v1  ;;  %v19455_v43 = vpop.f32.mrb[50].mxu0 }
 0xd09   : > { %15360 = vst [vmem:[%s25790_s22 + $0xf0] sm:$0xff] %v19508_v36  ;;  %v19510_v4 = vadd.f32 %v19455_v43, %v16153_v52  ;;  %v15286_v20 = vpop.f32.mrb[51].mxu0 }
 0xd0a   : > { %15358 = vst [vmem:[%s25790_s22 + $0xe0] sm:$0xff] %v19509_v18  ;;  %v19511_v42 = vadd.f32 %v16153_v52, %v15286_v20 }
 0xd0b   : > { %15361 = vst [vmem:[%s25790_s22 + $0xf8] sm:$0xff] %v19510_v4 }
 0xd0c   : > { %15359 = vst [vmem:[%s25790_s22 + $0xe8] sm:$0xff] %v19511_v42 }
 0xd0e   : > { %v19458_v29 = vpop.f32.mrb[52].mxu0 }
 0xd0f   : > { %v19512_v28 = vadd.f32 %v19458_v29, %v16153_v52  ;;  %v15299_v16 = vpop.f32.mrb[53].mxu0 }
 0xd10   : > { %v19513_v62 = vadd.f32 %v16153_v52, %v15299_v16  ;;  %v19459_v8 = vpop.f32.mrb[54].mxu0 }
 0xd11   : > { %15364 = vst [vmem:[%s25790_s22 + $0x110] sm:$0xff] %v19512_v28  ;;  %v19514_v5 = vadd.f32 %v19459_v8, %v16153_v52  ;;  %v15302_v3 = vpop.f32.mrb[55].mxu0 }
 0xd12   : > { %15362 = vst [vmem:[%s25790_s22 + $0x100] sm:$0xff] %v19513_v62  ;;  %v19515_v27 = vadd.f32 %v16153_v52, %v15302_v3 }
 0xd13   : > { %15365 = vst [vmem:[%s25790_s22 + $0x118] sm:$0xff] %v19514_v5 }
 0xd14   : > { %15363 = vst [vmem:[%s25790_s22 + $0x108] sm:$0xff] %v19515_v27 }
 0xd16   : > { %v19462_v31 = vpop.f32.mrb[56].mxu0 }
 0xd17   : > { %v19516_v23 = vadd.f32 %v19462_v31, %v16153_v52  ;;  %v15315_v63 = vpop.f32.mrb[57].mxu0 }
 0xd18   : > { %v19517_v12 = vadd.f32 %v16153_v52, %v15315_v63  ;;  %v19463_v11 = vpop.f32.mrb[58].mxu0 }
 0xd19   : > { %15368 = vst [vmem:[%s25790_s22 + $0x130] sm:$0xff] %v19516_v23  ;;  %v19518_v55 = vadd.f32 %v19463_v11, %v16153_v52  ;;  %v15318_v48 = vpop.f32.mrb[59].mxu0 }
 0xd1a   : > { %15366 = vst [vmem:[%s25790_s22 + $0x120] sm:$0xff] %v19517_v12  ;;  %v19519_v45 = vadd.f32 %v16153_v52, %v15318_v48 }
 0xd1b   : > { %15369 = vst [vmem:[%s25790_s22 + $0x138] sm:$0xff] %v19518_v55 }
 0xd1c   : > { %15367 = vst [vmem:[%s25790_s22 + $0x128] sm:$0xff] %v19519_v45 }
 0xd1d PF: > { %s19_s30 = sadd.s32 1, %s21142_s30  }
 0xd1e   : > { %p16_p4 = scmp.ge.s32.totalorder %s19_s30, 4  }
 0xd20   :  { %18 = sbr.rel (!%p16_p4) target bundleno = 1 (0x1), region = 114 }

</bundles_post_ra>
